<compile_context>
chip_gen: v7x
topology: tpu7x:2x2x1
jax: 0.10.0
libtpu: 0.0.40
codegen_flags: <defaults>
</compile_context>

<pallas_src>
import numpy as np
import jax
import jax.numpy as jnp
from jax.scipy.special import erf as _erf_ref
from jax.experimental import pallas as pl
from jax.experimental.pallas import tpu as pltpu

CHANNELS = [32, 64, 128]
KERNELS = [3, 3, 3]
STRIDES = [2, 2, 2]
PADDING = 1
LAYERS = 3
HIDDEN_DIM = 2            # config['hidden_dim']
FLAT_DIM = 2048           # 128 * 4 * 4 after three stride-2 convs on 28x28
BN_EPS = 1e-5
K1P = 16                  # layer-1 im2col contraction dim (9) padded to a sublane multiple
_INV_SQRT2 = 0.7071067811865476

_VMEM = pl.BlockSpec(memory_space=pltpu.MemorySpace.VMEM)


def _conv_out(n):
    return (n + 2 * PADDING - 3) // 2 + 1


def _round_up(n, m):
    return ((n + m - 1) // m) * m


# --------------------------- in-kernel math helpers ---------------------------

def _erf(x):
    # Abramowitz & Stegun 7.1.26 (|err| < 1.5e-7): uses only abs / exp / where / mul /
    # add, all of which lower cleanly in Mosaic.
    a1, a2, a3, a4, a5 = (0.254829592, -0.284496736, 1.421413741,
                          -1.453152027, 1.061405429)
    p = 0.3275911
    ax = jnp.abs(x)
    t = 1.0 / (1.0 + p * ax)
    poly = ((((a5 * t + a4) * t + a3) * t + a2) * t + a1) * t
    e = 1.0 - poly * jnp.exp(-(ax * ax))
    return jnp.where(x < 0.0, -e, e)


def _gelu(x):
    return 0.5 * x * (1.0 + _erf(x * _INV_SQRT2))


# ------------------------------- fused kernel -------------------------------

def _encoder_kernel(p1_ref, w1_ref, sc1_ref, sh1_ref,
                    g2_ref, w2_ref, sc2_ref, sh2_ref,
                    g3_ref, w3_ref, sc3_ref, sh3_ref,
                    wlat_ref, blat_ref, noise_ref,
                    z_ref, kl_ref, y2_buf):
    f32 = jnp.float32
    batch, nh = z_ref.shape
    s1p = p1_ref.shape[0] // batch        # padded per-batch spatial size of layer-1 output
    s2p = y2_buf.shape[0] // batch        # padded per-batch spatial size of layer-2 output

    def bn_gelu(acc, sc_ref, sh_ref):
        return _gelu(acc * sc_ref[...] + sh_ref[...])

    def conv_taps(y_in, g_ref, w_ref):
        # stride-2 3x3 conv = sum over the 9 taps of
        #   (constant 0/1 gather matrix) @ activations @ (per-tap weight)
        acc = None
        for t in range(9):
            gathered = jnp.dot(g_ref[t].astype(f32), y_in, preferred_element_type=f32)
            contrib = jnp.dot(gathered, w_ref[t], preferred_element_type=f32)
            acc = contrib if acc is None else acc + contrib
        return acc

    # ---- layer 1: im2col GEMM (+ folded BN + GELU) ----
    y1 = bn_gelu(jnp.dot(p1_ref[...], w1_ref[...], preferred_element_type=f32),
                 sc1_ref, sh1_ref)                     # (B*s1p, 32), rows = (b, h1, w1)

    # ---- layer 2: per-batch with batch-independent gather matrices (aligned slices) ----
    for b in range(batch):
        acc = conv_taps(y1[b * s1p:(b + 1) * s1p, :], g2_ref, w2_ref)
        y2_buf[b * s2p:(b + 1) * s2p, :] = bn_gelu(acc, sc2_ref, sh2_ref)
    y2 = y2_buf[...]                                   # (B*s2p, 64), rows = (b, h2, w2)

    # ---- layer 3: spatial-major output rows so the head can slice per spatial site ----
    y3 = bn_gelu(conv_taps(y2, g3_ref, w3_ref), sc3_ref, sh3_ref)   # (S3*B, 128), rows=(s,b)

    # ---- fused mu / log-sigma heads, reparameterisation and KL ----
    n_spatial = wlat_ref.shape[0]
    lat = None
    for s in range(n_spatial):
        part = jnp.dot(y3[s * batch:(s + 1) * batch, :], wlat_ref[s],
                       preferred_element_type=f32)
        lat = part if lat is None else lat + part
    lat = lat + blat_ref[...]
    mu = lat[:, :nh]
    logsig = lat[:, nh:]
    sigma = jnp.exp(logsig)
    z_ref[...] = mu + sigma * noise_ref[...]
    # use logsig directly instead of log(exp(logsig))
    kl_elem = sigma * sigma + mu * mu - logsig - 0.5
    kl_ref[...] = jnp.sum(jnp.sum(kl_elem, axis=1, keepdims=True),
                          axis=0, keepdims=True)


# ----------------------------- wrapper (glue) -----------------------------

def _tap_gather_single(h_in, w_in, h_out, w_out, rows_pad, cols_pad):
    """Batch-independent 0/1 selection matrices G[t]; (G[t] @ Y)[r, :] is the tap-t source
    row of Y (zero where the 3x3 tap falls into the conv zero-padding or a pad row)."""
    g = np.zeros((9, rows_pad, cols_pad), np.float32)
    for kh in range(3):
        for kw in range(3):
            t = kh * 3 + kw
            for ho in range(h_out):
                hi = 2 * ho + kh - PADDING
                if hi < 0 or hi >= h_in:
                    continue
                for wo in range(w_out):
                    wi = 2 * wo + kw - PADDING
                    if wi < 0 or wi >= w_in:
                        continue
                    g[t, ho * w_out + wo, hi * w_in + wi] = 1.0
    # 0/1 entries are exact in bf16 -> halves the constant DMA with no precision loss.
    return jnp.asarray(g, dtype=jnp.bfloat16)


def _tap_gather_spatial_major(h_in, w_in, h_out, w_out, batch, in_block):
    """Last-layer gather: consumes batch-major input rows (per-batch blocks of `in_block`
    rows) and emits spatial-major output rows (s, b) so the fused head slices contiguously."""
    g = np.zeros((9, h_out * w_out * batch, batch * in_block), np.float32)
    for kh in range(3):
        for kw in range(3):
            t = kh * 3 + kw
            for b in range(batch):
                for ho in range(h_out):
                    hi = 2 * ho + kh - PADDING
                    if hi < 0 or hi >= h_in:
                        continue
                    for wo in range(w_out):
                        wi = 2 * wo + kw - PADDING
                        if wi < 0 or wi >= w_in:
                            continue
                        r = (ho * w_out + wo) * batch + b
                        g[t, r, b * in_block + hi * w_in + wi] = 1.0
    return jnp.asarray(g, dtype=jnp.bfloat16)


def encoder_forward(params, x, noise):
    """Pallas implementation of Encoder.forward.  Returns (z, kl)."""
    x = x.astype(jnp.float32)
    B, _, H0, W0 = x.shape
    H1, W1 = _conv_out(H0), _conv_out(W0)
    H2, W2 = _conv_out(H1), _conv_out(W1)
    H3, W3 = _conv_out(H2), _conv_out(W2)
    S1, S2, S3 = H1 * W1, H2 * W2, H3 * W3
    S1P, S2P = _round_up(S1, 8), _round_up(S2, 8)   # sublane-aligned per-batch blocks

    # ---- layer-1 im2col on the raw input (static Python-int strides only) ----
    xp = jnp.pad(x[:, 0], ((0, 0), (PADDING, PADDING), (PADDING, PADDING)))
    cols = [xp[:, kh:kh + 2 * H1:2, kw:kw + 2 * W1:2]
            for kh in range(3) for kw in range(3)]
    p1 = jnp.stack(cols, axis=-1).reshape(B, S1, 9)          # rows = (b, h1, w1)
    p1 = jnp.pad(p1, ((0, 0), (0, S1P - S1), (0, K1P - 9))).reshape(B * S1P, K1P)

    # ---- fold conv bias + inference BatchNorm into per-channel scale/shift ----
    # TODO(synk): BatchNorm is folded in inference (running-stats) mode; training-mode
    # batch statistics are not computed in-kernel.
    def bn_fold(layer):
        inv = layer["gamma"] * jax.lax.rsqrt(layer["var"] + BN_EPS)
        return inv[None, :], ((layer["b"] - layer["mean"]) * inv + layer["beta"])[None, :]

    l1, l2, l3 = params["convs"]
    sc1, sh1 = bn_fold(l1)
    sc2, sh2 = bn_fold(l2)
    sc3, sh3 = bn_fold(l3)

    # ---- weight layout prep (tiny, wrapper-side) ----
    w1m = jnp.pad(l1["w"].reshape(CHANNELS[0], 9).T, ((0, K1P - 9), (0, 0)))   # (16, 32)
    w2r = jnp.transpose(l2["w"], (2, 3, 1, 0)).reshape(9, CHANNELS[0], CHANNELS[1])
    w3r = jnp.transpose(l3["w"], (2, 3, 1, 0)).reshape(9, CHANNELS[1], CHANNELS[2])
    # Fused mu/log-sigma head; rows permuted so the kernel consumes the conv output
    # directly (spatial-major rows, channel lanes) with torch nn.Flatten (NCHW) semantics.
    wcat = jnp.concatenate([params["wmu"], params["wsig"]], axis=1)            # (2048, 2*NH)
    wlat = wcat.reshape(CHANNELS[2], S3, 2 * HIDDEN_DIM).transpose(1, 0, 2)    # (S3, 128, 2*NH)
    blat = jnp.concatenate([params["bmu"], params["bsig"]]).reshape(1, 2 * HIDDEN_DIM)

    # ---- constant tap-gather matrices (trace-time numpy constants) ----
    g2 = _tap_gather_single(H1, W1, H2, W2, S2P, S1P)               # (9, 56, 200)
    g3 = _tap_gather_spatial_major(H2, W2, H3, W3, B, S2P)          # (9, S3*B, B*56)

    z, kl = pl.pallas_call(
        _encoder_kernel,
        out_shape=(jax.ShapeDtypeStruct((B, HIDDEN_DIM), jnp.float32),
                   jax.ShapeDtypeStruct((1, 1), jnp.float32)),
        in_specs=[_VMEM] * 15,
        out_specs=(_VMEM, _VMEM),
        scratch_shapes=[pltpu.VMEM((B * S2P, CHANNELS[1]), jnp.float32)],
    )(p1, w1m, sc1, sh1, g2, w2r, sc2, sh2, g3, w3r, sc3, sh3, wlat, blat, noise)
    return z, kl[0, 0]


# ----------------------------- parameters -----------------------------

def init_params(key):
    keys = iter(jax.random.split(key, 22))
    convs = []
    cin = 1
    for i in range(LAYERS):
        cout, k = CHANNELS[i], KERNELS[i]
        fan_in = cin * k * k
        w = jax.random.normal(next(keys), (cout, cin, k, k), jnp.float32) / jnp.sqrt(fan_in)
        b = 0.05 * jax.random.normal(next(keys), (cout,), jnp.float32)
        gamma = 1.0 + 0.1 * jax.random.normal(next(keys), (cout,), jnp.float32)
        beta = 0.1 * jax.random.normal(next(keys), (cout,), jnp.float32)
        mean = 0.1 * jax.random.normal(next(keys), (cout,), jnp.float32)
        var = 1.0 + 0.1 * jnp.abs(jax.random.normal(next(keys), (cout,), jnp.float32))
        convs.append(dict(w=w, b=b, gamma=gamma, beta=beta, mean=mean, var=var))
        cin = cout
    wmu = jax.random.normal(next(keys), (FLAT_DIM, HIDDEN_DIM), jnp.float32) / jnp.sqrt(FLAT_DIM)
    bmu = 0.05 * jax.random.normal(next(keys), (HIDDEN_DIM,), jnp.float32)
    wsig = jax.random.normal(next(keys), (FLAT_DIM, HIDDEN_DIM), jnp.float32) / jnp.sqrt(FLAT_DIM)
    bsig = 0.05 * jax.random.normal(next(keys), (HIDDEN_DIM,), jnp.float32)
    return dict(convs=convs, wmu=wmu, bmu=bmu, wsig=wsig, bsig=bsig)


# ----------------------------- pure-JAX reference -----------------------------

def reference_forward(params, x, noise):
    h = x
    for i in range(LAYERS):
        layer = params["convs"][i]
        s = STRIDES[i]
        h = jax.lax.conv_general_dilated(
            h, layer["w"], window_strides=(s, s),
            padding=((PADDING, PADDING), (PADDING, PADDING)),
            dimension_numbers=("NCHW", "OIHW", "NCHW"),
            precision=jax.lax.Precision.HIGHEST)
        h = h + layer["b"][None, :, None, None]
        inv = layer["gamma"] / jnp.sqrt(layer["var"] + BN_EPS)
        h = ((h - layer["mean"][None, :, None, None]) * inv[None, :, None, None]
             + layer["beta"][None, :, None, None])
        h = 0.5 * h * (1.0 + _erf_ref(h * _INV_SQRT2))
    feat = h.reshape(h.shape[0], -1)                       # torch nn.Flatten over NCHW
    mu = jnp.dot(feat, params["wmu"], precision=jax.lax.Precision.HIGHEST) + params["bmu"]
    logsig = jnp.dot(feat, params["wsig"], precision=jax.lax.Precision.HIGHEST) + params["bsig"]
    sigma = jnp.exp(logsig)
    z = mu + sigma * noise
    kl = jnp.sum(sigma ** 2 + mu ** 2 - logsig - 0.5)
    return z, kl


# ----------------------------- main -----------------------------

if __name__ == "__main__":
    key = jax.random.PRNGKey(0)
    k_param, k_x, k_noise = jax.random.split(key, 3)

    params = init_params(k_param)
    # FashionMNIST-like NCHW input (28x28 is what the 2048-wide flatten implies).
    x = jax.random.normal(k_x, (2, 1, 28, 28), jnp.float32)
    # TODO(synk): torch's self.norm.sample(x_mu.shape) is RNG; passed in as explicit
    # N(0,1) noise so the kernel stays deterministic.
    noise = jax.random.normal(k_noise, (2, HIDDEN_DIM), jnp.float32)

    z, kl = jax.jit(encoder_forward)(params, x, noise)
    z, kl = jax.block_until_ready((z, kl))

    z_ref, kl_ref = reference_forward(params, x, noise)
    # Tolerances cover MXU f32 rounding differences vs. the HIGHEST-precision XLA
    # reference; any structural / layout error would produce O(1) mismatches.
    assert jnp.allclose(z, z_ref, rtol=1e-2, atol=1e-2), (z, z_ref)
    assert jnp.allclose(kl, kl_ref, rtol=2e-2, atol=2e-2), (kl, kl_ref)

    print("KERNEL_OK")
</pallas_src>

<mosaic_0001>
module attributes {stable_mosaic.version = 11 : i64} {
  func.func @_encoder_kernel(%arg0: memref<400x16xf32, #tpu.memory_space<vmem>>, %arg1: memref<16x32xf32, #tpu.memory_space<vmem>>, %arg2: memref<1x32xf32, #tpu.memory_space<vmem>>, %arg3: memref<1x32xf32, #tpu.memory_space<vmem>>, %arg4: memref<9x56x200xbf16, #tpu.memory_space<vmem>>, %arg5: memref<9x32x64xf32, #tpu.memory_space<vmem>>, %arg6: memref<1x64xf32, #tpu.memory_space<vmem>>, %arg7: memref<1x64xf32, #tpu.memory_space<vmem>>, %arg8: memref<9x32x112xbf16, #tpu.memory_space<vmem>>, %arg9: memref<9x64x128xf32, #tpu.memory_space<vmem>>, %arg10: memref<1x128xf32, #tpu.memory_space<vmem>>, %arg11: memref<1x128xf32, #tpu.memory_space<vmem>>, %arg12: memref<16x128x4xf32, #tpu.memory_space<vmem>>, %arg13: memref<1x4xf32, #tpu.memory_space<vmem>>, %arg14: memref<2x2xf32, #tpu.memory_space<vmem>>, %arg15: memref<2x2xf32, #tpu.memory_space<vmem>>, %arg16: memref<1x1xf32, #tpu.memory_space<vmem>>, %arg17: memref<112x64xf32, #tpu.memory_space<vmem>>) attributes {dimension_semantics = [], scalar_prefetch = 0 : i64, scratch_operands = 1 : i64, tpu.core_type = #tpu.core_type<tc>} {
    %c0 = arith.constant 0 : index
    %c0_0 = arith.constant 0 : index
    %0 = vector.load %arg0[%c0, %c0_0] : memref<400x16xf32, #tpu.memory_space<vmem>>, vector<400x16xf32>
    %c0_1 = arith.constant 0 : index
    %c0_2 = arith.constant 0 : index
    %1 = vector.load %arg1[%c0_1, %c0_2] : memref<16x32xf32, #tpu.memory_space<vmem>>, vector<16x32xf32>
    %cst = arith.constant dense<0.000000e+00> : vector<400x32xf32>
    %2 = tpu.matmul %0, %1, %cst {dimension_numbers = #tpu.dot_dimension_numbers<[1], [0], [0], [1], [0, 0, 1, 1], [], []>} : vector<400x16xf32>, vector<16x32xf32>, vector<400x32xf32> -> vector<400x32xf32>
    %c0_3 = arith.constant 0 : index
    %c0_4 = arith.constant 0 : index
    %3 = vector.load %arg2[%c0_3, %c0_4] : memref<1x32xf32, #tpu.memory_space<vmem>>, vector<1x32xf32>
    %4 = vector.broadcast %3 : vector<1x32xf32> to vector<400x32xf32>
    %5 = arith.mulf %2, %4 : vector<400x32xf32>
    %c0_5 = arith.constant 0 : index
    %c0_6 = arith.constant 0 : index
    %6 = vector.load %arg3[%c0_5, %c0_6] : memref<1x32xf32, #tpu.memory_space<vmem>>, vector<1x32xf32>
    %7 = vector.broadcast %6 : vector<1x32xf32> to vector<400x32xf32>
    %8 = arith.addf %5, %7 : vector<400x32xf32>
    %cst_7 = arith.constant 5.000000e-01 : f32
    %9 = vector.broadcast %cst_7 : f32 to vector<400x32xf32>
    %10 = arith.mulf %9, %8 : vector<400x32xf32>
    %cst_8 = arith.constant 0.707106769 : f32
    %11 = vector.broadcast %cst_8 : f32 to vector<400x32xf32>
    %12 = arith.mulf %8, %11 : vector<400x32xf32>
    %13 = math.absf %12 : vector<400x32xf32>
    %cst_9 = arith.constant 0.327591091 : f32
    %14 = vector.broadcast %cst_9 : f32 to vector<400x32xf32>
    %15 = arith.mulf %14, %13 : vector<400x32xf32>
    %cst_10 = arith.constant 1.000000e+00 : f32
    %16 = vector.broadcast %cst_10 : f32 to vector<400x32xf32>
    %17 = arith.addf %16, %15 : vector<400x32xf32>
    %cst_11 = arith.constant 1.000000e+00 : f32
    %18 = vector.broadcast %cst_11 : f32 to vector<400x32xf32>
    %19 = arith.divf %18, %17 : vector<400x32xf32>
    %cst_12 = arith.constant 1.06140542 : f32
    %20 = vector.broadcast %cst_12 : f32 to vector<400x32xf32>
    %21 = arith.mulf %20, %19 : vector<400x32xf32>
    %cst_13 = arith.constant -1.45315206 : f32
    %22 = vector.broadcast %cst_13 : f32 to vector<400x32xf32>
    %23 = arith.addf %21, %22 : vector<400x32xf32>
    %24 = arith.mulf %23, %19 : vector<400x32xf32>
    %cst_14 = arith.constant 1.42141378 : f32
    %25 = vector.broadcast %cst_14 : f32 to vector<400x32xf32>
    %26 = arith.addf %24, %25 : vector<400x32xf32>
    %27 = arith.mulf %26, %19 : vector<400x32xf32>
    %cst_15 = arith.constant -0.284496725 : f32
    %28 = vector.broadcast %cst_15 : f32 to vector<400x32xf32>
    %29 = arith.addf %27, %28 : vector<400x32xf32>
    %30 = arith.mulf %29, %19 : vector<400x32xf32>
    %cst_16 = arith.constant 0.254829586 : f32
    %31 = vector.broadcast %cst_16 : f32 to vector<400x32xf32>
    %32 = arith.addf %30, %31 : vector<400x32xf32>
    %33 = arith.mulf %32, %19 : vector<400x32xf32>
    %34 = arith.mulf %13, %13 : vector<400x32xf32>
    %cst_17 = arith.constant 0.000000e+00 : f32
    %35 = vector.broadcast %cst_17 : f32 to vector<400x32xf32>
    %36 = arith.subf %35, %34 : vector<400x32xf32>
    %37 = math.exp %36 : vector<400x32xf32>
    %38 = arith.mulf %33, %37 : vector<400x32xf32>
    %cst_18 = arith.constant 1.000000e+00 : f32
    %39 = vector.broadcast %cst_18 : f32 to vector<400x32xf32>
    %40 = arith.subf %39, %38 : vector<400x32xf32>
    %cst_19 = arith.constant 0.000000e+00 : f32
    %41 = vector.broadcast %cst_19 : f32 to vector<400x32xf32>
    %42 = arith.cmpf olt, %12, %41 : vector<400x32xf32>
    %cst_20 = arith.constant 0.000000e+00 : f32
    %43 = vector.broadcast %cst_20 : f32 to vector<400x32xf32>
    %44 = arith.subf %43, %40 : vector<400x32xf32>
    %45 = arith.select %42, %44, %40 : vector<400x32xi1>, vector<400x32xf32>
    %cst_21 = arith.constant 1.000000e+00 : f32
    %46 = vector.broadcast %cst_21 : f32 to vector<400x32xf32>
    %47 = arith.addf %46, %45 : vector<400x32xf32>
    %48 = arith.mulf %10, %47 : vector<400x32xf32>
    %49 = vector.extract_strided_slice %48 {offsets = [0, 0], sizes = [200, 32], strides = [1, 1]} : vector<400x32xf32> to vector<200x32xf32>
    %c0_22 = arith.constant 0 : index
    %c0_23 = arith.constant 0 : index
    %c0_24 = arith.constant 0 : index
    %50 = vector.load %arg4[%c0_22, %c0_23, %c0_24] : memref<9x56x200xbf16, #tpu.memory_space<vmem>>, vector<1x56x200xbf16>
    %51 = vector.shape_cast %50 : vector<1x56x200xbf16> to vector<56x200xbf16>
    %52 = arith.extf %51 : vector<56x200xbf16> to vector<56x200xf32>
    %cst_25 = arith.constant dense<0.000000e+00> : vector<56x32xf32>
    %53 = tpu.matmul %52, %49, %cst_25 {dimension_numbers = #tpu.dot_dimension_numbers<[1], [0], [0], [1], [0, 0, 1, 1], [], []>} : vector<56x200xf32>, vector<200x32xf32>, vector<56x32xf32> -> vector<56x32xf32>
    %c0_26 = arith.constant 0 : index
    %c0_27 = arith.constant 0 : index
    %c0_28 = arith.constant 0 : index
    %54 = vector.load %arg5[%c0_26, %c0_27, %c0_28] : memref<9x32x64xf32, #tpu.memory_space<vmem>>, vector<1x32x64xf32>
    %55 = vector.shape_cast %54 : vector<1x32x64xf32> to vector<32x64xf32>
    %cst_29 = arith.constant dense<0.000000e+00> : vector<56x64xf32>
    %56 = tpu.matmul %53, %55, %cst_29 {dimension_numbers = #tpu.dot_dimension_numbers<[1], [0], [0], [1], [0, 0, 1, 1], [], []>} : vector<56x32xf32>, vector<32x64xf32>, vector<56x64xf32> -> vector<56x64xf32>
    %c1 = arith.constant 1 : index
    %c0_30 = arith.constant 0 : index
    %c0_31 = arith.constant 0 : index
    %57 = vector.load %arg4[%c1, %c0_30, %c0_31] : memref<9x56x200xbf16, #tpu.memory_space<vmem>>, vector<1x56x200xbf16>
    %58 = vector.shape_cast %57 : vector<1x56x200xbf16> to vector<56x200xbf16>
    %59 = arith.extf %58 : vector<56x200xbf16> to vector<56x200xf32>
    %cst_32 = arith.constant dense<0.000000e+00> : vector<56x32xf32>
    %60 = tpu.matmul %59, %49, %cst_32 {dimension_numbers = #tpu.dot_dimension_numbers<[1], [0], [0], [1], [0, 0, 1, 1], [], []>} : vector<56x200xf32>, vector<200x32xf32>, vector<56x32xf32> -> vector<56x32xf32>
    %c1_33 = arith.constant 1 : index
    %c0_34 = arith.constant 0 : index
    %c0_35 = arith.constant 0 : index
    %61 = vector.load %arg5[%c1_33, %c0_34, %c0_35] : memref<9x32x64xf32, #tpu.memory_space<vmem>>, vector<1x32x64xf32>
    %62 = vector.shape_cast %61 : vector<1x32x64xf32> to vector<32x64xf32>
    %cst_36 = arith.constant dense<0.000000e+00> : vector<56x64xf32>
    %63 = tpu.matmul %60, %62, %cst_36 {dimension_numbers = #tpu.dot_dimension_numbers<[1], [0], [0], [1], [0, 0, 1, 1], [], []>} : vector<56x32xf32>, vector<32x64xf32>, vector<56x64xf32> -> vector<56x64xf32>
    %64 = arith.addf %56, %63 : vector<56x64xf32>
    %c2 = arith.constant 2 : index
    %c0_37 = arith.constant 0 : index
    %c0_38 = arith.constant 0 : index
    %65 = vector.load %arg4[%c2, %c0_37, %c0_38] : memref<9x56x200xbf16, #tpu.memory_space<vmem>>, vector<1x56x200xbf16>
    %66 = vector.shape_cast %65 : vector<1x56x200xbf16> to vector<56x200xbf16>
    %67 = arith.extf %66 : vector<56x200xbf16> to vector<56x200xf32>
    %cst_39 = arith.constant dense<0.000000e+00> : vector<56x32xf32>
    %68 = tpu.matmul %67, %49, %cst_39 {dimension_numbers = #tpu.dot_dimension_numbers<[1], [0], [0], [1], [0, 0, 1, 1], [], []>} : vector<56x200xf32>, vector<200x32xf32>, vector<56x32xf32> -> vector<56x32xf32>
    %c2_40 = arith.constant 2 : index
    %c0_41 = arith.constant 0 : index
    %c0_42 = arith.constant 0 : index
    %69 = vector.load %arg5[%c2_40, %c0_41, %c0_42] : memref<9x32x64xf32, #tpu.memory_space<vmem>>, vector<1x32x64xf32>
    %70 = vector.shape_cast %69 : vector<1x32x64xf32> to vector<32x64xf32>
    %cst_43 = arith.constant dense<0.000000e+00> : vector<56x64xf32>
    %71 = tpu.matmul %68, %70, %cst_43 {dimension_numbers = #tpu.dot_dimension_numbers<[1], [0], [0], [1], [0, 0, 1, 1], [], []>} : vector<56x32xf32>, vector<32x64xf32>, vector<56x64xf32> -> vector<56x64xf32>
    %72 = arith.addf %64, %71 : vector<56x64xf32>
    %c3 = arith.constant 3 : index
    %c0_44 = arith.constant 0 : index
    %c0_45 = arith.constant 0 : index
    %73 = vector.load %arg4[%c3, %c0_44, %c0_45] : memref<9x56x200xbf16, #tpu.memory_space<vmem>>, vector<1x56x200xbf16>
    %74 = vector.shape_cast %73 : vector<1x56x200xbf16> to vector<56x200xbf16>
    %75 = arith.extf %74 : vector<56x200xbf16> to vector<56x200xf32>
    %cst_46 = arith.constant dense<0.000000e+00> : vector<56x32xf32>
    %76 = tpu.matmul %75, %49, %cst_46 {dimension_numbers = #tpu.dot_dimension_numbers<[1], [0], [0], [1], [0, 0, 1, 1], [], []>} : vector<56x200xf32>, vector<200x32xf32>, vector<56x32xf32> -> vector<56x32xf32>
    %c3_47 = arith.constant 3 : index
    %c0_48 = arith.constant 0 : index
    %c0_49 = arith.constant 0 : index
    %77 = vector.load %arg5[%c3_47, %c0_48, %c0_49] : memref<9x32x64xf32, #tpu.memory_space<vmem>>, vector<1x32x64xf32>
    %78 = vector.shape_cast %77 : vector<1x32x64xf32> to vector<32x64xf32>
    %cst_50 = arith.constant dense<0.000000e+00> : vector<56x64xf32>
    %79 = tpu.matmul %76, %78, %cst_50 {dimension_numbers = #tpu.dot_dimension_numbers<[1], [0], [0], [1], [0, 0, 1, 1], [], []>} : vector<56x32xf32>, vector<32x64xf32>, vector<56x64xf32> -> vector<56x64xf32>
    %80 = arith.addf %72, %79 : vector<56x64xf32>
    %c4 = arith.constant 4 : index
    %c0_51 = arith.constant 0 : index
    %c0_52 = arith.constant 0 : index
    %81 = vector.load %arg4[%c4, %c0_51, %c0_52] : memref<9x56x200xbf16, #tpu.memory_space<vmem>>, vector<1x56x200xbf16>
    %82 = vector.shape_cast %81 : vector<1x56x200xbf16> to vector<56x200xbf16>
    %83 = arith.extf %82 : vector<56x200xbf16> to vector<56x200xf32>
    %cst_53 = arith.constant dense<0.000000e+00> : vector<56x32xf32>
    %84 = tpu.matmul %83, %49, %cst_53 {dimension_numbers = #tpu.dot_dimension_numbers<[1], [0], [0], [1], [0, 0, 1, 1], [], []>} : vector<56x200xf32>, vector<200x32xf32>, vector<56x32xf32> -> vector<56x32xf32>
    %c4_54 = arith.constant 4 : index
    %c0_55 = arith.constant 0 : index
    %c0_56 = arith.constant 0 : index
    %85 = vector.load %arg5[%c4_54, %c0_55, %c0_56] : memref<9x32x64xf32, #tpu.memory_space<vmem>>, vector<1x32x64xf32>
    %86 = vector.shape_cast %85 : vector<1x32x64xf32> to vector<32x64xf32>
    %cst_57 = arith.constant dense<0.000000e+00> : vector<56x64xf32>
    %87 = tpu.matmul %84, %86, %cst_57 {dimension_numbers = #tpu.dot_dimension_numbers<[1], [0], [0], [1], [0, 0, 1, 1], [], []>} : vector<56x32xf32>, vector<32x64xf32>, vector<56x64xf32> -> vector<56x64xf32>
    %88 = arith.addf %80, %87 : vector<56x64xf32>
    %c5 = arith.constant 5 : index
    %c0_58 = arith.constant 0 : index
    %c0_59 = arith.constant 0 : index
    %89 = vector.load %arg4[%c5, %c0_58, %c0_59] : memref<9x56x200xbf16, #tpu.memory_space<vmem>>, vector<1x56x200xbf16>
    %90 = vector.shape_cast %89 : vector<1x56x200xbf16> to vector<56x200xbf16>
    %91 = arith.extf %90 : vector<56x200xbf16> to vector<56x200xf32>
    %cst_60 = arith.constant dense<0.000000e+00> : vector<56x32xf32>
    %92 = tpu.matmul %91, %49, %cst_60 {dimension_numbers = #tpu.dot_dimension_numbers<[1], [0], [0], [1], [0, 0, 1, 1], [], []>} : vector<56x200xf32>, vector<200x32xf32>, vector<56x32xf32> -> vector<56x32xf32>
    %c5_61 = arith.constant 5 : index
    %c0_62 = arith.constant 0 : index
    %c0_63 = arith.constant 0 : index
    %93 = vector.load %arg5[%c5_61, %c0_62, %c0_63] : memref<9x32x64xf32, #tpu.memory_space<vmem>>, vector<1x32x64xf32>
    %94 = vector.shape_cast %93 : vector<1x32x64xf32> to vector<32x64xf32>
    %cst_64 = arith.constant dense<0.000000e+00> : vector<56x64xf32>
    %95 = tpu.matmul %92, %94, %cst_64 {dimension_numbers = #tpu.dot_dimension_numbers<[1], [0], [0], [1], [0, 0, 1, 1], [], []>} : vector<56x32xf32>, vector<32x64xf32>, vector<56x64xf32> -> vector<56x64xf32>
    %96 = arith.addf %88, %95 : vector<56x64xf32>
    %c6 = arith.constant 6 : index
    %c0_65 = arith.constant 0 : index
    %c0_66 = arith.constant 0 : index
    %97 = vector.load %arg4[%c6, %c0_65, %c0_66] : memref<9x56x200xbf16, #tpu.memory_space<vmem>>, vector<1x56x200xbf16>
    %98 = vector.shape_cast %97 : vector<1x56x200xbf16> to vector<56x200xbf16>
    %99 = arith.extf %98 : vector<56x200xbf16> to vector<56x200xf32>
    %cst_67 = arith.constant dense<0.000000e+00> : vector<56x32xf32>
    %100 = tpu.matmul %99, %49, %cst_67 {dimension_numbers = #tpu.dot_dimension_numbers<[1], [0], [0], [1], [0, 0, 1, 1], [], []>} : vector<56x200xf32>, vector<200x32xf32>, vector<56x32xf32> -> vector<56x32xf32>
    %c6_68 = arith.constant 6 : index
    %c0_69 = arith.constant 0 : index
    %c0_70 = arith.constant 0 : index
    %101 = vector.load %arg5[%c6_68, %c0_69, %c0_70] : memref<9x32x64xf32, #tpu.memory_space<vmem>>, vector<1x32x64xf32>
    %102 = vector.shape_cast %101 : vector<1x32x64xf32> to vector<32x64xf32>
    %cst_71 = arith.constant dense<0.000000e+00> : vector<56x64xf32>
    %103 = tpu.matmul %100, %102, %cst_71 {dimension_numbers = #tpu.dot_dimension_numbers<[1], [0], [0], [1], [0, 0, 1, 1], [], []>} : vector<56x32xf32>, vector<32x64xf32>, vector<56x64xf32> -> vector<56x64xf32>
    %104 = arith.addf %96, %103 : vector<56x64xf32>
    %c7 = arith.constant 7 : index
    %c0_72 = arith.constant 0 : index
    %c0_73 = arith.constant 0 : index
    %105 = vector.load %arg4[%c7, %c0_72, %c0_73] : memref<9x56x200xbf16, #tpu.memory_space<vmem>>, vector<1x56x200xbf16>
    %106 = vector.shape_cast %105 : vector<1x56x200xbf16> to vector<56x200xbf16>
    %107 = arith.extf %106 : vector<56x200xbf16> to vector<56x200xf32>
    %cst_74 = arith.constant dense<0.000000e+00> : vector<56x32xf32>
    %108 = tpu.matmul %107, %49, %cst_74 {dimension_numbers = #tpu.dot_dimension_numbers<[1], [0], [0], [1], [0, 0, 1, 1], [], []>} : vector<56x200xf32>, vector<200x32xf32>, vector<56x32xf32> -> vector<56x32xf32>
    %c7_75 = arith.constant 7 : index
    %c0_76 = arith.constant 0 : index
    %c0_77 = arith.constant 0 : index
    %109 = vector.load %arg5[%c7_75, %c0_76, %c0_77] : memref<9x32x64xf32, #tpu.memory_space<vmem>>, vector<1x32x64xf32>
    %110 = vector.shape_cast %109 : vector<1x32x64xf32> to vector<32x64xf32>
    %cst_78 = arith.constant dense<0.000000e+00> : vector<56x64xf32>
    %111 = tpu.matmul %108, %110, %cst_78 {dimension_numbers = #tpu.dot_dimension_numbers<[1], [0], [0], [1], [0, 0, 1, 1], [], []>} : vector<56x32xf32>, vector<32x64xf32>, vector<56x64xf32> -> vector<56x64xf32>
    %112 = arith.addf %104, %111 : vector<56x64xf32>
    %c8 = arith.constant 8 : index
    %c0_79 = arith.constant 0 : index
    %c0_80 = arith.constant 0 : index
    %113 = vector.load %arg4[%c8, %c0_79, %c0_80] : memref<9x56x200xbf16, #tpu.memory_space<vmem>>, vector<1x56x200xbf16>
    %114 = vector.shape_cast %113 : vector<1x56x200xbf16> to vector<56x200xbf16>
    %115 = arith.extf %114 : vector<56x200xbf16> to vector<56x200xf32>
    %cst_81 = arith.constant dense<0.000000e+00> : vector<56x32xf32>
    %116 = tpu.matmul %115, %49, %cst_81 {dimension_numbers = #tpu.dot_dimension_numbers<[1], [0], [0], [1], [0, 0, 1, 1], [], []>} : vector<56x200xf32>, vector<200x32xf32>, vector<56x32xf32> -> vector<56x32xf32>
    %c8_82 = arith.constant 8 : index
    %c0_83 = arith.constant 0 : index
    %c0_84 = arith.constant 0 : index
    %117 = vector.load %arg5[%c8_82, %c0_83, %c0_84] : memref<9x32x64xf32, #tpu.memory_space<vmem>>, vector<1x32x64xf32>
    %118 = vector.shape_cast %117 : vector<1x32x64xf32> to vector<32x64xf32>
    %cst_85 = arith.constant dense<0.000000e+00> : vector<56x64xf32>
    %119 = tpu.matmul %116, %118, %cst_85 {dimension_numbers = #tpu.dot_dimension_numbers<[1], [0], [0], [1], [0, 0, 1, 1], [], []>} : vector<56x32xf32>, vector<32x64xf32>, vector<56x64xf32> -> vector<56x64xf32>
    %120 = arith.addf %112, %119 : vector<56x64xf32>
    %c0_86 = arith.constant 0 : index
    %c0_87 = arith.constant 0 : index
    %121 = vector.load %arg6[%c0_86, %c0_87] : memref<1x64xf32, #tpu.memory_space<vmem>>, vector<1x64xf32>
    %122 = vector.broadcast %121 : vector<1x64xf32> to vector<56x64xf32>
    %123 = arith.mulf %120, %122 : vector<56x64xf32>
    %c0_88 = arith.constant 0 : index
    %c0_89 = arith.constant 0 : index
    %124 = vector.load %arg7[%c0_88, %c0_89] : memref<1x64xf32, #tpu.memory_space<vmem>>, vector<1x64xf32>
    %125 = vector.broadcast %124 : vector<1x64xf32> to vector<56x64xf32>
    %126 = arith.addf %123, %125 : vector<56x64xf32>
    %cst_90 = arith.constant 5.000000e-01 : f32
    %127 = vector.broadcast %cst_90 : f32 to vector<56x64xf32>
    %128 = arith.mulf %127, %126 : vector<56x64xf32>
    %cst_91 = arith.constant 0.707106769 : f32
    %129 = vector.broadcast %cst_91 : f32 to vector<56x64xf32>
    %130 = arith.mulf %126, %129 : vector<56x64xf32>
    %131 = math.absf %130 : vector<56x64xf32>
    %cst_92 = arith.constant 0.327591091 : f32
    %132 = vector.broadcast %cst_92 : f32 to vector<56x64xf32>
    %133 = arith.mulf %132, %131 : vector<56x64xf32>
    %cst_93 = arith.constant 1.000000e+00 : f32
    %134 = vector.broadcast %cst_93 : f32 to vector<56x64xf32>
    %135 = arith.addf %134, %133 : vector<56x64xf32>
    %cst_94 = arith.constant 1.000000e+00 : f32
    %136 = vector.broadcast %cst_94 : f32 to vector<56x64xf32>
    %137 = arith.divf %136, %135 : vector<56x64xf32>
    %cst_95 = arith.constant 1.06140542 : f32
    %138 = vector.broadcast %cst_95 : f32 to vector<56x64xf32>
    %139 = arith.mulf %138, %137 : vector<56x64xf32>
    %cst_96 = arith.constant -1.45315206 : f32
    %140 = vector.broadcast %cst_96 : f32 to vector<56x64xf32>
    %141 = arith.addf %139, %140 : vector<56x64xf32>
    %142 = arith.mulf %141, %137 : vector<56x64xf32>
    %cst_97 = arith.constant 1.42141378 : f32
    %143 = vector.broadcast %cst_97 : f32 to vector<56x64xf32>
    %144 = arith.addf %142, %143 : vector<56x64xf32>
    %145 = arith.mulf %144, %137 : vector<56x64xf32>
    %cst_98 = arith.constant -0.284496725 : f32
    %146 = vector.broadcast %cst_98 : f32 to vector<56x64xf32>
    %147 = arith.addf %145, %146 : vector<56x64xf32>
    %148 = arith.mulf %147, %137 : vector<56x64xf32>
    %cst_99 = arith.constant 0.254829586 : f32
    %149 = vector.broadcast %cst_99 : f32 to vector<56x64xf32>
    %150 = arith.addf %148, %149 : vector<56x64xf32>
    %151 = arith.mulf %150, %137 : vector<56x64xf32>
    %152 = arith.mulf %131, %131 : vector<56x64xf32>
    %cst_100 = arith.constant 0.000000e+00 : f32
    %153 = vector.broadcast %cst_100 : f32 to vector<56x64xf32>
    %154 = arith.subf %153, %152 : vector<56x64xf32>
    %155 = math.exp %154 : vector<56x64xf32>
    %156 = arith.mulf %151, %155 : vector<56x64xf32>
    %cst_101 = arith.constant 1.000000e+00 : f32
    %157 = vector.broadcast %cst_101 : f32 to vector<56x64xf32>
    %158 = arith.subf %157, %156 : vector<56x64xf32>
    %cst_102 = arith.constant 0.000000e+00 : f32
    %159 = vector.broadcast %cst_102 : f32 to vector<56x64xf32>
    %160 = arith.cmpf olt, %130, %159 : vector<56x64xf32>
    %cst_103 = arith.constant 0.000000e+00 : f32
    %161 = vector.broadcast %cst_103 : f32 to vector<56x64xf32>
    %162 = arith.subf %161, %158 : vector<56x64xf32>
    %163 = arith.select %160, %162, %158 : vector<56x64xi1>, vector<56x64xf32>
    %cst_104 = arith.constant 1.000000e+00 : f32
    %164 = vector.broadcast %cst_104 : f32 to vector<56x64xf32>
    %165 = arith.addf %164, %163 : vector<56x64xf32>
    %166 = arith.mulf %128, %165 : vector<56x64xf32>
    %c0_105 = arith.constant 0 : index
    %c0_106 = arith.constant 0 : index
    %167 = vector.load %arg17[%c0_105, %c0_106] : memref<112x64xf32, #tpu.memory_space<vmem>>, vector<56x64xf32>
    tpu.vector_store %arg17[%c0_105, %c0_106], %166 {strides = array<i32>} : memref<112x64xf32, #tpu.memory_space<vmem>>, vector<56x64xf32>,
    %168 = vector.extract_strided_slice %48 {offsets = [200, 0], sizes = [200, 32], strides = [1, 1]} : vector<400x32xf32> to vector<200x32xf32>
    %c0_107 = arith.constant 0 : index
    %c0_108 = arith.constant 0 : index
    %c0_109 = arith.constant 0 : index
    %169 = vector.load %arg4[%c0_107, %c0_108, %c0_109] : memref<9x56x200xbf16, #tpu.memory_space<vmem>>, vector<1x56x200xbf16>
    %170 = vector.shape_cast %169 : vector<1x56x200xbf16> to vector<56x200xbf16>
    %171 = arith.extf %170 : vector<56x200xbf16> to vector<56x200xf32>
    %cst_110 = arith.constant dense<0.000000e+00> : vector<56x32xf32>
    %172 = tpu.matmul %171, %168, %cst_110 {dimension_numbers = #tpu.dot_dimension_numbers<[1], [0], [0], [1], [0, 0, 1, 1], [], []>} : vector<56x200xf32>, vector<200x32xf32>, vector<56x32xf32> -> vector<56x32xf32>
    %c0_111 = arith.constant 0 : index
    %c0_112 = arith.constant 0 : index
    %c0_113 = arith.constant 0 : index
    %173 = vector.load %arg5[%c0_111, %c0_112, %c0_113] : memref<9x32x64xf32, #tpu.memory_space<vmem>>, vector<1x32x64xf32>
    %174 = vector.shape_cast %173 : vector<1x32x64xf32> to vector<32x64xf32>
    %cst_114 = arith.constant dense<0.000000e+00> : vector<56x64xf32>
    %175 = tpu.matmul %172, %174, %cst_114 {dimension_numbers = #tpu.dot_dimension_numbers<[1], [0], [0], [1], [0, 0, 1, 1], [], []>} : vector<56x32xf32>, vector<32x64xf32>, vector<56x64xf32> -> vector<56x64xf32>
    %c1_115 = arith.constant 1 : index
    %c0_116 = arith.constant 0 : index
    %c0_117 = arith.constant 0 : index
    %176 = vector.load %arg4[%c1_115, %c0_116, %c0_117] : memref<9x56x200xbf16, #tpu.memory_space<vmem>>, vector<1x56x200xbf16>
    %177 = vector.shape_cast %176 : vector<1x56x200xbf16> to vector<56x200xbf16>
    %178 = arith.extf %177 : vector<56x200xbf16> to vector<56x200xf32>
    %cst_118 = arith.constant dense<0.000000e+00> : vector<56x32xf32>
    %179 = tpu.matmul %178, %168, %cst_118 {dimension_numbers = #tpu.dot_dimension_numbers<[1], [0], [0], [1], [0, 0, 1, 1], [], []>} : vector<56x200xf32>, vector<200x32xf32>, vector<56x32xf32> -> vector<56x32xf32>
    %c1_119 = arith.constant 1 : index
    %c0_120 = arith.constant 0 : index
    %c0_121 = arith.constant 0 : index
    %180 = vector.load %arg5[%c1_119, %c0_120, %c0_121] : memref<9x32x64xf32, #tpu.memory_space<vmem>>, vector<1x32x64xf32>
    %181 = vector.shape_cast %180 : vector<1x32x64xf32> to vector<32x64xf32>
    %cst_122 = arith.constant dense<0.000000e+00> : vector<56x64xf32>
    %182 = tpu.matmul %179, %181, %cst_122 {dimension_numbers = #tpu.dot_dimension_numbers<[1], [0], [0], [1], [0, 0, 1, 1], [], []>} : vector<56x32xf32>, vector<32x64xf32>, vector<56x64xf32> -> vector<56x64xf32>
    %183 = arith.addf %175, %182 : vector<56x64xf32>
    %c2_123 = arith.constant 2 : index
    %c0_124 = arith.constant 0 : index
    %c0_125 = arith.constant 0 : index
    %184 = vector.load %arg4[%c2_123, %c0_124, %c0_125] : memref<9x56x200xbf16, #tpu.memory_space<vmem>>, vector<1x56x200xbf16>
    %185 = vector.shape_cast %184 : vector<1x56x200xbf16> to vector<56x200xbf16>
    %186 = arith.extf %185 : vector<56x200xbf16> to vector<56x200xf32>
    %cst_126 = arith.constant dense<0.000000e+00> : vector<56x32xf32>
    %187 = tpu.matmul %186, %168, %cst_126 {dimension_numbers = #tpu.dot_dimension_numbers<[1], [0], [0], [1], [0, 0, 1, 1], [], []>} : vector<56x200xf32>, vector<200x32xf32>, vector<56x32xf32> -> vector<56x32xf32>
    %c2_127 = arith.constant 2 : index
    %c0_128 = arith.constant 0 : index
    %c0_129 = arith.constant 0 : index
    %188 = vector.load %arg5[%c2_127, %c0_128, %c0_129] : memref<9x32x64xf32, #tpu.memory_space<vmem>>, vector<1x32x64xf32>
    %189 = vector.shape_cast %188 : vector<1x32x64xf32> to vector<32x64xf32>
    %cst_130 = arith.constant dense<0.000000e+00> : vector<56x64xf32>
    %190 = tpu.matmul %187, %189, %cst_130 {dimension_numbers = #tpu.dot_dimension_numbers<[1], [0], [0], [1], [0, 0, 1, 1], [], []>} : vector<56x32xf32>, vector<32x64xf32>, vector<56x64xf32> -> vector<56x64xf32>
    %191 = arith.addf %183, %190 : vector<56x64xf32>
    %c3_131 = arith.constant 3 : index
    %c0_132 = arith.constant 0 : index
    %c0_133 = arith.constant 0 : index
    %192 = vector.load %arg4[%c3_131, %c0_132, %c0_133] : memref<9x56x200xbf16, #tpu.memory_space<vmem>>, vector<1x56x200xbf16>
    %193 = vector.shape_cast %192 : vector<1x56x200xbf16> to vector<56x200xbf16>
    %194 = arith.extf %193 : vector<56x200xbf16> to vector<56x200xf32>
    %cst_134 = arith.constant dense<0.000000e+00> : vector<56x32xf32>
    %195 = tpu.matmul %194, %168, %cst_134 {dimension_numbers = #tpu.dot_dimension_numbers<[1], [0], [0], [1], [0, 0, 1, 1], [], []>} : vector<56x200xf32>, vector<200x32xf32>, vector<56x32xf32> -> vector<56x32xf32>
    %c3_135 = arith.constant 3 : index
    %c0_136 = arith.constant 0 : index
    %c0_137 = arith.constant 0 : index
    %196 = vector.load %arg5[%c3_135, %c0_136, %c0_137] : memref<9x32x64xf32, #tpu.memory_space<vmem>>, vector<1x32x64xf32>
    %197 = vector.shape_cast %196 : vector<1x32x64xf32> to vector<32x64xf32>
    %cst_138 = arith.constant dense<0.000000e+00> : vector<56x64xf32>
    %198 = tpu.matmul %195, %197, %cst_138 {dimension_numbers = #tpu.dot_dimension_numbers<[1], [0], [0], [1], [0, 0, 1, 1], [], []>} : vector<56x32xf32>, vector<32x64xf32>, vector<56x64xf32> -> vector<56x64xf32>
    %199 = arith.addf %191, %198 : vector<56x64xf32>
    %c4_139 = arith.constant 4 : index
    %c0_140 = arith.constant 0 : index
    %c0_141 = arith.constant 0 : index
    %200 = vector.load %arg4[%c4_139, %c0_140, %c0_141] : memref<9x56x200xbf16, #tpu.memory_space<vmem>>, vector<1x56x200xbf16>
    %201 = vector.shape_cast %200 : vector<1x56x200xbf16> to vector<56x200xbf16>
    %202 = arith.extf %201 : vector<56x200xbf16> to vector<56x200xf32>
    %cst_142 = arith.constant dense<0.000000e+00> : vector<56x32xf32>
    %203 = tpu.matmul %202, %168, %cst_142 {dimension_numbers = #tpu.dot_dimension_numbers<[1], [0], [0], [1], [0, 0, 1, 1], [], []>} : vector<56x200xf32>, vector<200x32xf32>, vector<56x32xf32> -> vector<56x32xf32>
    %c4_143 = arith.constant 4 : index
    %c0_144 = arith.constant 0 : index
    %c0_145 = arith.constant 0 : index
    %204 = vector.load %arg5[%c4_143, %c0_144, %c0_145] : memref<9x32x64xf32, #tpu.memory_space<vmem>>, vector<1x32x64xf32>
    %205 = vector.shape_cast %204 : vector<1x32x64xf32> to vector<32x64xf32>
    %cst_146 = arith.constant dense<0.000000e+00> : vector<56x64xf32>
    %206 = tpu.matmul %203, %205, %cst_146 {dimension_numbers = #tpu.dot_dimension_numbers<[1], [0], [0], [1], [0, 0, 1, 1], [], []>} : vector<56x32xf32>, vector<32x64xf32>, vector<56x64xf32> -> vector<56x64xf32>
    %207 = arith.addf %199, %206 : vector<56x64xf32>
    %c5_147 = arith.constant 5 : index
    %c0_148 = arith.constant 0 : index
    %c0_149 = arith.constant 0 : index
    %208 = vector.load %arg4[%c5_147, %c0_148, %c0_149] : memref<9x56x200xbf16, #tpu.memory_space<vmem>>, vector<1x56x200xbf16>
    %209 = vector.shape_cast %208 : vector<1x56x200xbf16> to vector<56x200xbf16>
    %210 = arith.extf %209 : vector<56x200xbf16> to vector<56x200xf32>
    %cst_150 = arith.constant dense<0.000000e+00> : vector<56x32xf32>
    %211 = tpu.matmul %210, %168, %cst_150 {dimension_numbers = #tpu.dot_dimension_numbers<[1], [0], [0], [1], [0, 0, 1, 1], [], []>} : vector<56x200xf32>, vector<200x32xf32>, vector<56x32xf32> -> vector<56x32xf32>
    %c5_151 = arith.constant 5 : index
    %c0_152 = arith.constant 0 : index
    %c0_153 = arith.constant 0 : index
    %212 = vector.load %arg5[%c5_151, %c0_152, %c0_153] : memref<9x32x64xf32, #tpu.memory_space<vmem>>, vector<1x32x64xf32>
    %213 = vector.shape_cast %212 : vector<1x32x64xf32> to vector<32x64xf32>
    %cst_154 = arith.constant dense<0.000000e+00> : vector<56x64xf32>
    %214 = tpu.matmul %211, %213, %cst_154 {dimension_numbers = #tpu.dot_dimension_numbers<[1], [0], [0], [1], [0, 0, 1, 1], [], []>} : vector<56x32xf32>, vector<32x64xf32>, vector<56x64xf32> -> vector<56x64xf32>
    %215 = arith.addf %207, %214 : vector<56x64xf32>
    %c6_155 = arith.constant 6 : index
    %c0_156 = arith.constant 0 : index
    %c0_157 = arith.constant 0 : index
    %216 = vector.load %arg4[%c6_155, %c0_156, %c0_157] : memref<9x56x200xbf16, #tpu.memory_space<vmem>>, vector<1x56x200xbf16>
    %217 = vector.shape_cast %216 : vector<1x56x200xbf16> to vector<56x200xbf16>
    %218 = arith.extf %217 : vector<56x200xbf16> to vector<56x200xf32>
    %cst_158 = arith.constant dense<0.000000e+00> : vector<56x32xf32>
    %219 = tpu.matmul %218, %168, %cst_158 {dimension_numbers = #tpu.dot_dimension_numbers<[1], [0], [0], [1], [0, 0, 1, 1], [], []>} : vector<56x200xf32>, vector<200x32xf32>, vector<56x32xf32> -> vector<56x32xf32>
    %c6_159 = arith.constant 6 : index
    %c0_160 = arith.constant 0 : index
    %c0_161 = arith.constant 0 : index
    %220 = vector.load %arg5[%c6_159, %c0_160, %c0_161] : memref<9x32x64xf32, #tpu.memory_space<vmem>>, vector<1x32x64xf32>
    %221 = vector.shape_cast %220 : vector<1x32x64xf32> to vector<32x64xf32>
    %cst_162 = arith.constant dense<0.000000e+00> : vector<56x64xf32>
    %222 = tpu.matmul %219, %221, %cst_162 {dimension_numbers = #tpu.dot_dimension_numbers<[1], [0], [0], [1], [0, 0, 1, 1], [], []>} : vector<56x32xf32>, vector<32x64xf32>, vector<56x64xf32> -> vector<56x64xf32>
    %223 = arith.addf %215, %222 : vector<56x64xf32>
    %c7_163 = arith.constant 7 : index
    %c0_164 = arith.constant 0 : index
    %c0_165 = arith.constant 0 : index
    %224 = vector.load %arg4[%c7_163, %c0_164, %c0_165] : memref<9x56x200xbf16, #tpu.memory_space<vmem>>, vector<1x56x200xbf16>
    %225 = vector.shape_cast %224 : vector<1x56x200xbf16> to vector<56x200xbf16>
    %226 = arith.extf %225 : vector<56x200xbf16> to vector<56x200xf32>
    %cst_166 = arith.constant dense<0.000000e+00> : vector<56x32xf32>
    %227 = tpu.matmul %226, %168, %cst_166 {dimension_numbers = #tpu.dot_dimension_numbers<[1], [0], [0], [1], [0, 0, 1, 1], [], []>} : vector<56x200xf32>, vector<200x32xf32>, vector<56x32xf32> -> vector<56x32xf32>
    %c7_167 = arith.constant 7 : index
    %c0_168 = arith.constant 0 : index
    %c0_169 = arith.constant 0 : index
    %228 = vector.load %arg5[%c7_167, %c0_168, %c0_169] : memref<9x32x64xf32, #tpu.memory_space<vmem>>, vector<1x32x64xf32>
    %229 = vector.shape_cast %228 : vector<1x32x64xf32> to vector<32x64xf32>
    %cst_170 = arith.constant dense<0.000000e+00> : vector<56x64xf32>
    %230 = tpu.matmul %227, %229, %cst_170 {dimension_numbers = #tpu.dot_dimension_numbers<[1], [0], [0], [1], [0, 0, 1, 1], [], []>} : vector<56x32xf32>, vector<32x64xf32>, vector<56x64xf32> -> vector<56x64xf32>
    %231 = arith.addf %223, %230 : vector<56x64xf32>
    %c8_171 = arith.constant 8 : index
    %c0_172 = arith.constant 0 : index
    %c0_173 = arith.constant 0 : index
    %232 = vector.load %arg4[%c8_171, %c0_172, %c0_173] : memref<9x56x200xbf16, #tpu.memory_space<vmem>>, vector<1x56x200xbf16>
    %233 = vector.shape_cast %232 : vector<1x56x200xbf16> to vector<56x200xbf16>
    %234 = arith.extf %233 : vector<56x200xbf16> to vector<56x200xf32>
    %cst_174 = arith.constant dense<0.000000e+00> : vector<56x32xf32>
    %235 = tpu.matmul %234, %168, %cst_174 {dimension_numbers = #tpu.dot_dimension_numbers<[1], [0], [0], [1], [0, 0, 1, 1], [], []>} : vector<56x200xf32>, vector<200x32xf32>, vector<56x32xf32> -> vector<56x32xf32>
    %c8_175 = arith.constant 8 : index
    %c0_176 = arith.constant 0 : index
    %c0_177 = arith.constant 0 : index
    %236 = vector.load %arg5[%c8_175, %c0_176, %c0_177] : memref<9x32x64xf32, #tpu.memory_space<vmem>>, vector<1x32x64xf32>
    %237 = vector.shape_cast %236 : vector<1x32x64xf32> to vector<32x64xf32>
    %cst_178 = arith.constant dense<0.000000e+00> : vector<56x64xf32>
    %238 = tpu.matmul %235, %237, %cst_178 {dimension_numbers = #tpu.dot_dimension_numbers<[1], [0], [0], [1], [0, 0, 1, 1], [], []>} : vector<56x32xf32>, vector<32x64xf32>, vector<56x64xf32> -> vector<56x64xf32>
    %239 = arith.addf %231, %238 : vector<56x64xf32>
    %c0_179 = arith.constant 0 : index
    %c0_180 = arith.constant 0 : index
    %240 = vector.load %arg6[%c0_179, %c0_180] : memref<1x64xf32, #tpu.memory_space<vmem>>, vector<1x64xf32>
    %241 = vector.broadcast %240 : vector<1x64xf32> to vector<56x64xf32>
    %242 = arith.mulf %239, %241 : vector<56x64xf32>
    %c0_181 = arith.constant 0 : index
    %c0_182 = arith.constant 0 : index
    %243 = vector.load %arg7[%c0_181, %c0_182] : memref<1x64xf32, #tpu.memory_space<vmem>>, vector<1x64xf32>
    %244 = vector.broadcast %243 : vector<1x64xf32> to vector<56x64xf32>
    %245 = arith.addf %242, %244 : vector<56x64xf32>
    %cst_183 = arith.constant 5.000000e-01 : f32
    %246 = vector.broadcast %cst_183 : f32 to vector<56x64xf32>
    %247 = arith.mulf %246, %245 : vector<56x64xf32>
    %cst_184 = arith.constant 0.707106769 : f32
    %248 = vector.broadcast %cst_184 : f32 to vector<56x64xf32>
    %249 = arith.mulf %245, %248 : vector<56x64xf32>
    %250 = math.absf %249 : vector<56x64xf32>
    %cst_185 = arith.constant 0.327591091 : f32
    %251 = vector.broadcast %cst_185 : f32 to vector<56x64xf32>
    %252 = arith.mulf %251, %250 : vector<56x64xf32>
    %cst_186 = arith.constant 1.000000e+00 : f32
    %253 = vector.broadcast %cst_186 : f32 to vector<56x64xf32>
    %254 = arith.addf %253, %252 : vector<56x64xf32>
    %cst_187 = arith.constant 1.000000e+00 : f32
    %255 = vector.broadcast %cst_187 : f32 to vector<56x64xf32>
    %256 = arith.divf %255, %254 : vector<56x64xf32>
    %cst_188 = arith.constant 1.06140542 : f32
    %257 = vector.broadcast %cst_188 : f32 to vector<56x64xf32>
    %258 = arith.mulf %257, %256 : vector<56x64xf32>
    %cst_189 = arith.constant -1.45315206 : f32
    %259 = vector.broadcast %cst_189 : f32 to vector<56x64xf32>
    %260 = arith.addf %258, %259 : vector<56x64xf32>
    %261 = arith.mulf %260, %256 : vector<56x64xf32>
    %cst_190 = arith.constant 1.42141378 : f32
    %262 = vector.broadcast %cst_190 : f32 to vector<56x64xf32>
    %263 = arith.addf %261, %262 : vector<56x64xf32>
    %264 = arith.mulf %263, %256 : vector<56x64xf32>
    %cst_191 = arith.constant -0.284496725 : f32
    %265 = vector.broadcast %cst_191 : f32 to vector<56x64xf32>
    %266 = arith.addf %264, %265 : vector<56x64xf32>
    %267 = arith.mulf %266, %256 : vector<56x64xf32>
    %cst_192 = arith.constant 0.254829586 : f32
    %268 = vector.broadcast %cst_192 : f32 to vector<56x64xf32>
    %269 = arith.addf %267, %268 : vector<56x64xf32>
    %270 = arith.mulf %269, %256 : vector<56x64xf32>
    %271 = arith.mulf %250, %250 : vector<56x64xf32>
    %cst_193 = arith.constant 0.000000e+00 : f32
    %272 = vector.broadcast %cst_193 : f32 to vector<56x64xf32>
    %273 = arith.subf %272, %271 : vector<56x64xf32>
    %274 = math.exp %273 : vector<56x64xf32>
    %275 = arith.mulf %270, %274 : vector<56x64xf32>
    %cst_194 = arith.constant 1.000000e+00 : f32
    %276 = vector.broadcast %cst_194 : f32 to vector<56x64xf32>
    %277 = arith.subf %276, %275 : vector<56x64xf32>
    %cst_195 = arith.constant 0.000000e+00 : f32
    %278 = vector.broadcast %cst_195 : f32 to vector<56x64xf32>
    %279 = arith.cmpf olt, %249, %278 : vector<56x64xf32>
    %cst_196 = arith.constant 0.000000e+00 : f32
    %280 = vector.broadcast %cst_196 : f32 to vector<56x64xf32>
    %281 = arith.subf %280, %277 : vector<56x64xf32>
    %282 = arith.select %279, %281, %277 : vector<56x64xi1>, vector<56x64xf32>
    %cst_197 = arith.constant 1.000000e+00 : f32
    %283 = vector.broadcast %cst_197 : f32 to vector<56x64xf32>
    %284 = arith.addf %283, %282 : vector<56x64xf32>
    %285 = arith.mulf %247, %284 : vector<56x64xf32>
    %c56 = arith.constant 56 : index
    %c0_198 = arith.constant 0 : index
    %286 = vector.load %arg17[%c56, %c0_198] : memref<112x64xf32, #tpu.memory_space<vmem>>, vector<56x64xf32>
    tpu.vector_store %arg17[%c56, %c0_198], %285 {strides = array<i32>} : memref<112x64xf32, #tpu.memory_space<vmem>>, vector<56x64xf32>,
    %c0_199 = arith.constant 0 : index
    %c0_200 = arith.constant 0 : index
    %287 = vector.load %arg17[%c0_199, %c0_200] : memref<112x64xf32, #tpu.memory_space<vmem>>, vector<112x64xf32>
    %c0_201 = arith.constant 0 : index
    %c0_202 = arith.constant 0 : index
    %c0_203 = arith.constant 0 : index
    %288 = vector.load %arg8[%c0_201, %c0_202, %c0_203] : memref<9x32x112xbf16, #tpu.memory_space<vmem>>, vector<1x32x112xbf16>
    %289 = vector.shape_cast %288 : vector<1x32x112xbf16> to vector<32x112xbf16>
    %290 = arith.extf %289 : vector<32x112xbf16> to vector<32x112xf32>
    %cst_204 = arith.constant dense<0.000000e+00> : vector<32x64xf32>
    %291 = tpu.matmul %290, %287, %cst_204 {dimension_numbers = #tpu.dot_dimension_numbers<[1], [0], [0], [1], [0, 0, 1, 1], [], []>} : vector<32x112xf32>, vector<112x64xf32>, vector<32x64xf32> -> vector<32x64xf32>
    %c0_205 = arith.constant 0 : index
    %c0_206 = arith.constant 0 : index
    %c0_207 = arith.constant 0 : index
    %292 = vector.load %arg9[%c0_205, %c0_206, %c0_207] : memref<9x64x128xf32, #tpu.memory_space<vmem>>, vector<1x64x128xf32>
    %293 = vector.shape_cast %292 : vector<1x64x128xf32> to vector<64x128xf32>
    %cst_208 = arith.constant dense<0.000000e+00> : vector<32x128xf32>
    %294 = tpu.matmul %291, %293, %cst_208 {dimension_numbers = #tpu.dot_dimension_numbers<[1], [0], [0], [1], [0, 0, 1, 1], [], []>} : vector<32x64xf32>, vector<64x128xf32>, vector<32x128xf32> -> vector<32x128xf32>
    %c1_209 = arith.constant 1 : index
    %c0_210 = arith.constant 0 : index
    %c0_211 = arith.constant 0 : index
    %295 = vector.load %arg8[%c1_209, %c0_210, %c0_211] : memref<9x32x112xbf16, #tpu.memory_space<vmem>>, vector<1x32x112xbf16>
    %296 = vector.shape_cast %295 : vector<1x32x112xbf16> to vector<32x112xbf16>
    %297 = arith.extf %296 : vector<32x112xbf16> to vector<32x112xf32>
    %cst_212 = arith.constant dense<0.000000e+00> : vector<32x64xf32>
    %298 = tpu.matmul %297, %287, %cst_212 {dimension_numbers = #tpu.dot_dimension_numbers<[1], [0], [0], [1], [0, 0, 1, 1], [], []>} : vector<32x112xf32>, vector<112x64xf32>, vector<32x64xf32> -> vector<32x64xf32>
    %c1_213 = arith.constant 1 : index
    %c0_214 = arith.constant 0 : index
    %c0_215 = arith.constant 0 : index
    %299 = vector.load %arg9[%c1_213, %c0_214, %c0_215] : memref<9x64x128xf32, #tpu.memory_space<vmem>>, vector<1x64x128xf32>
    %300 = vector.shape_cast %299 : vector<1x64x128xf32> to vector<64x128xf32>
    %cst_216 = arith.constant dense<0.000000e+00> : vector<32x128xf32>
    %301 = tpu.matmul %298, %300, %cst_216 {dimension_numbers = #tpu.dot_dimension_numbers<[1], [0], [0], [1], [0, 0, 1, 1], [], []>} : vector<32x64xf32>, vector<64x128xf32>, vector<32x128xf32> -> vector<32x128xf32>
    %302 = arith.addf %294, %301 : vector<32x128xf32>
    %c2_217 = arith.constant 2 : index
    %c0_218 = arith.constant 0 : index
    %c0_219 = arith.constant 0 : index
    %303 = vector.load %arg8[%c2_217, %c0_218, %c0_219] : memref<9x32x112xbf16, #tpu.memory_space<vmem>>, vector<1x32x112xbf16>
    %304 = vector.shape_cast %303 : vector<1x32x112xbf16> to vector<32x112xbf16>
    %305 = arith.extf %304 : vector<32x112xbf16> to vector<32x112xf32>
    %cst_220 = arith.constant dense<0.000000e+00> : vector<32x64xf32>
    %306 = tpu.matmul %305, %287, %cst_220 {dimension_numbers = #tpu.dot_dimension_numbers<[1], [0], [0], [1], [0, 0, 1, 1], [], []>} : vector<32x112xf32>, vector<112x64xf32>, vector<32x64xf32> -> vector<32x64xf32>
    %c2_221 = arith.constant 2 : index
    %c0_222 = arith.constant 0 : index
    %c0_223 = arith.constant 0 : index
    %307 = vector.load %arg9[%c2_221, %c0_222, %c0_223] : memref<9x64x128xf32, #tpu.memory_space<vmem>>, vector<1x64x128xf32>
    %308 = vector.shape_cast %307 : vector<1x64x128xf32> to vector<64x128xf32>
    %cst_224 = arith.constant dense<0.000000e+00> : vector<32x128xf32>
    %309 = tpu.matmul %306, %308, %cst_224 {dimension_numbers = #tpu.dot_dimension_numbers<[1], [0], [0], [1], [0, 0, 1, 1], [], []>} : vector<32x64xf32>, vector<64x128xf32>, vector<32x128xf32> -> vector<32x128xf32>
    %310 = arith.addf %302, %309 : vector<32x128xf32>
    %c3_225 = arith.constant 3 : index
    %c0_226 = arith.constant 0 : index
    %c0_227 = arith.constant 0 : index
    %311 = vector.load %arg8[%c3_225, %c0_226, %c0_227] : memref<9x32x112xbf16, #tpu.memory_space<vmem>>, vector<1x32x112xbf16>
    %312 = vector.shape_cast %311 : vector<1x32x112xbf16> to vector<32x112xbf16>
    %313 = arith.extf %312 : vector<32x112xbf16> to vector<32x112xf32>
    %cst_228 = arith.constant dense<0.000000e+00> : vector<32x64xf32>
    %314 = tpu.matmul %313, %287, %cst_228 {dimension_numbers = #tpu.dot_dimension_numbers<[1], [0], [0], [1], [0, 0, 1, 1], [], []>} : vector<32x112xf32>, vector<112x64xf32>, vector<32x64xf32> -> vector<32x64xf32>
    %c3_229 = arith.constant 3 : index
    %c0_230 = arith.constant 0 : index
    %c0_231 = arith.constant 0 : index
    %315 = vector.load %arg9[%c3_229, %c0_230, %c0_231] : memref<9x64x128xf32, #tpu.memory_space<vmem>>, vector<1x64x128xf32>
    %316 = vector.shape_cast %315 : vector<1x64x128xf32> to vector<64x128xf32>
    %cst_232 = arith.constant dense<0.000000e+00> : vector<32x128xf32>
    %317 = tpu.matmul %314, %316, %cst_232 {dimension_numbers = #tpu.dot_dimension_numbers<[1], [0], [0], [1], [0, 0, 1, 1], [], []>} : vector<32x64xf32>, vector<64x128xf32>, vector<32x128xf32> -> vector<32x128xf32>
    %318 = arith.addf %310, %317 : vector<32x128xf32>
    %c4_233 = arith.constant 4 : index
    %c0_234 = arith.constant 0 : index
    %c0_235 = arith.constant 0 : index
    %319 = vector.load %arg8[%c4_233, %c0_234, %c0_235] : memref<9x32x112xbf16, #tpu.memory_space<vmem>>, vector<1x32x112xbf16>
    %320 = vector.shape_cast %319 : vector<1x32x112xbf16> to vector<32x112xbf16>
    %321 = arith.extf %320 : vector<32x112xbf16> to vector<32x112xf32>
    %cst_236 = arith.constant dense<0.000000e+00> : vector<32x64xf32>
    %322 = tpu.matmul %321, %287, %cst_236 {dimension_numbers = #tpu.dot_dimension_numbers<[1], [0], [0], [1], [0, 0, 1, 1], [], []>} : vector<32x112xf32>, vector<112x64xf32>, vector<32x64xf32> -> vector<32x64xf32>
    %c4_237 = arith.constant 4 : index
    %c0_238 = arith.constant 0 : index
    %c0_239 = arith.constant 0 : index
    %323 = vector.load %arg9[%c4_237, %c0_238, %c0_239] : memref<9x64x128xf32, #tpu.memory_space<vmem>>, vector<1x64x128xf32>
    %324 = vector.shape_cast %323 : vector<1x64x128xf32> to vector<64x128xf32>
    %cst_240 = arith.constant dense<0.000000e+00> : vector<32x128xf32>
    %325 = tpu.matmul %322, %324, %cst_240 {dimension_numbers = #tpu.dot_dimension_numbers<[1], [0], [0], [1], [0, 0, 1, 1], [], []>} : vector<32x64xf32>, vector<64x128xf32>, vector<32x128xf32> -> vector<32x128xf32>
    %326 = arith.addf %318, %325 : vector<32x128xf32>
    %c5_241 = arith.constant 5 : index
    %c0_242 = arith.constant 0 : index
    %c0_243 = arith.constant 0 : index
    %327 = vector.load %arg8[%c5_241, %c0_242, %c0_243] : memref<9x32x112xbf16, #tpu.memory_space<vmem>>, vector<1x32x112xbf16>
    %328 = vector.shape_cast %327 : vector<1x32x112xbf16> to vector<32x112xbf16>
    %329 = arith.extf %328 : vector<32x112xbf16> to vector<32x112xf32>
    %cst_244 = arith.constant dense<0.000000e+00> : vector<32x64xf32>
    %330 = tpu.matmul %329, %287, %cst_244 {dimension_numbers = #tpu.dot_dimension_numbers<[1], [0], [0], [1], [0, 0, 1, 1], [], []>} : vector<32x112xf32>, vector<112x64xf32>, vector<32x64xf32> -> vector<32x64xf32>
    %c5_245 = arith.constant 5 : index
    %c0_246 = arith.constant 0 : index
    %c0_247 = arith.constant 0 : index
    %331 = vector.load %arg9[%c5_245, %c0_246, %c0_247] : memref<9x64x128xf32, #tpu.memory_space<vmem>>, vector<1x64x128xf32>
    %332 = vector.shape_cast %331 : vector<1x64x128xf32> to vector<64x128xf32>
    %cst_248 = arith.constant dense<0.000000e+00> : vector<32x128xf32>
    %333 = tpu.matmul %330, %332, %cst_248 {dimension_numbers = #tpu.dot_dimension_numbers<[1], [0], [0], [1], [0, 0, 1, 1], [], []>} : vector<32x64xf32>, vector<64x128xf32>, vector<32x128xf32> -> vector<32x128xf32>
    %334 = arith.addf %326, %333 : vector<32x128xf32>
    %c6_249 = arith.constant 6 : index
    %c0_250 = arith.constant 0 : index
    %c0_251 = arith.constant 0 : index
    %335 = vector.load %arg8[%c6_249, %c0_250, %c0_251] : memref<9x32x112xbf16, #tpu.memory_space<vmem>>, vector<1x32x112xbf16>
    %336 = vector.shape_cast %335 : vector<1x32x112xbf16> to vector<32x112xbf16>
    %337 = arith.extf %336 : vector<32x112xbf16> to vector<32x112xf32>
    %cst_252 = arith.constant dense<0.000000e+00> : vector<32x64xf32>
    %338 = tpu.matmul %337, %287, %cst_252 {dimension_numbers = #tpu.dot_dimension_numbers<[1], [0], [0], [1], [0, 0, 1, 1], [], []>} : vector<32x112xf32>, vector<112x64xf32>, vector<32x64xf32> -> vector<32x64xf32>
    %c6_253 = arith.constant 6 : index
    %c0_254 = arith.constant 0 : index
    %c0_255 = arith.constant 0 : index
    %339 = vector.load %arg9[%c6_253, %c0_254, %c0_255] : memref<9x64x128xf32, #tpu.memory_space<vmem>>, vector<1x64x128xf32>
    %340 = vector.shape_cast %339 : vector<1x64x128xf32> to vector<64x128xf32>
    %cst_256 = arith.constant dense<0.000000e+00> : vector<32x128xf32>
    %341 = tpu.matmul %338, %340, %cst_256 {dimension_numbers = #tpu.dot_dimension_numbers<[1], [0], [0], [1], [0, 0, 1, 1], [], []>} : vector<32x64xf32>, vector<64x128xf32>, vector<32x128xf32> -> vector<32x128xf32>
    %342 = arith.addf %334, %341 : vector<32x128xf32>
    %c7_257 = arith.constant 7 : index
    %c0_258 = arith.constant 0 : index
    %c0_259 = arith.constant 0 : index
    %343 = vector.load %arg8[%c7_257, %c0_258, %c0_259] : memref<9x32x112xbf16, #tpu.memory_space<vmem>>, vector<1x32x112xbf16>
    %344 = vector.shape_cast %343 : vector<1x32x112xbf16> to vector<32x112xbf16>
    %345 = arith.extf %344 : vector<32x112xbf16> to vector<32x112xf32>
    %cst_260 = arith.constant dense<0.000000e+00> : vector<32x64xf32>
    %346 = tpu.matmul %345, %287, %cst_260 {dimension_numbers = #tpu.dot_dimension_numbers<[1], [0], [0], [1], [0, 0, 1, 1], [], []>} : vector<32x112xf32>, vector<112x64xf32>, vector<32x64xf32> -> vector<32x64xf32>
    %c7_261 = arith.constant 7 : index
    %c0_262 = arith.constant 0 : index
    %c0_263 = arith.constant 0 : index
    %347 = vector.load %arg9[%c7_261, %c0_262, %c0_263] : memref<9x64x128xf32, #tpu.memory_space<vmem>>, vector<1x64x128xf32>
    %348 = vector.shape_cast %347 : vector<1x64x128xf32> to vector<64x128xf32>
    %cst_264 = arith.constant dense<0.000000e+00> : vector<32x128xf32>
    %349 = tpu.matmul %346, %348, %cst_264 {dimension_numbers = #tpu.dot_dimension_numbers<[1], [0], [0], [1], [0, 0, 1, 1], [], []>} : vector<32x64xf32>, vector<64x128xf32>, vector<32x128xf32> -> vector<32x128xf32>
    %350 = arith.addf %342, %349 : vector<32x128xf32>
    %c8_265 = arith.constant 8 : index
    %c0_266 = arith.constant 0 : index
    %c0_267 = arith.constant 0 : index
    %351 = vector.load %arg8[%c8_265, %c0_266, %c0_267] : memref<9x32x112xbf16, #tpu.memory_space<vmem>>, vector<1x32x112xbf16>
    %352 = vector.shape_cast %351 : vector<1x32x112xbf16> to vector<32x112xbf16>
    %353 = arith.extf %352 : vector<32x112xbf16> to vector<32x112xf32>
    %cst_268 = arith.constant dense<0.000000e+00> : vector<32x64xf32>
    %354 = tpu.matmul %353, %287, %cst_268 {dimension_numbers = #tpu.dot_dimension_numbers<[1], [0], [0], [1], [0, 0, 1, 1], [], []>} : vector<32x112xf32>, vector<112x64xf32>, vector<32x64xf32> -> vector<32x64xf32>
    %c8_269 = arith.constant 8 : index
    %c0_270 = arith.constant 0 : index
    %c0_271 = arith.constant 0 : index
    %355 = vector.load %arg9[%c8_269, %c0_270, %c0_271] : memref<9x64x128xf32, #tpu.memory_space<vmem>>, vector<1x64x128xf32>
    %356 = vector.shape_cast %355 : vector<1x64x128xf32> to vector<64x128xf32>
    %cst_272 = arith.constant dense<0.000000e+00> : vector<32x128xf32>
    %357 = tpu.matmul %354, %356, %cst_272 {dimension_numbers = #tpu.dot_dimension_numbers<[1], [0], [0], [1], [0, 0, 1, 1], [], []>} : vector<32x64xf32>, vector<64x128xf32>, vector<32x128xf32> -> vector<32x128xf32>
    %358 = arith.addf %350, %357 : vector<32x128xf32>
    %c0_273 = arith.constant 0 : index
    %c0_274 = arith.constant 0 : index
    %359 = vector.load %arg10[%c0_273, %c0_274] : memref<1x128xf32, #tpu.memory_space<vmem>>, vector<1x128xf32>
    %360 = vector.broadcast %359 : vector<1x128xf32> to vector<32x128xf32>
    %361 = arith.mulf %358, %360 : vector<32x128xf32>
    %c0_275 = arith.constant 0 : index
    %c0_276 = arith.constant 0 : index
    %362 = vector.load %arg11[%c0_275, %c0_276] : memref<1x128xf32, #tpu.memory_space<vmem>>, vector<1x128xf32>
    %363 = vector.broadcast %362 : vector<1x128xf32> to vector<32x128xf32>
    %364 = arith.addf %361, %363 : vector<32x128xf32>
    %cst_277 = arith.constant 5.000000e-01 : f32
    %365 = vector.broadcast %cst_277 : f32 to vector<32x128xf32>
    %366 = arith.mulf %365, %364 : vector<32x128xf32>
    %cst_278 = arith.constant 0.707106769 : f32
    %367 = vector.broadcast %cst_278 : f32 to vector<32x128xf32>
    %368 = arith.mulf %364, %367 : vector<32x128xf32>
    %369 = math.absf %368 : vector<32x128xf32>
    %cst_279 = arith.constant 0.327591091 : f32
    %370 = vector.broadcast %cst_279 : f32 to vector<32x128xf32>
    %371 = arith.mulf %370, %369 : vector<32x128xf32>
    %cst_280 = arith.constant 1.000000e+00 : f32
    %372 = vector.broadcast %cst_280 : f32 to vector<32x128xf32>
    %373 = arith.addf %372, %371 : vector<32x128xf32>
    %cst_281 = arith.constant 1.000000e+00 : f32
    %374 = vector.broadcast %cst_281 : f32 to vector<32x128xf32>
    %375 = arith.divf %374, %373 : vector<32x128xf32>
    %cst_282 = arith.constant 1.06140542 : f32
    %376 = vector.broadcast %cst_282 : f32 to vector<32x128xf32>
    %377 = arith.mulf %376, %375 : vector<32x128xf32>
    %cst_283 = arith.constant -1.45315206 : f32
    %378 = vector.broadcast %cst_283 : f32 to vector<32x128xf32>
    %379 = arith.addf %377, %378 : vector<32x128xf32>
    %380 = arith.mulf %379, %375 : vector<32x128xf32>
    %cst_284 = arith.constant 1.42141378 : f32
    %381 = vector.broadcast %cst_284 : f32 to vector<32x128xf32>
    %382 = arith.addf %380, %381 : vector<32x128xf32>
    %383 = arith.mulf %382, %375 : vector<32x128xf32>
    %cst_285 = arith.constant -0.284496725 : f32
    %384 = vector.broadcast %cst_285 : f32 to vector<32x128xf32>
    %385 = arith.addf %383, %384 : vector<32x128xf32>
    %386 = arith.mulf %385, %375 : vector<32x128xf32>
    %cst_286 = arith.constant 0.254829586 : f32
    %387 = vector.broadcast %cst_286 : f32 to vector<32x128xf32>
    %388 = arith.addf %386, %387 : vector<32x128xf32>
    %389 = arith.mulf %388, %375 : vector<32x128xf32>
    %390 = arith.mulf %369, %369 : vector<32x128xf32>
    %cst_287 = arith.constant 0.000000e+00 : f32
    %391 = vector.broadcast %cst_287 : f32 to vector<32x128xf32>
    %392 = arith.subf %391, %390 : vector<32x128xf32>
    %393 = math.exp %392 : vector<32x128xf32>
    %394 = arith.mulf %389, %393 : vector<32x128xf32>
    %cst_288 = arith.constant 1.000000e+00 : f32
    %395 = vector.broadcast %cst_288 : f32 to vector<32x128xf32>
    %396 = arith.subf %395, %394 : vector<32x128xf32>
    %cst_289 = arith.constant 0.000000e+00 : f32
    %397 = vector.broadcast %cst_289 : f32 to vector<32x128xf32>
    %398 = arith.cmpf olt, %368, %397 : vector<32x128xf32>
    %cst_290 = arith.constant 0.000000e+00 : f32
    %399 = vector.broadcast %cst_290 : f32 to vector<32x128xf32>
    %400 = arith.subf %399, %396 : vector<32x128xf32>
    %401 = arith.select %398, %400, %396 : vector<32x128xi1>, vector<32x128xf32>
    %cst_291 = arith.constant 1.000000e+00 : f32
    %402 = vector.broadcast %cst_291 : f32 to vector<32x128xf32>
    %403 = arith.addf %402, %401 : vector<32x128xf32>
    %404 = arith.mulf %366, %403 : vector<32x128xf32>
    %405 = vector.extract_strided_slice %404 {offsets = [0, 0], sizes = [2, 128], strides = [1, 1]} : vector<32x128xf32> to vector<2x128xf32>
    %c0_292 = arith.constant 0 : index
    %c0_293 = arith.constant 0 : index
    %c0_294 = arith.constant 0 : index
    %406 = vector.load %arg12[%c0_292, %c0_293, %c0_294] : memref<16x128x4xf32, #tpu.memory_space<vmem>>, vector<1x128x4xf32>
    %407 = vector.shape_cast %406 : vector<1x128x4xf32> to vector<128x4xf32>
    %cst_295 = arith.constant dense<0.000000e+00> : vector<2x4xf32>
    %408 = tpu.matmul %405, %407, %cst_295 {dimension_numbers = #tpu.dot_dimension_numbers<[1], [0], [0], [1], [0, 0, 1, 1], [], []>} : vector<2x128xf32>, vector<128x4xf32>, vector<2x4xf32> -> vector<2x4xf32>
    %409 = vector.extract_strided_slice %404 {offsets = [2, 0], sizes = [2, 128], strides = [1, 1]} : vector<32x128xf32> to vector<2x128xf32>
    %c1_296 = arith.constant 1 : index
    %c0_297 = arith.constant 0 : index
    %c0_298 = arith.constant 0 : index
    %410 = vector.load %arg12[%c1_296, %c0_297, %c0_298] : memref<16x128x4xf32, #tpu.memory_space<vmem>>, vector<1x128x4xf32>
    %411 = vector.shape_cast %410 : vector<1x128x4xf32> to vector<128x4xf32>
    %cst_299 = arith.constant dense<0.000000e+00> : vector<2x4xf32>
    %412 = tpu.matmul %409, %411, %cst_299 {dimension_numbers = #tpu.dot_dimension_numbers<[1], [0], [0], [1], [0, 0, 1, 1], [], []>} : vector<2x128xf32>, vector<128x4xf32>, vector<2x4xf32> -> vector<2x4xf32>
    %413 = arith.addf %408, %412 : vector<2x4xf32>
    %414 = vector.extract_strided_slice %404 {offsets = [4, 0], sizes = [2, 128], strides = [1, 1]} : vector<32x128xf32> to vector<2x128xf32>
    %c2_300 = arith.constant 2 : index
    %c0_301 = arith.constant 0 : index
    %c0_302 = arith.constant 0 : index
    %415 = vector.load %arg12[%c2_300, %c0_301, %c0_302] : memref<16x128x4xf32, #tpu.memory_space<vmem>>, vector<1x128x4xf32>
    %416 = vector.shape_cast %415 : vector<1x128x4xf32> to vector<128x4xf32>
    %cst_303 = arith.constant dense<0.000000e+00> : vector<2x4xf32>
    %417 = tpu.matmul %414, %416, %cst_303 {dimension_numbers = #tpu.dot_dimension_numbers<[1], [0], [0], [1], [0, 0, 1, 1], [], []>} : vector<2x128xf32>, vector<128x4xf32>, vector<2x4xf32> -> vector<2x4xf32>
    %418 = arith.addf %413, %417 : vector<2x4xf32>
    %419 = vector.extract_strided_slice %404 {offsets = [6, 0], sizes = [2, 128], strides = [1, 1]} : vector<32x128xf32> to vector<2x128xf32>
    %c3_304 = arith.constant 3 : index
    %c0_305 = arith.constant 0 : index
    %c0_306 = arith.constant 0 : index
    %420 = vector.load %arg12[%c3_304, %c0_305, %c0_306] : memref<16x128x4xf32, #tpu.memory_space<vmem>>, vector<1x128x4xf32>
    %421 = vector.shape_cast %420 : vector<1x128x4xf32> to vector<128x4xf32>
    %cst_307 = arith.constant dense<0.000000e+00> : vector<2x4xf32>
    %422 = tpu.matmul %419, %421, %cst_307 {dimension_numbers = #tpu.dot_dimension_numbers<[1], [0], [0], [1], [0, 0, 1, 1], [], []>} : vector<2x128xf32>, vector<128x4xf32>, vector<2x4xf32> -> vector<2x4xf32>
    %423 = arith.addf %418, %422 : vector<2x4xf32>
    %424 = vector.extract_strided_slice %404 {offsets = [8, 0], sizes = [2, 128], strides = [1, 1]} : vector<32x128xf32> to vector<2x128xf32>
    %c4_308 = arith.constant 4 : index
    %c0_309 = arith.constant 0 : index
    %c0_310 = arith.constant 0 : index
    %425 = vector.load %arg12[%c4_308, %c0_309, %c0_310] : memref<16x128x4xf32, #tpu.memory_space<vmem>>, vector<1x128x4xf32>
    %426 = vector.shape_cast %425 : vector<1x128x4xf32> to vector<128x4xf32>
    %cst_311 = arith.constant dense<0.000000e+00> : vector<2x4xf32>
    %427 = tpu.matmul %424, %426, %cst_311 {dimension_numbers = #tpu.dot_dimension_numbers<[1], [0], [0], [1], [0, 0, 1, 1], [], []>} : vector<2x128xf32>, vector<128x4xf32>, vector<2x4xf32> -> vector<2x4xf32>
    %428 = arith.addf %423, %427 : vector<2x4xf32>
    %429 = vector.extract_strided_slice %404 {offsets = [10, 0], sizes = [2, 128], strides = [1, 1]} : vector<32x128xf32> to vector<2x128xf32>
    %c5_312 = arith.constant 5 : index
    %c0_313 = arith.constant 0 : index
    %c0_314 = arith.constant 0 : index
    %430 = vector.load %arg12[%c5_312, %c0_313, %c0_314] : memref<16x128x4xf32, #tpu.memory_space<vmem>>, vector<1x128x4xf32>
    %431 = vector.shape_cast %430 : vector<1x128x4xf32> to vector<128x4xf32>
    %cst_315 = arith.constant dense<0.000000e+00> : vector<2x4xf32>
    %432 = tpu.matmul %429, %431, %cst_315 {dimension_numbers = #tpu.dot_dimension_numbers<[1], [0], [0], [1], [0, 0, 1, 1], [], []>} : vector<2x128xf32>, vector<128x4xf32>, vector<2x4xf32> -> vector<2x4xf32>
    %433 = arith.addf %428, %432 : vector<2x4xf32>
    %434 = vector.extract_strided_slice %404 {offsets = [12, 0], sizes = [2, 128], strides = [1, 1]} : vector<32x128xf32> to vector<2x128xf32>
    %c6_316 = arith.constant 6 : index
    %c0_317 = arith.constant 0 : index
    %c0_318 = arith.constant 0 : index
    %435 = vector.load %arg12[%c6_316, %c0_317, %c0_318] : memref<16x128x4xf32, #tpu.memory_space<vmem>>, vector<1x128x4xf32>
    %436 = vector.shape_cast %435 : vector<1x128x4xf32> to vector<128x4xf32>
    %cst_319 = arith.constant dense<0.000000e+00> : vector<2x4xf32>
    %437 = tpu.matmul %434, %436, %cst_319 {dimension_numbers = #tpu.dot_dimension_numbers<[1], [0], [0], [1], [0, 0, 1, 1], [], []>} : vector<2x128xf32>, vector<128x4xf32>, vector<2x4xf32> -> vector<2x4xf32>
    %438 = arith.addf %433, %437 : vector<2x4xf32>
    %439 = vector.extract_strided_slice %404 {offsets = [14, 0], sizes = [2, 128], strides = [1, 1]} : vector<32x128xf32> to vector<2x128xf32>
    %c7_320 = arith.constant 7 : index
    %c0_321 = arith.constant 0 : index
    %c0_322 = arith.constant 0 : index
    %440 = vector.load %arg12[%c7_320, %c0_321, %c0_322] : memref<16x128x4xf32, #tpu.memory_space<vmem>>, vector<1x128x4xf32>
    %441 = vector.shape_cast %440 : vector<1x128x4xf32> to vector<128x4xf32>
    %cst_323 = arith.constant dense<0.000000e+00> : vector<2x4xf32>
    %442 = tpu.matmul %439, %441, %cst_323 {dimension_numbers = #tpu.dot_dimension_numbers<[1], [0], [0], [1], [0, 0, 1, 1], [], []>} : vector<2x128xf32>, vector<128x4xf32>, vector<2x4xf32> -> vector<2x4xf32>
    %443 = arith.addf %438, %442 : vector<2x4xf32>
    %444 = vector.extract_strided_slice %404 {offsets = [16, 0], sizes = [2, 128], strides = [1, 1]} : vector<32x128xf32> to vector<2x128xf32>
    %c8_324 = arith.constant 8 : index
    %c0_325 = arith.constant 0 : index
    %c0_326 = arith.constant 0 : index
    %445 = vector.load %arg12[%c8_324, %c0_325, %c0_326] : memref<16x128x4xf32, #tpu.memory_space<vmem>>, vector<1x128x4xf32>
    %446 = vector.shape_cast %445 : vector<1x128x4xf32> to vector<128x4xf32>
    %cst_327 = arith.constant dense<0.000000e+00> : vector<2x4xf32>
    %447 = tpu.matmul %444, %446, %cst_327 {dimension_numbers = #tpu.dot_dimension_numbers<[1], [0], [0], [1], [0, 0, 1, 1], [], []>} : vector<2x128xf32>, vector<128x4xf32>, vector<2x4xf32> -> vector<2x4xf32>
    %448 = arith.addf %443, %447 : vector<2x4xf32>
    %449 = vector.extract_strided_slice %404 {offsets = [18, 0], sizes = [2, 128], strides = [1, 1]} : vector<32x128xf32> to vector<2x128xf32>
    %c9 = arith.constant 9 : index
    %c0_328 = arith.constant 0 : index
    %c0_329 = arith.constant 0 : index
    %450 = vector.load %arg12[%c9, %c0_328, %c0_329] : memref<16x128x4xf32, #tpu.memory_space<vmem>>, vector<1x128x4xf32>
    %451 = vector.shape_cast %450 : vector<1x128x4xf32> to vector<128x4xf32>
    %cst_330 = arith.constant dense<0.000000e+00> : vector<2x4xf32>
    %452 = tpu.matmul %449, %451, %cst_330 {dimension_numbers = #tpu.dot_dimension_numbers<[1], [0], [0], [1], [0, 0, 1, 1], [], []>} : vector<2x128xf32>, vector<128x4xf32>, vector<2x4xf32> -> vector<2x4xf32>
    %453 = arith.addf %448, %452 : vector<2x4xf32>
    %454 = vector.extract_strided_slice %404 {offsets = [20, 0], sizes = [2, 128], strides = [1, 1]} : vector<32x128xf32> to vector<2x128xf32>
    %c10 = arith.constant 10 : index
    %c0_331 = arith.constant 0 : index
    %c0_332 = arith.constant 0 : index
    %455 = vector.load %arg12[%c10, %c0_331, %c0_332] : memref<16x128x4xf32, #tpu.memory_space<vmem>>, vector<1x128x4xf32>
    %456 = vector.shape_cast %455 : vector<1x128x4xf32> to vector<128x4xf32>
    %cst_333 = arith.constant dense<0.000000e+00> : vector<2x4xf32>
    %457 = tpu.matmul %454, %456, %cst_333 {dimension_numbers = #tpu.dot_dimension_numbers<[1], [0], [0], [1], [0, 0, 1, 1], [], []>} : vector<2x128xf32>, vector<128x4xf32>, vector<2x4xf32> -> vector<2x4xf32>
    %458 = arith.addf %453, %457 : vector<2x4xf32>
    %459 = vector.extract_strided_slice %404 {offsets = [22, 0], sizes = [2, 128], strides = [1, 1]} : vector<32x128xf32> to vector<2x128xf32>
    %c11 = arith.constant 11 : index
    %c0_334 = arith.constant 0 : index
    %c0_335 = arith.constant 0 : index
    %460 = vector.load %arg12[%c11, %c0_334, %c0_335] : memref<16x128x4xf32, #tpu.memory_space<vmem>>, vector<1x128x4xf32>
    %461 = vector.shape_cast %460 : vector<1x128x4xf32> to vector<128x4xf32>
    %cst_336 = arith.constant dense<0.000000e+00> : vector<2x4xf32>
    %462 = tpu.matmul %459, %461, %cst_336 {dimension_numbers = #tpu.dot_dimension_numbers<[1], [0], [0], [1], [0, 0, 1, 1], [], []>} : vector<2x128xf32>, vector<128x4xf32>, vector<2x4xf32> -> vector<2x4xf32>
    %463 = arith.addf %458, %462 : vector<2x4xf32>
    %464 = vector.extract_strided_slice %404 {offsets = [24, 0], sizes = [2, 128], strides = [1, 1]} : vector<32x128xf32> to vector<2x128xf32>
    %c12 = arith.constant 12 : index
    %c0_337 = arith.constant 0 : index
    %c0_338 = arith.constant 0 : index
    %465 = vector.load %arg12[%c12, %c0_337, %c0_338] : memref<16x128x4xf32, #tpu.memory_space<vmem>>, vector<1x128x4xf32>
    %466 = vector.shape_cast %465 : vector<1x128x4xf32> to vector<128x4xf32>
    %cst_339 = arith.constant dense<0.000000e+00> : vector<2x4xf32>
    %467 = tpu.matmul %464, %466, %cst_339 {dimension_numbers = #tpu.dot_dimension_numbers<[1], [0], [0], [1], [0, 0, 1, 1], [], []>} : vector<2x128xf32>, vector<128x4xf32>, vector<2x4xf32> -> vector<2x4xf32>
    %468 = arith.addf %463, %467 : vector<2x4xf32>
    %469 = vector.extract_strided_slice %404 {offsets = [26, 0], sizes = [2, 128], strides = [1, 1]} : vector<32x128xf32> to vector<2x128xf32>
    %c13 = arith.constant 13 : index
    %c0_340 = arith.constant 0 : index
    %c0_341 = arith.constant 0 : index
    %470 = vector.load %arg12[%c13, %c0_340, %c0_341] : memref<16x128x4xf32, #tpu.memory_space<vmem>>, vector<1x128x4xf32>
    %471 = vector.shape_cast %470 : vector<1x128x4xf32> to vector<128x4xf32>
    %cst_342 = arith.constant dense<0.000000e+00> : vector<2x4xf32>
    %472 = tpu.matmul %469, %471, %cst_342 {dimension_numbers = #tpu.dot_dimension_numbers<[1], [0], [0], [1], [0, 0, 1, 1], [], []>} : vector<2x128xf32>, vector<128x4xf32>, vector<2x4xf32> -> vector<2x4xf32>
    %473 = arith.addf %468, %472 : vector<2x4xf32>
    %474 = vector.extract_strided_slice %404 {offsets = [28, 0], sizes = [2, 128], strides = [1, 1]} : vector<32x128xf32> to vector<2x128xf32>
    %c14 = arith.constant 14 : index
    %c0_343 = arith.constant 0 : index
    %c0_344 = arith.constant 0 : index
    %475 = vector.load %arg12[%c14, %c0_343, %c0_344] : memref<16x128x4xf32, #tpu.memory_space<vmem>>, vector<1x128x4xf32>
    %476 = vector.shape_cast %475 : vector<1x128x4xf32> to vector<128x4xf32>
    %cst_345 = arith.constant dense<0.000000e+00> : vector<2x4xf32>
    %477 = tpu.matmul %474, %476, %cst_345 {dimension_numbers = #tpu.dot_dimension_numbers<[1], [0], [0], [1], [0, 0, 1, 1], [], []>} : vector<2x128xf32>, vector<128x4xf32>, vector<2x4xf32> -> vector<2x4xf32>
    %478 = arith.addf %473, %477 : vector<2x4xf32>
    %479 = vector.extract_strided_slice %404 {offsets = [30, 0], sizes = [2, 128], strides = [1, 1]} : vector<32x128xf32> to vector<2x128xf32>
    %c15 = arith.constant 15 : index
    %c0_346 = arith.constant 0 : index
    %c0_347 = arith.constant 0 : index
    %480 = vector.load %arg12[%c15, %c0_346, %c0_347] : memref<16x128x4xf32, #tpu.memory_space<vmem>>, vector<1x128x4xf32>
    %481 = vector.shape_cast %480 : vector<1x128x4xf32> to vector<128x4xf32>
    %cst_348 = arith.constant dense<0.000000e+00> : vector<2x4xf32>
    %482 = tpu.matmul %479, %481, %cst_348 {dimension_numbers = #tpu.dot_dimension_numbers<[1], [0], [0], [1], [0, 0, 1, 1], [], []>} : vector<2x128xf32>, vector<128x4xf32>, vector<2x4xf32> -> vector<2x4xf32>
    %483 = arith.addf %478, %482 : vector<2x4xf32>
    %c0_349 = arith.constant 0 : index
    %c0_350 = arith.constant 0 : index
    %484 = vector.load %arg13[%c0_349, %c0_350] : memref<1x4xf32, #tpu.memory_space<vmem>>, vector<1x4xf32>
    %485 = vector.broadcast %484 : vector<1x4xf32> to vector<2x4xf32>
    %486 = arith.addf %483, %485 : vector<2x4xf32>
    %487 = vector.extract_strided_slice %486 {offsets = [0, 0], sizes = [2, 2], strides = [1, 1]} : vector<2x4xf32> to vector<2x2xf32>
    %488 = vector.extract_strided_slice %486 {offsets = [0, 2], sizes = [2, 2], strides = [1, 1]} : vector<2x4xf32> to vector<2x2xf32>
    %489 = math.exp %488 : vector<2x2xf32>
    %c0_351 = arith.constant 0 : index
    %c0_352 = arith.constant 0 : index
    %490 = vector.load %arg14[%c0_351, %c0_352] : memref<2x2xf32, #tpu.memory_space<vmem>>, vector<2x2xf32>
    %491 = arith.mulf %489, %490 : vector<2x2xf32>
    %492 = arith.addf %487, %491 : vector<2x2xf32>
    %c0_353 = arith.constant 0 : index
    %c0_354 = arith.constant 0 : index
    %493 = vector.load %arg15[%c0_353, %c0_354] : memref<2x2xf32, #tpu.memory_space<vmem>>, vector<2x2xf32>
    tpu.vector_store %arg15[%c0_353, %c0_354], %492 {strides = array<i32>} : memref<2x2xf32, #tpu.memory_space<vmem>>, vector<2x2xf32>,
    %494 = arith.mulf %489, %489 : vector<2x2xf32>
    %495 = arith.mulf %487, %487 : vector<2x2xf32>
    %496 = arith.addf %494, %495 : vector<2x2xf32>
    %497 = arith.subf %496, %488 : vector<2x2xf32>
    %cst_355 = arith.constant 5.000000e-01 : f32
    %498 = vector.broadcast %cst_355 : f32 to vector<2x2xf32>
    %499 = arith.subf %497, %498 : vector<2x2xf32>
    %cst_356 = arith.constant dense<0.000000e+00> : vector<2xf32>
    %500 = vector.multi_reduction <add>, %499, %cst_356 [1] : vector<2x2xf32> to vector<2xf32>
    %501 = vector.shape_cast %500 : vector<2xf32> to vector<2x1xf32>
    %cst_357 = arith.constant dense<0.000000e+00> : vector<1xf32>
    %502 = vector.multi_reduction <add>, %501, %cst_357 [0] : vector<2x1xf32> to vector<1xf32>
    %503 = vector.shape_cast %502 : vector<1xf32> to vector<1x1xf32>
    %c0_358 = arith.constant 0 : index
    %c0_359 = arith.constant 0 : index
    %504 = vector.load %arg16[%c0_358, %c0_359] : memref<1x1xf32, #tpu.memory_space<vmem>>, vector<1x1xf32>
    tpu.vector_store %arg16[%c0_358, %c0_359], %503 {strides = array<i32>} : memref<1x1xf32, #tpu.memory_space<vmem>>, vector<1x1xf32>,
    return
  }
}

</mosaic_0001>

<bundles_post_ra>
// kernel: encoder_forward.1
= control target key start
LH: loop header
LB: loop body
LE: loop exit
PB: predicated region body
PF: predicated region fallthrough
CT: control target
= control target key end

     0   :  { %s21893_s0 = inlined_call_operand.vmem [shape: f32[400,16], index: 0, kind: input, shape index: {}]   ;;  %s21894_s1 = inlined_call_operand.vmem [shape: f32[16,32], index: 1, kind: input, shape index: {}]   ;;  %s21895_s2 = inlined_call_operand.vmem [shape: f32[1,32], index: 2, kind: input, shape index: {}]   ;;  %s21896_s3 = inlined_call_operand.vmem [shape: f32[1,32], index: 3, kind: input, shape index: {}]   ;;  %s21897_s4 = inlined_call_operand.vmem [shape: bf16[9,56,200], index: 4, kind: input, shape index: {}]   ;;  %s21898_s5 = inlined_call_operand.vmem [shape: f32[9,32,64], index: 5, kind: input, shape index: {}]   ;;  %s21899_s6 = inlined_call_operand.vmem [shape: f32[1,64], index: 6, kind: input, shape index: {}]   ;;  %s21900_s7 = inlined_call_operand.vmem [shape: f32[1,64], index: 7, kind: input, shape index: {}]   ;;  %s21901_s8 = inlined_call_operand.vmem [shape: bf16[9,32,112], index: 8, kind: input, shape index: {}]   ;;  %s21902_s9 = inlined_call_operand.vmem [shape: f32[9,64,128], index: 9, kind: input, shape index: {}]   ;;  %s21903_s10 = inlined_call_operand.vmem [shape: f32[1,128], index: 10, kind: input, shape index: {}]   ;;  %s21904_s11 = inlined_call_operand.vmem [shape: f32[1,128], index: 11, kind: input, shape index: {}]   ;;  %s21905_s12 = inlined_call_operand.vmem [shape: f32[16,128,4], index: 12, kind: input, shape index: {}]   ;;  %s21906_s13 = inlined_call_operand.vmem [shape: f32[1,4], index: 13, kind: input, shape index: {}]   ;;  %s21907_s14 = inlined_call_operand.vmem [shape: f32[2,2], index: 14, kind: input, shape index: {}]   ;;  %s21908_s15 = inlined_call_operand.hbm [shape: f32[2,2], index: 15, kind: output, shape index: {0}]   ;;  %s21909_s16 = inlined_call_operand.hbm [shape: f32[1,1], index: 16, kind: output, shape index: {1}]  }
   0x1   :  { %21943 = sst [smem:[#allocation30_spill]] %s21893_s0 }
   0x2   :  { %22 = vsyncpa [#allocation4], 0  ;;  %v104_v0 = vld [vmem:[%s21894_s1] sm:$0xff]  ;;  %v105_v1 = vld [vmem:[%s21894_s1 + $0x8] sm:$0xff]  ;;  %s21944_s27 = sld [smem:[#allocation30_spill]]  ;;  %vm106_vm0 = vcmask 130048  }
   0x3   :  { %v14438_v3 = vpack.c.bf16 %v105_v1, %v104_v0 }
   0x5   :  { %14439 = vmatprep.subr.bf16.mxu0 %v14438_v3 }
   0x6   :  { %14441 = vmatpush3.bf16.msra.mxu0 %v14438_v3 }
   0x8   :  { %v54_v2 = vld [vmem:[%s21944_s27] sm:$0xff]  ;;  %v55_v4 = vld [vmem:[%s21944_s27 + $0x8] sm:$0xff]  ;;  %v56_v5 = vld [vmem:[%s21944_s27 + $0x10] sm:$0xff] }
   0x9   :  { %12777 = vmatprep.mubr.msk.f32.mxu0 %vm106_vm0, %v54_v2  ;;  %v57_v6 = vld [vmem:[%s21944_s27 + $0x18] sm:$0xff]  ;;  %v58_v7 = vld [vmem:[%s21944_s27 + $0x20] sm:$0xff] }
   0xa   :  { %12778 = vmatmul.mubr.msk.f32.vlgmr.msra.gmra.mrb[0].mxu0 %vm106_vm0, %v55_v4 }
   0xb   :  { %12780 = vmatprep.mubr.msk.f32.mxu0 %vm106_vm0, %v56_v5 }
   0xc   :  { %23 = vsyncpa [#allocation6], 0  ;;  %v59_v8 = vld [vmem:[%s21944_s27 + $0x28] sm:$0xff]  ;;  %v60_v9 = vld [vmem:[%s21944_s27 + $0x30] sm:$0xff]  ;;  %s16573_s30 = smov 126  }
   0xd   :  { %v61_v10 = vld [vmem:[%s21944_s27 + $0x38] sm:$0xff]  ;;  %v62_v11 = vld [vmem:[%s21944_s27 + $0x40] sm:$0xff]  ;;  %v63_v12 = vld [vmem:[%s21944_s27 + $0x48] sm:$0xff] }
   0xe   :  { %12781 = vmatmul.mubr.msk.f32.gmra.mrb[2].mxu0 %vm106_vm0, %v57_v6  ;;  %v64_v13 = vld [vmem:[%s21944_s27 + $0x50] sm:$0xff]  ;;  %v65_v14 = vld [vmem:[%s21944_s27 + $0x58] sm:$0xff]  ;;  %v66_v15 = vld [vmem:[%s21944_s27 + $0x60] sm:$0xff] }
   0xf   :  { %12783 = vmatprep.mubr.msk.f32.mxu0 %vm106_vm0, %v58_v7  ;;  %v67_v16 = vld [vmem:[%s21944_s27 + $0x68] sm:$0xff]  ;;  %v68_v17 = vld [vmem:[%s21944_s27 + $0x70] sm:$0xff]  ;;  %v69_v18 = vld [vmem:[%s21944_s27 + $0x78] sm:$0xff] }
  0x10   :  { %v70_v19 = vld [vmem:[%s21944_s27 + $0x80] sm:$0xff]  ;;  %v71_v20 = vld [vmem:[%s21944_s27 + $0x88] sm:$0xff]  ;;  %v72_v21 = vld [vmem:[%s21944_s27 + $0x90] sm:$0xff] }
  0x11   :  { %v73_v22 = vld [vmem:[%s21944_s27 + $0x98] sm:$0xff]  ;;  %v74_v23 = vld [vmem:[%s21944_s27 + $0xa0] sm:$0xff]  ;;  %v75_v24 = vld [vmem:[%s21944_s27 + $0xa8] sm:$0xff] }
  0x12   :  { %12784 = vmatmul.mubr.msk.f32.gmra.mrb[4].mxu0 %vm106_vm0, %v59_v8  ;;  %v76_v25 = vld [vmem:[%s21944_s27 + $0xb0] sm:$0xff]  ;;  %v77_v26 = vld [vmem:[%s21944_s27 + $0xb8] sm:$0xff]  ;;  %v78_v27 = vld [vmem:[%s21944_s27 + $0xc0] sm:$0xff] }
  0x13   :  { %12786 = vmatprep.mubr.msk.f32.mxu0 %vm106_vm0, %v60_v9  ;;  %v79_v28 = vld [vmem:[%s21944_s27 + $0xc8] sm:$0xff]  ;;  %v80_v29 = vld [vmem:[%s21944_s27 + $0xd0] sm:$0xff]  ;;  %v81_v30 = vld [vmem:[%s21944_s27 + $0xd8] sm:$0xff] }
  0x14   :  { %v16782_v31 = vld [vmem:[%s21895_s2] ss:$0 sm:$0xff] }
  0x15   :  { %v16787_v33 = vld [vmem:[%s21896_s3] ss:$0 sm:$0xff] }
  0x16   :  { %12787 = vmatmul.mubr.msk.f32.gmra.mrb[6].mxu0 %vm106_vm0, %v61_v10 }
  0x17   :  { %12789 = vmatprep.mubr.msk.f32.mxu0 %vm106_vm0, %v62_v11 }
  0x1a   :  { %12790 = vmatmul.mubr.msk.f32.gmra.mrb[8].mxu0 %vm106_vm0, %v63_v12 }
  0x1b   :  { %12792 = vmatprep.mubr.msk.f32.mxu0 %vm106_vm0, %v64_v13 }
  0x1e   :  { %12793 = vmatmul.mubr.msk.f32.gmra.mrb[10].mxu0 %vm106_vm0, %v65_v14 }
  0x1f   :  { %12795 = vmatprep.mubr.msk.f32.mxu0 %vm106_vm0, %v66_v15 }
  0x22   :  { %12796 = vmatmul.mubr.msk.f32.gmra.mrb[12].mxu0 %vm106_vm0, %v67_v16 }
  0x23   :  { %12798 = vmatprep.mubr.msk.f32.mxu0 %vm106_vm0, %v68_v17 }
  0x26   :  { %12799 = vmatmul.mubr.msk.f32.gmra.mrb[14].mxu0 %vm106_vm0, %v69_v18 }
  0x27   :  { %12801 = vmatprep.mubr.msk.f32.mxu0 %vm106_vm0, %v70_v19 }
  0x2a   :  { %12802 = vmatmul.mubr.msk.f32.gmra.mrb[16].mxu0 %vm106_vm0, %v71_v20 }
  0x2b   :  { %12804 = vmatprep.mubr.msk.f32.mxu0 %vm106_vm0, %v72_v21 }
  0x2e   :  { %12805 = vmatmul.mubr.msk.f32.gmra.mrb[18].mxu0 %vm106_vm0, %v73_v22 }
  0x2f   :  { %12807 = vmatprep.mubr.msk.f32.mxu0 %vm106_vm0, %v74_v23 }
  0x32   :  { %12808 = vmatmul.mubr.msk.f32.gmra.mrb[20].mxu0 %vm106_vm0, %v75_v24 }
  0x33   :  { %12810 = vmatprep.mubr.msk.f32.mxu0 %vm106_vm0, %v76_v25 }
  0x36   :  { %12811 = vmatmul.mubr.msk.f32.gmra.mrb[22].mxu0 %vm106_vm0, %v77_v26 }
  0x37   :  { %12813 = vmatprep.mubr.msk.f32.mxu0 %vm106_vm0, %v78_v27 }
  0x3a   :  { %12814 = vmatmul.mubr.msk.f32.gmra.mrb[24].mxu0 %vm106_vm0, %v79_v28 }
  0x3b   :  { %12816 = vmatprep.mubr.msk.f32.mxu0 %vm106_vm0, %v80_v29 }
  0x3e   :  { %12817 = vmatmul.mubr.msk.f32.gmra.mrb[26].mxu0 %vm106_vm0, %v81_v30 }
  0xdd   :  { %v12779_v32 = vpop.f32.mrb[0].mxu0 }
  0xde   :  { %v580_v34 = vmul.f32 %v12779_v32, %v16782_v31  ;;  %v323_v35 = vpop.f32.mrb[1].mxu0 }
  0xdf   :  { %v579_v36 = vmul.f32 %v16782_v31, %v323_v35 }
  0xe0   :  { %v637_v37 = vadd.f32 %v16787_v33, %v580_v34 }
  0xe1   :  { %v636_v38 = vadd.f32 %v16787_v33, %v579_v36  ;;  %v12782_v39 = vpop.f32.mrb[2].mxu0 }
  0xe2   :  { %v16793_v40 = vmul.f32 0.70710677, %v637_v37  ;;  %v582_v41 = vmul.f32 %v12782_v39, %v16782_v31  ;;  %v333_v42 = vpop.f32.mrb[3].mxu0  ;;  %v16823_v16 = vmul.f32 0.5, %v637_v37 }
  0xe3   :  { %v16796_v43 = vmul.f32 0.70710677, %v636_v38  ;;  %v581_v44 = vmul.f32 %v16782_v31, %v333_v42  ;;  %v16831_v20 = vmul.f32 0.5, %v636_v38 }
  0xe4   :  { %v787_v45 = vand.u32 2147483647, %v16793_v40  ;;  %v639_v46 = vadd.f32 %v16787_v33, %v582_v41  ;;  %vm1787_vm1 = vcmp.lt.f32.partialorder %v16793_v40, 0.0 }
  0xe5   :  { %v786_v47 = vand.u32 2147483647, %v16796_v43  ;;  %v638_v48 = vadd.f32 %v16787_v33, %v581_v44  ;;  %v12785_v49 = vpop.f32.mrb[4].mxu0  ;;  %vm1786_vm2 = vcmp.lt.f32.partialorder %v16796_v43, 0.0 }
  0xe6   :  { %v837_v50 = vmul.f32 0.3275911, %v787_v45  ;;  %v1487_v51 = vmul.f32 %v787_v45, %v787_v45  ;;  %v16803_v52 = vmul.f32 0.70710677, %v639_v46  ;;  %v343_v53 = vpop.f32.mrb[5].mxu0  ;;  %v584_v4 = vmul.f32 %v12785_v49, %v16782_v31 }
  0xe7   :  { %v836_v54 = vmul.f32 0.3275911, %v786_v47  ;;  %v1486_v55 = vmul.f32 %v786_v47, %v786_v47  ;;  %v16805_v56 = vmul.f32 0.70710677, %v638_v48  ;;  %v583_v7 = vmul.f32 %v16782_v31, %v343_v53 }
  0xe8   :  { %v887_v57 = vadd.f32 1.0, %v837_v50  ;;  %v789_v58 = vand.u32 2147483647, %v16803_v52  ;;  %v1537_v62 = vsub.f32 0.0, %v1487_v51  ;;  %v16814_v10 = vadd.f32 %v16787_v33, %v584_v4 }
  0xe9   :  { %v886_v59 = vadd.f32 1.0, %v836_v54  ;;  %v788_v60 = vand.u32 2147483647, %v16805_v56  ;;  %v12788_v61 = vpop.f32.mrb[6].mxu0  ;;  %v1536_v1 = vsub.f32 0.0, %v1486_v55  ;;  %v16820_v14 = vadd.f32 %v16787_v33, %v583_v7 }
  0xea   :  { %16241 = vrcp.f32 %v887_v57  ;;  %v839_v63 = vmul.f32 0.3275911, %v789_v58  ;;  %v353_v0 = vpop.f32.mrb[7].mxu0  ;;  %v1489_v5 = vmul.f32 %v789_v58, %v789_v58  ;;  %v1588_v9 = vmul.f32 1.442695, %v1537_v62 }
  0xeb   :  { %16243 = vrcp.f32 %v886_v59  ;;  %v838_v2 = vmul.f32 0.3275911, %v788_v60  ;;  %v586_v11 = vmul.f32 %v12788_v61, %v16782_v31  ;;  %v1586_v13 = vmul.f32 1.442695, %v1536_v1 }
  0xec   :  { %v889_v3 = vadd.f32 1.0, %v839_v63  ;;  %v585_v15 = vmul.f32 %v16782_v31, %v353_v0  ;;  %v1488_v17 = vmul.f32 %v788_v60, %v788_v60  ;;  %v16826_v18 = vmul.f32 0.70710677, %v16814_v10 }
  0xed   :  { %v888_v6 = vadd.f32 1.0, %v838_v2  ;;  %v16811_v8 = vpop.f32.mrb[8].mxu0  ;;  %v16829_v19 = vadd.f32 %v16787_v33, %v586_v11  ;;  %v1539_v21 = vsub.f32 0.0, %v1489_v5  ;;  %v16834_v22 = vmul.f32 0.70710677, %v16820_v14 }
  0xee   :  { %16245 = vrcp.f32 %v889_v3  ;;  %v16817_v12 = vpop.f32.mrb[9].mxu0  ;;  %v16837_v23 = vadd.f32 %v16787_v33, %v585_v15  ;;  %v16841_v25 = vmul.f32 0.5, %v639_v46  ;;  %v791_v26 = vand.u32 2147483647, %v16826_v18 }
  0xef   :  { %16247 = vrcp.f32 %v888_v6  ;;  %v16845_v27 = vmul.f32 0.70710677, %v16829_v19  ;;  %v16847_v28 = vmul.f32 0.5, %v638_v48  ;;  %v790_v29 = vand.u32 2147483647, %v16834_v22 }
  0xf0   :  { %16249 = vpow2.f32 %v1588_v9  ;;  %v16851_v30 = vmul.f32 0.70710677, %v16837_v23  ;;  %v1538_v34 = vsub.f32 0.0, %v1488_v17  ;;  %v841_v35 = vmul.f32 0.3275911, %v791_v26 }
  0xf1   :  { %v16839_v24 = vpop.f32.mrb[10].mxu0  ;;  %16251 = vpow2.f32 %v1586_v13  ;;  %v1491_v36 = vmul.f32 %v791_v26, %v791_v26  ;;  %v793_v37 = vand.u32 2147483647, %v16845_v27  ;;  %v1592_v42 = vmul.f32 1.442695, %v1539_v21 }
  0xf2   :  { %v16856_v38 = vpop.f32.mrb[11].mxu0  ;;  %v840_v44 = vmul.f32 0.3275911, %v790_v29  ;;  %v1490_v45 = vmul.f32 %v790_v29, %v790_v29  ;;  %v891_v47 = vadd.f32 1.0, %v841_v35  ;;  %v792_v54 = vand.u32 2147483647, %v16851_v30 }
  0xf3   :  { %v1541_v48 = vsub.f32 0.0, %v1491_v36  ;;  %v843_v49 = vmul.f32 0.3275911, %v793_v37  ;;  %v1493_v53 = vmul.f32 %v793_v37, %v793_v37  ;;  %v1590_v1 = vmul.f32 1.442695, %v1538_v34 }
  0xf4   :  { %v16853_v32 = vpop.eup %16241  ;;  %v890_v51 = vadd.f32 1.0, %v840_v44  ;;  %16253 = vrcp.f32 %v891_v47  ;;  %v1540_v59 = vsub.f32 0.0, %v1490_v45  ;;  %v842_v13 = vmul.f32 0.3275911, %v792_v54 }
  0xf5   :  { %v16858_v39 = vpop.eup %16243  ;;  %v1037_v41 = vmul.f32 1.0614054, %v16853_v32  ;;  %v16863_v55 = vpop.f32.mrb[12].mxu0  ;;  %v893_v60 = vadd.f32 1.0, %v843_v49  ;;  %v1596_v5 = vmul.f32 1.442695, %v1541_v48  ;;  %v1492_v37 = vmul.f32 %v792_v54, %v792_v54 }
  0xf6   :  { %v1036_v46 = vmul.f32 1.0614054, %v16858_v39  ;;  %v16867_v61 = vpop.f32.mrb[13].mxu0  ;;  %16255 = vrcp.f32 %v890_v51  ;;  %v1543_v6 = vsub.f32 0.0, %v1493_v53  ;;  %v1594_v26 = vmul.f32 1.442695, %v1540_v59 }
  0xf7   :  { %v1087_v50 = vadd.f32 -1.4531521, %v1037_v41  ;;  %16257 = vpow2.f32 %v1592_v42  ;;  %v892_v36 = vadd.f32 1.0, %v842_v13  ;;  %v1542_v49 = vsub.f32 0.0, %v1492_v37 }
  0xf8   :  { %v16865_v57 = vpop.eup %16245  ;;  %v1086_v58 = vadd.f32 -1.4531521, %v1036_v46  ;;  %16259 = vrcp.f32 %v893_v60  ;;  %v1600_v42 = vmul.f32 1.442695, %v1543_v6  ;;  %v588_v53 = vmul.f32 %v16811_v8, %v16782_v31 }
  0xf9   :  { %v16869_v62 = vpop.eup %16247  ;;  %v1137_v63 = vmul.f32 %v16853_v32, %v1087_v50  ;;  %v1039_v0 = vmul.f32 1.0614054, %v16865_v57  ;;  %v16873_v2 = vpop.f32.mrb[14].mxu0  ;;  %16261 = vpow2.f32 %v1590_v1  ;;  %v1598_v59 = vmul.f32 1.442695, %v1542_v49 }
  0xfa   :  { %v1136_v3 = vmul.f32 %v16858_v39, %v1086_v58  ;;  %v1038_v4 = vmul.f32 1.0614054, %v16869_v62  ;;  %v16877_v7 = vpop.f32.mrb[15].mxu0  ;;  %v16250_v15 = vpop.eup %16249  ;;  %16263 = vrcp.f32 %v892_v36  ;;  %vm1789_vm3 = vcmp.lt.f32.partialorder %v16803_v52, 0.0 }
  0xfb   :  { %v1187_v9 = vadd.f32 1.4214138, %v1137_v63  ;;  %v1089_v11 = vadd.f32 -1.4531521, %v1039_v0  ;;  %v16252_v29 = vpop.eup %16251  ;;  %16265 = vpow2.f32 %v1596_v5  ;;  %vm1788_vm4 = vcmp.lt.f32.partialorder %v16805_v56, 0.0 }
  0xfc   :  { %v1186_v17 = vadd.f32 1.4214138, %v1136_v3  ;;  %v1088_v21 = vadd.f32 -1.4531521, %v1038_v4  ;;  %16267 = vpow2.f32 %v1594_v26  ;;  %v16898_v3 = vadd.f32 %v16787_v33, %v588_v53 }
  0xfd   :  { %v1237_v34 = vmul.f32 %v16853_v32, %v1187_v9  ;;  %v1139_v35 = vmul.f32 %v16865_v57, %v1089_v11  ;;  %v16881_v41 = vpop.f32.mrb[16].mxu0  ;;  %16269 = vpow2.f32 %v1600_v42  ;;  %v16907_v11 = vmul.f32 %v16782_v31, %v16817_v12 }
  0xfe   :  { %v1236_v44 = vmul.f32 %v16858_v39, %v1186_v17  ;;  %v1138_v45 = vmul.f32 %v16869_v62, %v1088_v21  ;;  %v16885_v46 = vpop.f32.mrb[17].mxu0  ;;  %v16893_v63 = vpop.eup %16253  ;;  %v16913_v26 = vmul.f32 %v16839_v24, %v16782_v31  ;;  %16271 = vpow2.f32 %v1598_v59 }
  0xff   :  { %v1287_v47 = vadd.f32 -0.28449672, %v1237_v34  ;;  %v1189_v48 = vadd.f32 1.4214138, %v1139_v35  ;;  %v1041_v9 = vmul.f32 1.0614054, %v16893_v63 }
 0x100   :  { %v1286_v50 = vadd.f32 -0.28449672, %v1236_v44  ;;  %v1188_v51 = vadd.f32 1.4214138, %v1138_v45  ;;  %v16902_v8 = vpop.eup %16255  ;;  %v16925_v24 = vmul.f32 0.70710677, %v16898_v3 }
 0x101   :  { %v1337_v54 = vmul.f32 %v16853_v32, %v1287_v47  ;;  %v1239_v58 = vmul.f32 %v16865_v57, %v1189_v48  ;;  %v16891_v60 = vpop.f32.mrb[18].mxu0  ;;  %v1040_v21 = vmul.f32 1.0614054, %v16902_v8  ;;  %v16258_v34 = vpop.eup %16257  ;;  %v1091_v37 = vadd.f32 -1.4531521, %v1041_v9 }
 0x102   :  { %v1336_v0 = vmul.f32 %v16858_v39, %v1286_v50  ;;  %v1238_v1 = vmul.f32 %v16869_v62, %v1188_v51  ;;  %v16900_v4 = vpop.f32.mrb[19].mxu0  ;;  %v16920_v44 = vpop.eup %16259  ;;  %v16934_v59 = vand.u32 2147483647, %v16925_v24  ;;  %vm1791_vm5 = vcmp.lt.f32.partialorder %v16826_v18, 0.0 }
 0x103   :  { %v1387_v5 = vadd.f32 0.2548296, %v1337_v54  ;;  %v1289_v6 = vadd.f32 -0.28449672, %v1239_v58  ;;  %v1090_v47 = vadd.f32 -1.4531521, %v1040_v21  ;;  %v1141_v50 = vmul.f32 %v16893_v63, %v1091_v37  ;;  %v16262_v53 = vpop.eup %16261 }
 0x104   :  { %v1386_v13 = vadd.f32 0.2548296, %v1336_v0  ;;  %v1288_v17 = vadd.f32 -0.28449672, %v1238_v1  ;;  %v1043_v51 = vmul.f32 1.0614054, %v16920_v44  ;;  %v16936_v0 = vpop.eup %16263 }
 0x105   :  { %v1437_v35 = vmul.f32 %v16853_v32, %v1387_v5  ;;  %v1339_v36 = vmul.f32 %v16865_v57, %v1289_v6  ;;  %v16918_v12 = vpop.f32.mrb[20].mxu0  ;;  %v1191_v5 = vadd.f32 1.4214138, %v1141_v50  ;;  %v845_v56 = vmul.f32 0.3275911, %v16934_v59 }
 0x106   :  { %v1436_v45 = vmul.f32 %v16858_v39, %v1386_v13  ;;  %v1338_v42 = vmul.f32 %v16869_v62, %v1288_v17  ;;  %v16927_v48 = vpop.f32.mrb[21].mxu0  ;;  %v1140_v39 = vmul.f32 %v16902_v8, %v1090_v47  ;;  %v1093_v6 = vadd.f32 -1.4531521, %v1043_v51 }
 0x107   :  { %21945 = vst [vmem:[#allocation9_spill] sm:$0xff] %v16927_v48  ;;  %v1687_v32 = vmul.f32 %v16250_v15, %v1437_v35  ;;  %v1389_v49 = vadd.f32 0.2548296, %v1339_v36  ;;  %v1042_v35 = vmul.f32 1.0614054, %v16936_v0  ;;  %vm1790_vm6 = vcmp.lt.f32.partialorder %v16834_v22, 0.0 }
 0x108   :  { %v1686_v54 = vmul.f32 %v16252_v29, %v1436_v45  ;;  %v1388_v58 = vadd.f32 0.2548296, %v1338_v42  ;;  %v16266_v29 = vpop.eup %16265  ;;  %v1190_v21 = vadd.f32 1.4214138, %v1140_v39  ;;  %v1143_v47 = vmul.f32 %v16920_v44, %v1093_v6 }
 0x109   :  { %v1737_v1 = vsub.f32 1.0, %v1687_v32  ;;  %v1439_v15 = vmul.f32 %v16865_v57, %v1389_v49  ;;  %v16940_v9 = vpop.f32.mrb[22].mxu0  ;;  %v16268_v37 = vpop.eup %16267  ;;  %v1241_v57 = vmul.f32 %v16893_v63, %v1191_v5  ;;  %vm1793_vm7 = vcmp.lt.f32.partialorder %v16845_v27, 0.0 }
 0x10a   :  { %21946 = vst [vmem:[#allocation10_spill] sm:$0xff] %v16940_v9  ;;  %v1736_v13 = vsub.f32 1.0, %v1686_v54  ;;  %v1438_v17 = vmul.f32 %v16869_v62, %v1388_v58  ;;  %v16944_v36 = vpop.f32.mrb[23].mxu0  ;;  %v16270_v32 = vpop.eup %16269  ;;  %v1240_v51 = vmul.f32 %v16902_v8, %v1190_v21  ;;  %v1092_v54 = vadd.f32 -1.4531521, %v1042_v35 }
 0x10b   :  { %21947 = vst [vmem:[#allocation11_spill] sm:$0xff] %v16944_v36  ;;  %v1837_v45 = vsub.f32 0.0, %v1737_v1  ;;  %v1689_v42 = vmul.f32 %v16258_v34, %v1439_v15  ;;  %v1291_v39 = vadd.f32 -0.28449672, %v1241_v57  ;;  %v1193_v9 = vadd.f32 1.4214138, %v1143_v47 }
 0x10c   :  { %v1836_v49 = vsub.f32 0.0, %v1736_v13  ;;  %v1688_v50 = vmul.f32 %v16262_v53, %v1438_v17  ;;  %v1290_v5 = vadd.f32 -0.28449672, %v1240_v51  ;;  %v16272_v53 = vpop.eup %16271  ;;  %v1142_v57 = vmul.f32 %v16936_v0, %v1092_v54 }
 0x10d   :  { %v1887_v62 = vsel %vm1787_vm1, %v1837_v45, %v1737_v1  ;;  %v1739_v58 = vsub.f32 1.0, %v1689_v42  ;;  %v16951_v36 = vpop.f32.mrb[24].mxu0  ;;  %v1341_v35 = vmul.f32 %v16893_v63, %v1291_v39  ;;  %v1243_v40 = vmul.f32 %v16920_v44, %v1193_v9 }
 0x10e   :  { %v1937_v48 = vadd.f32 1.0, %v1887_v62  ;;  %v1886_v34 = vsel %vm1786_vm2, %v1836_v49, %v1736_v13  ;;  %v1738_v15 = vsub.f32 1.0, %v1688_v50  ;;  %v16955_v6 = vpop.f32.mrb[25].mxu0  ;;  %v1340_v42 = vmul.f32 %v16902_v8, %v1290_v5 }
 0x10f   :  { %v1936_v17 = vadd.f32 1.0, %v1886_v34  ;;  %v1839_v21 = vsub.f32 0.0, %v1739_v58  ;;  %v1391_v47 = vadd.f32 0.2548296, %v1341_v35  ;;  %v1293_v49 = vadd.f32 -0.28449672, %v1243_v40 }
 0x110   :  { %v1987_v1 = vmul.f32 %v1937_v48, %v16823_v16  ;;  %v1838_v45 = vsub.f32 0.0, %v1738_v15  ;;  %v1390_v62 = vadd.f32 0.2548296, %v1340_v42  ;;  %v1192_v16 = vadd.f32 1.4214138, %v1142_v57 }
 0x111   :  { %v1986_v43 = vmul.f32 %v1936_v17, %v16831_v20  ;;  %v1889_v13 = vsel %vm1789_vm3, %v1839_v21, %v1739_v58  ;;  %v16965_v50 = vpop.f32.mrb[26].mxu0  ;;  %v1441_v20 = vmul.f32 %v16893_v63, %v1391_v47  ;;  %v1343_v52 = vmul.f32 %v16920_v44, %v1293_v49 }
 0x112   :  { %v1939_v51 = vadd.f32 1.0, %v1889_v13  ;;  %v1888_v9 = vsel %vm1788_vm4, %v1838_v45, %v1738_v15  ;;  %v16969_v48 = vpop.f32.mrb[27].mxu0  ;;  %v1440_v34 = vmul.f32 %v16902_v8, %v1390_v62  ;;  %v1242_v5 = vmul.f32 %v16936_v0, %v1192_v16 }
 0x113   :  { %v16971_v39 = vpack.c.bf16 %v1987_v1, %v1986_v43  ;;  %v1938_v54 = vadd.f32 1.0, %v1888_v9  ;;  %v1691_v17 = vmul.f32 %v16266_v29, %v1441_v20  ;;  %v1393_v21 = vadd.f32 0.2548296, %v1343_v52 }
 0x114   :  { %v1989_v58 = vmul.f32 %v1939_v51, %v16841_v25  ;;  %v16982_v35 = vadd.f32 %v16787_v33, %v16907_v11  ;;  %v1690_v40 = vmul.f32 %v16268_v37, %v1440_v34  ;;  %v1292_v63 = vadd.f32 -0.28449672, %v1242_v5 }
 0x115   :  { %21948 = vst [vmem:[#allocation12_spill] sm:$0xff] %v16971_v39  ;;  %v1988_v15 = vmul.f32 %v1938_v54, %v16847_v28  ;;  %v895_v1 = vadd.f32 1.0, %v845_v56  ;;  %v16986_v25 = vadd.f32 %v16787_v33, %v16913_v26  ;;  %v1741_v45 = vsub.f32 1.0, %v1691_v17 }
 0x116   :  { %v1443_v42 = vmul.f32 %v16920_v44, %v1393_v21  ;;  %v1740_v57 = vsub.f32 1.0, %v1690_v40  ;;  %v1342_v28 = vmul.f32 %v16936_v0, %v1292_v63  ;;  %v691_v29 = vmul.f32 0.5, %v16814_v10 }
 0x117   :  { %v16988_v8 = vpack.c.bf16 %v1989_v58, %v1988_v15  ;;  %16273 = vrcp.f32 %v895_v1  ;;  %v1841_v11 = vsub.f32 0.0, %v1741_v45  ;;  %v16994_v37 = vmul.f32 0.70710677, %v16982_v35 }
 0x118   :  { %v1693_v43 = vmul.f32 %v16270_v32, %v1443_v42  ;;  %v1840_v26 = vsub.f32 0.0, %v1740_v57  ;;  %v1392_v13 = vadd.f32 0.2548296, %v1342_v28  ;;  %v16998_v47 = vmul.f32 0.70710677, %v16986_v25 }
 0x119   :  { %21949 = vst [vmem:[#allocation13_spill] sm:$0xff] %v16988_v8  ;;  %v1891_v49 = vsel %vm1791_vm5, %v1841_v11, %v1741_v45  ;;  %v794_v51 = vand.u32 2147483647, %v16994_v37  ;;  %v690_v10 = vmul.f32 0.5, %v16820_v14  ;;  %v1495_v58 = vmul.f32 %v16934_v59, %v16934_v59 }
 0x11a   :  { %v1743_v44 = vsub.f32 1.0, %v1693_v43  ;;  %v1941_v9 = vadd.f32 1.0, %v1891_v49  ;;  %v1890_v32 = vsel %vm1790_vm6, %v1840_v26, %v1740_v57  ;;  %v1442_v62 = vmul.f32 %v16936_v0, %v1392_v13 }
 0x11b   :  { %v1940_v16 = vadd.f32 1.0, %v1890_v32  ;;  %v844_v54 = vmul.f32 0.3275911, %v794_v51  ;;  %v797_v22 = vand.u32 2147483647, %v16998_v47  ;;  %v589_v27 = vmul.f32 %v16782_v31, %v16856_v38 }
 0x11c   :  { %v1843_v18 = vsub.f32 0.0, %v1743_v44  ;;  %v1991_v20 = vmul.f32 %v1941_v9, %v691_v29  ;;  %v1692_v52 = vmul.f32 %v16272_v53, %v1442_v62  ;;  %v693_v53 = vmul.f32 0.5, %v16829_v19 }
 0x11d   :  { %v1990_v34 = vmul.f32 %v1940_v16, %v690_v10  ;;  %v894_v56 = vadd.f32 1.0, %v844_v54  ;;  %v847_v14 = vmul.f32 0.3275911, %v797_v22  ;;  %v1545_v59 = vsub.f32 0.0, %v1495_v58 }
 0x11e   :  { %v1893_v5 = vsel %vm1793_vm7, %v1843_v18, %v1743_v44  ;;  %v1742_v15 = vsub.f32 1.0, %v1692_v52  ;;  %vm1792_vm8 = vcmp.lt.f32.partialorder %v16851_v30, 0.0  ;;  %v17018_v45 = vadd.f32 %v16787_v33, %v589_v27 }
 0x11f   :  { %v17008_v17 = vpack.c.bf16 %v1991_v20, %v1990_v34  ;;  %v1943_v0 = vadd.f32 1.0, %v1893_v5  ;;  %16275 = vrcp.f32 %v894_v56  ;;  %v897_v63 = vadd.f32 1.0, %v847_v14 }
 0x120   :  { %v1842_v40 = vsub.f32 0.0, %v1742_v15  ;;  %v592_v42 = vmul.f32 %v16863_v55, %v16782_v31  ;;  %v692_v57 = vmul.f32 0.5, %v16837_v23  ;;  %v591_v19 = vmul.f32 %v16782_v31, %v16867_v61 }
 0x121   :  { %21950 = vst [vmem:[#allocation14_spill] sm:$0xff] %v17008_v17  ;;  %v17012_v21 = vpop.eup %16273  ;;  %16277 = vrcp.f32 %v897_v63  ;;  %v1993_v28 = vmul.f32 %v1943_v0, %v693_v53  ;;  %v17026_v30 = vmul.f32 0.70710677, %v17018_v45  ;;  %v1604_v43 = vmul.f32 1.442695, %v1545_v59 }
 0x122   :  { %v1045_v1 = vmul.f32 1.0614054, %v17012_v21  ;;  %v1892_v38 = vsel %vm1792_vm8, %v1842_v40, %v1742_v15  ;;  %v1494_v26 = vmul.f32 %v794_v51, %v794_v51  ;;  %v649_v13 = vadd.f32 %v16787_v33, %v592_v42 }
 0x123   :  { %v1942_v29 = vadd.f32 1.0, %v1892_v38  ;;  %v17030_v49 = vadd.f32 %v16787_v33, %v591_v19  ;;  %v1497_v44 = vmul.f32 %v797_v22, %v797_v22  ;;  %v796_v9 = vand.u32 2147483647, %v17026_v30 }
 0x124   :  { %v1095_v11 = vadd.f32 -1.4531521, %v1045_v1  ;;  %v17035_v61 = vmul.f32 0.5, %v16898_v3  ;;  %v17037_v10 = vmul.f32 0.70710677, %v649_v13  ;;  %16279 = vpow2.f32 %v1604_v43 }
 0x125   :  { %v1992_v55 = vmul.f32 %v1942_v29, %v692_v57  ;;  %v17040_v32 = vmul.f32 0.70710677, %v17030_v49  ;;  %v846_v16 = vmul.f32 0.3275911, %v796_v9  ;;  %v1496_v18 = vmul.f32 %v796_v9, %v796_v9 }
 0x126   :  { %v1145_v23 = vmul.f32 %v17012_v21, %v1095_v11  ;;  %v799_v54 = vand.u32 2147483647, %v17037_v10  ;;  %v594_v52 = vmul.f32 %v16873_v2, %v16782_v31  ;;  %v1544_v22 = vsub.f32 0.0, %v1494_v26 }
 0x127   :  { %v17042_v51 = vpack.c.bf16 %v1993_v28, %v1992_v55  ;;  %v798_v20 = vand.u32 2147483647, %v17040_v32  ;;  %v1547_v34 = vsub.f32 0.0, %v1497_v44  ;;  %v896_v5 = vadd.f32 1.0, %v846_v16 }
 0x128   :  { %v1195_v62 = vadd.f32 1.4214138, %v1145_v23  ;;  %v849_v15 = vmul.f32 0.3275911, %v799_v54  ;;  %v17053_v27 = vmul.f32 0.5, %v16982_v35  ;;  %v1546_v53 = vsub.f32 0.0, %v1496_v18 }
 0x129   :  { %v17048_v3 = vpop.eup %16275  ;;  %v848_v14 = vmul.f32 0.3275911, %v798_v20  ;;  %16281 = vrcp.f32 %v896_v5  ;;  %v17058_v1 = vadd.f32 %v16787_v33, %v594_v52  ;;  %v1602_v57 = vmul.f32 1.442695, %v1544_v22 }
 0x12a   :  { %v1245_v58 = vmul.f32 %v17012_v21, %v1195_v62  ;;  %v1044_v56 = vmul.f32 1.0614054, %v17048_v3  ;;  %v899_v59 = vadd.f32 1.0, %v849_v15  ;;  %v17062_v38 = vmul.f32 0.5, %v16986_v25 }
 0x12b   :  { %v17055_v40 = vpop.eup %16277  ;;  %v898_v63 = vadd.f32 1.0, %v848_v14  ;;  %v1608_v28 = vmul.f32 1.442695, %v1547_v34  ;;  %v1499_v29 = vmul.f32 %v799_v54, %v799_v54  ;;  %v1606_v26 = vmul.f32 1.442695, %v1546_v53 }
 0x12c   :  { %v1295_v0 = vadd.f32 -0.28449672, %v1245_v58  ;;  %v1094_v2 = vadd.f32 -1.4531521, %v1044_v56  ;;  %v1047_v19 = vmul.f32 1.0614054, %v17055_v40  ;;  %16283 = vrcp.f32 %v899_v59 }
 0x12d   :  { %16285 = vrcp.f32 %v898_v63  ;;  %v1498_v23 = vmul.f32 %v798_v20, %v798_v20  ;;  %v17067_v44 = vmul.f32 0.70710677, %v17058_v1  ;;  %v593_v25 = vmul.f32 %v16782_v31, %v16877_v7 }
 0x12e   :  { %v1345_v42 = vmul.f32 %v17012_v21, %v1295_v0  ;;  %v1144_v35 = vmul.f32 %v17048_v3, %v1094_v2  ;;  %v1097_v43 = vadd.f32 -1.4531521, %v1047_v19  ;;  %vm1795_vm9 = vcmp.lt.f32.partialorder %v16925_v24, 0.0  ;;  %v16280_v18 = vpop.eup %16279 }
 0x12f   :  { %16287 = vpow2.f32 %v1602_v57  ;;  %v17075_v16 = vmul.f32 0.5, %v17018_v45  ;;  %v1549_v20 = vsub.f32 0.0, %v1499_v29  ;;  %v801_v52 = vand.u32 2147483647, %v17067_v44 }
 0x130   :  { %v1395_v11 = vadd.f32 0.2548296, %v1345_v42  ;;  %v1194_v55 = vadd.f32 1.4214138, %v1144_v35  ;;  %v1147_v62 = vmul.f32 %v17055_v40, %v1097_v43  ;;  %v17080_v58 = vadd.f32 %v16787_v33, %v593_v25 }
 0x131   :  { %16289 = vpow2.f32 %v1608_v28  ;;  %v1548_v5 = vsub.f32 0.0, %v1498_v23  ;;  %v851_v56 = vmul.f32 0.3275911, %v801_v52  ;;  %v596_v53 = vmul.f32 %v16881_v41, %v16782_v31 }
 0x132   :  { %v1445_v9 = vmul.f32 %v17012_v21, %v1395_v11  ;;  %v1244_v54 = vmul.f32 %v17048_v3, %v1194_v55  ;;  %v1197_v22 = vadd.f32 1.4214138, %v1147_v62  ;;  %v17082_v21 = vmul.f32 0.5, %v649_v13 }
 0x133   :  { %16291 = vpow2.f32 %v1606_v26  ;;  %v17084_v45 = vpop.eup %16281  ;;  %v17088_v0 = vmul.f32 0.70710677, %v17080_v58  ;;  %v1612_v59 = vmul.f32 1.442695, %v1549_v20  ;;  %v901_v63 = vadd.f32 1.0, %v851_v56 }
 0x134   :  { %v1695_v7 = vmul.f32 %v16280_v18, %v1445_v9  ;;  %v1294_v34 = vadd.f32 -0.28449672, %v1244_v54  ;;  %v1247_v14 = vmul.f32 %v17055_v40, %v1197_v22  ;;  %v1046_v13 = vmul.f32 1.0614054, %v17084_v45 }
 0x135   :  { %v1501_v19 = vmul.f32 %v801_v52, %v801_v52  ;;  %v800_v35 = vand.u32 2147483647, %v17088_v0  ;;  %v1610_v43 = vmul.f32 1.442695, %v1548_v5  ;;  %16293 = vrcp.f32 %v901_v63 }
 0x136   :  { %v1745_v15 = vsub.f32 1.0, %v1695_v7  ;;  %v1344_v2 = vmul.f32 %v17048_v3, %v1294_v34  ;;  %v1297_v57 = vadd.f32 -0.28449672, %v1247_v14  ;;  %v17095_v28 = vpop.eup %16283  ;;  %v1096_v11 = vadd.f32 -1.4531521, %v1046_v13 }
 0x137   :  { %v17097_v26 = vpop.eup %16285  ;;  %vm1794_vm10 = vcmp.lt.f32.partialorder %v16994_v37, 0.0  ;;  %v1049_v55 = vmul.f32 1.0614054, %v17095_v28  ;;  %v850_v23 = vmul.f32 0.3275911, %v800_v35  ;;  %v17103_v25 = vadd.f32 %v16787_v33, %v596_v53 }
 0x138   :  { %v1845_v42 = vsub.f32 0.0, %v1745_v15  ;;  %v1394_v29 = vadd.f32 0.2548296, %v1344_v2  ;;  %v1347_v41 = vmul.f32 %v17055_v40, %v1297_v57  ;;  %v1146_v18 = vmul.f32 %v17084_v45, %v1096_v11 }
 0x139   :  { %v1048_v54 = vmul.f32 1.0614054, %v17097_v26  ;;  %v16288_v20 = vpop.eup %16287  ;;  %v1099_v7 = vadd.f32 -1.4531521, %v1049_v55  ;;  %v1551_v22 = vsub.f32 0.0, %v1501_v19  ;;  %v900_v34 = vadd.f32 1.0, %v850_v23 }
 0x13a   :  { %v1895_v9 = vsel %vm1795_vm9, %v1845_v42, %v1745_v15  ;;  %v1444_v62 = vmul.f32 %v17048_v3, %v1394_v29  ;;  %v1397_v52 = vadd.f32 0.2548296, %v1347_v41  ;;  %v1196_v56 = vadd.f32 1.4214138, %v1146_v18 }
 0x13b   :  { %16295 = vpow2.f32 %v1612_v59  ;;  %v1098_v14 = vadd.f32 -1.4531521, %v1048_v54  ;;  %v16290_v53 = vpop.eup %16289  ;;  %v1945_v2 = vadd.f32 1.0, %v1895_v9  ;;  %v1149_v15 = vmul.f32 %v17095_v28, %v1099_v7 }
 0x13c   :  { %v1694_v5 = vmul.f32 %v16288_v20, %v1444_v62  ;;  %v1447_v24 = vmul.f32 %v17055_v40, %v1397_v52  ;;  %16297 = vrcp.f32 %v900_v34  ;;  %v1246_v63 = vmul.f32 %v17084_v45, %v1196_v56 }
 0x13d   :  { %v16292_v3 = vpop.eup %16291  ;;  %v1148_v42 = vmul.f32 %v17097_v26, %v1098_v14  ;;  %v17115_v57 = vmul.f32 0.70710677, %v17103_v25  ;;  %vm1797_vm11 = vcmp.lt.f32.partialorder %v16998_v47, 0.0  ;;  %v1199_v59 = vadd.f32 1.4214138, %v1149_v15 }
 0x13e   :  { %v1744_v13 = vsub.f32 1.0, %v1694_v5  ;;  %v1697_v19 = vmul.f32 %v16290_v53, %v1447_v24  ;;  %16299 = vpow2.f32 %v1610_v43  ;;  %v1616_v29 = vmul.f32 1.442695, %v1551_v22 }
 0x13f   :  { %v1296_v40 = vadd.f32 -0.28449672, %v1246_v63  ;;  %v1198_v41 = vadd.f32 1.4214138, %v1148_v42  ;;  %v595_v55 = vmul.f32 %v16782_v31, %v16885_v46  ;;  %v1249_v9 = vmul.f32 %v17095_v28, %v1199_v59  ;;  %v17122_v54 = vpop.eup %16293 }
 0x140   :  { %v1844_v11 = vsub.f32 0.0, %v1744_v13  ;;  %v1747_v23 = vsub.f32 1.0, %v1697_v19  ;;  %v1500_v62 = vmul.f32 %v800_v35, %v800_v35  ;;  %v803_v18 = vand.u32 2147483647, %v17115_v57 }
 0x141   :  { %v1995_v20 = vmul.f32 %v1945_v2, %v17035_v61  ;;  %v1346_v52 = vmul.f32 %v17084_v45, %v1296_v40  ;;  %v1248_v7 = vmul.f32 %v17097_v26, %v1198_v41  ;;  %v1299_v46 = vadd.f32 -0.28449672, %v1249_v9 }
 0x142   :  { %v1894_v43 = vsel %vm1794_vm10, %v1844_v11, %v1744_v13  ;;  %v1847_v34 = vsub.f32 0.0, %v1747_v23  ;;  %v1051_v5 = vmul.f32 1.0614054, %v17122_v54  ;;  %v853_v14 = vmul.f32 0.3275911, %v803_v18 }
 0x143   :  { %v1944_v22 = vadd.f32 1.0, %v1894_v43  ;;  %v1396_v56 = vadd.f32 0.2548296, %v1346_v52  ;;  %v1298_v35 = vadd.f32 -0.28449672, %v1248_v7  ;;  %vm1796_vm12 = vcmp.lt.f32.partialorder %v17026_v30, 0.0 }
 0x144   :  { %v1349_v61 = vmul.f32 %v17095_v28, %v1299_v46  ;;  %v1101_v37 = vadd.f32 -1.4531521, %v1051_v5  ;;  %v1550_v2 = vsub.f32 0.0, %v1500_v62  ;;  %v903_v63 = vadd.f32 1.0, %v853_v14 }
 0x145   :  { %v1994_v53 = vmul.f32 %v1944_v22, %v17053_v27  ;;  %v16296_v24 = vpop.eup %16295  ;;  %v1446_v15 = vmul.f32 %v17084_v45, %v1396_v56  ;;  %v1348_v13 = vmul.f32 %v17097_v26, %v1298_v35  ;;  %v17136_v42 = vadd.f32 %v16787_v33, %v595_v55 }
 0x146   :  { %v17138_v19 = vpop.eup %16297  ;;  %v1399_v27 = vadd.f32 0.2548296, %v1349_v61  ;;  %v1151_v11 = vmul.f32 %v17122_v54, %v1101_v37  ;;  %16301 = vpow2.f32 %v1616_v29  ;;  %v1897_v40 = vsel %vm1797_vm11, %v1847_v34, %v1747_v23 }
 0x147   :  { %v17140_v59 = vpack.c.bf16 %v1995_v20, %v1994_v53  ;;  %v1696_v41 = vmul.f32 %v16292_v3, %v1446_v15  ;;  %vm1799_vm13 = vcmp.lt.f32.partialorder %v17037_v10, 0.0  ;;  %v1398_v45 = vadd.f32 0.2548296, %v1348_v13 }
 0x148   :  { %v1050_v9 = vmul.f32 1.0614054, %v17138_v19  ;;  %v16300_v62 = vpop.eup %16299  ;;  %v1449_v55 = vmul.f32 %v17095_v28, %v1399_v27  ;;  %vm1798_vm14 = vcmp.lt.f32.partialorder %v17040_v32, 0.0  ;;  %v1201_v20 = vadd.f32 1.4214138, %v1151_v11 }
 0x149   :  { %v1614_v43 = vmul.f32 1.442695, %v1550_v2  ;;  %16303 = vrcp.f32 %v903_v63  ;;  %v1746_v52 = vsub.f32 1.0, %v1696_v41  ;;  %v1448_v29 = vmul.f32 %v17097_v26, %v1398_v45 }
 0x14a   :  { %v1100_v7 = vadd.f32 -1.4531521, %v1050_v9  ;;  %v17151_v47 = vmul.f32 0.70710677, %v17136_v42  ;;  %v1947_v3 = vadd.f32 1.0, %v1897_v40  ;;  %v1699_v23 = vmul.f32 %v16296_v24, %v1449_v55 }
 0x14b   :  { %v1251_v22 = vmul.f32 %v17122_v54, %v1201_v20  ;;  %v1503_v34 = vmul.f32 %v803_v18, %v803_v18  ;;  %v1846_v46 = vsub.f32 0.0, %v1746_v52  ;;  %v1698_v5 = vmul.f32 %v16300_v62, %v1448_v29 }
 0x14c   :  { %v1150_v28 = vmul.f32 %v17138_v19, %v1100_v7  ;;  %v802_v56 = vand.u32 2147483647, %v17151_v47  ;;  %v1749_v35 = vsub.f32 1.0, %v1699_v23  ;;  %16305 = vpow2.f32 %v1614_v43 }
 0x14d   :  { %v1301_v14 = vadd.f32 -0.28449672, %v1251_v22  ;;  %v598_v26 = vmul.f32 %v16891_v60, %v16782_v31  ;;  %v1896_v53 = vsel %vm1796_vm12, %v1846_v46, %v1746_v52  ;;  %v1748_v61 = vsub.f32 1.0, %v1698_v5 }
 0x14e   :  { %v1200_v37 = vadd.f32 1.4214138, %v1150_v28  ;;  %v852_v2 = vmul.f32 0.3275911, %v802_v56  ;;  %v1997_v18 = vmul.f32 %v1947_v3, %v17062_v38  ;;  %v1946_v24 = vadd.f32 1.0, %v1896_v53 }
 0x14f   :  { %v1849_v15 = vsub.f32 0.0, %v1749_v35  ;;  %v1351_v13 = vmul.f32 %v17122_v54, %v1301_v14  ;;  %v1848_v63 = vsub.f32 0.0, %v1748_v61  ;;  %v1553_v11 = vsub.f32 0.0, %v1503_v34  ;;  %v17200_v53 = vld [vmem:[%s21896_s3] ss:$0 sm:$0xff] }
 0x150   :  { %v1250_v27 = vmul.f32 %v17138_v19, %v1200_v37  ;;  %v902_v40 = vadd.f32 1.0, %v852_v2  ;;  %v16302_v41 = vpop.eup %16301  ;;  %v1996_v31 = vmul.f32 %v1946_v24, %v17075_v16  ;;  %v17167_v45 = vadd.f32 %v16787_v33, %v598_v26 }
 0x151   :  { %v1899_v60 = vsel %vm1799_vm13, %v1849_v15, %v1749_v35  ;;  %v1401_v30 = vadd.f32 0.2548296, %v1351_v13  ;;  %v1898_v9 = vsel %vm1798_vm14, %v1848_v63, %v1748_v61  ;;  %v698_v43 = vmul.f32 0.5, %v17030_v49  ;;  %v17186_v49 = vld [vmem:[%s21895_s2] ss:$0 sm:$0xff] }
 0x152   :  { %v1949_v38 = vadd.f32 1.0, %v1899_v60  ;;  %v1300_v62 = vadd.f32 -0.28449672, %v1250_v27  ;;  %16307 = vrcp.f32 %v902_v40  ;;  %v17173_v20 = vpack.c.bf16 %v1997_v18, %v1996_v31  ;;  %v21951_v40 = vld [vmem:[#allocation9_spill] sm:$0xff] }
 0x153   :  { %v17171_v55 = vpop.eup %16303  ;;  %v1948_v16 = vadd.f32 1.0, %v1898_v9  ;;  %v1451_v10 = vmul.f32 %v17122_v54, %v1401_v30  ;;  %v1620_v3 = vmul.f32 1.442695, %v1553_v11  ;;  %v17181_v23 = vmul.f32 0.70710677, %v17167_v45 }
 0x154   :  { %v1999_v52 = vmul.f32 %v1949_v38, %v17082_v21  ;;  %v1350_v33 = vmul.f32 %v17138_v19, %v1300_v62  ;;  %v1053_v29 = vmul.f32 1.0614054, %v17171_v55  ;;  %v1502_v46 = vmul.f32 %v802_v56, %v802_v56 }
 0x155   :  { %v1998_v7 = vmul.f32 %v1948_v16, %v698_v43  ;;  %v1701_v32 = vmul.f32 %v16302_v41, %v1451_v10  ;;  %v597_v21 = vmul.f32 %v17186_v49, %v16900_v4  ;;  %v805_v35 = vand.u32 2147483647, %v17181_v23 }
 0x156   :  { %v1400_v22 = vadd.f32 0.2548296, %v1350_v33  ;;  %v1103_v34 = vadd.f32 -1.4531521, %v1053_v29  ;;  %v16306_v54 = vpop.eup %16305  ;;  %v600_v14 = vmul.f32 %v17186_v49, %v16918_v12  ;;  %v701_v61 = vmul.f32 0.5, %v17058_v1 }
 0x157   :  { %v17190_v5 = vpack.c.bf16 %v1999_v52, %v1998_v7  ;;  %v1751_v28 = vsub.f32 1.0, %v1701_v32  ;;  %v17203_v4 = vadd.f32 %v17200_v53, %v597_v21  ;;  %vm1801_vm15 = vcmp.lt.f32.partialorder %v17067_v44, 0.0 }
 0x158   :  { %v1450_v26 = vmul.f32 %v17138_v19, %v1400_v22  ;;  %v1153_v56 = vmul.f32 %v17171_v55, %v1103_v34  ;;  %v855_v2 = vmul.f32 0.3275911, %v805_v35  ;;  %16309 = vpow2.f32 %v1620_v3 }
 0x159   :  { %v1851_v37 = vsub.f32 0.0, %v1751_v28  ;;  %v17208_v19 = vmul.f32 0.70710677, %v17203_v4  ;;  %v1552_v15 = vsub.f32 0.0, %v1502_v46  ;;  %v17211_v63 = vadd.f32 %v17200_v53, %v600_v14 }
 0x15a   :  { %v1700_v18 = vmul.f32 %v16306_v54, %v1450_v26  ;;  %v1203_v12 = vadd.f32 1.4214138, %v1153_v56  ;;  %v905_v13 = vadd.f32 1.0, %v855_v2  ;;  %v599_v41 = vmul.f32 %v17186_v49, %v21951_v40  ;;  %v21952_v56 = vld [vmem:[#allocation10_spill] sm:$0xff] }
 0x15b   :  { %v1901_v24 = vsel %vm1801_vm15, %v1851_v37, %v1751_v28  ;;  %v804_v44 = vand.u32 2147483647, %v17208_v19  ;;  %v700_v60 = vmul.f32 0.5, %v17080_v58  ;;  %vm1800_vm1 = vcmp.lt.f32.partialorder %v17088_v0, 0.0 }
 0x15c   :  { %v17213_v27 = vpop.eup %16307  ;;  %v1750_v11 = vsub.f32 1.0, %v1700_v18  ;;  %v1253_v1 = vmul.f32 %v17171_v55, %v1203_v12  ;;  %v1951_v31 = vadd.f32 1.0, %v1901_v24  ;;  %16311 = vrcp.f32 %v905_v13 }
 0x15d   :  { %v1052_v30 = vmul.f32 1.0614054, %v17213_v27  ;;  %v854_v62 = vmul.f32 0.3275911, %v804_v44  ;;  %v1618_v16 = vmul.f32 1.442695, %v1552_v15  ;;  %v17227_v7 = vadd.f32 %v17200_v53, %v599_v41 }
 0x15e   :  { %v1850_v38 = vsub.f32 0.0, %v1750_v11  ;;  %v1303_v9 = vadd.f32 -0.28449672, %v1253_v1  ;;  %v17223_v10 = vmul.f32 0.70710677, %v17211_v63  ;;  %v2001_v58 = vmul.f32 %v1951_v31, %v701_v61 }
 0x15f   :  { %v1102_v43 = vadd.f32 -1.4531521, %v1052_v30  ;;  %v904_v29 = vadd.f32 1.0, %v854_v62  ;;  %v1505_v34 = vmul.f32 %v805_v35, %v805_v35  ;;  %v17233_v26 = vmul.f32 0.70710677, %v17227_v7  ;;  %v82_v35 = vld [vmem:[%s21944_s27 + $0xe0] sm:$0xff] }
 0x160   :  { %v1900_v52 = vsel %vm1800_vm1, %v1850_v38, %v1750_v11  ;;  %v1353_v33 = vmul.f32 %v17171_v55, %v1303_v9  ;;  %v807_v0 = vand.u32 2147483647, %v17223_v10  ;;  %v602_v61 = vmul.f32 %v17186_v49, %v21952_v56  ;;  %12819 = vmatprep.mubr.msk.f32.mxu0 %vm106_vm0, %v82_v35  ;;  %v21953_v30 = vld [vmem:[#allocation11_spill] sm:$0xff] }
 0x161   :  { %v1950_v32 = vadd.f32 1.0, %v1900_v52  ;;  %v1152_v3 = vmul.f32 %v17213_v27, %v1102_v43  ;;  %16313 = vrcp.f32 %v904_v29  ;;  %v1555_v24 = vsub.f32 0.0, %v1505_v34  ;;  %v83_v38 = vld [vmem:[%s21944_s27 + $0xe8] sm:$0xff]  ;;  %v84_v43 = vld [vmem:[%s21944_s27 + $0xf0] sm:$0xff]  ;;  %v86_v56 = vld [vmem:[%s21944_s27 + $0x100] sm:$0xff] }
 0x162   :  { %v1403_v22 = vadd.f32 0.2548296, %v1353_v33  ;;  %v857_v54 = vmul.f32 0.3275911, %v807_v0  ;;  %v16310_v28 = vpop.eup %16309  ;;  %16315 = vpow2.f32 %v1618_v16  ;;  %v1504_v15 = vmul.f32 %v804_v44, %v804_v44  ;;  %12820 = vmatmul.mubr.msk.f32.gmra.mrb[28].mxu0 %vm106_vm0, %v83_v38 }
 0x163   :  { %v2000_v46 = vmul.f32 %v1950_v32, %v700_v60  ;;  %v1202_v21 = vadd.f32 1.4214138, %v1152_v3  ;;  %v17248_v11 = vmul.f32 0.5, %v17103_v25  ;;  %v17251_v40 = vadd.f32 %v17200_v53, %v602_v61  ;;  %12822 = vmatprep.mubr.msk.f32.mxu0 %vm106_vm0, %v84_v43 }
 0x164   :  { %v1453_v14 = vmul.f32 %v17171_v55, %v1403_v22  ;;  %v907_v18 = vadd.f32 1.0, %v857_v54  ;;  %v806_v55 = vand.u32 2147483647, %v17233_v26  ;;  %v1507_v60 = vmul.f32 %v807_v0, %v807_v0 }
 0x165   :  { %v17237_v37 = vpack.c.bf16 %v2001_v58, %v2000_v46  ;;  %v1252_v2 = vmul.f32 %v17213_v27, %v1202_v21  ;;  %v601_v44 = vmul.f32 %v17186_v49, %v21953_v30  ;;  %vm1803_vm2 = vcmp.lt.f32.partialorder %v17115_v57, 0.0  ;;  %v85_v21 = vld [vmem:[%s21944_s27 + $0xf8] sm:$0xff] }
 0x166   :  { %v1703_v12 = vmul.f32 %v16310_v28, %v1453_v14  ;;  %v17245_v13 = vpop.eup %16311  ;;  %16317 = vrcp.f32 %v907_v18  ;;  %v856_v9 = vmul.f32 0.3275911, %v806_v55  ;;  %v17262_v62 = vmul.f32 0.70710677, %v17251_v40  ;;  %12823 = vmatmul.mubr.msk.f32.gmra.mrb[30].mxu0 %vm106_vm0, %v85_v21 }
 0x167   :  { %v1302_v1 = vadd.f32 -0.28449672, %v1252_v2  ;;  %v1055_v31 = vmul.f32 1.0614054, %v17245_v13  ;;  %v17269_v16 = vmul.f32 0.5, %v17136_v42  ;;  %v1554_v29 = vsub.f32 0.0, %v1504_v15  ;;  %12825 = vmatprep.mubr.msk.f32.mxu0 %vm106_vm0, %v86_v56 }
 0x168   :  { %v1753_v41 = vsub.f32 1.0, %v1703_v12  ;;  %v1624_v33 = vmul.f32 1.442695, %v1555_v24  ;;  %v906_v3 = vadd.f32 1.0, %v856_v9  ;;  %v809_v0 = vand.u32 2147483647, %v17262_v62 }
 0x169   :  { %v1352_v25 = vmul.f32 %v17213_v27, %v1302_v1  ;;  %v1105_v52 = vadd.f32 -1.4531521, %v1055_v31  ;;  %vm1802_vm3 = vcmp.lt.f32.partialorder %v17151_v47, 0.0  ;;  %v1557_v46 = vsub.f32 0.0, %v1507_v60  ;;  %v91_v47 = vld [vmem:[%s21944_s27 + $0x128] sm:$0xff] }
 0x16a   :  { %v1853_v58 = vsub.f32 0.0, %v1753_v41  ;;  %v17278_v42 = vadd.f32 %v17200_v53, %v601_v44  ;;  %16319 = vrcp.f32 %v906_v3  ;;  %v1506_v14 = vmul.f32 %v806_v55, %v806_v55 }
 0x16b   :  { %v1402_v32 = vadd.f32 0.2548296, %v1352_v25  ;;  %v17273_v22 = vpop.eup %16313  ;;  %v1155_v34 = vmul.f32 %v17245_v13, %v1105_v52  ;;  %v17290_v2 = vmul.f32 0.5, %v17167_v45  ;;  %16321 = vpow2.f32 %v1624_v33  ;;  %v87_v45 = vld [vmem:[%s21944_s27 + $0x108] sm:$0xff]  ;;  %v88_v25 = vld [vmem:[%s21944_s27 + $0x110] sm:$0xff] }
 0x16c   :  { %v1054_v28 = vmul.f32 1.0614054, %v17273_v22  ;;  %v16316_v61 = vpop.eup %16315  ;;  %v859_v35 = vmul.f32 0.3275911, %v809_v0  ;;  %v1622_v15 = vmul.f32 1.442695, %v1554_v29  ;;  %v604_v38 = vmul.f32 %v17186_v49, %v16951_v36  ;;  %12826 = vmatmul.mubr.msk.f32.gmra.mrb[32].mxu0 %vm106_vm0, %v87_v45 }
 0x16d   :  { %v1452_v54 = vmul.f32 %v17213_v27, %v1402_v32  ;;  %v1205_v18 = vadd.f32 1.4214138, %v1155_v34  ;;  %v1903_v27 = vsel %vm1803_vm2, %v1853_v58, %v1753_v41  ;;  %v1628_v1 = vmul.f32 1.442695, %v1557_v46  ;;  %12828 = vmatprep.mubr.msk.f32.mxu0 %vm106_vm0, %v88_v25  ;;  %v89_v34 = vld [vmem:[%s21944_s27 + $0x118] sm:$0xff] }
 0x16e   :  { %v1104_v24 = vadd.f32 -1.4531521, %v1054_v28  ;;  %v909_v31 = vadd.f32 1.0, %v859_v35  ;;  %v17297_v60 = vmul.f32 0.70710677, %v17278_v42  ;;  %v1556_v41 = vsub.f32 0.0, %v1506_v14 }
 0x16f   :  { %v1702_v12 = vmul.f32 %v16316_v61, %v1452_v54  ;;  %v1255_v55 = vmul.f32 %v17245_v13, %v1205_v18  ;;  %v1953_v9 = vadd.f32 1.0, %v1903_v27  ;;  %v17316_v3 = vadd.f32 %v17200_v53, %v604_v38  ;;  %v90_v35 = vld [vmem:[%s21944_s27 + $0x120] sm:$0xff] }
 0x170   :  { %v17302_v30 = vpop.eup %16317  ;;  %v1154_v57 = vmul.f32 %v17273_v22, %v1104_v24  ;;  %16323 = vrcp.f32 %v909_v31  ;;  %v808_v58 = vand.u32 2147483647, %v17297_v60  ;;  %v1626_v54 = vmul.f32 1.442695, %v1556_v41  ;;  %12829 = vmatmul.mubr.msk.f32.gmra.mrb[34].mxu0 %vm106_vm0, %v89_v34 }
 0x171   :  { %v1752_v44 = vsub.f32 1.0, %v1702_v12  ;;  %v1305_v43 = vadd.f32 -0.28449672, %v1255_v55  ;;  %v1057_v52 = vmul.f32 1.0614054, %v17302_v30  ;;  %16325 = vpow2.f32 %v1622_v15  ;;  %12831 = vmatprep.mubr.msk.f32.mxu0 %vm106_vm0, %v90_v35 }
 0x172   :  { %v1204_v29 = vadd.f32 1.4214138, %v1154_v57  ;;  %16327 = vpow2.f32 %v1628_v1  ;;  %v858_v28 = vmul.f32 0.3275911, %v808_v58  ;;  %v2003_v14 = vmul.f32 %v1953_v9, %v17248_v11  ;;  %v92_v9 = vld [vmem:[%s21944_s27 + $0x130] sm:$0xff] }
 0x173   :  { %v1852_v33 = vsub.f32 0.0, %v1752_v44  ;;  %v1355_v36 = vmul.f32 %v17245_v13, %v1305_v43  ;;  %v1107_v32 = vadd.f32 -1.4531521, %v1057_v52  ;;  %v1509_v24 = vmul.f32 %v809_v0, %v809_v0  ;;  %v93_v43 = vld [vmem:[%s21944_s27 + $0x138] sm:$0xff] }
 0x174   :  { %v1254_v21 = vmul.f32 %v17273_v22, %v1204_v29  ;;  %v17333_v27 = vpop.eup %16319  ;;  %v908_v15 = vadd.f32 1.0, %v858_v28  ;;  %v17336_v55 = vmul.f32 0.70710677, %v17316_v3  ;;  %v603_v0 = vmul.f32 %v17186_v49, %v16955_v6  ;;  %12832 = vmatmul.mubr.msk.f32.gmra.mrb[36].mxu0 %vm106_vm0, %v91_v47 }
 0x175   :  { %v1902_v46 = vsel %vm1802_vm3, %v1852_v33, %v1752_v44  ;;  %v1405_v61 = vadd.f32 0.2548296, %v1355_v36  ;;  %v1157_v18 = vmul.f32 %v17302_v30, %v1107_v32  ;;  %v16322_v11 = vpop.eup %16321  ;;  %v1056_v44 = vmul.f32 1.0614054, %v17333_v27  ;;  %12834 = vmatprep.mubr.msk.f32.mxu0 %vm106_vm0, %v92_v9 }
 0x176   :  { %v1952_v56 = vadd.f32 1.0, %v1902_v46  ;;  %v1304_v12 = vadd.f32 -0.28449672, %v1254_v21  ;;  %16329 = vrcp.f32 %v908_v15  ;;  %v17344_v41 = vand.u32 2147483647, %v17336_v55 }
 0x177   :  { %v1455_v31 = vmul.f32 %v17245_v13, %v1405_v61  ;;  %v1207_v45 = vadd.f32 1.4214138, %v1157_v18  ;;  %v1106_v13 = vadd.f32 -1.4531521, %v1056_v44  ;;  %vm1805_vm4 = vcmp.lt.f32.partialorder %v17181_v23, 0.0  ;;  %v96_v23 = vld [vmem:[%s21944_s27 + $0x150] sm:$0xff] }
 0x178   :  { %v2002_v1 = vmul.f32 %v1952_v56, %v17269_v16  ;;  %v1354_v57 = vmul.f32 %v17273_v22, %v1304_v12  ;;  %v1559_v6 = vsub.f32 0.0, %v1509_v24  ;;  %v861_v33 = vmul.f32 0.3275911, %v17344_v41  ;;  %12835 = vmatmul.mubr.msk.f32.gmra.mrb[38].mxu0 %vm106_vm0, %v93_v43 }
 0x179   :  { %v1705_v25 = vmul.f32 %v16322_v11, %v1455_v31  ;;  %v1257_v16 = vmul.f32 %v17302_v30, %v1207_v45  ;;  %v1156_v34 = vmul.f32 %v17333_v27, %v1106_v13  ;;  %16331 = vpow2.f32 %v1626_v54  ;;  %v94_v54 = vld [vmem:[%s21944_s27 + $0x140] sm:$0xff] }
 0x17a   :  { %v17349_v38 = vpack.c.bf16 %v2003_v14, %v2002_v1  ;;  %v1404_v52 = vadd.f32 0.2548296, %v1354_v57  ;;  %v17361_v29 = vpop.eup %16323  ;;  %v1508_v14 = vmul.f32 %v808_v58, %v808_v58  ;;  %v911_v56 = vadd.f32 1.0, %v861_v33  ;;  %12837 = vmatprep.mubr.msk.f32.mxu0 %vm106_vm0, %v94_v54  ;;  %v98_v54 = vld [vmem:[%s21944_s27 + $0x160] sm:$0xff] }
 0x17b   :  { %v1755_v36 = vsub.f32 1.0, %v1705_v25  ;;  %v1307_v32 = vadd.f32 -0.28449672, %v1257_v16  ;;  %v16326_v46 = vpop.eup %16325  ;;  %v1059_v28 = vmul.f32 1.0614054, %v17361_v29  ;;  %v17369_v12 = vadd.f32 %v17200_v53, %v603_v0 }
 0x17c   :  { %v1454_v21 = vmul.f32 %v17273_v22, %v1404_v52  ;;  %v16328_v61 = vpop.eup %16327  ;;  %v1206_v47 = vadd.f32 1.4214138, %v1156_v34  ;;  %v95_v22 = vld [vmem:[%s21944_s27 + $0x148] sm:$0xff]  ;;  %v1632_v15 = vmul.f32 1.442695, %v1559_v6  ;;  %16333 = vrcp.f32 %v911_v56 }
 0x17d   :  { %v1855_v18 = vsub.f32 0.0, %v1755_v36  ;;  %v1357_v35 = vmul.f32 %v17302_v30, %v1307_v32  ;;  %v1109_v24 = vadd.f32 -1.4531521, %v1059_v28  ;;  %v704_v1 = vmul.f32 0.5, %v17203_v4  ;;  %12838 = vmatmul.mubr.msk.f32.gmra.mrb[40].mxu0 %vm106_vm0, %v95_v22  ;;  %v97_v4 = vld [vmem:[%s21944_s27 + $0x158] sm:$0xff] }
 0x17e   :  { %v1704_v58 = vmul.f32 %v16326_v46, %v1454_v21  ;;  %v1256_v45 = vmul.f32 %v17333_v27, %v1206_v47  ;;  %v1558_v25 = vsub.f32 0.0, %v1508_v14  ;;  %v17386_v9 = vmul.f32 0.70710677, %v17369_v12  ;;  %12840 = vmatprep.mubr.msk.f32.mxu0 %vm106_vm0, %v96_v23 }
 0x17f   :  { %v1905_v11 = vsel %vm1805_vm4, %v1855_v18, %v1755_v36  ;;  %v1407_v31 = vadd.f32 0.2548296, %v1357_v35  ;;  %v1159_v0 = vmul.f32 %v17361_v29, %v1109_v24  ;;  %vm1804_vm5 = vcmp.lt.f32.partialorder %v17208_v19, 0.0 }
 0x180   :  { %v1955_v44 = vadd.f32 1.0, %v1905_v11  ;;  %v1754_v57 = vsub.f32 1.0, %v1704_v58  ;;  %v1306_v13 = vadd.f32 -0.28449672, %v1256_v45  ;;  %v17394_v43 = vpop.eup %16329  ;;  %16335 = vpow2.f32 %v1632_v15  ;;  %v99_v15 = vld [vmem:[%s21944_s27 + $0x168] sm:$0xff] }
 0x181   :  { %v1457_v16 = vmul.f32 %v17302_v30, %v1407_v31  ;;  %v1209_v6 = vadd.f32 1.4214138, %v1159_v0  ;;  %v1058_v36 = vmul.f32 1.0614054, %v17394_v43  ;;  %v17401_v32 = vand.u32 2147483647, %v17386_v9  ;;  %12841 = vmatmul.mubr.msk.f32.gmra.mrb[42].mxu0 %vm106_vm0, %v97_v4 }
 0x182   :  { %v1854_v52 = vsub.f32 0.0, %v1754_v57  ;;  %v1356_v33 = vmul.f32 %v17333_v27, %v1306_v13  ;;  %v2005_v34 = vmul.f32 %v1955_v44, %v17290_v2  ;;  %v1630_v28 = vmul.f32 1.442695, %v1558_v25  ;;  %12843 = vmatprep.mubr.msk.f32.mxu0 %vm106_vm0, %v98_v54  ;;  %v100_v0 = vld [vmem:[%s21944_s27 + $0x170] sm:$0xff]  ;;  %v101_v25 = vld [vmem:[%s21944_s27 + $0x178] sm:$0xff] }
 0x183   :  { %v1707_v30 = vmul.f32 %v16328_v61, %v1457_v16  ;;  %v1259_v21 = vmul.f32 %v17361_v29, %v1209_v6  ;;  %v16332_v19 = vpop.eup %16331  ;;  %v1108_v61 = vadd.f32 -1.4531521, %v1058_v36  ;;  %v860_v47 = vmul.f32 0.3275911, %v17401_v32 }
 0x184   :  { %v1904_v46 = vsel %vm1804_vm5, %v1854_v52, %v1754_v57  ;;  %v1406_v18 = vadd.f32 0.2548296, %v1356_v33  ;;  %vm1807_vm6 = vcmp.lt.f32.partialorder %v17223_v10, 0.0  ;;  %16337 = vpow2.f32 %v1630_v28 }
 0x185   :  { %v1954_v14 = vadd.f32 1.0, %v1904_v46  ;;  %v1757_v56 = vsub.f32 1.0, %v1707_v30  ;;  %v1309_v35 = vadd.f32 -0.28449672, %v1259_v21  ;;  %v1158_v24 = vmul.f32 %v17394_v43, %v1108_v61  ;;  %12844 = vmatmul.mubr.msk.f32.gmra.mrb[44].mxu0 %vm106_vm0, %v99_v15  ;;  %v102_v46 = vld [vmem:[%s21944_s27 + $0x180] sm:$0xff] }
 0x186   :  { %v1456_v58 = vmul.f32 %v17333_v27, %v1406_v18  ;;  %v17416_v11 = vpop.eup %16333  ;;  %v910_v45 = vadd.f32 1.0, %v860_v47  ;;  %v605_v13 = vmul.f32 %v17186_v49, %v16969_v48  ;;  %12846 = vmatprep.mubr.msk.f32.mxu0 %vm106_vm0, %v100_v0  ;;  %v707_v48 = vmul.f32 0.5, %v17211_v63  ;;  %v17465_v15 = vld [vmem:[%s21897_s4] sm:$0xff] }
 0x187   :  { %v2004_v22 = vmul.f32 %v1954_v14, %v704_v1  ;;  %v1857_v2 = vsub.f32 0.0, %v1757_v56  ;;  %v1359_v31 = vmul.f32 %v17361_v29, %v1309_v35  ;;  %v1208_v57 = vadd.f32 1.4214138, %v1158_v24 }
 0x188   :  { %v1706_v44 = vmul.f32 %v16332_v19, %v1456_v58  ;;  %v1061_v16 = vmul.f32 1.0614054, %v17416_v11  ;;  %16339 = vrcp.f32 %v910_v45  ;;  %vm1806_vm7 = vcmp.lt.f32.partialorder %v17233_v26, 0.0 }
 0x189   :  { %v17421_v1 = vpack.c.bf16 %v2005_v34, %v2004_v22  ;;  %v1907_v27 = vsel %vm1807_vm6, %v1857_v2, %v1757_v56  ;;  %v1409_v10 = vadd.f32 0.2548296, %v1359_v31  ;;  %v1258_v4 = vmul.f32 %v17394_v43, %v1208_v57  ;;  %12847 = vmatmul.mubr.msk.f32.gmra.mrb[46].mxu0 %vm106_vm0, %v101_v25 }
 0x18a   :  { %v1756_v23 = vsub.f32 1.0, %v1706_v44  ;;  %v16336_v52 = vpop.eup %16335  ;;  %v1957_v6 = vadd.f32 1.0, %v1907_v27  ;;  %v1111_v33 = vadd.f32 -1.4531521, %v1061_v16  ;;  %v17442_v28 = vadd.f32 %v17200_v53, %v605_v13  ;;  %12849 = vmatprep.mubr.msk.f32.mxu0 %vm106_vm0, %v102_v46 }
 0x18b   :  { %v1459_v30 = vmul.f32 %v17361_v29, %v1409_v10  ;;  %v1308_v34 = vadd.f32 -0.28449672, %v1258_v4  ;;  %v103_v29 = vld [vmem:[%s21944_s27 + $0x188] sm:$0xff]  ;;  %v706_v19 = vmul.f32 0.5, %v17227_v7  ;;  %v21911_v35 = vmov 0.0|0.0  }
 0x18c   :  { %v1856_v36 = vsub.f32 0.0, %v1756_v23  ;;  %v2007_v18 = vmul.f32 %v1957_v6, %v707_v48  ;;  %v1161_v26 = vmul.f32 %v17416_v11, %v1111_v33  ;;  %14442 = vmatprep.subr.bf16.mxu1 %v21911_v35  ;;  %v17454_v54 = vmul.f32 0.70710677, %v17442_v28  ;;  %14514 = vmatprep.subr.bf16.mxu0 %v21911_v35 }
 0x18d   :  { %v1709_v21 = vmul.f32 %v16336_v52, %v1459_v30  ;;  %v1358_v56 = vmul.f32 %v17394_v43, %v1308_v34  ;;  %12850 = vmatmul.mubr.msk.f32.gmra.mrb[48].mxu0 %vm106_vm0, %v103_v29  ;;  %14444 = vmatpush1.bf16.msra.mxu1 %v16971_v39  ;;  %vm1809_vm8 = vcmp.lt.f32.partialorder %v17262_v62, 0.0  ;;  %v1511_v44 = vmul.f32 %v17344_v41, %v17344_v41 }
 0x18e   :  { %v1906_v14 = vsel %vm1806_vm7, %v1856_v36, %v1756_v23  ;;  %v16338_v7 = vpop.eup %16337  ;;  %14445 = vmatprep.subr.bf16.mxu1 %v21911_v35  ;;  %v812_v24 = vand.u32 2147483647, %v17454_v54  ;;  %v1211_v27 = vadd.f32 1.4214138, %v1161_v26  ;;  %v1510_v57 = vmul.f32 %v17401_v32, %v17401_v32 }
 0x18f   :  { %v1956_v61 = vadd.f32 1.0, %v1906_v14  ;;  %v1759_v63 = vsub.f32 1.0, %v1709_v21  ;;  %v1408_v47 = vadd.f32 0.2548296, %v1358_v56  ;;  %v2044_v10 = vunpack.c.h.bf16 %v17465_v15 }
 0x190   :  { %v862_v25 = vmul.f32 0.3275911, %v812_v24  ;;  %v1261_v52 = vmul.f32 %v17416_v11, %v1211_v27  ;;  %v1561_v41 = vsub.f32 0.0, %v1511_v44  ;;  %vm2057_vm0 = vcmask 588800  }
 0x191   :  { %v2006_v22 = vmul.f32 %v1956_v61, %v706_v19  ;;  %v1859_v2 = vsub.f32 0.0, %v1759_v63  ;;  %v1458_v58 = vmul.f32 %v17394_v43, %v1408_v47  ;;  %14447 = vmatpush1.bf16.msra.mxu1 %v16988_v8  ;;  %v1560_v30 = vsub.f32 0.0, %v1510_v57  ;;  %11048 = vmatprep.mubr.msk.f32.mxu1 %vm2057_vm0, %v2044_v10 }
 0x192   :  { %v16340_v31 = vpop.eup %16339  ;;  %14448 = vmatprep.subr.bf16.mxu1 %v21911_v35  ;;  %v912_v23 = vadd.f32 1.0, %v862_v25  ;;  %v709_v33 = vmul.f32 0.5, %v17251_v40  ;;  %vm1808_vm9 = vcmp.lt.f32.partialorder %v17297_v60, 0.0  ;;  %v708_v36 = vmul.f32 0.5, %v17278_v42 }
 0x193   :  { %v17467_v45 = vpack.c.bf16 %v2007_v18, %v2006_v22  ;;  %v1909_v62 = vsel %vm1809_vm8, %v1859_v2, %v1759_v63  ;;  %v1708_v0 = vmul.f32 %v16338_v7, %v1458_v58  ;;  %v1060_v43 = vmul.f32 1.0614054, %v16340_v31 }
 0x194   :  { %v1959_v4 = vadd.f32 1.0, %v1909_v62  ;;  %16341 = vrcp.f32 %v912_v23  ;;  %v1311_v29 = vadd.f32 -0.28449672, %v1261_v52  ;;  %v1636_v19 = vmul.f32 1.442695, %v1561_v41 }
 0x195   :  { %21954 = vst [vmem:[#allocation9_spill] sm:$0xff] %v17467_v45  ;;  %v1758_v16 = vsub.f32 1.0, %v1708_v0  ;;  %v1110_v13 = vadd.f32 -1.4531521, %v1060_v43  ;;  %14450 = vmatpush1.bf16.msra.mxu1 %v17008_v17  ;;  %v1634_v56 = vmul.f32 1.442695, %v1560_v30  ;;  %v1512_v18 = vmul.f32 %v812_v24, %v812_v24 }
 0x196   :  { %14451 = vmatprep.subr.bf16.mxu1 %v21911_v35  ;;  %v2009_v48 = vmul.f32 %v1959_v4, %v709_v33  ;;  %v1361_v63 = vmul.f32 %v17416_v11, %v1311_v29  ;;  %16343 = vpow2.f32 %v1636_v19  ;;  %vm1811_vm10 = vcmp.lt.f32.partialorder %v17336_v55, 0.0  ;;  %v2037_v55 = vld [vmem:[%s21897_s4 + $0x8] sm:$0xff] }
 0x197   :  { %v1858_v6 = vsub.f32 0.0, %v1758_v16  ;;  %v1160_v32 = vmul.f32 %v16340_v31, %v1110_v13  ;;  %16345 = vpow2.f32 %v1634_v56  ;;  %v1562_v26 = vsub.f32 0.0, %v1512_v18 }
 0x198   :  { %v1411_v7 = vadd.f32 0.2548296, %v1361_v63  ;;  %vm1810_vm11 = vcmp.lt.f32.partialorder %v17386_v9, 0.0  ;;  %vm1812_vm12 = vcmp.lt.f32.partialorder %v17454_v54, 0.0  ;;  %v712_v29 = vmul.f32 0.5, %v17442_v28 }
 0x199   :  { %v1908_v34 = vsel %vm1808_vm9, %v1858_v6, %v1758_v16  ;;  %v1210_v46 = vadd.f32 1.4214138, %v1160_v32  ;;  %14453 = vmatpush1.bf16.msra.mxu1 %v17042_v51  ;;  %v1638_v58 = vmul.f32 1.442695, %v1562_v26  ;;  %v711_v9 = vmul.f32 0.5, %v17316_v3  ;;  %v2039_v26 = vld [vmem:[%s21897_s4 + $0x18] sm:$0xff] }
 0x19a   :  { %v1958_v21 = vadd.f32 1.0, %v1908_v34  ;;  %14454 = vmatprep.subr.bf16.mxu1 %v21911_v35  ;;  %v1461_v27 = vmul.f32 %v17416_v11, %v1411_v7  ;;  %v21923_v54 = vmov 0.0   ;;  %v2043_v18 = vunpack.c.l.bf16 %v17465_v15 }
 0x19b   :  { %v1260_v14 = vmul.f32 %v16340_v31, %v1210_v46  ;;  %16347 = vpow2.f32 %v1638_v58  ;;  %v2046_v63 = vunpack.c.h.bf16 %v2037_v55  ;;  %v2050_v7 = vunpack.c.h.bf16 %v2039_v26 }
 0x19c   :  { %v2008_v61 = vmul.f32 %v1958_v21, %v708_v36  ;;  %vm16571_vm14 = vmmov 0  }
 0x19d   :  { %v1310_v40 = vadd.f32 -0.28449672, %v1260_v14  ;;  %14456 = vmatpush1.bf16.msra.mxu1 %v17140_v59  ;;  %v710_v14 = vmul.f32 0.5, %v17369_v12  ;;  %v2045_v12 = vunpack.c.l.bf16 %v2037_v55  ;;  %12860 = vmatprep.mubr.msk.f32.mxu0 %vm16571_vm14, %v21923_v54 }
 0x19e   :  { %v17485_v60 = vpack.c.bf16 %v2009_v48, %v2008_v61  ;;  %14457 = vmatprep.subr.bf16.mxu1 %v21911_v35  ;;  %v16342_v47 = vpop.eup %16341 }
 0x19f   :  { %v1360_v42 = vmul.f32 %v16340_v31, %v1310_v40  ;;  %v1062_v2 = vmul.f32 1.0614054, %v16342_v47 }
 0x1a0   :  { %21955 = vst [vmem:[#allocation10_spill] sm:$0xff] %v17485_v60  ;;  %v16344_v62 = vpop.eup %16343 }
 0x1a1   :  { %v1410_v22 = vadd.f32 0.2548296, %v1360_v42  ;;  %14459 = vmatpush1.bf16.msra.mxu1 %v17173_v20  ;;  %v1112_v24 = vadd.f32 -1.4531521, %v1062_v2  ;;  %v16346_v43 = vpop.eup %16345  ;;  %v1711_v25 = vmul.f32 %v16344_v62, %v1461_v27  ;;  %v2038_v42 = vld [vmem:[%s21897_s4 + $0x10] sm:$0xff]  ;;  %v2049_v2 = vunpack.c.l.bf16 %v2039_v26 }
 0x1a2   :  { %14460 = vmatprep.subr.bf16.mxu1 %v21911_v35  ;;  %v2048_v15 = vunpack.c.h.bf16 %v2038_v42 }
 0x1a3   :  { %v1460_v44 = vmul.f32 %v16340_v31, %v1410_v22  ;;  %v1162_v57 = vmul.f32 %v16342_v47, %v1112_v24  ;;  %v1761_v23 = vsub.f32 1.0, %v1711_v25  ;;  %v2040_v22 = vld [vmem:[%s21897_s4 + $0x20] sm:$0xff]  ;;  %v2041_v24 = vld [vmem:[%s21897_s4 + $0x28] sm:$0xff] }
 0x1a4   :  { %v2052_v58 = vunpack.c.h.bf16 %v2040_v22  ;;  %v2051_v27 = vunpack.c.l.bf16 %v2040_v22  ;;  %v2053_v62 = vunpack.c.l.bf16 %v2041_v24 }
 0x1a5   :  { %14462 = vmatpush1.bf16.msra.mxu1 %v17190_v5  ;;  %v1212_v0 = vadd.f32 1.4214138, %v1162_v57  ;;  %v1710_v10 = vmul.f32 %v16346_v43, %v1460_v44  ;;  %v16348_v52 = vpop.eup %16347  ;;  %v1861_v41 = vsub.f32 0.0, %v1761_v23  ;;  %v2054_v44 = vunpack.c.h.bf16 %v2041_v24  ;;  %v2042_v57 = vld [vmem:[%s21897_s4 + $0x30] sm:$0xff]  ;;  %v11055_v43 = vld [vmem:[%s21897_s4 + $0x38] sm:$0xff] }
 0x1a6   :  { %14463 = vmatprep.subr.bf16.mxu1 %v21911_v35  ;;  %v2055_v25 = vunpack.c.l.bf16 %v2042_v57 }
 0x1a7   :  { %v1262_v16 = vmul.f32 %v16342_v47, %v1212_v0  ;;  %v1760_v11 = vsub.f32 1.0, %v1710_v10  ;;  %v1911_v33 = vsel %vm1811_vm10, %v1861_v41, %v1761_v23  ;;  %v2056_v0 = vunpack.c.h.bf16 %v2042_v57  ;;  %v11056_v23 = vld [vmem:[%s21897_s4 + $0x40] sm:$0xff] }
 0x1a8   :  { %v1961_v48 = vadd.f32 1.0, %v1911_v33  ;;  %v2192_v10 = vunpack.c.h.bf16 %v11055_v43  ;;  %v2193_v41 = vunpack.c.l.bf16 %v11056_v23 }
 0x1a9   :  { %14465 = vmatpush1.bf16.msra.mxu1 %v17237_v37  ;;  %v1312_v13 = vadd.f32 -0.28449672, %v1262_v16  ;;  %v1860_v6 = vsub.f32 0.0, %v1760_v11  ;;  %v606_v16 = vmul.f32 %v17186_v49, %v16965_v50  ;;  %v2194_v50 = vunpack.c.h.bf16 %v11056_v23  ;;  %v11057_v49 = vld [vmem:[%s21897_s4 + $0x48] sm:$0xff] }
 0x1aa   :  { %14466 = vmatprep.subr.bf16.mxu1 %v21911_v35  ;;  %v2011_v61 = vmul.f32 %v1961_v48, %v711_v9  ;;  %v2195_v33 = vunpack.c.l.bf16 %v11057_v49 }
 0x1ab   :  { %v1362_v31 = vmul.f32 %v16342_v47, %v1312_v13  ;;  %v1910_v36 = vsel %vm1810_vm11, %v1860_v6, %v1760_v11  ;;  %v17571_v13 = vadd.f32 %v17200_v53, %v606_v16  ;;  %v2191_v11 = vunpack.c.l.bf16 %v11055_v43  ;;  %v11069_v53 = vld [vmem:[%s21898_s5 + $0x20] sm:$0xff]  ;;  %v11072_v43 = vld [vmem:[%s21898_s5 + $0x38] sm:$0xff] }
 0x1ac   :  { %v1960_v21 = vadd.f32 1.0, %v1910_v36 }
 0x1ad   :  { %14468 = vmatpush1.bf16.msra.mxu1 %v17349_v38  ;;  %v1412_v4 = vadd.f32 0.2548296, %v1362_v31  ;;  %v17579_v31 = vmul.f32 0.70710677, %v17571_v13 }
 0x1ae   :  { %14469 = vmatprep.subr.bf16.mxu1 %v21911_v35  ;;  %v17515_v40 = vmul.f32 %v1960_v21, %v710_v14  ;;  %v11061_v14 = vld [vmem:[%s21897_s4 + $0x68] sm:$0xff] }
 0x1af   :  { %v1462_v32 = vmul.f32 %v16342_v47, %v1412_v4  ;;  %v2047_v47 = vunpack.c.l.bf16 %v2038_v42  ;;  %v11070_v4 = vld [vmem:[%s21898_s5 + $0x28] sm:$0xff]  ;;  %v813_v6 = vand.u32 2147483647, %v17579_v31  ;;  %vm1813_vm13 = vcmp.lt.f32.partialorder %v17579_v31, 0.0 }
 0x1b1   :  { %14471 = vmatpush1.bf16.msra.mxu1 %v17421_v1  ;;  %v1712_v30 = vmul.f32 %v16348_v52, %v1462_v32  ;;  %v14515_v52 = vpack.c.bf16 %v11070_v4, %v11069_v53  ;;  %v2196_v32 = vunpack.c.h.bf16 %v11057_v49  ;;  %v863_v36 = vmul.f32 0.3275911, %v813_v6  ;;  %v11091_v4 = vld [vmem:[%s21897_s4 + $0x90] sm:$0xff] }
 0x1b2   :  { %14472 = vmatprep.subr.bf16.mxu1 %v21911_v35 }
 0x1b3   :  { %v1762_v34 = vsub.f32 1.0, %v1712_v30  ;;  %v11058_v30 = vld [vmem:[%s21897_s4 + $0x50] sm:$0xff]  ;;  %14516 = vmatpush3.bf16.msra.mxu0 %v14515_v52  ;;  %v913_v21 = vadd.f32 1.0, %v863_v36  ;;  %v2590_v36 = vunpack.c.l.bf16 %v11091_v4 }
 0x1b4   :  { %14517 = vmatprep.subr.bf16.mxu0 %v21911_v35  ;;  %v2197_v48 = vunpack.c.l.bf16 %v11058_v30 }
 0x1b5   :  { %14474 = vmatpush1.bf16.msra.mxu1 %v17467_v45  ;;  %v1862_v46 = vsub.f32 0.0, %v1762_v34  ;;  %16349 = vrcp.f32 %v913_v21 }
 0x1b6   :  { %14475 = vmatprep.subr.bf16.mxu1 %v21911_v35 }
 0x1b7   :  { %v1912_v19 = vsel %vm1812_vm12, %v1862_v46, %v1762_v34  ;;  %v2198_v34 = vunpack.c.h.bf16 %v11058_v30  ;;  %v11059_v46 = vld [vmem:[%s21897_s4 + $0x58] sm:$0xff] }
 0x1b8   :  { %v1962_v56 = vadd.f32 1.0, %v1912_v19  ;;  %v11060_v19 = vld [vmem:[%s21897_s4 + $0x60] sm:$0xff]  ;;  %v2199_v55 = vunpack.c.l.bf16 %v11059_v46  ;;  %v11092_v30 = vld [vmem:[%s21897_s4 + $0x98] sm:$0xff] }
 0x1b9   :  { %14477 = vmatpush1.bf16.msra.mxu1 %v17485_v60  ;;  %v2202_v9 = vunpack.c.h.bf16 %v11060_v19  ;;  %v2592_v21 = vunpack.c.l.bf16 %v11092_v30 }
 0x1ba   :  { %2127 = vmatprep.subr.mxu1 %v21923_v54  ;;  %v2012_v28 = vmul.f32 %v1962_v56, %v712_v29  ;;  %v2200_v29 = vunpack.c.h.bf16 %v11059_v46  ;;  %v2201_v56 = vunpack.c.l.bf16 %v11060_v19  ;;  %v11093_v46 = vld [vmem:[%s21897_s4 + $0xa0] sm:$0xff]  ;;  %v17685_v19 = vld [vmem:[%s21897_s4 + $0xa8] sm:$0xff] }
 0x1bc   :  { %v17520_v3 = vpack.c.bf16 %v2012_v28, %v2011_v61  ;;  %v11087_v61 = vld [vmem:[%s21897_s4 + $0x70] sm:$0xff]  ;;  %v2203_v28 = vunpack.c.l.bf16 %v11061_v14 }
 0x1bd   :  { %2128 = vmatpush1.msra.mxu1 %v17515_v40 }
 0x1be   :  { %21956 = vst [vmem:[#allocation11_spill] sm:$0xff] %v17520_v3  ;;  %2144 = vmatmul.mubr.f32.vlgmr.msra.gmra.mrb[0].mxu1 %v2043_v18  ;;  %14478 = vmatprep.subr.bf16.mxu1 %v21911_v35  ;;  %v2204_v18 = vunpack.c.h.bf16 %v11061_v14  ;;  %v2859_v14 = vunpack.c.h.bf16 %v17685_v19 }
 0x1bf   :  { %14480 = vmatpush1.bf16.msra.mxu1 %v16971_v39  ;;  %11049 = vmatprep.mubr.msk.f32.mxu1 %vm2057_vm0, %v2046_v63  ;;  %v2583_v63 = vunpack.c.h.bf16 %v11087_v61  ;;  %v16350_v42 = vpop.eup %16349 }
 0x1c0   :  { %14481 = vmatprep.subr.bf16.mxu1 %v21911_v35 }
 0x1c2   :  { %2149 = vmatmul.mubr.f32.gmra.mrb[2].mxu1 %v2045_v12  ;;  %v1063_v12 = vmul.f32 1.0614054, %v16350_v42 }
 0x1c3   :  { %14483 = vmatpush1.bf16.msra.mxu1 %v16988_v8  ;;  %11050 = vmatprep.mubr.msk.f32.mxu1 %vm2057_vm0, %v2048_v15 }
 0x1c4   :  { %14484 = vmatprep.subr.bf16.mxu1 %v21911_v35  ;;  %v1113_v15 = vadd.f32 -1.4531521, %v1063_v12 }
 0x1c6   :  { %2154 = vmatmul.mubr.f32.gmra.mrb[4].mxu1 %v2047_v47  ;;  %v1163_v26 = vmul.f32 %v16350_v42, %v1113_v15  ;;  %v1513_v47 = vmul.f32 %v813_v6, %v813_v6 }
 0x1c7   :  { %14486 = vmatpush1.bf16.msra.mxu1 %v17008_v17  ;;  %11051 = vmatprep.mubr.msk.f32.mxu1 %vm2057_vm0, %v2050_v7 }
 0x1c8   :  { %14487 = vmatprep.subr.bf16.mxu1 %v21911_v35  ;;  %v1213_v7 = vadd.f32 1.4214138, %v1163_v26  ;;  %v1563_v22 = vsub.f32 0.0, %v1513_v47 }
 0x1ca   :  { %2159 = vmatmul.mubr.f32.gmra.mrb[6].mxu1 %v2049_v2  ;;  %v1263_v2 = vmul.f32 %v16350_v42, %v1213_v7  ;;  %v1640_v24 = vmul.f32 1.442695, %v1563_v22 }
 0x1cb   :  { %14489 = vmatpush1.bf16.msra.mxu1 %v17042_v51  ;;  %11052 = vmatprep.mubr.msk.f32.mxu1 %vm2057_vm0, %v2052_v58  ;;  %v11088_v58 = vld [vmem:[%s21897_s4 + $0x78] sm:$0xff] }
 0x1cc   :  { %14490 = vmatprep.subr.bf16.mxu1 %v21911_v35  ;;  %v2585_v57 = vunpack.c.h.bf16 %v11088_v58  ;;  %16351 = vpow2.f32 %v1640_v24  ;;  %v2584_v16 = vunpack.c.l.bf16 %v11088_v58 }
 0x1ce   :  { %2164 = vmatmul.mubr.f32.gmra.mrb[8].mxu1 %v2051_v27  ;;  %v1313_v27 = vadd.f32 -0.28449672, %v1263_v2  ;;  %v713_v2 = vmul.f32 0.5, %v17571_v13 }
 0x1cf   :  { %14492 = vmatpush1.bf16.msra.mxu1 %v17140_v59  ;;  %11053 = vmatprep.mubr.msk.f32.mxu1 %vm2057_vm0, %v2054_v44  ;;  %v2582_v44 = vunpack.c.l.bf16 %v11087_v61 }
 0x1d0   :  { %14493 = vmatprep.subr.bf16.mxu1 %v21911_v35 }
 0x1d2   :  { %2169 = vmatmul.mubr.f32.gmra.mrb[10].mxu1 %v2053_v62  ;;  %v11089_v62 = vld [vmem:[%s21897_s4 + $0x80] sm:$0xff] }
 0x1d3   :  { %14495 = vmatpush1.bf16.msra.mxu1 %v17173_v20  ;;  %11054 = vmatprep.mubr.msk.f32.mxu1 %vm2057_vm0, %v2056_v0  ;;  %v11071_v0 = vld [vmem:[%s21898_s5 + $0x30] sm:$0xff]  ;;  %v2587_v23 = vunpack.c.h.bf16 %v11089_v62  ;;  %v2586_v49 = vunpack.c.l.bf16 %v11089_v62 }
 0x1d4   :  { %14496 = vmatprep.subr.bf16.mxu1 %v21911_v35  ;;  %v17730_v62 = vld [vmem:[%s21897_s4 + $0xb0] sm:$0xff] }
 0x1d6   :  { %2174 = vmatmul.mubr.f32.gmra.mrb[12].mxu1 %v2055_v25  ;;  %v14518_v25 = vpack.c.bf16 %v11072_v43, %v11071_v0  ;;  %v16352_v6 = vpop.eup %16351 }
 0x1d7   :  { %14498 = vmatpush1.bf16.msra.mxu1 %v17190_v5  ;;  %11062 = vmatprep.mubr.msk.f32.mxu1 %vm2057_vm0, %v2192_v10  ;;  %v1363_v10 = vmul.f32 %v16350_v42, %v1313_v27 }
 0x1d8   :  { %14499 = vmatprep.subr.bf16.mxu1 %v21911_v35  ;;  %14519 = vmatpush3.bf16.msra.mxu0 %v14518_v25  ;;  %v17740_v25 = vld [vmem:[%s21897_s4 + $0xb8] sm:$0xff] }
 0x1d9   :  { %14520 = vmatprep.subr.bf16.mxu0 %v21911_v35 }
 0x1db   :  { %14501 = vmatpush1.bf16.msra.mxu1 %v17237_v37 }
 0x1dc   :  { %14502 = vmatprep.subr.bf16.mxu1 %v21911_v35 }
 0x1df   :  { %14504 = vmatpush1.bf16.msra.mxu1 %v17349_v38 }
 0x1e0   :  { %14505 = vmatprep.subr.bf16.mxu1 %v21911_v35 }
 0x1e3   :  { %14507 = vmatpush1.bf16.msra.mxu1 %v17421_v1 }
 0x1e4   :  { %14508 = vmatprep.subr.bf16.mxu1 %v21911_v35 }
 0x1e7   :  { %14510 = vmatpush1.bf16.msra.mxu1 %v17467_v45 }
 0x1e8   :  { %14511 = vmatprep.subr.bf16.mxu1 %v21911_v35 }
 0x1eb   :  { %14513 = vmatpush1.bf16.msra.mxu1 %v17485_v60 }
 0x1ec   :  { %2274 = vmatprep.subr.mxu1 %v21923_v54 }
 0x1ef   :  { %2275 = vmatpush1.msra.mxu1 %v17515_v40 }
 0x1f0   :  { %2291 = vmatmul.mubr.f32.vlgmr.msra.gmra.mrb[14].mxu1 %v2191_v11  ;;  %14526 = vmatprep.subr.bf16.mxu1 %v21911_v35  ;;  %v11090_v11 = vld [vmem:[%s21897_s4 + $0x88] sm:$0xff] }
 0x1f1   :  { %14528 = vmatpush1.bf16.msra.mxu1 %v16971_v39  ;;  %11063 = vmatprep.mubr.msk.f32.mxu1 %vm2057_vm0, %v2194_v50  ;;  %v1413_v50 = vadd.f32 0.2548296, %v1363_v10  ;;  %v2589_v53 = vunpack.c.h.bf16 %v11090_v11 }
 0x1f2   :  { %14529 = vmatprep.subr.bf16.mxu1 %v21911_v35 }
 0x1f3   :  { %v1463_v52 = vmul.f32 %v16350_v42, %v1413_v50  ;;  %v17702_v42 = vld [vmem:[%s21896_s3] ss:$0 sm:$0xff] }
 0x1f4   :  { %2296 = vmatmul.mubr.f32.gmra.mrb[16].mxu1 %v2193_v41  ;;  %v2588_v41 = vunpack.c.l.bf16 %v11090_v11 }
 0x1f5   :  { %14531 = vmatpush1.bf16.msra.mxu1 %v16988_v8  ;;  %11064 = vmatprep.mubr.msk.f32.mxu1 %vm2057_vm0, %v2196_v32  ;;  %v2591_v32 = vunpack.c.h.bf16 %v11091_v4 }
 0x1f6   :  { %14532 = vmatprep.subr.bf16.mxu1 %v21911_v35 }
 0x1f8   :  { %2301 = vmatmul.mubr.f32.gmra.mrb[18].mxu1 %v2195_v33  ;;  %v1713_v33 = vmul.f32 %v16352_v6, %v1463_v52  ;;  %v17761_v6 = vld [vmem:[%s21897_s4 + $0xc8] sm:$0xff] }
 0x1f9   :  { %14534 = vmatpush1.bf16.msra.mxu1 %v17008_v17  ;;  %11065 = vmatprep.mubr.msk.f32.mxu1 %vm2057_vm0, %v2198_v34  ;;  %v2593_v34 = vunpack.c.h.bf16 %v11092_v30 }
 0x1fa   :  { %14535 = vmatprep.subr.bf16.mxu1 %v21911_v35 }
 0x1fc   :  { %2306 = vmatmul.mubr.f32.gmra.mrb[20].mxu1 %v2197_v48  ;;  %v1763_v48 = vsub.f32 1.0, %v1713_v33 }
 0x1fd   :  { %14537 = vmatpush1.bf16.msra.mxu1 %v17042_v51  ;;  %11066 = vmatprep.mubr.msk.f32.mxu1 %vm2057_vm0, %v2200_v29  ;;  %v2595_v29 = vunpack.c.h.bf16 %v11093_v46 }
 0x1fe   :  { %14538 = vmatprep.subr.bf16.mxu1 %v21911_v35 }
 0x200   :  { %2311 = vmatmul.mubr.f32.gmra.mrb[22].mxu1 %v2199_v55  ;;  %v1863_v55 = vsub.f32 0.0, %v1763_v48 }
 0x201   :  { %14540 = vmatpush1.bf16.msra.mxu1 %v17140_v59  ;;  %11067 = vmatprep.mubr.msk.f32.mxu1 %vm2057_vm0, %v2202_v9  ;;  %v2594_v9 = vunpack.c.l.bf16 %v11093_v46 }
 0x202   :  { %14541 = vmatprep.subr.bf16.mxu1 %v21911_v35  ;;  %v1913_v31 = vsel %vm1813_vm13, %v1863_v55, %v1763_v48 }
 0x203   :  { %v1963_v58 = vadd.f32 1.0, %v1913_v31 }
 0x204   :  { %2316 = vmatmul.mubr.f32.gmra.mrb[24].mxu1 %v2201_v56 }
 0x205   :  { %14543 = vmatpush1.bf16.msra.mxu1 %v17173_v20  ;;  %11068 = vmatprep.mubr.msk.f32.mxu1 %vm2057_vm0, %v2204_v18  ;;  %v17695_v18 = vld [vmem:[%s21895_s2] ss:$0 sm:$0xff]  ;;  %v17745_v11 = vmul.f32 %v1963_v58, %v713_v2  ;;  %v17785_v58 = vld [vmem:[%s21897_s4 + $0xd8] sm:$0xff] }
 0x206   :  { %14544 = vmatprep.subr.bf16.mxu1 %v21911_v35 }
 0x208   :  { %2321 = vmatmul.mubr.f32.gmra.mrb[26].mxu1 %v2203_v28 }
 0x209   :  { %14546 = vmatpush1.bf16.msra.mxu1 %v17190_v5  ;;  %11094 = vmatprep.mubr.msk.f32.mxu1 %vm2057_vm0, %v2583_v63 }
 0x20a   :  { %14547 = vmatprep.subr.bf16.mxu1 %v21911_v35 }
 0x20d   :  { %14549 = vmatpush1.bf16.msra.mxu1 %v17237_v37 }
 0x20e   :  { %14550 = vmatprep.subr.bf16.mxu1 %v21911_v35 }
 0x211   :  { %14552 = vmatpush1.bf16.msra.mxu1 %v17349_v38 }
 0x212   :  { %14553 = vmatprep.subr.bf16.mxu1 %v21911_v35 }
 0x215   :  { %14555 = vmatpush1.bf16.msra.mxu1 %v17421_v1 }
 0x216   :  { %14556 = vmatprep.subr.bf16.mxu1 %v21911_v35 }
 0x219   :  { %14558 = vmatpush1.bf16.msra.mxu1 %v17467_v45 }
 0x21a   :  { %14559 = vmatprep.subr.bf16.mxu1 %v21911_v35 }
 0x21d   :  { %14561 = vmatpush1.bf16.msra.mxu1 %v17485_v60 }
 0x21e   :  { %2665 = vmatprep.subr.mxu1 %v21923_v54 }
 0x221   :  { %2666 = vmatpush1.msra.mxu1 %v17515_v40 }
 0x222   :  { %2682 = vmatmul.mubr.f32.vlgmr.msra.gmra.mrb[28].mxu1 %v2582_v44  ;;  %14568 = vmatprep.subr.bf16.mxu1 %v21911_v35 }
 0x223   :  { %14570 = vmatpush1.bf16.msra.mxu1 %v16971_v39  ;;  %11095 = vmatprep.mubr.msk.f32.mxu1 %vm2057_vm0, %v2585_v57 }
 0x224   :  { %14571 = vmatprep.subr.bf16.mxu1 %v21911_v35 }
 0x226   :  { %2687 = vmatmul.mubr.f32.gmra.mrb[30].mxu1 %v2584_v16 }
 0x227   :  { %14573 = vmatpush1.bf16.msra.mxu1 %v16988_v8  ;;  %11096 = vmatprep.mubr.msk.f32.mxu1 %vm2057_vm0, %v2587_v23 }
 0x228   :  { %14574 = vmatprep.subr.bf16.mxu1 %v21911_v35 }
 0x22a   :  { %2692 = vmatmul.mubr.f32.gmra.mrb[32].mxu1 %v2586_v49  ;;  %v17751_v49 = vld [vmem:[%s21897_s4 + $0xc0] sm:$0xff] }
 0x22b   :  { %14576 = vmatpush1.bf16.msra.mxu1 %v17008_v17  ;;  %11097 = vmatprep.mubr.msk.f32.mxu1 %vm2057_vm0, %v2589_v53 }
 0x22c   :  { %14577 = vmatprep.subr.bf16.mxu1 %v21911_v35 }
 0x22e   :  { %2697 = vmatmul.mubr.f32.gmra.mrb[34].mxu1 %v2588_v41 }
 0x22f   :  { %14579 = vmatpush1.bf16.msra.mxu1 %v17042_v51  ;;  %11098 = vmatprep.mubr.msk.f32.mxu1 %vm2057_vm0, %v2591_v32 }
 0x230   :  { %14580 = vmatprep.subr.bf16.mxu1 %v21911_v35 }
 0x232   :  { %2702 = vmatmul.mubr.f32.gmra.mrb[36].mxu1 %v2590_v36 }
 0x233   :  { %14582 = vmatpush1.bf16.msra.mxu1 %v17140_v59  ;;  %11099 = vmatprep.mubr.msk.f32.mxu1 %vm2057_vm0, %v2593_v34 }
 0x234   :  { %14583 = vmatprep.subr.bf16.mxu1 %v21911_v35 }
 0x235   :  { %v12821_v56 = vpop.f32.mrb[28].mxu0 }
 0x236   :  { %2707 = vmatmul.mubr.f32.gmra.mrb[38].mxu1 %v2592_v21  ;;  %v608_v61 = vmul.f32 %v17695_v18, %v12821_v56  ;;  %v463_v28 = vpop.f32.mrb[29].mxu0 }
 0x237   :  { %14585 = vmatpush1.bf16.msra.mxu1 %v17173_v20  ;;  %11100 = vmatprep.mubr.msk.f32.mxu1 %vm2057_vm0, %v2595_v29  ;;  %v607_v63 = vmul.f32 %v17695_v18, %v463_v28  ;;  %v17773_v29 = vld [vmem:[%s21897_s4 + $0xd0] sm:$0xff] }
 0x238   :  { %14586 = vmatprep.subr.bf16.mxu1 %v21911_v35  ;;  %v17705_v12 = vadd.f32 %v17702_v42, %v608_v61 }
 0x239   :  { %v17710_v15 = vadd.f32 %v17702_v42, %v607_v63  ;;  %v12824_v26 = vpop.f32.mrb[30].mxu0 }
 0x23a   :  { %2712 = vmatmul.mubr.f32.gmra.mrb[40].mxu1 %v2594_v9  ;;  %v17714_v47 = vmul.f32 0.70710677, %v17705_v12  ;;  %v610_v7 = vmul.f32 %v17695_v18, %v12824_v26  ;;  %v473_v22 = vpop.f32.mrb[31].mxu0 }
 0x23b   :  { %14588 = vmatpush1.bf16.msra.mxu1 %v17190_v5  ;;  %11119 = vmatprep.mubr.msk.f32.mxu1 %vm2057_vm0, %v2859_v14  ;;  %v17719_v24 = vmul.f32 0.70710677, %v17710_v15  ;;  %v609_v27 = vmul.f32 %v17695_v18, %v473_v22 }
 0x23c   :  { %14589 = vmatprep.subr.bf16.mxu1 %v21911_v35  ;;  %v815_v44 = vand.u32 2147483647, %v17714_v47  ;;  %v17724_v57 = vadd.f32 %v17702_v42, %v610_v7  ;;  %vm1815_vm15 = vcmp.lt.f32.partialorder %v17714_v47, 0.0  ;;  %v21982_v47 = vunpack.c.h.bf16 %v17785_v58 }
 0x23d   :  { %v814_v13 = vand.u32 2147483647, %v17719_v24  ;;  %v17734_v0 = vadd.f32 %v17702_v42, %v609_v27  ;;  %vm1814_vm1 = vcmp.lt.f32.partialorder %v17719_v24, 0.0 }
 0x23e   :  { %v865_v10 = vmul.f32 0.3275911, %v815_v44  ;;  %v17743_v16 = vmul.f32 0.70710677, %v17724_v57  ;;  %v1515_v55 = vmul.f32 %v815_v44, %v815_v44 }
 0x23f   :  { %14591 = vmatpush1.bf16.msra.mxu1 %v17237_v37  ;;  %v12827_v43 = vpop.f32.mrb[32].mxu0  ;;  %v864_v53 = vmul.f32 0.3275911, %v814_v13  ;;  %v17754_v4 = vmul.f32 0.70710677, %v17734_v0  ;;  %v1514_v31 = vmul.f32 %v814_v13, %v814_v13  ;;  %v17794_v13 = vld [vmem:[%s21897_s4 + $0x118] sm:$0xff] }
 0x240   :  { %14592 = vmatprep.subr.bf16.mxu1 %v21911_v35  ;;  %v483_v23 = vpop.f32.mrb[33].mxu0  ;;  %v915_v32 = vadd.f32 1.0, %v865_v10  ;;  %v817_v30 = vand.u32 2147483647, %v17743_v16  ;;  %v612_v7 = vmul.f32 %v17695_v18, %v12827_v43  ;;  %v1565_v43 = vsub.f32 0.0, %v1515_v55 }
 0x241   :  { %v914_v34 = vadd.f32 1.0, %v864_v53  ;;  %v816_v46 = vand.u32 2147483647, %v17754_v4  ;;  %v611_v44 = vmul.f32 %v17695_v18, %v483_v23  ;;  %v1564_v2 = vsub.f32 0.0, %v1514_v31  ;;  %v17821_v31 = vld [vmem:[%s21897_s4 + $0x120] sm:$0xff] }
 0x242   :  { %16353 = vrcp.f32 %v915_v32  ;;  %v867_v9 = vmul.f32 0.3275911, %v817_v30  ;;  %v17797_v53 = vadd.f32 %v17702_v42, %v612_v7  ;;  %21959 = vst [vmem:[#allocation17_spill] sm:$0xff] %v17821_v31  ;;  %vm1816_vm2 = vcmp.lt.f32.partialorder %v17754_v4, 0.0  ;;  %v18021_v4 = vld [vmem:[%s21897_s4 + $0x130] sm:$0xff] }
 0x243   :  { %14594 = vmatpush1.bf16.msra.mxu1 %v17349_v38  ;;  %v12830_v48 = vpop.f32.mrb[34].mxu0  ;;  %16355 = vrcp.f32 %v914_v34  ;;  %v866_v28 = vmul.f32 0.3275911, %v816_v46  ;;  %v17803_v23 = vadd.f32 %v17702_v42, %v611_v44  ;;  %v17830_v44 = vmul.f32 0.5, %v17705_v12 }
 0x244   :  { %14595 = vmatprep.subr.bf16.mxu1 %v21911_v35  ;;  %v493_v14 = vpop.f32.mrb[35].mxu0  ;;  %v917_v26 = vadd.f32 1.0, %v867_v9  ;;  %21957 = vst [vmem:[#allocation15_spill] sm:$0xff] %v17797_v53  ;;  %v614_v32 = vmul.f32 %v17695_v18, %v12830_v48  ;;  %v1517_v9 = vmul.f32 %v817_v30, %v817_v30  ;;  %v17807_v22 = vmul.f32 0.70710677, %v17797_v53 }
 0x245   :  { %v916_v27 = vadd.f32 1.0, %v866_v28  ;;  %v17824_v7 = vmul.f32 0.70710677, %v17803_v23  ;;  %v1644_v30 = vmul.f32 1.442695, %v1565_v43  ;;  %v613_v61 = vmul.f32 %v17695_v18, %v493_v14 }
 0x246   :  { %16357 = vrcp.f32 %v917_v26  ;;  %v17810_v55 = vadd.f32 %v17702_v42, %v614_v32  ;;  %v1516_v32 = vmul.f32 %v816_v46, %v816_v46  ;;  %v819_v48 = vand.u32 2147483647, %v17807_v22 }
 0x247   :  { %14597 = vmatpush1.bf16.msra.mxu1 %v17421_v1  ;;  %v17788_v10 = vpop.f32.mrb[36].mxu0  ;;  %16359 = vrcp.f32 %v916_v27  ;;  %v1567_v28 = vsub.f32 0.0, %v1517_v9  ;;  %v818_v63 = vand.u32 2147483647, %v17824_v7  ;;  %v1642_v12 = vmul.f32 1.442695, %v1564_v2 }
 0x248   :  { %14598 = vmatprep.subr.bf16.mxu1 %v21911_v35  ;;  %v17800_v34 = vpop.f32.mrb[37].mxu0  ;;  %21958 = vst [vmem:[#allocation16_spill] sm:$0xff] %v17810_v55  ;;  %v17834_v26 = vmul.f32 0.70710677, %v17810_v55  ;;  %v869_v33 = vmul.f32 0.3275911, %v819_v48  ;;  %v17860_v43 = vadd.f32 %v17702_v42, %v613_v61 }
 0x249   :  { %v17852_v14 = vmul.f32 0.5, %v17710_v15  ;;  %v868_v52 = vmul.f32 0.3275911, %v818_v63  ;;  %v1566_v36 = vsub.f32 0.0, %v1516_v32  ;;  %v1648_v55 = vmul.f32 1.442695, %v1567_v28 }
 0x24a   :  { %21960 = vst [vmem:[#allocation18_spill] sm:$0xff] %v17834_v26  ;;  %v17844_v46 = vand.u32 2147483647, %v17834_v26  ;;  %v919_v50 = vadd.f32 1.0, %v869_v33  ;;  %v21963_v32 = vunpack.c.l.bf16 %v17685_v19  ;;  %vm1817_vm3 = vcmp.lt.f32.partialorder %v17743_v16, 0.0  ;;  %v18043_v16 = vld [vmem:[%s21897_s4 + $0x138] sm:$0xff] }
 0x24b   :  { %14600 = vmatpush1.bf16.msra.mxu1 %v17467_v45  ;;  %v17826_v27 = vpop.f32.mrb[38].mxu0  ;;  %vm1818_vm4 = vcmp.lt.f32.partialorder %v17824_v7, 0.0  ;;  %vm1819_vm5 = vcmp.lt.f32.partialorder %v17807_v22, 0.0  ;;  %v18097_v22 = vld [vmem:[%s21897_s4 + $0x140] sm:$0xff] }
 0x24c   :  { %14601 = vmatprep.subr.bf16.mxu1 %v21911_v35  ;;  %v17838_v56 = vpop.f32.mrb[39].mxu0  ;;  %v17840_v21 = vpop.eup %16353  ;;  %v871_v3 = vmul.f32 0.3275911, %v17844_v46  ;;  %16361 = vrcp.f32 %v919_v50 }
 0x24d   :  { %v17846_v41 = vpop.eup %16355  ;;  %v1065_v9 = vmul.f32 1.0614054, %v17840_v21 }
 0x24e   :  { %v1064_v2 = vmul.f32 1.0614054, %v17846_v41 }
 0x24f   :  { %14603 = vmatpush1.bf16.msra.mxu1 %v17485_v60  ;;  %v1115_v26 = vadd.f32 -1.4531521, %v1065_v9  ;;  %v918_v60 = vadd.f32 1.0, %v868_v52  ;;  %v1518_v52 = vmul.f32 %v818_v63, %v818_v63  ;;  %v21964_v9 = vmov 0.0|0.0  }
 0x250   :  { %v17854_v35 = vpop.f32.mrb[40].mxu0  ;;  %2941 = vmatprep.subr.mxu1 %v21923_v54  ;;  %v17864_v15 = vpop.eup %16357  ;;  %v1114_v45 = vadd.f32 -1.4531521, %v1064_v2  ;;  %v921_v54 = vadd.f32 1.0, %v871_v3 }
 0x251   :  { %21961 = vst [vmem:[#allocation19_spill] sm:$0xff] %v17854_v35  ;;  %v17862_v31 = vpop.f32.mrb[41].mxu0  ;;  %v1519_v35 = vmul.f32 %v819_v48, %v819_v48  ;;  %v17866_v53 = vpop.eup %16359  ;;  %v1165_v33 = vmul.f32 %v17840_v21, %v1115_v26  ;;  %v1067_v28 = vmul.f32 1.0614054, %v17864_v15  ;;  %16363 = vrcp.f32 %v918_v60 }
 0x252   :  { %16365 = vpow2.f32 %v1644_v30  ;;  %v1164_v3 = vmul.f32 %v17846_v41, %v1114_v45  ;;  %v1066_v50 = vmul.f32 1.0614054, %v17866_v53  ;;  %v1646_v48 = vmul.f32 1.442695, %v1566_v36 }
 0x253   :  { %2942 = vmatpush1.msra.mxu1 %v17515_v40  ;;  %v21966_v60 = vunpack.c.h.bf16 %v17730_v62  ;;  %v1215_v63 = vadd.f32 1.4214138, %v1165_v33  ;;  %16367 = vpow2.f32 %v1642_v12  ;;  %v1117_v19 = vadd.f32 -1.4531521, %v1067_v28 }
 0x254   :  { %v17871_v61 = vpop.f32.mrb[42].mxu0  ;;  %2958 = vmatmul.mubr.f32.vlgmr.msra.gmra.mrb[42].mxu1 %v21963_v32  ;;  %14652 = vmatprep.subr.bf16.mxu1 %v21964_v9  ;;  %v17885_v26 = vmul.f32 0.70710677, %v17860_v43  ;;  %v1214_v45 = vadd.f32 1.4214138, %v1164_v3  ;;  %v1569_v32 = vsub.f32 0.0, %v1519_v35  ;;  %16369 = vrcp.f32 %v921_v54 }
 0x255   :  { %21962 = vst [vmem:[#allocation20_spill] sm:$0xff] %v17871_v61  ;;  %v17878_v2 = vpop.f32.mrb[43].mxu0  ;;  %14654 = vmatpush1.bf16.msra.mxu1 %v16971_v39  ;;  %11120 = vmatprep.mubr.msk.f32.mxu1 %vm2057_vm0, %v21966_v60  ;;  %v1116_v30 = vadd.f32 -1.4531521, %v1066_v50  ;;  %v1265_v36 = vmul.f32 %v17840_v21, %v1215_v63  ;;  %v1568_v61 = vsub.f32 0.0, %v1518_v52  ;;  %v21968_v12 = vunpack.c.l.bf16 %v17730_v62 }
 0x256   :  { %21965 = vst [vmem:[#allocation21_spill] sm:$0xff] %v17878_v2  ;;  %14655 = vmatprep.subr.bf16.mxu1 %v21964_v9  ;;  %v1167_v2 = vmul.f32 %v17864_v15, %v1117_v19  ;;  %v820_v39 = vand.u32 2147483647, %v17885_v26  ;;  %v1264_v33 = vmul.f32 %v17846_v41, %v1214_v45  ;;  %16371 = vpow2.f32 %v1648_v55 }
 0x257   :  { %v1166_v28 = vmul.f32 %v17866_v53, %v1116_v30  ;;  %v616_v35 = vmul.f32 %v17695_v18, %v17788_v10  ;;  %v21970_v52 = vunpack.c.h.bf16 %v17740_v25  ;;  %v1315_v3 = vadd.f32 -0.28449672, %v1265_v36  ;;  %v17913_v36 = vpop.eup %16361 }
 0x258   :  { %v17891_v60 = vpop.f32.mrb[44].mxu0  ;;  %2963 = vmatmul.mubr.f32.gmra.mrb[44].mxu1 %v21968_v12  ;;  %v1217_v50 = vadd.f32 1.4214138, %v1167_v2  ;;  %16373 = vpow2.f32 %v1646_v48  ;;  %v870_v62 = vmul.f32 0.3275911, %v820_v39  ;;  %v21973_v48 = vunpack.c.l.bf16 %v17740_v25 }
 0x259   :  { %21967 = vst [vmem:[#allocation22_spill] sm:$0xff] %v17891_v60  ;;  %v17899_v54 = vpop.f32.mrb[45].mxu0  ;;  %14657 = vmatpush1.bf16.msra.mxu1 %v16988_v8  ;;  %11121 = vmatprep.mubr.msk.f32.mxu1 %vm2057_vm0, %v21970_v52  ;;  %v1314_v55 = vadd.f32 -0.28449672, %v1264_v33  ;;  %v1216_v63 = vadd.f32 1.4214138, %v1166_v28  ;;  %v17907_v45 = vadd.f32 %v17702_v42, %v616_v35  ;;  %v1365_v10 = vmul.f32 %v17840_v21, %v1315_v3 }
 0x25a   :  { %21969 = vst [vmem:[#allocation23_spill] sm:$0xff] %v17899_v54  ;;  %14658 = vmatprep.subr.bf16.mxu1 %v21964_v9  ;;  %v1652_v19 = vmul.f32 1.442695, %v1569_v32  ;;  %v1267_v30 = vmul.f32 %v17864_v15, %v1217_v50  ;;  %v1650_v12 = vmul.f32 1.442695, %v1568_v61  ;;  %v920_v54 = vadd.f32 1.0, %v870_v62 }
 0x25b   :  { %21971 = vst [vmem:[#allocation24_spill] sm:$0xff] %v17907_v45  ;;  %v1364_v2 = vmul.f32 %v17846_v41, %v1314_v55  ;;  %v17920_v32 = vmul.f32 0.5, %v17734_v0  ;;  %v1266_v33 = vmul.f32 %v17866_v53, %v1216_v63  ;;  %v17924_v28 = vmul.f32 0.70710677, %v17907_v45  ;;  %v17928_v35 = vpop.eup %16363 }
 0x25c   :  { %v17911_v60 = vpop.f32.mrb[46].mxu0  ;;  %2968 = vmatmul.mubr.f32.gmra.mrb[46].mxu1 %v21973_v48  ;;  %v21975_v25 = vunpack.c.h.bf16 %v17751_v49  ;;  %v1415_v52 = vadd.f32 0.2548296, %v1365_v10  ;;  %v1317_v0 = vadd.f32 -0.28449672, %v1267_v30  ;;  %16375 = vrcp.f32 %v920_v54  ;;  %v16366_v50 = vpop.eup %16365 }
 0x25d   :  { %21972 = vst [vmem:[#allocation25_spill] sm:$0xff] %v17911_v60  ;;  %v17926_v61 = vpop.f32.mrb[47].mxu0  ;;  %14660 = vmatpush1.bf16.msra.mxu1 %v17008_v17  ;;  %v1069_v3 = vmul.f32 1.0614054, %v17913_v36  ;;  %v1414_v62 = vadd.f32 0.2548296, %v1364_v2  ;;  %16377 = vpow2.f32 %v1652_v19  ;;  %v16368_v48 = vpop.eup %16367  ;;  %v21976_v54 = vunpack.c.l.bf16 %v17751_v49 }
 0x25e   :  { %21974 = vst [vmem:[#allocation26_spill] sm:$0xff] %v17926_v61  ;;  %11122 = vmatprep.mubr.msk.f32.mxu1 %vm2057_vm0, %v21975_v25  ;;  %14661 = vmatprep.subr.bf16.mxu1 %v21964_v9  ;;  %v1316_v55 = vadd.f32 -0.28449672, %v1266_v33  ;;  %v1068_v63 = vmul.f32 1.0614054, %v17928_v35  ;;  %v1465_v61 = vmul.f32 %v17840_v21, %v1415_v52  ;;  %v1367_v25 = vmul.f32 %v17864_v15, %v1317_v0  ;;  %v17942_v30 = vpop.eup %16369 }
 0x25f   :  { %v1119_v10 = vadd.f32 -1.4531521, %v1069_v3  ;;  %16379 = vpow2.f32 %v1650_v12  ;;  %v1464_v2 = vmul.f32 %v17846_v41, %v1414_v62  ;;  %v1520_v17 = vmul.f32 %v820_v39, %v820_v39 }
 0x260   :  { %v17940_v60 = vpop.f32.mrb[48].mxu0  ;;  %2973 = vmatmul.mubr.f32.gmra.mrb[48].mxu1 %v21976_v54  ;;  %v1366_v19 = vmul.f32 %v17866_v53, %v1316_v55  ;;  %v1118_v33 = vadd.f32 -1.4531521, %v1068_v63  ;;  %v21978_v21 = vunpack.c.h.bf16 %v17761_v6  ;;  %v1715_v12 = vmul.f32 %v16366_v50, %v1465_v61  ;;  %v16372_v3 = vpop.eup %16371 }
 0x261   :  { %v17948_v45 = vpop.f32.mrb[49].mxu0  ;;  %14663 = vmatpush1.bf16.msra.mxu1 %v17042_v51  ;;  %v1417_v52 = vadd.f32 0.2548296, %v1367_v25  ;;  %v1169_v0 = vmul.f32 %v17913_v36, %v1119_v10  ;;  %v1071_v49 = vmul.f32 1.0614054, %v17942_v30  ;;  %v1714_v41 = vmul.f32 %v16368_v48, %v1464_v2 }
 0x262   :  { %21977 = vst [vmem:[#allocation27_spill] sm:$0xff] %v17948_v45  ;;  %11123 = vmatprep.mubr.msk.f32.mxu1 %vm2057_vm0, %v21978_v21  ;;  %14664 = vmatprep.subr.bf16.mxu1 %v21964_v9  ;;  %v1416_v62 = vadd.f32 0.2548296, %v1366_v19  ;;  %v1168_v39 = vmul.f32 %v17928_v35, %v1118_v33  ;;  %v17959_v55 = vand.u32 2147483647, %v17924_v28  ;;  %v16374_v63 = vpop.eup %16373  ;;  %v1765_v54 = vsub.f32 1.0, %v1715_v12 }
 0x263   :  { %v1467_v21 = vmul.f32 %v17864_v15, %v1417_v52  ;;  %v1219_v61 = vadd.f32 1.4214138, %v1169_v0  ;;  %v1121_v50 = vadd.f32 -1.4531521, %v1071_v49  ;;  %v21979_v25 = vunpack.c.l.bf16 %v17761_v6 }
 0x264   :  { %v1764_v10 = vsub.f32 1.0, %v1714_v41  ;;  %v1466_v45 = vmul.f32 %v17866_v53, %v1416_v62  ;;  %v1218_v48 = vadd.f32 1.4214138, %v1168_v39  ;;  %v21980_v2 = vunpack.c.h.bf16 %v17773_v29 }
 0x265   :  { %2978 = vmatmul.mubr.f32.gmra.mrb[50].mxu1 %v21979_v25  ;;  %v1865_v19 = vsub.f32 0.0, %v1765_v54  ;;  %v1717_v33 = vmul.f32 %v16372_v3, %v1467_v21  ;;  %v1269_v15 = vmul.f32 %v17913_v36, %v1219_v61  ;;  %v17974_v6 = vmul.f32 %v17844_v46, %v17844_v46 }
 0x266   :  { %14666 = vmatpush1.bf16.msra.mxu1 %v17140_v59  ;;  %11124 = vmatprep.mubr.msk.f32.mxu1 %vm2057_vm0, %v21980_v2  ;;  %v1864_v53 = vsub.f32 0.0, %v1764_v10  ;;  %v1716_v12 = vmul.f32 %v16374_v63, %v1466_v45  ;;  %v1268_v52 = vmul.f32 %v17928_v35, %v1218_v48  ;;  %v873_v0 = vmul.f32 0.3275911, %v17959_v55  ;;  %v17979_v49 = vpop.eup %16375 }
 0x267   :  { %14667 = vmatprep.subr.bf16.mxu1 %v21964_v9  ;;  %v1915_v3 = vsel %vm1815_vm15, %v1865_v19, %v1765_v54  ;;  %v1319_v41 = vadd.f32 -0.28449672, %v1269_v15  ;;  %v1171_v62 = vmul.f32 %v17942_v30, %v1121_v50  ;;  %v1570_v39 = vsub.f32 0.0, %v1520_v17  ;;  %v16378_v21 = vpop.eup %16377 }
 0x268   :  { %v21981_v46 = vunpack.c.l.bf16 %v17773_v29  ;;  %v1914_v45 = vsel %vm1814_vm1, %v1864_v53, %v1764_v10  ;;  %v1767_v63 = vsub.f32 1.0, %v1717_v33  ;;  %v1766_v61 = vsub.f32 1.0, %v1716_v12 }
 0x269   :  { %v1318_v25 = vadd.f32 -0.28449672, %v1268_v52  ;;  %v16380_v48 = vpop.eup %16379  ;;  %v1965_v54 = vadd.f32 1.0, %v1915_v3  ;;  %v1964_v50 = vadd.f32 1.0, %v1914_v45  ;;  %v1369_v17 = vmul.f32 %v17913_v36, %v1319_v41 }
 0x26a   :  { %2983 = vmatmul.mubr.f32.gmra.mrb[52].mxu1 %v21981_v46  ;;  %v615_v29 = vmul.f32 %v17695_v18, %v17800_v34  ;;  %v1866_v24 = vsub.f32 0.0, %v1766_v61  ;;  %v1070_v2 = vmul.f32 1.0614054, %v17979_v49  ;;  %v923_v19 = vadd.f32 1.0, %v873_v0  ;;  %v18004_v34 = vld [vmem:[%s21897_s4 + $0x128] sm:$0xff] }
 0x26b   :  { %14669 = vmatpush1.bf16.msra.mxu1 %v17173_v20  ;;  %11125 = vmatprep.mubr.msk.f32.mxu1 %vm2057_vm0, %v21982_v47  ;;  %v1368_v10 = vmul.f32 %v17928_v35, %v1318_v25  ;;  %v2014_v33 = vmul.f32 %v1964_v50, %v17852_v14  ;;  %v1419_v15 = vadd.f32 0.2548296, %v1369_v17  ;;  %v1221_v53 = vadd.f32 1.4214138, %v1171_v62 }
 0x26c   :  { %14670 = vmatprep.subr.bf16.mxu1 %v21964_v9  ;;  %v1654_v12 = vmul.f32 1.442695, %v1570_v39  ;;  %v21983_v52 = vunpack.c.l.bf16 %v17785_v58  ;;  %v1867_v3 = vsub.f32 0.0, %v1767_v63  ;;  %v1916_v41 = vsel %vm1816_vm2, %v1866_v24, %v1766_v61 }
 0x26d   :  { %v1418_v46 = vadd.f32 0.2548296, %v1368_v10  ;;  %v1120_v45 = vadd.f32 -1.4531521, %v1070_v2  ;;  %v21984_v14 = vunpack.c.h.bf16 %v17794_v13  ;;  %v2015_v58 = vmul.f32 %v1965_v54, %v17830_v44 }
 0x26e   :  { %2988 = vmatmul.mubr.f32.gmra.mrb[54].mxu1 %v21983_v52  ;;  %v18014_v0 = vpack.c.bf16 %v2014_v33, %v17745_v11  ;;  %v1966_v62 = vadd.f32 1.0, %v1916_v41  ;;  %v1469_v39 = vmul.f32 %v17913_v36, %v1419_v15  ;;  %16381 = vrcp.f32 %v923_v19  ;;  %v21995_v19 = vld [vmem:[#allocation17_spill] sm:$0xff] }
 0x26f   :  { %14672 = vmatpush1.bf16.msra.mxu1 %v17190_v5  ;;  %11169 = vmatprep.mubr.msk.f32.mxu1 %vm2057_vm0, %v21984_v14  ;;  %v1468_v61 = vmul.f32 %v17928_v35, %v1418_v46  ;;  %v1170_v25 = vmul.f32 %v17979_v49, %v1120_v45  ;;  %v18026_v44 = vadd.f32 %v17702_v42, %v615_v29  ;;  %16383 = vpow2.f32 %v1654_v12 }
 0x270   :  { %21985 = vst [vmem:[#allocation28_spill] sm:$0xff] %v18014_v0  ;;  %14673 = vmatprep.subr.bf16.mxu1 %v21964_v9  ;;  %v2016_v36 = vmul.f32 %v1966_v62, %v17920_v32  ;;  %v1917_v54 = vsel %vm1817_vm3, %v1867_v3, %v1767_v63  ;;  %v1719_v50 = vmul.f32 %v16378_v21, %v1469_v39  ;;  %v1571_v2 = vsub.f32 0.0, %v17974_v6 }
 0x271   :  { %v1718_v17 = vmul.f32 %v16380_v48, %v1468_v61  ;;  %v1220_v24 = vadd.f32 1.4214138, %v1170_v25  ;;  %v1271_v29 = vmul.f32 %v17942_v30, %v1221_v53  ;;  %v18047_v63 = vmul.f32 0.70710677, %v18026_v44 }
 0x272   :  { %v18035_v10 = vpack.c.bf16 %v2016_v36, %v2015_v58  ;;  %v618_v48 = vmul.f32 %v17695_v18, %v17826_v27  ;;  %v717_v6 = vmul.f32 0.5, %v17724_v57  ;;  %v1967_v33 = vadd.f32 1.0, %v1917_v54 }
 0x273   :  { %14675 = vmatpush1.bf16.msra.mxu1 %v17237_v37  ;;  %v1768_v32 = vsub.f32 1.0, %v1718_v17  ;;  %v1270_v21 = vmul.f32 %v17979_v49, %v1220_v24  ;;  %v1769_v15 = vsub.f32 1.0, %v1719_v50  ;;  %v822_v52 = vand.u32 2147483647, %v18047_v63 }
 0x274   :  { %21986 = vst [vmem:[#allocation29_spill] sm:$0xff] %v18035_v10  ;;  %14676 = vmatprep.subr.bf16.mxu1 %v21964_v9  ;;  %v718_v41 = vmul.f32 0.5, %v17803_v23  ;;  %v1656_v46 = vmul.f32 1.442695, %v1571_v2  ;;  %v18059_v27 = vadd.f32 %v17702_v42, %v618_v48  ;;  %v1321_v45 = vadd.f32 -0.28449672, %v1271_v29 }
 0x275   :  { %v1868_v53 = vsub.f32 0.0, %v1768_v32  ;;  %v1320_v12 = vadd.f32 -0.28449672, %v1270_v21  ;;  %v872_v14 = vmul.f32 0.3275911, %v822_v52  ;;  %v2017_v62 = vmul.f32 %v1967_v33, %v717_v6  ;;  %v21987_v48 = vld [vmem:[#allocation15_spill] sm:$0xff] }
 0x276   :  { %v1869_v23 = vsub.f32 0.0, %v1769_v15  ;;  %v18068_v54 = vmul.f32 0.70710677, %v18059_v27  ;;  %16385 = vpow2.f32 %v1656_v46  ;;  %v617_v29 = vmul.f32 %v17695_v18, %v17838_v56 }
 0x277   :  { %14678 = vmatpush1.bf16.msra.mxu1 %v17349_v38  ;;  %v1918_v57 = vsel %vm1818_vm4, %v1868_v53, %v1768_v32  ;;  %v1370_v7 = vmul.f32 %v17979_v49, %v1320_v12  ;;  %v922_v36 = vadd.f32 1.0, %v872_v14  ;;  %v1371_v2 = vmul.f32 %v17942_v30, %v1321_v45  ;;  %v21990_v14 = vld [vmem:[#allocation19_spill] sm:$0xff] }
 0x278   :  { %14679 = vmatprep.subr.bf16.mxu1 %v21964_v9  ;;  %v1968_v39 = vadd.f32 1.0, %v1918_v57  ;;  %v18065_v61 = vpop.eup %16381  ;;  %v825_v21 = vand.u32 2147483647, %v18068_v54  ;;  %v719_v6 = vmul.f32 0.5, %v21987_v48  ;;  %vm1820_vm6 = vcmp.lt.f32.partialorder %v17885_v26, 0.0  ;;  %v21989_v57 = vld [vmem:[#allocation9_spill] sm:$0xff] }
 0x279   :  { %v1420_v25 = vadd.f32 0.2548296, %v1370_v7  ;;  %v16384_v50 = vpop.eup %16383  ;;  %v1073_v24 = vmul.f32 1.0614054, %v18065_v61  ;;  %16387 = vrcp.f32 %v922_v36  ;;  %v1919_v12 = vsel %vm1819_vm5, %v1869_v23, %v1769_v15 }
 0x27a   :  { %v2018_v17 = vmul.f32 %v1968_v39, %v718_v41  ;;  %v1523_v41 = vmul.f32 %v17959_v55, %v17959_v55  ;;  %v875_v46 = vmul.f32 0.3275911, %v825_v21  ;;  %v1522_v45 = vmul.f32 %v822_v52, %v822_v52 }
 0x27b   :  { %14681 = vmatpush1.bf16.msra.mxu1 %v17421_v1  ;;  %v1470_v32 = vmul.f32 %v17979_v49, %v1420_v25  ;;  %v1123_v53 = vadd.f32 -1.4531521, %v1073_v24  ;;  %v18089_v7 = vadd.f32 %v17702_v42, %v617_v29  ;;  %v1421_v55 = vadd.f32 0.2548296, %v1371_v2  ;;  %v21991_v2 = vld [vmem:[#allocation10_spill] sm:$0xff] }
 0x27c   :  { %14682 = vmatprep.subr.bf16.mxu1 %v21964_v9  ;;  %v18079_v33 = vpack.c.bf16 %v2018_v17, %v2017_v62  ;;  %v620_v62 = vmul.f32 %v17695_v18, %v21990_v14  ;;  %v925_v39 = vadd.f32 1.0, %v875_v46  ;;  %v619_v23 = vmul.f32 %v17695_v18, %v17862_v31 }
 0x27d   :  { %v1720_v56 = vmul.f32 %v16384_v50, %v1470_v32  ;;  %v1173_v49 = vmul.f32 %v18065_v61, %v1123_v53  ;;  %v1969_v52 = vadd.f32 1.0, %v1919_v12  ;;  %v18102_v36 = vmul.f32 0.70710677, %v18089_v7 }
 0x27e   :  { %21988 = vst [vmem:[#allocation15_spill] sm:$0xff] %v18079_v33  ;;  %v18105_v50 = vadd.f32 %v17702_v42, %v620_v62  ;;  %v1573_v24 = vsub.f32 0.0, %v1523_v41  ;;  %16389 = vrcp.f32 %v925_v39  ;;  %v18108_v29 = vadd.f32 %v17702_v42, %v619_v23 }
 0x27f   :  { %14684 = vmatpush1.bf16.msra.mxu1 %v21989_v57  ;;  %v1770_v15 = vsub.f32 1.0, %v1720_v56  ;;  %v1223_v25 = vadd.f32 1.4214138, %v1173_v49  ;;  %v720_v31 = vmul.f32 0.5, %v17860_v43  ;;  %v1572_v48 = vsub.f32 0.0, %v1522_v45  ;;  %v18125_v43 = vld [vmem:[%s21897_s4 + $0x148] sm:$0xff] }
 0x280   :  { %14685 = vmatprep.subr.bf16.mxu1 %v21964_v9  ;;  %v824_v53 = vand.u32 2147483647, %v18102_v36  ;;  %v21992_v12 = vmov 0.0   ;;  %v18120_v49 = vmul.f32 0.70710677, %v18105_v50  ;;  %v16386_v14 = vpop.eup %16385  ;;  %v2019_v45 = vmul.f32 %v1969_v52, %v719_v6 }
 0x281   :  { %v1870_v17 = vsub.f32 0.0, %v1770_v15  ;;  %v1273_v46 = vmul.f32 %v18065_v61, %v1223_v25  ;;  %v1471_v62 = vmul.f32 %v17942_v30, %v1421_v55  ;;  %v1660_v26 = vmul.f32 1.442695, %v1573_v24  ;;  %v21998_v55 = vld [vmem:[#allocation16_spill] sm:$0xff] }
 0x282   :  { %v874_v23 = vmul.f32 0.3275911, %v824_v53  ;;  %v827_v25 = vand.u32 2147483647, %v18120_v49  ;;  %v1658_v3 = vmul.f32 1.442695, %v1572_v48  ;;  %v21993_v30 = vunpack.c.l.bf16 %v17794_v13 }
 0x283   :  { %14687 = vmatpush1.bf16.msra.mxu1 %v21991_v2  ;;  %v1920_v41 = vsel %vm1820_vm6, %v1870_v17, %v1770_v15  ;;  %v18128_v56 = vpop.eup %16387  ;;  %v1525_v15 = vmul.f32 %v825_v21, %v825_v21  ;;  %v18132_v17 = vmul.f32 0.70710677, %v18108_v29  ;;  %v1323_v21 = vadd.f32 -0.28449672, %v1273_v46 }
 0x284   :  { %3493 = vmatprep.subr.mxu1 %v21992_v12  ;;  %v1970_v39 = vadd.f32 1.0, %v1920_v41  ;;  %v1072_v58 = vmul.f32 1.0614054, %v18128_v56  ;;  %v924_v6 = vadd.f32 1.0, %v874_v23  ;;  %v877_v52 = vmul.f32 0.3275911, %v827_v25 }
 0x285   :  { %v826_v24 = vand.u32 2147483647, %v18132_v17  ;;  %v21994_v41 = vld [vmem:[#allocation12_spill] sm:$0xff]  ;;  %v21996_v35 = vunpack.c.h.bf16 %v21995_v19  ;;  %v1575_v46 = vsub.f32 0.0, %v1525_v15  ;;  %v18152_v47 = vmul.f32 0.5, %v21998_v55 }
 0x286   :  { %v2020_v32 = vmul.f32 %v1970_v39, %v720_v31  ;;  %v18145_v31 = vmul.f32 %v16386_v14, %v1471_v62  ;;  %v1122_v39 = vadd.f32 -1.4531521, %v1072_v58  ;;  %16391 = vrcp.f32 %v924_v6  ;;  %v22000_v62 = vld [vmem:[#allocation20_spill] sm:$0xff] }
 0x287   :  { %3494 = vmatpush1.msra.mxu1 %v17515_v40  ;;  %v927_v23 = vadd.f32 1.0, %v877_v52  ;;  %16393 = vpow2.f32 %v1660_v26  ;;  %v1373_v58 = vmul.f32 %v18065_v61, %v1323_v21  ;;  %v622_v15 = vmul.f32 %v17695_v18, %v22000_v62 }
 0x288   :  { %14694 = vmatprep.subr.bf16.mxu1 %v21964_v9  ;;  %3510 = vmatmul.mubr.f32.vlgmr.msra.gmra.mrb[56].mxu1 %v21993_v30  ;;  %v18147_v48 = vpack.c.bf16 %v2020_v32, %v2019_v45  ;;  %v876_v30 = vmul.f32 0.3275911, %v826_v24  ;;  %v1172_v11 = vmul.f32 %v18128_v56, %v1122_v39  ;;  %v18155_v14 = vpop.eup %16389  ;;  %v21999_v32 = vunpack.c.l.bf16 %v21995_v19  ;;  %v22002_v19 = vld [vmem:[#allocation18_spill] sm:$0xff] }
 0x289   :  { %14696 = vmatpush1.bf16.msra.mxu1 %v21994_v41  ;;  %11170 = vmatprep.mubr.msk.f32.mxu1 %vm2057_vm0, %v21996_v35  ;;  %v1524_v35 = vmul.f32 %v824_v53, %v824_v53  ;;  %16395 = vpow2.f32 %v1658_v3  ;;  %v22001_v6 = vunpack.c.h.bf16 %v18004_v34  ;;  %v1771_v53 = vsub.f32 1.0, %v18145_v31 }
 0x28a   :  { %21997 = vst [vmem:[#allocation9_spill] sm:$0xff] %v18147_v48  ;;  %14697 = vmatprep.subr.bf16.mxu1 %v21964_v9  ;;  %v926_v45 = vadd.f32 1.0, %v876_v30  ;;  %v1222_v26 = vadd.f32 1.4214138, %v1172_v11  ;;  %v1075_v55 = vmul.f32 1.0614054, %v18155_v14  ;;  %16397 = vrcp.f32 %v927_v23 }
 0x28b   :  { %vm1821_vm7 = vcmp.lt.f32.partialorder %v22002_v19, 0.0  ;;  %v1664_v3 = vmul.f32 1.442695, %v1575_v46  ;;  %v1527_v21 = vmul.f32 %v827_v25, %v827_v25  ;;  %v18171_v52 = vadd.f32 %v17702_v42, %v622_v15  ;;  %v22005_v11 = vld [vmem:[#allocation24_spill] sm:$0xff]  ;;  %v22007_v46 = vld [vmem:[#allocation21_spill] sm:$0xff]  ;;  %v22008_v15 = vld [vmem:[#allocation14_spill] sm:$0xff] }
 0x28c   :  { %3515 = vmatmul.mubr.f32.gmra.mrb[58].mxu1 %v21999_v32  ;;  %v1272_v39 = vmul.f32 %v18128_v56, %v1222_v26  ;;  %v1125_v30 = vadd.f32 -1.4531521, %v1075_v55  ;;  %v1574_v32 = vsub.f32 0.0, %v1524_v35  ;;  %16399 = vrcp.f32 %v926_v45 }
 0x28d   :  { %14699 = vmatpush1.bf16.msra.mxu1 %v16988_v8  ;;  %11171 = vmatprep.mubr.msk.f32.mxu1 %vm2057_vm0, %v22001_v6  ;;  %22003 = vst [vmem:[#allocation19_spill] sm:$0xff] %v18171_v52  ;;  %v22004_v31 = vunpack.c.l.bf16 %v18004_v34  ;;  %v18177_v62 = vmul.f32 0.5, %v22005_v11  ;;  %v1423_v23 = vadd.f32 0.2548296, %v1373_v58  ;;  %v18180_v6 = vmul.f32 0.70710677, %v18171_v52 }
 0x28e   :  { %14700 = vmatprep.subr.bf16.mxu1 %v21964_v9  ;;  %v621_v25 = vmul.f32 %v17695_v18, %v22007_v46  ;;  %v22009_v26 = vunpack.c.h.bf16 %v18021_v4  ;;  %v1871_v35 = vsub.f32 0.0, %v1771_v53  ;;  %v1322_v45 = vadd.f32 -0.28449672, %v1272_v39 }
 0x28f   :  { %22006 = vst [vmem:[#allocation10_spill] sm:$0xff] %v18180_v6  ;;  %v1175_v34 = vmul.f32 %v18155_v14, %v1125_v30  ;;  %v1526_v55 = vmul.f32 %v826_v24, %v826_v24  ;;  %16401 = vpow2.f32 %v1664_v3  ;;  %v1577_v58 = vsub.f32 0.0, %v1527_v21 }
 0x290   :  { %3520 = vmatmul.mubr.f32.gmra.mrb[60].mxu1 %v22004_v31  ;;  %v18191_v31 = vand.u32 2147483647, %v18180_v6  ;;  %v18194_v18 = vadd.f32 %v17702_v42, %v621_v25  ;;  %v18196_v11 = vpop.eup %16391  ;;  %v1372_v39 = vmul.f32 %v18128_v56, %v1322_v45  ;;  %v1662_v30 = vmul.f32 1.442695, %v1574_v32 }
 0x291   :  { %14702 = vmatpush1.bf16.msra.mxu1 %v22008_v15  ;;  %11172 = vmatprep.mubr.msk.f32.mxu1 %vm2057_vm0, %v22009_v26  ;;  %v18198_v46 = vpop.f32.mrb[0].mxu1  ;;  %v18201_v26 = vmul.f32 0.5, %v18026_v44  ;;  %v1225_v24 = vadd.f32 1.4214138, %v1175_v34  ;;  %v22011_v3 = vunpack.c.l.bf16 %v18021_v4  ;;  %v1473_v21 = vmul.f32 %v18065_v61, %v1423_v23  ;;  %v16394_v48 = vpop.eup %16393 }
 0x292   :  { %14703 = vmatprep.subr.bf16.mxu1 %v21964_v9  ;;  %22010 = vst [vmem:[#allocation17_spill] sm:$0xff] %v18198_v46  ;;  %v2147_v13 = vpop.f32.mrb[1].mxu1  ;;  %vm1822_vm8 = vcmp.lt.f32.partialorder %v18047_v63, 0.0  ;;  %v1074_v42 = vmul.f32 1.0614054, %v18196_v11  ;;  %v22012_v44 = vunpack.c.h.bf16 %v18043_v16  ;;  %v1576_v4 = vsub.f32 0.0, %v1526_v55 }
 0x293   :  { %v879_v25 = vmul.f32 0.3275911, %v18191_v31  ;;  %v1422_v32 = vadd.f32 0.2548296, %v1372_v39  ;;  %v1275_v13 = vmul.f32 %v18155_v14, %v1225_v24  ;;  %v18216_v45 = vmul.f32 0.70710677, %v18194_v18  ;;  %v16396_v61 = vpop.eup %16395 }
 0x294   :  { %3525 = vmatmul.mubr.f32.gmra.mrb[62].mxu1 %v22011_v3  ;;  %v1921_v23 = vsel %vm1821_vm7, %v1871_v35, %v1771_v53  ;;  %v1124_v34 = vadd.f32 -1.4531521, %v1074_v42  ;;  %v18221_v3 = vmul.f32 1.442695, %v1577_v58  ;;  %v18223_v10 = vpop.eup %16397  ;;  %v18230_v55 = vld [vmem:[%s21897_s4 + $0x150] sm:$0xff]  ;;  %16403 = vpow2.f32 %v1662_v30 }
 0x295   :  { %14705 = vmatpush1.bf16.msra.mxu1 %v17042_v51  ;;  %11173 = vmatprep.mubr.msk.f32.mxu1 %vm2057_vm0, %v22012_v44  ;;  %v929_v33 = vadd.f32 1.0, %v879_v25  ;;  %v18225_v44 = vpop.f32.mrb[2].mxu1  ;;  %v1472_v39 = vmul.f32 %v18128_v56, %v1422_v32  ;;  %v1325_v24 = vadd.f32 -0.28449672, %v1275_v13  ;;  %v828_v19 = vand.u32 2147483647, %v18216_v45 }
 0x296   :  { %14706 = vmatprep.subr.bf16.mxu1 %v21964_v9  ;;  %22013 = vst [vmem:[#allocation16_spill] sm:$0xff] %v18225_v44  ;;  %v2152_v53 = vpop.f32.mrb[3].mxu1  ;;  %v22014_v35 = vunpack.c.l.bf16 %v18043_v16  ;;  %v18236_v58 = vmul.f32 %v16394_v48, %v1473_v21  ;;  %v1174_v42 = vmul.f32 %v18196_v11, %v1124_v34  ;;  %v1077_v25 = vmul.f32 1.0614054, %v18223_v10  ;;  %v18240_v0 = vpop.eup %16399 }
 0x297   :  { %16405 = vrcp.f32 %v929_v33  ;;  %v22015_v56 = vunpack.c.h.bf16 %v18097_v22  ;;  %v1722_v30 = vmul.f32 %v16396_v61, %v1472_v39  ;;  %v1375_v32 = vmul.f32 %v18155_v14, %v1325_v24 }
 0x298   :  { %3530 = vmatmul.mubr.f32.gmra.mrb[64].mxu1 %v22014_v35  ;;  %v1666_v16 = vmul.f32 1.442695, %v1576_v4  ;;  %v878_v13 = vmul.f32 0.3275911, %v828_v19  ;;  %v3687_v48 = vunpack.c.h.bf16 %v18230_v55  ;;  %vm1823_vm9 = vcmp.lt.f32.partialorder %v17924_v28, 0.0 }
 0x299   :  { %14708 = vmatpush1.bf16.msra.mxu1 %v17140_v59  ;;  %11174 = vmatprep.mubr.msk.f32.mxu1 %vm2057_vm0, %v22015_v56  ;;  %v1224_v33 = vadd.f32 1.4214138, %v1174_v42  ;;  %v1127_v21 = vadd.f32 -1.4531521, %v1077_v25  ;;  %v1076_v34 = vmul.f32 1.0614054, %v18240_v0  ;;  %v16402_v39 = vpop.eup %16401  ;;  %v22017_v4 = vunpack.c.l.bf16 %v18097_v22 }
 0x29a   :  { %14709 = vmatprep.subr.bf16.mxu1 %v21964_v9  ;;  %v18251_v53 = vpop.f32.mrb[4].mxu1  ;;  %v1971_v35 = vadd.f32 1.0, %v1921_v23  ;;  %v1772_v44 = vsub.f32 1.0, %v1722_v30  ;;  %v1425_v56 = vadd.f32 0.2548296, %v1375_v32  ;;  %v928_v61 = vadd.f32 1.0, %v878_v13 }
 0x29b   :  { %22016 = vst [vmem:[#allocation20_spill] sm:$0xff] %v18251_v53  ;;  %v2157_v24 = vpop.f32.mrb[5].mxu1  ;;  %v1274_v46 = vmul.f32 %v18196_v11, %v1224_v33  ;;  %v1177_v52 = vmul.f32 %v18223_v10, %v1127_v21  ;;  %v1126_v6 = vadd.f32 -1.4531521, %v1076_v34  ;;  %v18260_v42 = vld [vmem:[%s21895_s2] ss:$0 sm:$0xff]  ;;  %v22019_v30 = vunpack.c.h.bf16 %v18125_v43 }
 0x29c   :  { %3535 = vmatmul.mubr.f32.gmra.mrb[66].mxu1 %v22017_v4  ;;  %v22018_v25 = vld [vmem:[#allocation22_spill] sm:$0xff]  ;;  %v1773_v22 = vsub.f32 1.0, %v18236_v58  ;;  %v1872_v32 = vsub.f32 0.0, %v1772_v44  ;;  %v1475_v13 = vmul.f32 %v18155_v14, %v1425_v56  ;;  %16407 = vrcp.f32 %v928_v61 }
 0x29d   :  { %v624_v23 = vmul.f32 %v18260_v42, %v22018_v25  ;;  %14711 = vmatpush1.bf16.msra.mxu1 %v17173_v20  ;;  %11175 = vmatprep.mubr.msk.f32.mxu1 %vm2057_vm0, %v22019_v30  ;;  %v1324_v33 = vadd.f32 -0.28449672, %v1274_v46  ;;  %v1227_v21 = vadd.f32 1.4214138, %v1177_v52  ;;  %v1176_v34 = vmul.f32 %v18240_v0, %v1126_v6  ;;  %v18275_v24 = vld [vmem:[%s21896_s3] ss:$0 sm:$0xff] }
 0x29e   :  { %14712 = vmatprep.subr.bf16.mxu1 %v21964_v9  ;;  %v18280_v25 = vpop.f32.mrb[6].mxu1  ;;  %v2021_v58 = vmul.f32 %v1971_v35, %v18152_v47  ;;  %v1922_v14 = vsel %vm1822_vm8, %v1872_v32, %v1772_v44  ;;  %v18285_v56 = vmul.f32 %v16402_v39, %v1475_v13  ;;  %16409 = vpow2.f32 %v1666_v16  ;;  %v16404_v53 = vpop.eup %16403 }
 0x29f   :  { %v18278_v4 = vadd.f32 %v18275_v24, %v624_v23  ;;  %v2162_v52 = vpop.f32.mrb[7].mxu1  ;;  %v22020_v6 = vunpack.c.l.bf16 %v18125_v43  ;;  %v1972_v46 = vadd.f32 1.0, %v1922_v14  ;;  %v1374_v61 = vmul.f32 %v18196_v11, %v1324_v33  ;;  %v22021_v33 = vld [vmem:[#allocation23_spill] sm:$0xff] }
 0x2a0   :  { %v1277_v23 = vmul.f32 %v18223_v10, %v1227_v21  ;;  %v1226_v30 = vadd.f32 1.4214138, %v1176_v34  ;;  %v1873_v47 = vsub.f32 0.0, %v1773_v22  ;;  %16411 = vpow2.f32 %v18221_v3 }
 0x2a1   :  { %3540 = vmatmul.mubr.f32.gmra.mrb[68].mxu1 %v22020_v6  ;;  %v1528_v63 = vmul.f32 %v828_v19, %v828_v19  ;;  %v18295_v44 = vmul.f32 0.70710677, %v18278_v4  ;;  %v18297_v43 = vpop.eup %16405  ;;  %v2022_v16 = vmul.f32 %v1972_v46, %v18201_v26  ;;  %v1424_v35 = vadd.f32 0.2548296, %v1374_v61  ;;  %v18302_v13 = vpop.f32.mrb[8].mxu1 }
 0x2a2   :  { %14714 = vmatpush1.bf16.msra.mxu1 %v17190_v5  ;;  %11194 = vmatprep.mubr.msk.f32.mxu1 %vm2057_vm0, %v3687_v48  ;;  %v1327_v39 = vadd.f32 -0.28449672, %v1277_v23  ;;  %v1276_v32 = vmul.f32 %v18240_v0, %v1226_v30  ;;  %v1775_v48 = vsub.f32 1.0, %v18285_v56  ;;  %v1079_v3 = vmul.f32 1.0614054, %v18297_v43  ;;  %v2167_v34 = vpop.f32.mrb[9].mxu1 }
 0x2a3   :  { %14715 = vmatprep.subr.bf16.mxu1 %v21964_v9  ;;  %v18307_v19 = vand.u32 2147483647, %v18295_v44  ;;  %v623_v21 = vmul.f32 %v18260_v42, %v22021_v33  ;;  %v18311_v14 = vpack.c.bf16 %v2022_v16, %v2021_v58  ;;  %v1474_v26 = vmul.f32 %v18196_v11, %v1424_v35 }
 0x2a4   :  { %v1377_v52 = vmul.f32 %v18223_v10, %v1327_v39  ;;  %v1326_v6 = vadd.f32 -0.28449672, %v1276_v32  ;;  %v1923_v56 = vsel %vm1823_vm9, %v1873_v47, %v1773_v22  ;;  %v18319_v46 = vmul.f32 0.5, %v18059_v27 }
 0x2a5   :  { %v1129_v61 = vadd.f32 -1.4531521, %v1079_v3  ;;  %v881_v23 = vmul.f32 0.3275911, %v18307_v19  ;;  %vm1825_vm10 = vcmp.lt.f32.partialorder %v18068_v54, 0.0  ;;  %v1724_v58 = vmul.f32 %v16404_v53, %v1474_v26  ;;  %v18327_v35 = vpop.f32.mrb[10].mxu1 }
 0x2a6   :  { %14717 = vmatpush1.bf16.msra.mxu1 %v17237_v37  ;;  %v1376_v11 = vmul.f32 %v18240_v0, %v1326_v6  ;;  %v1578_v30 = vsub.f32 0.0, %v1528_v63  ;;  %v18325_v16 = vpop.eup %16407  ;;  %v1875_v28 = vsub.f32 0.0, %v1775_v48  ;;  %v1427_v22 = vadd.f32 0.2548296, %v1377_v52  ;;  %v2172_v39 = vpop.f32.mrb[11].mxu1 }
 0x2a7   :  { %14718 = vmatprep.subr.bf16.mxu1 %v21964_v9  ;;  %v931_v47 = vadd.f32 1.0, %v881_v23  ;;  %v18330_v27 = vadd.f32 %v18275_v24, %v623_v21  ;;  %v1973_v32 = vadd.f32 1.0, %v1923_v56  ;;  %v724_v3 = vmul.f32 0.5, %v18089_v7 }
 0x2a8   :  { %v1774_v33 = vsub.f32 1.0, %v1724_v58  ;;  %v1426_v34 = vadd.f32 0.2548296, %v1376_v11  ;;  %v16410_v53 = vpop.eup %16409  ;;  %vm1824_vm11 = vcmp.lt.f32.partialorder %v18102_v36, 0.0  ;;  %v1179_v63 = vmul.f32 %v18297_v43, %v1129_v61 }
 0x2a9   :  { %v1078_v26 = vmul.f32 1.0614054, %v18325_v16  ;;  %16413 = vrcp.f32 %v931_v47  ;;  %vm1826_vm12 = vcmp.lt.f32.partialorder %v18132_v17, 0.0  ;;  %v1670_v7 = vmul.f32 1.442695, %v1578_v30  ;;  %v18340_v56 = vpop.f32.mrb[12].mxu1 }
 0x2aa   :  { %14720 = vmatpush1.bf16.msra.mxu1 %v17349_v38  ;;  %v1874_v21 = vsub.f32 0.0, %v1774_v33  ;;  %v1476_v52 = vmul.f32 %v18240_v0, %v1426_v34  ;;  %v16412_v6 = vpop.eup %16411  ;;  %v1925_v23 = vsel %vm1825_vm10, %v1875_v28, %v1775_v48  ;;  %v1477_v58 = vmul.f32 %v18223_v10, %v1427_v22  ;;  %v2177_v47 = vpop.f32.mrb[13].mxu1 }
 0x2ab   :  { %14721 = vmatprep.subr.bf16.mxu1 %v21964_v9  ;;  %v1128_v61 = vadd.f32 -1.4531521, %v1078_v26  ;;  %v18346_v11 = vmul.f32 0.70710677, %v18330_v27  ;;  %v2023_v39 = vmul.f32 %v1973_v32, %v18177_v62  ;;  %v1529_v30 = vmul.f32 %v18191_v31, %v18191_v31  ;;  %v22022_v62 = vld [vmem:[#allocation25_spill] sm:$0xff] }
 0x2ac   :  { %v1924_v0 = vsel %vm1824_vm11, %v1874_v21, %v1774_v33  ;;  %v1726_v34 = vmul.f32 %v16410_v53, %v1476_v52  ;;  %v1229_v48 = vadd.f32 1.4214138, %v1179_v63  ;;  %v1975_v22 = vadd.f32 1.0, %v1925_v23 }
 0x2ad   :  { %v1974_v54 = vadd.f32 1.0, %v1924_v0  ;;  %v1178_v10 = vmul.f32 %v18325_v16, %v1128_v61  ;;  %v830_v28 = vand.u32 2147483647, %v18346_v11  ;;  %16415 = vpow2.f32 %v1670_v7 }
 0x2ae   :  { %14723 = vmatpush1.bf16.msra.mxu1 %v17421_v1  ;;  %v1776_v26 = vsub.f32 1.0, %v1726_v34  ;;  %v626_v36 = vmul.f32 %v18260_v42, %v22022_v62  ;;  %v1727_v33 = vmul.f32 %v16412_v6, %v1477_v58  ;;  %v1579_v52 = vsub.f32 0.0, %v1529_v30 }
 0x2af   :  { %14724 = vmatprep.subr.bf16.mxu1 %v21964_v9  ;;  %v2024_v32 = vmul.f32 %v1974_v54, %v724_v3  ;;  %v1228_v53 = vadd.f32 1.4214138, %v1178_v10  ;;  %v880_v31 = vmul.f32 0.3275911, %v830_v28  ;;  %v726_v23 = vmul.f32 0.5, %v18108_v29  ;;  %v11188_v29 = vld [vmem:[%s21897_s4 + $0x158] sm:$0xff] }
 0x2b0   :  { %v1876_v21 = vsub.f32 0.0, %v1776_v26  ;;  %v18360_v63 = vadd.f32 %v18275_v24, %v626_v36  ;;  %v1279_v7 = vmul.f32 %v18297_v43, %v1229_v48  ;;  %v2025_v0 = vmul.f32 %v1975_v22, %v18319_v46 }
 0x2b1   :  { %v18363_v61 = vpack.c.bf16 %v2024_v32, %v2023_v39  ;;  %v1278_v47 = vmul.f32 %v18325_v16, %v1228_v53  ;;  %v930_v6 = vadd.f32 1.0, %v880_v31  ;;  %v1777_v34 = vsub.f32 1.0, %v1727_v33 }
 0x2b2   :  { %14726 = vmatpush1.bf16.msra.mxu1 %v21989_v57  ;;  %v1926_v3 = vsel %vm1826_vm12, %v1876_v21, %v1776_v26  ;;  %v1672_v54 = vmul.f32 1.442695, %v1579_v52  ;;  %v18379_v10 = vmul.f32 0.70710677, %v18360_v63  ;;  %v3686_v17 = vunpack.c.l.bf16 %v18230_v55  ;;  %v22025_v21 = vld [vmem:[#allocation26_spill] sm:$0xff] }
 0x2b3   :  { %22023 = vst [vmem:[#allocation18_spill] sm:$0xff] %v18363_v61  ;;  %14727 = vmatprep.subr.bf16.mxu1 %v21964_v9  ;;  %v18371_v58 = vpop.eup %16413  ;;  %v1976_v30 = vadd.f32 1.0, %v1926_v3  ;;  %v1328_v39 = vadd.f32 -0.28449672, %v1278_v47  ;;  %16417 = vrcp.f32 %v930_v6  ;;  %v1329_v46 = vadd.f32 -0.28449672, %v1279_v7 }
 0x2b4   :  { %v1081_v48 = vmul.f32 1.0614054, %v18371_v58  ;;  %vm1827_vm13 = vcmp.lt.f32.partialorder %v18120_v49, 0.0  ;;  %v3689_v62 = vunpack.c.h.bf16 %v11188_v29  ;;  %v18387_v32 = vand.u32 2147483647, %v18379_v10 }
 0x2b5   :  { %v2026_v26 = vmul.f32 %v1976_v30, %v726_v23  ;;  %v1378_v22 = vmul.f32 %v18325_v16, %v1328_v39  ;;  %v1877_v33 = vsub.f32 0.0, %v1777_v34  ;;  %v625_v55 = vmul.f32 %v18260_v42, %v22025_v21  ;;  %v11189_v23 = vld [vmem:[%s21897_s4 + $0x160] sm:$0xff] }
 0x2b6   :  { %14729 = vmatpush1.bf16.msra.mxu1 %v21991_v2  ;;  %v1131_v36 = vadd.f32 -1.4531521, %v1081_v48  ;;  %16419 = vpow2.f32 %v1672_v54  ;;  %v1530_v47 = vmul.f32 %v830_v28, %v830_v28  ;;  %v883_v3 = vmul.f32 0.3275911, %v18387_v32 }
 0x2b7   :  { %3769 = vmatprep.subr.mxu1 %v21992_v12  ;;  %v18389_v53 = vpack.c.bf16 %v2026_v26, %v2025_v0  ;;  %v1428_v31 = vadd.f32 0.2548296, %v1378_v22  ;;  %v16416_v52 = vpop.eup %16415  ;;  %v1379_v6 = vmul.f32 %v18297_v43, %v1329_v46  ;;  %v18402_v30 = vadd.f32 %v18275_v24, %v625_v55 }
 0x2b8   :  { %v1181_v7 = vmul.f32 %v18371_v58, %v1131_v36  ;;  %v727_v39 = vmul.f32 0.5, %v18105_v50  ;;  %v3688_v54 = vunpack.c.l.bf16 %v11188_v29  ;;  %v1531_v28 = vmul.f32 %v18307_v19, %v18307_v19  ;;  %v11190_v19 = vld [vmem:[%s21897_s4 + $0x168] sm:$0xff] }
 0x2b9   :  { %22024 = vst [vmem:[#allocation24_spill] sm:$0xff] %v18389_v53  ;;  %v1478_v0 = vmul.f32 %v18325_v16, %v1428_v31  ;;  %v933_v48 = vadd.f32 1.0, %v883_v3  ;;  %vm2331_vm15 = vcmask 261120   ;;  %v1927_v26 = vsel %vm1827_vm13, %v1877_v33, %v1777_v34  ;;  %v2180_v3 = vld [vmem:[%s21898_s5 + $0x8] sm:$0xff] }
 0x2ba   :  { %3770 = vmatpush1.msra.mxu1 %v17515_v40  ;;  %v3691_v46 = vunpack.c.h.bf16 %v11189_v23  ;;  %v18413_v22 = vmul.f32 0.70710677, %v18402_v30  ;;  %v1231_v50 = vadd.f32 1.4214138, %v1181_v7  ;;  %v1580_v29 = vsub.f32 0.0, %v1530_v47  ;;  %v2179_v47 = vld [vmem:[%s21898_s5] sm:$0xff] }
 0x2bb   :  { %14736 = vmatprep.subr.bf16.mxu1 %v21964_v9  ;;  %3786 = vmatmul.mubr.f32.vlgmr.msra.gmra.mrb[70].mxu1 %v3686_v17  ;;  %v1728_v16 = vmul.f32 %v16416_v52, %v1478_v0  ;;  %16421 = vrcp.f32 %v933_v48  ;;  %v628_v49 = vmul.f32 %v18260_v42, %v17940_v60  ;;  %v1429_v34 = vadd.f32 0.2548296, %v1379_v6 }
 0x2bc   :  { %14738 = vmatpush1.bf16.msra.mxu1 %v21994_v41  ;;  %11195 = vmatprep.mubr.msk.f32.mxu1 %vm2057_vm0, %v3689_v62  ;;  %v728_v17 = vmul.f32 0.5, %v18194_v18  ;;  %v832_v36 = vand.u32 2147483647, %v18413_v22  ;;  %v1977_v31 = vadd.f32 1.0, %v1927_v26  ;;  %vm1828_vm1 = vcmp.lt.f32.partialorder %v18216_v45, 0.0 }
 0x2bd   :  { %14739 = vmatprep.subr.bf16.mxu1 %v21964_v9  ;;  %v1778_v62 = vsub.f32 1.0, %v1728_v16  ;;  %v18423_v33 = vpop.eup %16417  ;;  %v1581_v21 = vsub.f32 0.0, %v1531_v28  ;;  %v3690_v55 = vunpack.c.l.bf16 %v11189_v23  ;;  %v3693_v7 = vunpack.c.h.bf16 %v11190_v19 }
 0x2be   :  { %v1080_v60 = vmul.f32 1.0614054, %v18423_v33  ;;  %v882_v18 = vmul.f32 0.3275911, %v832_v36  ;;  %v1281_v23 = vmul.f32 %v18371_v58, %v1231_v50  ;;  %v1674_v6 = vmul.f32 1.442695, %v1580_v29 }
 0x2bf   :  { %3791 = vmatmul.mubr.f32.gmra.mrb[72].mxu1 %v3688_v54  ;;  %v1878_v52 = vsub.f32 0.0, %v1778_v62  ;;  %v18438_v0 = vadd.f32 %v18275_v24, %v628_v49  ;;  %v22026_v54 = vld [vmem:[#allocation27_spill] sm:$0xff]  ;;  %v1479_v48 = vmul.f32 %v18297_v43, %v1429_v34  ;;  %v2027_v41 = vmul.f32 %v1977_v31, %v727_v39  ;;  %v11191_v29 = vld [vmem:[%s21897_s4 + $0x170] sm:$0xff] }
 0x2c0   :  { %14741 = vmatpush1.bf16.msra.mxu1 %v16988_v8  ;;  %11196 = vmatprep.mubr.msk.f32.mxu1 %vm2057_vm0, %v3691_v46  ;;  %v627_v28 = vmul.f32 %v18260_v42, %v22026_v54  ;;  %v1130_v16 = vadd.f32 -1.4531521, %v1080_v60  ;;  %v932_v46 = vadd.f32 1.0, %v882_v18  ;;  %v16420_v8 = vpop.eup %16419  ;;  %v1676_v61 = vmul.f32 1.442695, %v1581_v21  ;;  %v11192_v18 = vld [vmem:[%s21897_s4 + $0x178] sm:$0xff] }
 0x2c1   :  { %14742 = vmatprep.subr.bf16.mxu1 %v21964_v9  ;;  %v1928_v26 = vsel %vm1828_vm1, %v1878_v52, %v1778_v62  ;;  %v3692_v50 = vunpack.c.l.bf16 %v11190_v19  ;;  %v14521_v42 = vpack.c.bf16 %v2180_v3, %v2179_v47  ;;  %v1331_v49 = vadd.f32 -0.28449672, %v1281_v23  ;;  %v2181_v19 = vld [vmem:[%s21898_s5 + $0x10] sm:$0xff]  ;;  %v18495_v54 = vld [vmem:[%s21897_s4 + $0x180] sm:$0xff] }
 0x2c2   :  { %v1978_v53 = vadd.f32 1.0, %v1928_v26  ;;  %v1180_v43 = vmul.f32 %v18423_v33, %v1130_v16  ;;  %16423 = vrcp.f32 %v932_v46  ;;  %v18452_v45 = vadd.f32 %v18275_v24, %v627_v28  ;;  %v2182_v24 = vld [vmem:[%s21898_s5 + $0x18] sm:$0xff] }
 0x2c3   :  { %3796 = vmatmul.mubr.f32.gmra.mrb[74].mxu1 %v3690_v55  ;;  %16425 = vpow2.f32 %v1674_v6  ;;  %v18459_v34 = vmul.f32 0.70710677, %v18438_v0  ;;  %v2292_v62 = vpop.f32.mrb[14].mxu1  ;;  %v18461_v31 = vmul.f32 %v16420_v8, %v1479_v48  ;;  %v3695_v55 = vunpack.c.h.bf16 %v11191_v29 }
 0x2c4   :  { %14744 = vmatpush1.bf16.msra.mxu1 %v22008_v15  ;;  %11197 = vmatprep.mubr.msk.f32.mxu1 %vm2057_vm0, %v3693_v7  ;;  %v2028_v39 = vmul.f32 %v1978_v53, %v728_v17  ;;  %v1230_v21 = vadd.f32 1.4214138, %v1180_v43  ;;  %v18467_v53 = vmul.f32 0.70710677, %v18452_v45  ;;  %v2294_v52 = vpop.f32.mrb[15].mxu1  ;;  %16427 = vpow2.f32 %v1676_v61  ;;  %v22027_v43 = vld [vmem:[#allocation10_spill] sm:$0xff] }
 0x2c5   :  { %14745 = vmatprep.subr.bf16.mxu1 %v21964_v9  ;;  %v18469_v17 = vpop.eup %16421  ;;  %12861 = vmatmul.mubr.msk.f32.vlgmr.msra.gmra.mrb[50].mxu0 %vm2331_vm15, %v2292_v62  ;;  %v1533_v8 = vmul.f32 %v18387_v32, %v18387_v32  ;;  %v3694_v7 = vunpack.c.l.bf16 %v11191_v29  ;;  %v1532_v3 = vmul.f32 %v832_v36, %v832_v36  ;;  %v1381_v32 = vmul.f32 %v18371_v58, %v1331_v49 }
 0x2c6   :  { %v18472_v60 = vpack.c.bf16 %v2028_v39, %v2027_v41  ;;  %12863 = vmatprep.mubr.msk.f32.mxu0 %vm16571_vm14, %v21992_v12  ;;  %v1280_v47 = vmul.f32 %v18423_v33, %v1230_v21  ;;  %v1083_v41 = vmul.f32 1.0614054, %v18469_v17  ;;  %v18485_v61 = vand.u32 2147483647, %v18467_v53  ;;  %14522 = vmatpush3.bf16.msra.mxu0 %v14521_v42 }
 0x2c7   :  { %3801 = vmatmul.mubr.f32.gmra.mrb[76].mxu1 %v3692_v50  ;;  %v14524_v23 = vpack.c.bf16 %v2182_v24, %v2181_v19  ;;  %v18490_v6 = vand.u32 2147483647, %v18459_v34  ;;  %v2297_v28 = vpop.f32.mrb[16].mxu1  ;;  %v1779_v36 = vsub.f32 1.0, %v18461_v31  ;;  %14523 = vmatprep.subr.bf16.mxu0 %v21964_v9  ;;  %v3697_v16 = vunpack.c.h.bf16 %v11192_v18 }
 0x2c8   :  { %14747 = vmatpush1.bf16.msra.mxu1 %v17042_v51  ;;  %v1330_v48 = vadd.f32 -0.28449672, %v1280_v47  ;;  %v1133_v26 = vadd.f32 -1.4531521, %v1083_v41  ;;  %11198 = vmatprep.mubr.msk.f32.mxu1 %vm2057_vm0, %v3695_v55  ;;  %v2299_v46 = vpop.f32.mrb[17].mxu1  ;;  %v1583_v50 = vsub.f32 0.0, %v1533_v8  ;;  %v3696_v42 = vunpack.c.l.bf16 %v11192_v18 }
 0x2c9   :  { %14748 = vmatprep.subr.bf16.mxu1 %v21964_v9  ;;  %12864 = vmatmul.mubr.msk.f32.gmra.mrb[52].mxu0 %vm2331_vm15, %v2297_v28  ;;  %v884_v29 = vmul.f32 0.3275911, %v18485_v61  ;;  %vm1829_vm2 = vcmp.lt.f32.partialorder %v22027_v43, 0.0  ;;  %v1582_v19 = vsub.f32 0.0, %v1532_v3  ;;  %v1431_v62 = vadd.f32 0.2548296, %v1381_v32 }
 0x2ca   :  { %12866 = vmatprep.mubr.msk.f32.mxu0 %vm16571_vm14, %v21992_v12  ;;  %v1380_v39 = vmul.f32 %v18423_v33, %v1330_v48  ;;  %v1183_v49 = vmul.f32 %v18469_v17, %v1133_v26  ;;  %14525 = vmatpush3.bf16.msra.mxu0 %v14524_v23  ;;  %v885_v31 = vmul.f32 0.3275911, %v18490_v6  ;;  %v3699_v24 = vunpack.c.h.bf16 %v18495_v54  ;;  %v18514_v55 = vld [vmem:[%s21897_s4 + $0x188] sm:$0xff] }
 0x2cb   :  { %3806 = vmatmul.mubr.f32.gmra.mrb[78].mxu1 %v3694_v7  ;;  %v934_v21 = vadd.f32 1.0, %v884_v29  ;;  %v2302_v8 = vpop.f32.mrb[18].mxu1  ;;  %v1879_v7 = vsub.f32 0.0, %v1779_v36  ;;  %14562 = vmatprep.subr.bf16.mxu0 %v21964_v9  ;;  %v1680_v32 = vmul.f32 1.442695, %v1583_v50  ;;  %v3698_v28 = vunpack.c.l.bf16 %v18495_v54 }
 0x2cc   :  { %14750 = vmatpush1.bf16.msra.mxu1 %v17140_v59  ;;  %v18516_v52 = vpop.eup %16423  ;;  %v1430_v18 = vadd.f32 0.2548296, %v1380_v39  ;;  %v1233_v47 = vadd.f32 1.4214138, %v1183_v49  ;;  %11199 = vmatprep.mubr.msk.f32.mxu1 %vm2057_vm0, %v3697_v16  ;;  %v2304_v3 = vpop.f32.mrb[19].mxu1  ;;  %v1481_v50 = vmul.f32 %v18371_v58, %v1431_v62  ;;  %v3963_v54 = vunpack.c.h.bf16 %v18514_v55  ;;  %v22028_v62 = vld [vmem:[#allocation19_spill] sm:$0xff] }
 0x2cd   :  { %14751 = vmatprep.subr.bf16.mxu1 %v21964_v9  ;;  %v16426_v41 = vpop.eup %16425  ;;  %12867 = vmatmul.mubr.msk.f32.gmra.mrb[54].mxu0 %vm2331_vm15, %v2302_v8  ;;  %v1082_v23 = vmul.f32 1.0614054, %v18516_v52  ;;  %16429 = vrcp.f32 %v934_v21  ;;  %v1678_v16 = vmul.f32 1.442695, %v1582_v19  ;;  %v1929_v39 = vsel %vm1829_vm2, %v1879_v7, %v1779_v36 }
 0x2ce   :  { %12869 = vmatprep.mubr.msk.f32.mxu0 %vm16571_vm14, %v21992_v12  ;;  %v1480_v48 = vmul.f32 %v18423_v33, %v1430_v18  ;;  %v1283_v26 = vmul.f32 %v18469_v17, %v1233_v47  ;;  %v16428_v46 = vpop.eup %16427  ;;  %v935_v33 = vadd.f32 1.0, %v885_v31  ;;  %16431 = vpow2.f32 %v1680_v32 }
 0x2cf   :  { %3811 = vmatmul.mubr.f32.gmra.mrb[80].mxu1 %v3696_v42  ;;  %v1132_v29 = vadd.f32 -1.4531521, %v1082_v23  ;;  %v2307_v42 = vpop.f32.mrb[20].mxu1  ;;  %v1534_v58 = vmul.f32 %v18485_v61, %v18485_v61  ;;  %16433 = vpow2.f32 %v1678_v16  ;;  %v1979_v31 = vadd.f32 1.0, %v1929_v39 }
 0x2d0   :  { %14753 = vmatpush1.bf16.msra.mxu1 %v17173_v20  ;;  %11200 = vmatprep.mubr.msk.f32.mxu1 %vm2057_vm0, %v3699_v24  ;;  %v1730_v49 = vmul.f32 %v16426_v41, %v1480_v48  ;;  %v1333_v21 = vadd.f32 -0.28449672, %v1283_v26  ;;  %v2309_v19 = vpop.f32.mrb[21].mxu1  ;;  %v729_v24 = vmul.f32 0.5, %v22028_v62  ;;  %v1731_v7 = vmul.f32 %v16428_v46, %v1481_v50 }
 0x2d1   :  { %14754 = vmatprep.subr.bf16.mxu1 %v21964_v9  ;;  %12870 = vmatmul.mubr.msk.f32.gmra.mrb[56].mxu0 %vm2331_vm15, %v2307_v42  ;;  %v1182_v8 = vmul.f32 %v18516_v52, %v1132_v29  ;;  %vm1830_vm3 = vcmp.lt.f32.partialorder %v18346_v11, 0.0  ;;  %16435 = vrcp.f32 %v935_v33  ;;  %v730_v3 = vmul.f32 0.5, %v18330_v27 }
 0x2d2   :  { %12872 = vmatprep.mubr.msk.f32.mxu0 %vm16571_vm14, %v21992_v12  ;;  %v1780_v36 = vsub.f32 1.0, %v1730_v49  ;;  %v1383_v43 = vmul.f32 %v18469_v17, %v1333_v21  ;;  %v1584_v23 = vsub.f32 0.0, %v1534_v58  ;;  %v2029_v26 = vmul.f32 %v1979_v31, %v729_v24  ;;  %v11102_v31 = vld [vmem:[%s21898_s5 + $0x48] sm:$0xff] }
 0x2d3   :  { %3816 = vmatmul.mubr.f32.gmra.mrb[82].mxu1 %v3698_v28  ;;  %v1232_v18 = vadd.f32 1.4214138, %v1182_v8  ;;  %v2312_v61 = vpop.f32.mrb[22].mxu1  ;;  %v1781_v16 = vsub.f32 1.0, %v1731_v7  ;;  %vm1831_vm4 = vcmp.lt.f32.partialorder %v18295_v44, 0.0  ;;  %vm1832_vm5 = vcmp.lt.f32.partialorder %v18413_v22, 0.0 }
 0x2d4   :  { %14756 = vmatpush1.bf16.msra.mxu1 %v17190_v5  ;;  %11219 = vmatprep.mubr.msk.f32.mxu1 %vm2057_vm0, %v3963_v54  ;;  %v1880_v47 = vsub.f32 0.0, %v1780_v36  ;;  %v2314_v41 = vpop.f32.mrb[23].mxu1  ;;  %v1433_v28 = vadd.f32 0.2548296, %v1383_v43  ;;  %v1682_v49 = vmul.f32 1.442695, %v1584_v23 }
 0x2d5   :  { %14757 = vmatprep.subr.bf16.mxu1 %v21964_v9  ;;  %12873 = vmatmul.mubr.msk.f32.gmra.mrb[58].mxu0 %vm2331_vm15, %v2312_v61  ;;  %v1282_v32 = vmul.f32 %v18516_v52, %v1232_v18  ;;  %v1881_v8 = vsub.f32 0.0, %v1781_v16  ;;  %v11103_v23 = vld [vmem:[%s21898_s5 + $0x50] sm:$0xff]  ;;  %vm1833_vm6 = vcmp.lt.f32.partialorder %v18379_v10, 0.0  ;;  %v11214_v10 = vld [vmem:[%s21897_s4 + $0x198] sm:$0xff]  ;;  %vm1834_vm7 = vcmp.lt.f32.partialorder %v18467_v53, 0.0 }
 0x2d6   :  { %12875 = vmatprep.mubr.msk.f32.mxu0 %vm16571_vm14, %v21992_v12  ;;  %v1930_v11 = vsel %vm1830_vm3, %v1880_v47, %v1780_v36  ;;  %v1483_v21 = vmul.f32 %v18469_v17, %v1433_v28  ;;  %v11101_v17 = vld [vmem:[%s21898_s5 + $0x40] sm:$0xff]  ;;  %16437 = vpow2.f32 %v1682_v49  ;;  %v731_v28 = vmul.f32 0.5, %v18278_v4  ;;  %v22030_v22 = vld [vmem:[#allocation16_spill] sm:$0xff] }
 0x2d7   :  { %v18552_v48 = vpop.eup %16429  ;;  %v1980_v46 = vadd.f32 1.0, %v1930_v11  ;;  %v1332_v50 = vadd.f32 -0.28449672, %v1282_v32  ;;  %v2317_v29 = vpop.f32.mrb[24].mxu1  ;;  %v1931_v41 = vsel %vm1831_vm4, %v1881_v8, %v1781_v16  ;;  %v14563_v32 = vpack.c.bf16 %v11102_v31, %v11101_v17  ;;  %v11104_v11 = vld [vmem:[%s21898_s5 + $0x58] sm:$0xff]  ;;  %v22033_v53 = vld [vmem:[#allocation28_spill] sm:$0xff] }
 0x2d8   :  { %14759 = vmatpush1.bf16.msra.mxu1 %v17237_v37  ;;  %v1084_v27 = vmul.f32 1.0614054, %v18552_v48  ;;  %v2319_v42 = vpop.f32.mrb[25].mxu1  ;;  %v16432_v19 = vpop.eup %16431  ;;  %v22029_v16 = vld [vmem:[#allocation17_spill] sm:$0xff]  ;;  %v14566_v4 = vpack.c.bf16 %v11104_v11, %v11103_v23  ;;  %v733_v23 = vmul.f32 0.5, %v18360_v63  ;;  %v3966_v63 = vunpack.c.l.bf16 %v11214_v10 }
 0x2d9   :  { %14760 = vmatprep.subr.bf16.mxu1 %v21964_v9  ;;  %v2030_v54 = vmul.f32 %v1980_v46, %v730_v3  ;;  %12876 = vmatmul.mubr.msk.f32.gmra.mrb[60].mxu0 %vm2331_vm15, %v2317_v29  ;;  %v1382_v39 = vmul.f32 %v18516_v52, %v1332_v50  ;;  %v16434_v24 = vpop.eup %16433  ;;  %v1733_v44 = vmul.f32 %v16432_v19, %v1483_v21  ;;  %v1981_v50 = vadd.f32 1.0, %v1931_v41 }
 0x2da   :  { %12878 = vmatprep.mubr.msk.f32.mxu0 %vm16571_vm14, %v21992_v12  ;;  %v1134_v33 = vadd.f32 -1.4531521, %v1084_v27  ;;  %v732_v42 = vmul.f32 0.5, %v18402_v30  ;;  %v1535_v41 = vmul.f32 %v18490_v6, %v18490_v6  ;;  %v11215_v6 = vld [vmem:[%s21897_s4 + $0x1a0] sm:$0xff]  ;;  %vm1835_vm8 = vcmp.lt.f32.partialorder %v18459_v34, 0.0  ;;  %v4732_v34 = vld [vmem:[%s21897_s4 + $0x8] sm:$0xff] }
 0x2db   :  { %v18562_v58 = vpack.c.bf16 %v2030_v54, %v2029_v26  ;;  %v1432_v62 = vadd.f32 0.2548296, %v1382_v39  ;;  %v2322_v36 = vpop.f32.mrb[26].mxu1  ;;  %v18575_v61 = vpop.eup %16435  ;;  %v1783_v29 = vsub.f32 1.0, %v1733_v44  ;;  %v2031_v19 = vmul.f32 %v1981_v50, %v731_v28 }
 0x2dc   :  { %14762 = vmatpush1.bf16.msra.mxu1 %v17349_v38  ;;  %v1184_v43 = vmul.f32 %v18552_v48, %v1134_v33  ;;  %v2324_v18 = vpop.f32.mrb[27].mxu1  ;;  %v1085_v46 = vmul.f32 1.0614054, %v18575_v61  ;;  %v11213_v33 = vld [vmem:[%s21897_s4 + $0x190] sm:$0xff]  ;;  %vm7429_vm3 = vcmask 916480  }
 0x2dd   :  { %14763 = vmatprep.subr.bf16.mxu1 %v21964_v9  ;;  %v1482_v7 = vmul.f32 %v18516_v52, %v1432_v62  ;;  %12879 = vmatmul.mubr.msk.f32.gmra.mrb[62].mxu0 %vm2331_vm15, %v2322_v36  ;;  %v1883_v8 = vsub.f32 0.0, %v1783_v29  ;;  %v3962_v36 = vunpack.c.l.bf16 %v18514_v55  ;;  %v3965_v31 = vunpack.c.h.bf16 %v11213_v33  ;;  %v22031_v18 = vld [vmem:[#allocation20_spill] sm:$0xff] }
 0x2de   :  { %12889 = vmatprep.mubr.msk.f32.mxu0 %vm16571_vm14, %v21992_v12  ;;  %v1234_v47 = vadd.f32 1.4214138, %v1184_v43  ;;  %v1135_v21 = vadd.f32 -1.4531521, %v1085_v46  ;;  %v734_v46 = vmul.f32 0.5, %v18452_v45  ;;  %v11216_v45 = vld [vmem:[%s21897_s4 + $0x1a8] sm:$0xff] }
 0x2df   :  { %v1732_v3 = vmul.f32 %v16434_v24, %v1482_v7  ;;  %v1933_v44 = vsel %vm1833_vm6, %v1883_v8, %v1783_v29 }
 0x2e0   :  { %14765 = vmatpush1.bf16.msra.mxu1 %v17421_v1  ;;  %v1284_v52 = vmul.f32 %v18552_v48, %v1234_v47  ;;  %v16438_v30 = vpop.eup %16437  ;;  %v1185_v7 = vmul.f32 %v18575_v61, %v1135_v21  ;;  %v1983_v11 = vadd.f32 1.0, %v1933_v44  ;;  %v3971_v21 = vunpack.c.h.bf16 %v11216_v45  ;;  %v11128_v44 = vld [vmem:[%s21898_s5 + $0x70] sm:$0xff] }
 0x2e1   :  { %14766 = vmatprep.subr.bf16.mxu1 %v21964_v9  ;;  %v1782_v26 = vsub.f32 1.0, %v1732_v3  ;;  %12890 = vmatmul.mubr.msk.f32.vlgmr.msra.gmra.mrb[50].mxu0 %vm2331_vm15, %v22029_v16  ;;  %v1585_v16 = vsub.f32 0.0, %v1535_v41 }
 0x2e2   :  { %v1334_v27 = vadd.f32 -0.28449672, %v1284_v52  ;;  %12892 = vmatprep.mubr.msk.f32.mxu0 %vm16571_vm14, %v21992_v12  ;;  %14564 = vmatpush3.bf16.msra.mxu0 %v14563_v32  ;;  %v22032_v32 = vld [vmem:[#allocation11_spill] sm:$0xff]  ;;  %v3967_v52 = vunpack.c.h.bf16 %v11214_v10  ;;  %v1235_v28 = vadd.f32 1.4214138, %v1185_v7  ;;  %v2033_v29 = vmul.f32 %v1983_v11, %v733_v23 }
 0x2e3   :  { %v1882_v54 = vsub.f32 0.0, %v1782_v26  ;;  %14565 = vmatprep.subr.bf16.mxu0 %v21964_v9 }
 0x2e4   :  { %14768 = vmatpush1.bf16.msra.mxu1 %v21989_v57  ;;  %v1384_v39 = vmul.f32 %v18552_v48, %v1334_v27  ;;  %v1285_v27 = vmul.f32 %v18575_v61, %v1235_v28 }
 0x2e5   :  { %14769 = vmatprep.subr.bf16.mxu1 %v21964_v9  ;;  %v1932_v49 = vsel %vm1832_vm5, %v1882_v54, %v1782_v26  ;;  %12893 = vmatmul.mubr.msk.f32.gmra.mrb[52].mxu0 %vm2331_vm15, %v22030_v22 }
 0x2e6   :  { %v1982_v62 = vadd.f32 1.0, %v1932_v49  ;;  %v1434_v24 = vadd.f32 0.2548296, %v1384_v39  ;;  %12895 = vmatprep.mubr.msk.f32.mxu0 %vm16571_vm14, %v21992_v12  ;;  %14567 = vmatpush3.bf16.msra.mxu0 %v14566_v4  ;;  %v1684_v39 = vmul.f32 1.442695, %v1585_v16  ;;  %v22034_v49 = vld [vmem:[#allocation29_spill] sm:$0xff] }
 0x2e7   :  { %14604 = vmatprep.subr.bf16.mxu0 %v21964_v9  ;;  %v1335_v22 = vadd.f32 -0.28449672, %v1285_v27  ;;  %v22038_v27 = vld [vmem:[#allocation24_spill] sm:$0xff] }
 0x2e8   :  { %14771 = vmatpush1.bf16.msra.mxu1 %v21991_v2  ;;  %v2032_v43 = vmul.f32 %v1982_v62, %v732_v42  ;;  %v1484_v17 = vmul.f32 %v18552_v48, %v1434_v24  ;;  %v3964_v48 = vunpack.c.l.bf16 %v11213_v33  ;;  %v3968_v42 = vunpack.c.l.bf16 %v11215_v6  ;;  %v11217_v33 = vld [vmem:[%s21897_s4 + $0x1b0] sm:$0xff]  ;;  %v11126_v62 = vld [vmem:[%s21898_s5 + $0x60] sm:$0xff]  ;;  %v11127_v24 = vld [vmem:[%s21898_s5 + $0x68] sm:$0xff] }
 0x2e9   :  { %4045 = vmatprep.subr.mxu1 %v21992_v12  ;;  %12896 = vmatmul.mubr.msk.f32.gmra.mrb[54].mxu0 %vm2331_vm15, %v22031_v18  ;;  %16439 = vpow2.f32 %v1684_v39  ;;  %v3972_v10 = vunpack.c.l.bf16 %v11217_v33 }
 0x2ea   :  { %v18619_v47 = vpack.c.bf16 %v2032_v43, %v2031_v19  ;;  %v1734_v55 = vmul.f32 %v16438_v30, %v1484_v17  ;;  %12898 = vmatprep.mubr.msk.f32.mxu0 %vm16571_vm14, %v21992_v12  ;;  %v22035_v30 = vld [vmem:[#allocation15_spill] sm:$0xff]  ;;  %v1385_v43 = vmul.f32 %v18575_v61, %v1335_v22  ;;  %v11218_v17 = vld [vmem:[%s21897_s4 + $0x1b8] sm:$0xff] }
 0x2eb   :  { %v3974_v28 = vunpack.c.l.bf16 %v11218_v17 }
 0x2ec   :  { %4046 = vmatpush1.msra.mxu1 %v17515_v40  ;;  %v1784_v3 = vsub.f32 1.0, %v1734_v55  ;;  %v22036_v55 = vld [vmem:[#allocation9_spill] sm:$0xff]  ;;  %v1435_v41 = vadd.f32 0.2548296, %v1385_v43 }
 0x2ed   :  { %14820 = vmatprep.subr.bf16.mxu1 %v21964_v9  ;;  %4062 = vmatmul.mubr.f32.vlgmr.msra.gmra.mrb[84].mxu1 %v3962_v36  ;;  %v3973_v36 = vunpack.c.h.bf16 %v11217_v33  ;;  %v735_v33 = vmul.f32 0.5, %v18438_v0  ;;  %v4734_v43 = vld [vmem:[%s21897_s4 + $0x18] sm:$0xff] }
 0x2ee   :  { %14822 = vmatpush1.bf16.msra.mxu1 %v22032_v32  ;;  %11220 = vmatprep.mubr.msk.f32.mxu1 %vm2057_vm0, %v3965_v31  ;;  %v1884_v26 = vsub.f32 0.0, %v1784_v3  ;;  %v14605_v31 = vpack.c.bf16 %v11127_v24, %v11126_v62  ;;  %v4741_v62 = vunpack.c.h.bf16 %v4732_v34  ;;  %v4733_v24 = vld [vmem:[%s21897_s4 + $0x10] sm:$0xff] }
 0x2ef   :  { %12899 = vmatmul.mubr.msk.f32.gmra.mrb[56].mxu0 %vm2331_vm15, %v18280_v25  ;;  %14823 = vmatprep.subr.bf16.mxu1 %v21964_v9  ;;  %v3969_v25 = vunpack.c.h.bf16 %v11215_v6 }
 0x2f0   :  { %12901 = vmatprep.mubr.msk.f32.mxu0 %vm16571_vm14, %v21992_v12  ;;  %v1934_v50 = vsel %vm1834_vm7, %v1884_v26, %v1784_v3  ;;  %v18693_v3 = vld [vmem:[%s21897_s4] sm:$0xff]  ;;  %v1485_v26 = vmul.f32 %v18575_v61, %v1435_v41  ;;  %v4736_v41 = vld [vmem:[%s21897_s4 + $0x28] sm:$0xff] }
 0x2f1   :  { %4067 = vmatmul.mubr.f32.gmra.mrb[86].mxu1 %v3964_v48  ;;  %v1984_v54 = vadd.f32 1.0, %v1934_v50  ;;  %v3975_v48 = vunpack.c.h.bf16 %v11218_v17  ;;  %v4739_v6 = vunpack.c.h.bf16 %v18693_v3  ;;  %v22037_v50 = vld [vmem:[#allocation18_spill] sm:$0xff]  ;;  %v4738_v0 = vunpack.c.l.bf16 %v18693_v3  ;;  %v22039_v3 = vld [vmem:[#allocation12_spill] sm:$0xff] }
 0x2f2   :  { %14825 = vmatpush1.bf16.msra.mxu1 %v22033_v53  ;;  %11221 = vmatprep.mubr.msk.f32.mxu1 %vm2057_vm0, %v3967_v52  ;;  %v4742_v17 = vunpack.c.l.bf16 %v4733_v24 }
 0x2f3   :  { %12902 = vmatmul.mubr.msk.f32.gmra.mrb[58].mxu0 %vm2331_vm15, %v18302_v13  ;;  %14826 = vmatprep.subr.bf16.mxu1 %v21964_v9  ;;  %v2034_v4 = vmul.f32 %v1984_v54, %v734_v46  ;;  %v16440_v46 = vpop.eup %16439 }
 0x2f4   :  { %12904 = vmatprep.mubr.msk.f32.mxu0 %vm16571_vm14, %v21992_v12 }
 0x2f5   :  { %4072 = vmatmul.mubr.f32.gmra.mrb[88].mxu1 %v3966_v63  ;;  %v18653_v13 = vpack.c.bf16 %v2034_v4, %v2033_v29  ;;  %v2683_v19 = vpop.f32.mrb[28].mxu1 }
 0x2f6   :  { %14828 = vmatpush1.bf16.msra.mxu1 %v22034_v49  ;;  %11222 = vmatprep.mubr.msk.f32.mxu1 %vm2057_vm0, %v3969_v25  ;;  %v2685_v8 = vpop.f32.mrb[29].mxu1  ;;  %v1735_v25 = vmul.f32 %v16440_v46, %v1485_v26  ;;  %v22040_v26 = vld [vmem:[#allocation13_spill] sm:$0xff] }
 0x2f7   :  { %12905 = vmatmul.mubr.msk.f32.gmra.mrb[60].mxu0 %vm2331_vm15, %v18327_v35  ;;  %14829 = vmatprep.subr.bf16.mxu1 %v21964_v9  ;;  %v3970_v35 = vunpack.c.l.bf16 %v11216_v45 }
 0x2f8   :  { %12907 = vmatprep.mubr.msk.f32.mxu0 %vm16571_vm14, %v21992_v12  ;;  %v1785_v54 = vsub.f32 1.0, %v1735_v25 }
 0x2f9   :  { %4077 = vmatmul.mubr.f32.gmra.mrb[90].mxu1 %v3968_v42  ;;  %v2688_v7 = vpop.f32.mrb[30].mxu1 }
 0x2fa   :  { %14831 = vmatpush1.bf16.msra.mxu1 %v22035_v30  ;;  %11223 = vmatprep.mubr.msk.f32.mxu1 %vm2057_vm0, %v3971_v21  ;;  %v2690_v18 = vpop.f32.mrb[31].mxu1  ;;  %v1885_v42 = vsub.f32 0.0, %v1785_v54 }
 0x2fb   :  { %12908 = vmatmul.mubr.msk.f32.gmra.mrb[62].mxu0 %vm2331_vm15, %v18340_v56  ;;  %14832 = vmatprep.subr.bf16.mxu1 %v21964_v9  ;;  %v11129_v56 = vld [vmem:[%s21898_s5 + $0x78] sm:$0xff]  ;;  %v4735_v18 = vld [vmem:[%s21897_s4 + $0x20] sm:$0xff] }
 0x2fc   :  { %12918 = vmatprep.mubr.msk.f32.mxu0 %vm16571_vm14, %v21992_v12  ;;  %v14608_v23 = vpack.c.bf16 %v11129_v56, %v11128_v44  ;;  %v1935_v22 = vsel %vm1835_vm8, %v1885_v42, %v1785_v54  ;;  %v4747_v44 = vunpack.c.h.bf16 %v4735_v18 }
 0x2fd   :  { %4082 = vmatmul.mubr.f32.gmra.mrb[92].mxu1 %v3970_v35  ;;  %v2693_v52 = vpop.f32.mrb[32].mxu1  ;;  %v4740_v35 = vunpack.c.l.bf16 %v4732_v34 }
 0x2fe   :  { %14834 = vmatpush1.bf16.msra.mxu1 %v22036_v55  ;;  %11224 = vmatprep.mubr.msk.f32.mxu1 %vm2057_vm0, %v3973_v36  ;;  %v2695_v11 = vpop.f32.mrb[33].mxu1  ;;  %v4743_v36 = vunpack.c.h.bf16 %v4733_v24 }
 0x2ff   :  { %12919 = vmatmul.mubr.msk.f32.vlgmr.msra.gmra.mrb[50].mxu0 %vm2331_vm15, %v2683_v19  ;;  %14835 = vmatprep.subr.bf16.mxu1 %v21964_v9  ;;  %v1985_v19 = vadd.f32 1.0, %v1935_v22  ;;  %v11137_v22 = vld [vmem:[%s21897_s4 + $0xe0] sm:$0xff] }
 0x300   :  { %14606 = vmatpush3.bf16.msra.mxu0 %v14605_v31  ;;  %12921 = vmatprep.mubr.msk.f32.mxu0 %vm16571_vm14, %v21992_v12  ;;  %v4745_v31 = vunpack.c.h.bf16 %v4734_v43 }
 0x301   :  { %4087 = vmatmul.mubr.f32.gmra.mrb[94].mxu1 %v3972_v10  ;;  %14607 = vmatprep.subr.bf16.mxu0 %v21964_v9  ;;  %v2698_v63 = vpop.f32.mrb[34].mxu1  ;;  %v18738_v8 = vmul.f32 %v1985_v19, %v735_v33  ;;  %v3135_v19 = vunpack.c.h.bf16 %v11137_v22 }
 0x302   :  { %14837 = vmatpush1.bf16.msra.mxu1 %v18311_v14  ;;  %11225 = vmatprep.mubr.msk.f32.mxu1 %vm2057_vm0, %v3975_v48  ;;  %v2700_v16 = vpop.f32.mrb[35].mxu1  ;;  %v4746_v48 = vunpack.c.l.bf16 %v4735_v18 }
 0x303   :  { %14838 = vmatprep.subr.bf16.mxu1 %v21964_v9  ;;  %12922 = vmatmul.mubr.msk.f32.gmra.mrb[52].mxu0 %vm2331_vm15, %v2688_v7  ;;  %v4744_v7 = vunpack.c.l.bf16 %v4734_v43 }
 0x304   :  { %12924 = vmatprep.mubr.msk.f32.mxu0 %vm16571_vm14, %v21992_v12  ;;  %14609 = vmatpush3.bf16.msra.mxu0 %v14608_v23  ;;  %v4749_v23 = vunpack.c.h.bf16 %v4736_v41 }
 0x305   :  { %4092 = vmatmul.mubr.f32.gmra.mrb[96].mxu1 %v3974_v28  ;;  %14610 = vmatprep.subr.bf16.mxu0 %v21964_v9  ;;  %v2703_v61 = vpop.f32.mrb[36].mxu1  ;;  %v4748_v28 = vunpack.c.l.bf16 %v4736_v41  ;;  %v11139_v41 = vld [vmem:[%s21897_s4 + $0xf0] sm:$0xff] }
 0x306   :  { %14840 = vmatpush1.bf16.msra.mxu1 %v22037_v50  ;;  %11264 = vmatprep.mubr.msk.f32.mxu1 %vm2057_vm0, %v4739_v6  ;;  %v2705_v29 = vpop.f32.mrb[37].mxu1  ;;  %v4737_v6 = vld [vmem:[%s21897_s4 + $0x30] sm:$0xff] }
 0x307   :  { %14841 = vmatprep.subr.bf16.mxu1 %v21964_v9  ;;  %12925 = vmatmul.mubr.msk.f32.gmra.mrb[54].mxu0 %vm2331_vm15, %v2693_v52  ;;  %v4750_v25 = vunpack.c.l.bf16 %v4737_v6 }
 0x308   :  { %12927 = vmatprep.mubr.msk.f32.mxu0 %vm16571_vm14, %v21992_v12 }
 0x309   :  { %v2708_v45 = vpop.f32.mrb[38].mxu1 }
 0x30a   :  { %14843 = vmatpush1.bf16.msra.mxu1 %v22038_v27  ;;  %v2710_v4 = vpop.f32.mrb[39].mxu1 }
 0x30b   :  { %14844 = vmatprep.subr.bf16.mxu1 %v21964_v9  ;;  %12928 = vmatmul.mubr.msk.f32.gmra.mrb[56].mxu0 %vm2331_vm15, %v2698_v63  ;;  %v4751_v63 = vunpack.c.h.bf16 %v4737_v6 }
 0x30c   :  { %12930 = vmatprep.mubr.msk.f32.mxu0 %vm16571_vm14, %v21992_v12 }
 0x30d   :  { %v2713_v39 = vpop.f32.mrb[40].mxu1 }
 0x30e   :  { %14846 = vmatpush1.bf16.msra.mxu1 %v18472_v60  ;;  %v2715_v21 = vpop.f32.mrb[41].mxu1 }
 0x30f   :  { %14847 = vmatprep.subr.bf16.mxu1 %v21964_v9  ;;  %12931 = vmatmul.mubr.msk.f32.gmra.mrb[58].mxu0 %vm2331_vm15, %v2703_v61  ;;  %v11271_v61 = vld [vmem:[%s21897_s4 + $0x38] sm:$0xff] }
 0x310   :  { %12933 = vmatprep.mubr.msk.f32.mxu0 %vm16571_vm14, %v21992_v12  ;;  %v4885_v54 = vunpack.c.h.bf16 %v11271_v61 }
 0x312   :  { %14849 = vmatpush1.bf16.msra.mxu1 %v18562_v58 }
 0x313   :  { %14850 = vmatprep.subr.bf16.mxu1 %v21964_v9  ;;  %12934 = vmatmul.mubr.msk.f32.gmra.mrb[60].mxu0 %vm2331_vm15, %v2708_v45 }
 0x314   :  { %12936 = vmatprep.mubr.msk.f32.mxu0 %vm16571_vm14, %v21992_v12 }
 0x316   :  { %14852 = vmatpush1.bf16.msra.mxu1 %v18619_v47 }
 0x317   :  { %14853 = vmatprep.subr.bf16.mxu1 %v21964_v9  ;;  %12937 = vmatmul.mubr.msk.f32.gmra.mrb[62].mxu0 %vm2331_vm15, %v2713_v39 }
 0x318   :  { %12947 = vmatprep.mubr.msk.f32.mxu0 %vm16571_vm14, %v21992_v12 }
 0x31a   :  { %14855 = vmatpush1.bf16.msra.mxu1 %v18653_v13 }
 0x31b   :  { %4821 = vmatprep.subr.mxu1 %v21992_v12 }
 0x31e   :  { %4822 = vmatpush1.msra.mxu1 %v18738_v8 }
 0x31f   :  { %14856 = vmatprep.subr.bf16.mxu1 %v21964_v9  ;;  %4838 = vmatmul.mubr.f32.vlgmr.msra.gmra.mrb[98].mxu1 %v4738_v0  ;;  %v11272_v0 = vld [vmem:[%s21897_s4 + $0x40] sm:$0xff] }
 0x320   :  { %14858 = vmatpush1.bf16.msra.mxu1 %v22032_v32  ;;  %11265 = vmatprep.mubr.msk.f32.mxu1 %vm2057_vm0, %v4741_v62  ;;  %v4884_v62 = vunpack.c.l.bf16 %v11271_v61  ;;  %v4887_v24 = vunpack.c.h.bf16 %v11272_v0 }
 0x321   :  { %14859 = vmatprep.subr.bf16.mxu1 %v21964_v9 }
 0x323   :  { %4843 = vmatmul.mubr.f32.gmra.mrb[100].mxu1 %v4740_v35  ;;  %v11273_v35 = vld [vmem:[%s21897_s4 + $0x48] sm:$0xff] }
 0x324   :  { %14861 = vmatpush1.bf16.msra.mxu1 %v22033_v53  ;;  %11266 = vmatprep.mubr.msk.f32.mxu1 %vm2057_vm0, %v4743_v36  ;;  %v4886_v36 = vunpack.c.l.bf16 %v11272_v0  ;;  %v4889_v43 = vunpack.c.h.bf16 %v11273_v35  ;;  %v11143_v0 = vld [vmem:[%s21897_s4 + $0x110] sm:$0xff] }
 0x325   :  { %14862 = vmatprep.subr.bf16.mxu1 %v21964_v9 }
 0x327   :  { %4848 = vmatmul.mubr.f32.gmra.mrb[102].mxu1 %v4742_v17  ;;  %v2959_v10 = vpop.f32.mrb[42].mxu1  ;;  %v11274_v17 = vld [vmem:[%s21897_s4 + $0x50] sm:$0xff] }
 0x328   :  { %14864 = vmatpush1.bf16.msra.mxu1 %v22034_v49  ;;  %11267 = vmatprep.mubr.msk.f32.mxu1 %vm2057_vm0, %v4745_v31  ;;  %v2961_v56 = vpop.f32.mrb[43].mxu1  ;;  %v4888_v31 = vunpack.c.l.bf16 %v11273_v35  ;;  %v4891_v18 = vunpack.c.h.bf16 %v11274_v17  ;;  %v3146_v35 = vunpack.c.l.bf16 %v11143_v0 }
 0x329   :  { %14865 = vmatprep.subr.bf16.mxu1 %v21964_v9  ;;  %12948 = vmatmul.mubr.msk.f32.vlgmr.msra.gmra.mrb[50].mxu0 %vm2331_vm15, %v2959_v10  ;;  %v11275_v10 = vld [vmem:[%s21897_s4 + $0x58] sm:$0xff] }
 0x32a   :  { %14612 = vmatpush1.bf16.msra.mxu0 %v22039_v3  ;;  %12950 = vmatprep.mubr.msk.f32.mxu0 %vm16571_vm14, %v21992_v12  ;;  %v4892_v6 = vunpack.c.l.bf16 %v11275_v10 }
 0x32b   :  { %4853 = vmatmul.mubr.f32.gmra.mrb[104].mxu1 %v4744_v7  ;;  %14613 = vmatprep.subr.bf16.mxu0 %v21964_v9  ;;  %v2964_v52 = vpop.f32.mrb[44].mxu1  ;;  %v11138_v7 = vld [vmem:[%s21897_s4 + $0xe8] sm:$0xff] }
 0x32c   :  { %14867 = vmatpush1.bf16.msra.mxu1 %v22035_v30  ;;  %11268 = vmatprep.mubr.msk.f32.mxu1 %vm2057_vm0, %v4747_v44  ;;  %v2966_v11 = vpop.f32.mrb[45].mxu1  ;;  %v3134_v44 = vunpack.c.l.bf16 %v11137_v22  ;;  %v3137_v56 = vunpack.c.h.bf16 %v11138_v7  ;;  %v11142_v22 = vld [vmem:[%s21897_s4 + $0x108] sm:$0xff] }
 0x32d   :  { %14868 = vmatprep.subr.bf16.mxu1 %v21964_v9  ;;  %12951 = vmatmul.mubr.msk.f32.gmra.mrb[52].mxu0 %vm2331_vm15, %v2964_v52  ;;  %v4893_v52 = vunpack.c.h.bf16 %v11275_v10  ;;  %v3136_v11 = vunpack.c.l.bf16 %v11138_v7  ;;  %v11306_v10 = vld [vmem:[%s21897_s4 + $0x88] sm:$0xff] }
 0x32e   :  { %14615 = vmatpush1.bf16.msra.mxu0 %v22040_v26  ;;  %12953 = vmatprep.mubr.msk.f32.mxu0 %vm16571_vm14, %v21992_v12 }
 0x32f   :  { %4858 = vmatmul.mubr.f32.gmra.mrb[106].mxu1 %v4746_v48  ;;  %14616 = vmatprep.subr.bf16.mxu0 %v21964_v9  ;;  %v2969_v46 = vpop.f32.mrb[46].mxu1  ;;  %v4890_v48 = vunpack.c.l.bf16 %v11274_v17 }
 0x330   :  { %14870 = vmatpush1.bf16.msra.mxu1 %v22036_v55  ;;  %11269 = vmatprep.mubr.msk.f32.mxu1 %vm2057_vm0, %v4749_v23  ;;  %v2971_v16 = vpop.f32.mrb[47].mxu1  ;;  %v11276_v23 = vld [vmem:[%s21897_s4 + $0x60] sm:$0xff] }
 0x331   :  { %14871 = vmatprep.subr.bf16.mxu1 %v21964_v9  ;;  %12954 = vmatmul.mubr.msk.f32.gmra.mrb[54].mxu0 %vm2331_vm15, %v2969_v46  ;;  %v11140_v46 = vld [vmem:[%s21897_s4 + $0xf8] sm:$0xff]  ;;  %v11277_v16 = vld [vmem:[%s21897_s4 + $0x68] sm:$0xff] }
 0x332   :  { %14618 = vmatpush1.bf16.msra.mxu0 %v22008_v15  ;;  %12956 = vmatprep.mubr.msk.f32.mxu0 %vm16571_vm14, %v21992_v12  ;;  %v3141_v61 = vunpack.c.h.bf16 %v11140_v46 }
 0x333   :  { %4863 = vmatmul.mubr.f32.gmra.mrb[108].mxu1 %v4748_v28  ;;  %14619 = vmatprep.subr.bf16.mxu0 %v21964_v9  ;;  %v2974_v29 = vpop.f32.mrb[48].mxu1  ;;  %v3139_v28 = vunpack.c.h.bf16 %v11139_v41 }
 0x334   :  { %14873 = vmatpush1.bf16.msra.mxu1 %v18311_v14  ;;  %11270 = vmatprep.mubr.msk.f32.mxu1 %vm2057_vm0, %v4751_v63  ;;  %v2976_v45 = vpop.f32.mrb[49].mxu1  ;;  %v4895_v63 = vunpack.c.h.bf16 %v11276_v23 }
 0x335   :  { %14874 = vmatprep.subr.bf16.mxu1 %v21964_v9  ;;  %12957 = vmatmul.mubr.msk.f32.gmra.mrb[56].mxu0 %vm2331_vm15, %v2974_v29  ;;  %v4894_v29 = vunpack.c.l.bf16 %v11276_v23  ;;  %v4897_v45 = vunpack.c.h.bf16 %v11277_v16  ;;  %v11308_v23 = vld [vmem:[%s21897_s4 + $0x98] sm:$0xff] }
 0x336   :  { %14621 = vmatpush1.bf16.msra.mxu0 %v17042_v51  ;;  %12959 = vmatprep.mubr.msk.f32.mxu0 %vm16571_vm14, %v21992_v12 }
 0x337   :  { %4868 = vmatmul.mubr.f32.gmra.mrb[110].mxu1 %v4750_v25  ;;  %14622 = vmatprep.subr.bf16.mxu0 %v21964_v9  ;;  %v3138_v25 = vunpack.c.l.bf16 %v11139_v41  ;;  %v5278_v41 = vunpack.c.l.bf16 %v11306_v10 }
 0x338   :  { %14876 = vmatpush1.bf16.msra.mxu1 %v22037_v50  ;;  %v2979_v4 = vpop.f32.mrb[50].mxu1  ;;  %11278 = vmatprep.mubr.msk.f32.mxu1 %vm2057_vm0, %v4885_v54  ;;  %v11141_v54 = vld [vmem:[%s21897_s4 + $0x100] sm:$0xff] }
 0x339   :  { %14877 = vmatprep.subr.bf16.mxu1 %v21964_v9  ;;  %v2981_v42 = vpop.f32.mrb[51].mxu1  ;;  %12960 = vmatmul.mubr.msk.f32.gmra.mrb[58].mxu0 %vm2331_vm15, %v2979_v4  ;;  %v11303_v4 = vld [vmem:[%s21897_s4 + $0x70] sm:$0xff] }
 0x33a   :  { %14624 = vmatpush1.bf16.msra.mxu0 %v17140_v59  ;;  %12962 = vmatprep.mubr.msk.f32.mxu0 %vm16571_vm14, %v21992_v12  ;;  %v3140_v42 = vunpack.c.l.bf16 %v11140_v46  ;;  %v5282_v46 = vunpack.c.l.bf16 %v11308_v23 }
 0x33b   :  { %14625 = vmatprep.subr.bf16.mxu0 %v21964_v9 }
 0x33c   :  { %14879 = vmatpush1.bf16.msra.mxu1 %v22038_v27 }
 0x33d   :  { %14880 = vmatprep.subr.bf16.mxu1 %v21964_v9  ;;  %v2984_v39 = vpop.f32.mrb[52].mxu1 }
 0x33e   :  { %v2986_v21 = vpop.f32.mrb[53].mxu1  ;;  %12963 = vmatmul.mubr.msk.f32.gmra.mrb[60].mxu0 %vm2331_vm15, %v2984_v39  ;;  %v3143_v39 = vunpack.c.h.bf16 %v11141_v54 }
 0x33f   :  { %14627 = vmatpush1.bf16.msra.mxu0 %v17173_v20  ;;  %12965 = vmatprep.mubr.msk.f32.mxu0 %vm16571_vm14, %v21992_v12  ;;  %v4896_v21 = vunpack.c.l.bf16 %v11277_v16  ;;  %v11151_v16 = vld [vmem:[%s21898_s5 + $0x80] sm:$0xff] }
 0x340   :  { %14882 = vmatpush1.bf16.msra.mxu1 %v18472_v60  ;;  %14628 = vmatprep.subr.bf16.mxu0 %v21964_v9 }
 0x341   :  { %14883 = vmatprep.subr.bf16.mxu1 %v21964_v9  ;;  %v2989_v33 = vpop.f32.mrb[54].mxu1 }
 0x342   :  { %v2991_v34 = vpop.f32.mrb[55].mxu1  ;;  %12966 = vmatmul.mubr.msk.f32.gmra.mrb[62].mxu0 %vm2331_vm15, %v2989_v33  ;;  %v5273_v33 = vunpack.c.h.bf16 %v11303_v4 }
 0x343   :  { %14630 = vmatpush1.bf16.msra.mxu0 %v17190_v5  ;;  %11144 = vmatprep.mubr.msk.f32.mxu0 %vm2057_vm0, %v3135_v19  ;;  %v3142_v19 = vunpack.c.l.bf16 %v11141_v54  ;;  %v3145_v34 = vunpack.c.h.bf16 %v11142_v22 }
 0x344   :  { %14885 = vmatpush1.bf16.msra.mxu1 %v18562_v58  ;;  %14631 = vmatprep.subr.bf16.mxu0 %v21964_v9 }
 0x345   :  { %14886 = vmatprep.subr.bf16.mxu1 %v21964_v9 }
 0x347   :  { %14633 = vmatpush1.bf16.msra.mxu0 %v17237_v37 }
 0x348   :  { %14888 = vmatpush1.bf16.msra.mxu1 %v18619_v47  ;;  %14634 = vmatprep.subr.bf16.mxu0 %v21964_v9 }
 0x349   :  { %14889 = vmatprep.subr.bf16.mxu1 %v21964_v9 }
 0x34b   :  { %14636 = vmatpush1.bf16.msra.mxu0 %v17349_v38 }
 0x34c   :  { %14891 = vmatpush1.bf16.msra.mxu1 %v18653_v13  ;;  %14637 = vmatprep.subr.bf16.mxu0 %v21964_v9 }
 0x34d   :  { %4967 = vmatprep.subr.mxu1 %v21992_v12 }
 0x34f   :  { %14639 = vmatpush1.bf16.msra.mxu0 %v17421_v1 }
 0x350   :  { %4968 = vmatpush1.msra.mxu1 %v18738_v8  ;;  %14640 = vmatprep.subr.bf16.mxu0 %v21964_v9 }
 0x351   :  { %14904 = vmatprep.subr.bf16.mxu1 %v21964_v9  ;;  %4984 = vmatmul.mubr.f32.vlgmr.msra.gmra.mrb[112].mxu1 %v4884_v62  ;;  %v3144_v62 = vunpack.c.l.bf16 %v11142_v22 }
 0x352   :  { %14906 = vmatpush1.bf16.msra.mxu1 %v22032_v32  ;;  %11279 = vmatprep.mubr.msk.f32.mxu1 %vm2057_vm0, %v4887_v24  ;;  %v3147_v24 = vunpack.c.h.bf16 %v11143_v0  ;;  %v11330_v0 = vld [vmem:[%s21897_s4 + $0xb8] sm:$0xff] }
 0x353   :  { %14642 = vmatpush1.bf16.msra.mxu0 %v21989_v57  ;;  %14907 = vmatprep.subr.bf16.mxu1 %v21964_v9 }
 0x354   :  { %14643 = vmatprep.subr.bf16.mxu0 %v21964_v9 }
 0x355   :  { %4989 = vmatmul.mubr.f32.gmra.mrb[114].mxu1 %v4886_v36  ;;  %v11304_v36 = vld [vmem:[%s21897_s4 + $0x78] sm:$0xff] }
 0x356   :  { %14909 = vmatpush1.bf16.msra.mxu1 %v22033_v53  ;;  %11280 = vmatprep.mubr.msk.f32.mxu1 %vm2057_vm0, %v4889_v43  ;;  %v5272_v43 = vunpack.c.l.bf16 %v11303_v4  ;;  %v5275_v17 = vunpack.c.h.bf16 %v11304_v36  ;;  %v5274_v7 = vunpack.c.l.bf16 %v11304_v36 }
 0x357   :  { %14645 = vmatpush1.bf16.msra.mxu0 %v21991_v2  ;;  %14910 = vmatprep.subr.bf16.mxu1 %v21964_v9 }
 0x358   :  { %3217 = vmatprep.subr.mxu0 %v21992_v12 }
 0x359   :  { %4994 = vmatmul.mubr.f32.gmra.mrb[116].mxu1 %v4888_v31  ;;  %v11305_v31 = vld [vmem:[%s21897_s4 + $0x80] sm:$0xff] }
 0x35a   :  { %14912 = vmatpush1.bf16.msra.mxu1 %v22034_v49  ;;  %11281 = vmatprep.mubr.msk.f32.mxu1 %vm2057_vm0, %v4891_v18  ;;  %v5277_v18 = vunpack.c.h.bf16 %v11305_v31 }
 0x35b   :  { %3218 = vmatpush1.msra.mxu0 %v17515_v40  ;;  %14913 = vmatprep.subr.bf16.mxu1 %v21964_v9  ;;  %v18974_v4 = vpop.f32.mrb[56].mxu1 }
 0x35c   :  { %3234 = vmatmul.mubr.f32.vlgmr.msra.gmra.mrb[64].mxu0 %v3134_v44  ;;  %14646 = vmatprep.subr.bf16.mxu0 %v21964_v9  ;;  %v5276_v44 = vunpack.c.l.bf16 %v11305_v31 }
 0x35d   :  { %11145 = vmatprep.mubr.msk.f32.mxu0 %vm2057_vm0, %v3137_v56  ;;  %4999 = vmatmul.mubr.f32.gmra.mrb[118].mxu1 %v4890_v48  ;;  %v5279_v56 = vunpack.c.h.bf16 %v11306_v10  ;;  %v11307_v48 = vld [vmem:[%s21897_s4 + $0x90] sm:$0xff] }
 0x35e   :  { %14915 = vmatpush1.bf16.msra.mxu1 %v22035_v30  ;;  %11282 = vmatprep.mubr.msk.f32.mxu1 %vm2057_vm0, %v4893_v52  ;;  %v5281_v52 = vunpack.c.h.bf16 %v11307_v48 }
 0x35f   :  { %14916 = vmatprep.subr.bf16.mxu1 %v21964_v9 }
 0x360   :  { %3239 = vmatmul.mubr.f32.gmra.mrb[66].mxu0 %v3136_v11  ;;  %v5280_v11 = vunpack.c.l.bf16 %v11307_v48  ;;  %v11333_v48 = vld [vmem:[%s21897_s4 + $0xd0] sm:$0xff] }
 0x361   :  { %11146 = vmatprep.mubr.msk.f32.mxu0 %vm2057_vm0, %v3139_v28  ;;  %5004 = vmatmul.mubr.f32.gmra.mrb[120].mxu1 %v4892_v6  ;;  %v5283_v28 = vunpack.c.h.bf16 %v11308_v23  ;;  %v11309_v6 = vld [vmem:[%s21897_s4 + $0xa0] sm:$0xff] }
 0x362   :  { %14918 = vmatpush1.bf16.msra.mxu1 %v22036_v55  ;;  %11283 = vmatprep.mubr.msk.f32.mxu1 %vm2057_vm0, %v4895_v63  ;;  %v5285_v63 = vunpack.c.h.bf16 %v11309_v6  ;;  %v5284_v54 = vunpack.c.l.bf16 %v11309_v6 }
 0x363   :  { %14919 = vmatprep.subr.bf16.mxu1 %v21964_v9 }
 0x364   :  { %3244 = vmatmul.mubr.f32.gmra.mrb[68].mxu0 %v3138_v25  ;;  %v11152_v25 = vld [vmem:[%s21898_s5 + $0x88] sm:$0xff] }
 0x365   :  { %11147 = vmatprep.mubr.msk.f32.mxu0 %vm2057_vm0, %v3141_v61  ;;  %5009 = vmatmul.mubr.f32.gmra.mrb[122].mxu1 %v4894_v29  ;;  %v11328_v61 = vld [vmem:[%s21897_s4 + $0xa8] sm:$0xff]  ;;  %v14647_v29 = vpack.c.bf16 %v11152_v25, %v11151_v16  ;;  %v11378_v25 = vld [vmem:[%s21897_s4 + $0x118] sm:$0xff] }
 0x366   :  { %14921 = vmatpush1.bf16.msra.mxu1 %v18311_v14  ;;  %11284 = vmatprep.mubr.msk.f32.mxu1 %vm2057_vm0, %v4897_v45  ;;  %v5547_v45 = vunpack.c.h.bf16 %v11328_v61 }
 0x367   :  { %14922 = vmatprep.subr.bf16.mxu1 %v21964_v9  ;;  %14648 = vmatpush3.bf16.msra.mxu0 %v14647_v29 }
 0x368   :  { %3249 = vmatmul.mubr.f32.gmra.mrb[70].mxu0 %v3140_v42  ;;  %14649 = vmatprep.subr.bf16.mxu0 %v21964_v9  ;;  %v3513_v42 = vpop.f32.mrb[57].mxu1 }
 0x369   :  { %11148 = vmatprep.mubr.msk.f32.mxu0 %vm2057_vm0, %v3143_v39  ;;  %5014 = vmatmul.mubr.f32.gmra.mrb[124].mxu1 %v4896_v21  ;;  %v11153_v39 = vld [vmem:[%s21898_s5 + $0x90] sm:$0xff]  ;;  %v11154_v21 = vld [vmem:[%s21898_s5 + $0x98] sm:$0xff]  ;;  %v19007_v36 = vpop.f32.mrb[58].mxu1 }
 0x36a   :  { %14924 = vmatpush1.bf16.msra.mxu1 %v22037_v50  ;;  %11310 = vmatprep.mubr.msk.f32.mxu1 %vm2057_vm0, %v5273_v33  ;;  %v14650_v22 = vpack.c.bf16 %v11154_v21, %v11153_v39  ;;  %v11329_v33 = vld [vmem:[%s21897_s4 + $0xb0] sm:$0xff] }
 0x36b   :  { %14925 = vmatprep.subr.bf16.mxu1 %v21964_v9 }
 0x36c   :  { %3254 = vmatmul.mubr.f32.gmra.mrb[72].mxu0 %v3142_v19  ;;  %v5546_v19 = vunpack.c.l.bf16 %v11328_v61 }
 0x36d   :  { %11149 = vmatprep.mubr.msk.f32.mxu0 %vm2057_vm0, %v3145_v34  ;;  %14651 = vmatpush3.bf16.msra.mxu0 %v14650_v22  ;;  %v5549_v34 = vunpack.c.h.bf16 %v11329_v33 }
 0x36e   :  { %14927 = vmatpush1.bf16.msra.mxu1 %v22038_v27  ;;  %14688 = vmatprep.subr.bf16.mxu0 %v21964_v9 }
 0x36f   :  { %14928 = vmatprep.subr.bf16.mxu1 %v21964_v9 }
 0x370   :  { %3259 = vmatmul.mubr.f32.gmra.mrb[74].mxu0 %v3144_v62  ;;  %v5548_v62 = vunpack.c.l.bf16 %v11329_v33  ;;  %v11379_v33 = vld [vmem:[%s21897_s4 + $0x120] sm:$0xff] }
 0x371   :  { %11150 = vmatprep.mubr.msk.f32.mxu0 %vm2057_vm0, %v3147_v24  ;;  %v5551_v24 = vunpack.c.h.bf16 %v11330_v0 }
 0x372   :  { %14930 = vmatpush1.bf16.msra.mxu1 %v18472_v60 }
 0x373   :  { %14931 = vmatprep.subr.bf16.mxu1 %v21964_v9 }
 0x374   :  { %3264 = vmatmul.mubr.f32.gmra.mrb[76].mxu0 %v3146_v35  ;;  %v11331_v35 = vld [vmem:[%s21897_s4 + $0xc0] sm:$0xff] }
 0x375   :  { %12976 = vmatprep.mubr.msk.f32.mxu0 %vm16571_vm14, %v21992_v12  ;;  %v5553_v31 = vunpack.c.h.bf16 %v11331_v35  ;;  %v5552_v10 = vunpack.c.l.bf16 %v11331_v35  ;;  %v11381_v35 = vld [vmem:[%s21897_s4 + $0x130] sm:$0xff] }
 0x376   :  { %14933 = vmatpush1.bf16.msra.mxu1 %v18562_v58 }
 0x377   :  { %14934 = vmatprep.subr.bf16.mxu1 %v21964_v9 }
 0x37a   :  { %14936 = vmatpush1.bf16.msra.mxu1 %v18619_v47 }
 0x37b   :  { %14937 = vmatprep.subr.bf16.mxu1 %v21964_v9 }
 0x37e   :  { %14939 = vmatpush1.bf16.msra.mxu1 %v18653_v13 }
 0x37f   :  { %5355 = vmatprep.subr.mxu1 %v21992_v12 }
 0x382   :  { %5356 = vmatpush1.msra.mxu1 %v18738_v8 }
 0x383   :  { %14946 = vmatprep.subr.bf16.mxu1 %v21964_v9  ;;  %5372 = vmatmul.mubr.f32.vlgmr.msra.gmra.mrb[126].mxu1 %v5272_v43  ;;  %v5550_v43 = vunpack.c.l.bf16 %v11330_v0  ;;  %v11380_v0 = vld [vmem:[%s21897_s4 + $0x128] sm:$0xff] }
 0x384   :  { %14948 = vmatpush1.bf16.msra.mxu1 %v22032_v32  ;;  %11311 = vmatprep.mubr.msk.f32.mxu1 %vm2057_vm0, %v5275_v17  ;;  %v3518_v17 = vpop.f32.mrb[59].mxu1 }
 0x385   :  { %14949 = vmatprep.subr.bf16.mxu1 %v21964_v9 }
 0x387   :  { %5377 = vmatmul.mubr.f32.gmra.mrb[128].mxu1 %v5274_v7  ;;  %v11332_v7 = vld [vmem:[%s21897_s4 + $0xc8] sm:$0xff] }
 0x388   :  { %14951 = vmatpush1.bf16.msra.mxu1 %v22033_v53  ;;  %11312 = vmatprep.mubr.msk.f32.mxu1 %vm2057_vm0, %v5277_v18  ;;  %v19015_v18 = vpop.f32.mrb[60].mxu1 }
 0x389   :  { %14952 = vmatprep.subr.bf16.mxu1 %v21964_v9 }
 0x38b   :  { %5382 = vmatmul.mubr.f32.gmra.mrb[130].mxu1 %v5276_v44  ;;  %v3523_v44 = vpop.f32.mrb[61].mxu1 }
 0x38c   :  { %14954 = vmatpush1.bf16.msra.mxu1 %v22034_v49  ;;  %11313 = vmatprep.mubr.msk.f32.mxu1 %vm2057_vm0, %v5279_v56  ;;  %v5555_v56 = vunpack.c.h.bf16 %v11332_v7  ;;  %v11382_v44 = vld [vmem:[%s21897_s4 + $0x138] sm:$0xff] }
 0x38d   :  { %14955 = vmatprep.subr.bf16.mxu1 %v21964_v9 }
 0x38f   :  { %5387 = vmatmul.mubr.f32.gmra.mrb[132].mxu1 %v5278_v41  ;;  %v19023_v41 = vpop.f32.mrb[62].mxu1 }
 0x390   :  { %14957 = vmatpush1.bf16.msra.mxu1 %v22035_v30  ;;  %11314 = vmatprep.mubr.msk.f32.mxu1 %vm2057_vm0, %v5281_v52  ;;  %v5554_v52 = vunpack.c.l.bf16 %v11332_v7  ;;  %v3528_v23 = vpop.f32.mrb[63].mxu1  ;;  %v6101_v7 = vunpack.c.h.bf16 %v11381_v35 }
 0x391   :  { %14958 = vmatprep.subr.bf16.mxu1 %v21964_v9  ;;  %v19031_v6 = vpop.f32.mrb[64].mxu1 }
 0x393   :  { %5392 = vmatmul.mubr.f32.gmra.mrb[134].mxu1 %v5280_v11  ;;  %v5557_v11 = vunpack.c.h.bf16 %v11333_v48 }
 0x394   :  { %14960 = vmatpush1.bf16.msra.mxu1 %v22036_v55  ;;  %11315 = vmatprep.mubr.msk.f32.mxu1 %vm2057_vm0, %v5283_v28  ;;  %v11334_v28 = vld [vmem:[%s21897_s4 + $0xd8] sm:$0xff] }
 0x395   :  { %14961 = vmatprep.subr.bf16.mxu1 %v21964_v9  ;;  %v5559_v16 = vunpack.c.h.bf16 %v11334_v28  ;;  %v5558_v29 = vunpack.c.l.bf16 %v11334_v28 }
 0x397   :  { %5397 = vmatmul.mubr.f32.gmra.mrb[136].mxu1 %v5282_v46  ;;  %v5556_v46 = vunpack.c.l.bf16 %v11333_v48  ;;  %v6100_v48 = vunpack.c.l.bf16 %v11381_v35 }
 0x398   :  { %14963 = vmatpush1.bf16.msra.mxu1 %v18311_v14  ;;  %11316 = vmatprep.mubr.msk.f32.mxu1 %vm2057_vm0, %v5285_v63  ;;  %v3533_v63 = vpop.f32.mrb[65].mxu1 }
 0x399   :  { %14964 = vmatprep.subr.bf16.mxu1 %v21964_v9  ;;  %v19039_v61 = vpop.f32.mrb[66].mxu1 }
 0x39b   :  { %5402 = vmatmul.mubr.f32.gmra.mrb[138].mxu1 %v5284_v54  ;;  %v3538_v54 = vpop.f32.mrb[67].mxu1 }
 0x39c   :  { %14966 = vmatpush1.bf16.msra.mxu1 %v22037_v50  ;;  %11335 = vmatprep.mubr.msk.f32.mxu1 %vm2057_vm0, %v5547_v45  ;;  %v6095_v45 = vunpack.c.h.bf16 %v11378_v25  ;;  %v19044_v42 = vpop.f32.mrb[68].mxu1 }
 0x39d   :  { %14967 = vmatprep.subr.bf16.mxu1 %v21964_v9  ;;  %v3543_v39 = vpop.f32.mrb[69].mxu1 }
 0x39e   :  { %v19049_v21 = vpop.f32.mrb[70].mxu1 }
 0x39f   :  { %v3789_v22 = vpop.f32.mrb[71].mxu1 }
 0x3a0   :  { %14969 = vmatpush1.bf16.msra.mxu1 %v22038_v27  ;;  %v11403_v22 = vld [vmem:[%s21897_s4 + $0x150] sm:$0xff] }
 0x3a1   :  { %14970 = vmatprep.subr.bf16.mxu1 %v21964_v9 }
 0x3a4   :  { %14972 = vmatpush1.bf16.msra.mxu1 %v18472_v60 }
 0x3a5   :  { %14973 = vmatprep.subr.bf16.mxu1 %v21964_v9 }
 0x3a8   :  { %14975 = vmatpush1.bf16.msra.mxu1 %v18562_v58 }
 0x3a9   :  { %14976 = vmatprep.subr.bf16.mxu1 %v21964_v9 }
 0x3ac   :  { %14978 = vmatpush1.bf16.msra.mxu1 %v18619_v47 }
 0x3ad   :  { %14979 = vmatprep.subr.bf16.mxu1 %v21964_v9 }
 0x3b0   :  { %14981 = vmatpush1.bf16.msra.mxu1 %v18653_v13 }
 0x3b1   :  { %5629 = vmatprep.subr.mxu1 %v21992_v12 }
 0x3b4   :  { %5630 = vmatpush1.msra.mxu1 %v18738_v8 }
 0x3b5   :  { %15030 = vmatprep.subr.bf16.mxu1 %v21964_v9  ;;  %5646 = vmatmul.mubr.f32.vlgmr.msra.gmra.mrb[140].mxu1 %v5546_v19  ;;  %v6094_v19 = vunpack.c.l.bf16 %v11378_v25  ;;  %v11384_v25 = vld [vmem:[%s21897_s4 + $0x148] sm:$0xff] }
 0x3b6   :  { %15032 = vmatpush1.bf16.msra.mxu1 %v22032_v32  ;;  %11336 = vmatprep.mubr.msk.f32.mxu1 %vm2057_vm0, %v5549_v34  ;;  %v6097_v34 = vunpack.c.h.bf16 %v11379_v33 }
 0x3b7   :  { %15033 = vmatprep.subr.bf16.mxu1 %v21964_v9 }
 0x3b9   :  { %5651 = vmatmul.mubr.f32.gmra.mrb[142].mxu1 %v5548_v62  ;;  %v6096_v62 = vunpack.c.l.bf16 %v11379_v33 }
 0x3ba   :  { %15035 = vmatpush1.bf16.msra.mxu1 %v22033_v53  ;;  %11337 = vmatprep.mubr.msk.f32.mxu1 %vm2057_vm0, %v5551_v24  ;;  %v6099_v24 = vunpack.c.h.bf16 %v11380_v0 }
 0x3bb   :  { %15036 = vmatprep.subr.bf16.mxu1 %v21964_v9 }
 0x3bd   :  { %5656 = vmatmul.mubr.f32.gmra.mrb[144].mxu1 %v5550_v43  ;;  %v19075_v43 = vpop.f32.mrb[72].mxu1 }
 0x3be   :  { %15038 = vmatpush1.bf16.msra.mxu1 %v22034_v49  ;;  %11338 = vmatprep.mubr.msk.f32.mxu1 %vm2057_vm0, %v5553_v31  ;;  %v3794_v17 = vpop.f32.mrb[73].mxu1  ;;  %v6098_v31 = vunpack.c.l.bf16 %v11380_v0 }
 0x3bf   :  { %15039 = vmatprep.subr.bf16.mxu1 %v21964_v9  ;;  %v11404_v17 = vld [vmem:[%s21897_s4 + $0x158] sm:$0xff] }
 0x3c1   :  { %5661 = vmatmul.mubr.f32.gmra.mrb[146].mxu1 %v5552_v10  ;;  %v19079_v10 = vpop.f32.mrb[74].mxu1 }
 0x3c2   :  { %15041 = vmatpush1.bf16.msra.mxu1 %v22035_v30  ;;  %11339 = vmatprep.mubr.msk.f32.mxu1 %vm2057_vm0, %v5555_v56  ;;  %v3799_v56 = vpop.f32.mrb[75].mxu1 }
 0x3c3   :  { %15042 = vmatprep.subr.bf16.mxu1 %v21964_v9  ;;  %v19087_v23 = vpop.f32.mrb[76].mxu1  ;;  %v6370_v56 = vunpack.c.l.bf16 %v11404_v17 }
 0x3c4   :  { %v3804_v28 = vpop.f32.mrb[77].mxu1 }
 0x3c5   :  { %5666 = vmatmul.mubr.f32.gmra.mrb[148].mxu1 %v5554_v52  ;;  %v6103_v52 = vunpack.c.h.bf16 %v11382_v44  ;;  %v11406_v28 = vld [vmem:[%s21897_s4 + $0x168] sm:$0xff] }
 0x3c6   :  { %15044 = vmatpush1.bf16.msra.mxu1 %v22036_v55  ;;  %11340 = vmatprep.mubr.msk.f32.mxu1 %vm2057_vm0, %v5557_v11  ;;  %v11383_v11 = vld [vmem:[%s21897_s4 + $0x140] sm:$0xff] }
 0x3c7   :  { %15045 = vmatprep.subr.bf16.mxu1 %v21964_v9  ;;  %v6105_v63 = vunpack.c.h.bf16 %v11383_v11  ;;  %v6104_v54 = vunpack.c.l.bf16 %v11383_v11 }
 0x3c9   :  { %5671 = vmatmul.mubr.f32.gmra.mrb[150].mxu1 %v5556_v46  ;;  %v6102_v46 = vunpack.c.l.bf16 %v11382_v44  ;;  %v11405_v44 = vld [vmem:[%s21897_s4 + $0x160] sm:$0xff] }
 0x3ca   :  { %15047 = vmatpush1.bf16.msra.mxu1 %v18311_v14  ;;  %11341 = vmatprep.mubr.msk.f32.mxu1 %vm2057_vm0, %v5559_v16  ;;  %v19095_v16 = vpop.f32.mrb[78].mxu1 }
 0x3cb   :  { %15048 = vmatprep.subr.bf16.mxu1 %v21964_v9 }
 0x3cd   :  { %5676 = vmatmul.mubr.f32.gmra.mrb[152].mxu1 %v5558_v29  ;;  %v3809_v29 = vpop.f32.mrb[79].mxu1 }
 0x3ce   :  { %15050 = vmatpush1.bf16.msra.mxu1 %v22037_v50  ;;  %11385 = vmatprep.mubr.msk.f32.mxu1 %vm2057_vm0, %v6095_v45  ;;  %v6107_v45 = vunpack.c.h.bf16 %v11384_v25  ;;  %v19103_v39 = vpop.f32.mrb[80].mxu1 }
 0x3cf   :  { %15051 = vmatprep.subr.bf16.mxu1 %v21964_v9  ;;  %v3814_v33 = vpop.f32.mrb[81].mxu1 }
 0x3d0   :  { %v19111_v0 = vpop.f32.mrb[82].mxu1 }
 0x3d2   :  { %15053 = vmatpush1.bf16.msra.mxu1 %v22038_v27 }
 0x3d3   :  { %15054 = vmatprep.subr.bf16.mxu1 %v21964_v9 }
 0x3d6   :  { %15056 = vmatpush1.bf16.msra.mxu1 %v18472_v60 }
 0x3d7   :  { %15057 = vmatprep.subr.bf16.mxu1 %v21964_v9 }
 0x3da   :  { %15059 = vmatpush1.bf16.msra.mxu1 %v18562_v58 }
 0x3db   :  { %15060 = vmatprep.subr.bf16.mxu1 %v21964_v9 }
 0x3de   :  { %15062 = vmatpush1.bf16.msra.mxu1 %v18619_v47 }
 0x3df   :  { %15063 = vmatprep.subr.bf16.mxu1 %v21964_v9 }
 0x3e2   :  { %15065 = vmatpush1.bf16.msra.mxu1 %v18653_v13 }
 0x3e3   :  { %6177 = vmatprep.subr.mxu1 %v21992_v12 }
 0x3e6   :  { %6178 = vmatpush1.msra.mxu1 %v18738_v8 }
 0x3e7   :  { %15072 = vmatprep.subr.bf16.mxu1 %v21964_v9  ;;  %6194 = vmatmul.mubr.f32.vlgmr.msra.gmra.mrb[154].mxu1 %v6094_v19  ;;  %v6106_v19 = vunpack.c.l.bf16 %v11384_v25  ;;  %v6375_v25 = vunpack.c.h.bf16 %v11406_v28 }
 0x3e8   :  { %15074 = vmatpush1.bf16.msra.mxu1 %v22032_v32  ;;  %11386 = vmatprep.mubr.msk.f32.mxu1 %vm2057_vm0, %v6097_v34  ;;  %v6369_v34 = vunpack.c.h.bf16 %v11403_v22 }
 0x3e9   :  { %15075 = vmatprep.subr.bf16.mxu1 %v21964_v9 }
 0x3eb   :  { %6199 = vmatmul.mubr.f32.gmra.mrb[156].mxu1 %v6096_v62  ;;  %v3819_v62 = vpop.f32.mrb[83].mxu1 }
 0x3ec   :  { %15077 = vmatpush1.bf16.msra.mxu1 %v22033_v53  ;;  %11387 = vmatprep.mubr.msk.f32.mxu1 %vm2057_vm0, %v6099_v24  ;;  %v19116_v24 = vpop.f32.mrb[84].mxu1 }
 0x3ed   :  { %15078 = vmatprep.subr.bf16.mxu1 %v21964_v9  ;;  %v4065_v35 = vpop.f32.mrb[85].mxu1 }
 0x3ef   :  { %6204 = vmatmul.mubr.f32.gmra.mrb[158].mxu1 %v6098_v31  ;;  %v6368_v31 = vunpack.c.l.bf16 %v11403_v22 }
 0x3f0   :  { %15080 = vmatpush1.bf16.msra.mxu1 %v22034_v49  ;;  %11388 = vmatprep.mubr.msk.f32.mxu1 %vm2057_vm0, %v6101_v7  ;;  %v6371_v7 = vunpack.c.h.bf16 %v11404_v17 }
 0x3f1   :  { %15081 = vmatprep.subr.bf16.mxu1 %v21964_v9 }
 0x3f3   :  { %6209 = vmatmul.mubr.f32.gmra.mrb[160].mxu1 %v6100_v48  ;;  %v19137_v48 = vpop.f32.mrb[86].mxu1 }
 0x3f4   :  { %15083 = vmatpush1.bf16.msra.mxu1 %v22035_v30  ;;  %11389 = vmatprep.mubr.msk.f32.mxu1 %vm2057_vm0, %v6103_v52  ;;  %v6373_v52 = vunpack.c.h.bf16 %v11405_v44  ;;  %v4070_v11 = vpop.f32.mrb[87].mxu1 }
 0x3f5   :  { %15084 = vmatprep.subr.bf16.mxu1 %v21964_v9  ;;  %v11177_v11 = vld [vmem:[%s21898_s5 + $0xa8] sm:$0xff] }
 0x3f7   :  { %6214 = vmatmul.mubr.f32.gmra.mrb[162].mxu1 %v6102_v46  ;;  %v6372_v46 = vunpack.c.l.bf16 %v11405_v44 }
 0x3f8   :  { %15086 = vmatpush1.bf16.msra.mxu1 %v22036_v55  ;;  %11390 = vmatprep.mubr.msk.f32.mxu1 %vm2057_vm0, %v6105_v63  ;;  %v19145_v63 = vpop.f32.mrb[88].mxu1 }
 0x3f9   :  { %15087 = vmatprep.subr.bf16.mxu1 %v21964_v9  ;;  %v4075_v29 = vpop.f32.mrb[89].mxu1 }
 0x3fa   :  { %v19153_v22 = vpop.f32.mrb[90].mxu1  ;;  %v19183_v29 = vld [vmem:[%s21897_s4 + $0x188] sm:$0xff] }
 0x3fb   :  { %6219 = vmatmul.mubr.f32.gmra.mrb[164].mxu1 %v6104_v54  ;;  %v11407_v54 = vld [vmem:[%s21897_s4 + $0x170] sm:$0xff] }
 0x3fc   :  { %15089 = vmatpush1.bf16.msra.mxu1 %v18311_v14  ;;  %11391 = vmatprep.mubr.msk.f32.mxu1 %vm2057_vm0, %v6107_v45  ;;  %v6374_v45 = vunpack.c.l.bf16 %v11406_v28  ;;  %v6377_v33 = vunpack.c.h.bf16 %v11407_v54  ;;  %v6376_v62 = vunpack.c.l.bf16 %v11407_v54 }
 0x3fd   :  { %15090 = vmatprep.subr.bf16.mxu1 %v21964_v9 }
 0x3ff   :  { %6224 = vmatmul.mubr.f32.gmra.mrb[166].mxu1 %v6106_v19  ;;  %v4080_v19 = vpop.f32.mrb[91].mxu1 }
 0x400   :  { %15092 = vmatpush1.bf16.msra.mxu1 %v22037_v50  ;;  %11410 = vmatprep.mubr.msk.f32.mxu1 %vm2057_vm0, %v6369_v34  ;;  %v11408_v34 = vld [vmem:[%s21897_s4 + $0x178] sm:$0xff]  ;;  %v19161_v35 = vpop.f32.mrb[92].mxu1 }
 0x401   :  { %15093 = vmatprep.subr.bf16.mxu1 %v21964_v9  ;;  %v6379_v17 = vunpack.c.h.bf16 %v11408_v34  ;;  %v6378_v44 = vunpack.c.l.bf16 %v11408_v34 }
 0x404   :  { %15095 = vmatpush1.bf16.msra.mxu1 %v22038_v27 }
 0x405   :  { %15096 = vmatprep.subr.bf16.mxu1 %v21964_v9 }
 0x408   :  { %15098 = vmatpush1.bf16.msra.mxu1 %v18472_v60 }
 0x409   :  { %15099 = vmatprep.subr.bf16.mxu1 %v21964_v9 }
 0x40c   :  { %15101 = vmatpush1.bf16.msra.mxu1 %v18562_v58 }
 0x40d   :  { %15102 = vmatprep.subr.bf16.mxu1 %v21964_v9 }
 0x410   :  { %15104 = vmatpush1.bf16.msra.mxu1 %v18619_v47 }
 0x411   :  { %15105 = vmatprep.subr.bf16.mxu1 %v21964_v9 }
 0x414   :  { %15107 = vmatpush1.bf16.msra.mxu1 %v18653_v13 }
 0x415   :  { %6451 = vmatprep.subr.mxu1 %v21992_v12 }
 0x418   :  { %6452 = vmatpush1.msra.mxu1 %v18738_v8 }
 0x419   :  { %15114 = vmatprep.subr.bf16.mxu1 %v21964_v9  ;;  %6468 = vmatmul.mubr.f32.vlgmr.msra.gmra.mrb[168].mxu1 %v6368_v31  ;;  %v4085_v31 = vpop.f32.mrb[93].mxu1 }
 0x41a   :  { %15116 = vmatpush1.bf16.msra.mxu1 %v22032_v32  ;;  %11411 = vmatprep.mubr.msk.f32.mxu1 %vm2057_vm0, %v6371_v7  ;;  %v11409_v7 = vld [vmem:[%s21897_s4 + $0x180] sm:$0xff]  ;;  %v6643_v31 = vunpack.c.h.bf16 %v19183_v29 }
 0x41b   :  { %15117 = vmatprep.subr.bf16.mxu1 %v21964_v9  ;;  %v6381_v28 = vunpack.c.h.bf16 %v11409_v7 }
 0x41d   :  { %6473 = vmatmul.mubr.f32.gmra.mrb[170].mxu1 %v6370_v56  ;;  %v19169_v56 = vpop.f32.mrb[94].mxu1 }
 0x41e   :  { %15119 = vmatpush1.bf16.msra.mxu1 %v22033_v53  ;;  %11412 = vmatprep.mubr.msk.f32.mxu1 %vm2057_vm0, %v6373_v52  ;;  %v11176_v52 = vld [vmem:[%s21898_s5 + $0xa0] sm:$0xff] }
 0x41f   :  { %15120 = vmatprep.subr.bf16.mxu1 %v21964_v9 }
 0x421   :  { %6478 = vmatmul.mubr.f32.gmra.mrb[172].mxu1 %v6372_v46  ;;  %v4090_v46 = vpop.f32.mrb[95].mxu1 }
 0x422   :  { %15122 = vmatpush1.bf16.msra.mxu1 %v22034_v49  ;;  %11413 = vmatprep.mubr.msk.f32.mxu1 %vm2057_vm0, %v6375_v25  ;;  %v14689_v25 = vpack.c.bf16 %v11177_v11, %v11176_v52  ;;  %v19185_v54 = vpop.f32.mrb[96].mxu1 }
 0x423   :  { %15123 = vmatprep.subr.bf16.mxu1 %v21964_v9  ;;  %v4095_v19 = vpop.f32.mrb[97].mxu1 }
 0x425   :  { %6483 = vmatmul.mubr.f32.gmra.mrb[174].mxu1 %v6374_v45  ;;  %v11178_v45 = vld [vmem:[%s21898_s5 + $0xb0] sm:$0xff] }
 0x426   :  { %15125 = vmatpush1.bf16.msra.mxu1 %v22035_v30  ;;  %11414 = vmatprep.mubr.msk.f32.mxu1 %vm2057_vm0, %v6377_v33  ;;  %v11179_v33 = vld [vmem:[%s21898_s5 + $0xb8] sm:$0xff] }
 0x427   :  { %15126 = vmatprep.subr.bf16.mxu1 %v21964_v9 }
 0x429   :  { %6488 = vmatmul.mubr.f32.gmra.mrb[176].mxu1 %v6376_v62  ;;  %v6380_v62 = vunpack.c.l.bf16 %v11409_v7 }
 0x42a   :  { %15128 = vmatpush1.bf16.msra.mxu1 %v22036_v55  ;;  %11415 = vmatprep.mubr.msk.f32.mxu1 %vm2057_vm0, %v6379_v17 }
 0x42b   :  { %15129 = vmatprep.subr.bf16.mxu1 %v21964_v9 }
 0x42d   :  { %6493 = vmatmul.mubr.f32.gmra.mrb[178].mxu1 %v6378_v44  ;;  %v14692_v44 = vpack.c.bf16 %v11179_v33, %v11178_v45 }
 0x42e   :  { %15131 = vmatpush1.bf16.msra.mxu1 %v18311_v14  ;;  %11416 = vmatprep.mubr.msk.f32.mxu1 %vm2057_vm0, %v6381_v28 }
 0x42f   :  { %v3235_v34 = vpop.f32.mrb[64].mxu0  ;;  %15132 = vmatprep.subr.bf16.mxu1 %v21964_v9 }
 0x430   :  { %v3237_v17 = vpop.f32.mrb[65].mxu0  ;;  %12977 = vmatmul.mubr.msk.f32.vlgmr.msra.gmra.mrb[50].mxu0 %vm2331_vm15, %v3235_v34 }
 0x431   :  { %14690 = vmatpush3.bf16.msra.mxu0 %v14689_v25  ;;  %12979 = vmatprep.mubr.msk.f32.mxu0 %vm16571_vm14, %v21992_v12  ;;  %v11202_v17 = vld [vmem:[%s21898_s5 + $0xc8] sm:$0xff] }
 0x432   :  { %15134 = vmatpush1.bf16.msra.mxu1 %v22037_v50  ;;  %14691 = vmatprep.subr.bf16.mxu0 %v21964_v9 }
 0x433   :  { %v3240_v52 = vpop.f32.mrb[66].mxu0  ;;  %15135 = vmatprep.subr.bf16.mxu1 %v21964_v9  ;;  %6498 = vmatmul.mubr.f32.gmra.mrb[180].mxu1 %v6380_v62  ;;  %v11201_v62 = vld [vmem:[%s21898_s5 + $0xc0] sm:$0xff] }
 0x434   :  { %v3242_v11 = vpop.f32.mrb[67].mxu0  ;;  %12980 = vmatmul.mubr.msk.f32.gmra.mrb[52].mxu0 %vm2331_vm15, %v3240_v52  ;;  %11435 = vmatprep.mubr.msk.f32.mxu1 %vm2057_vm0, %v6643_v31 }
 0x435   :  { %12982 = vmatprep.mubr.msk.f32.mxu0 %vm16571_vm14, %v21992_v12  ;;  %14693 = vmatpush3.bf16.msra.mxu0 %v14692_v44  ;;  %v6642_v44 = vunpack.c.l.bf16 %v19183_v29  ;;  %v14731_v11 = vpack.c.bf16 %v11202_v17, %v11201_v62  ;;  %v11204_v29 = vld [vmem:[%s21898_s5 + $0xd8] sm:$0xff] }
 0x436   :  { %15137 = vmatpush1.bf16.msra.mxu1 %v22038_v27  ;;  %14730 = vmatprep.subr.bf16.mxu0 %v21964_v9  ;;  %v11229_v62 = vld [vmem:[%s21898_s5 + $0xf8] sm:$0xff] }
 0x437   :  { %v3245_v7 = vpop.f32.mrb[68].mxu0  ;;  %15138 = vmatprep.subr.bf16.mxu1 %v21964_v9 }
 0x438   :  { %v3247_v28 = vpop.f32.mrb[69].mxu0  ;;  %12983 = vmatmul.mubr.msk.f32.gmra.mrb[54].mxu0 %vm2331_vm15, %v3245_v7  ;;  %v11203_v7 = vld [vmem:[%s21898_s5 + $0xd0] sm:$0xff] }
 0x439   :  { %12985 = vmatprep.mubr.msk.f32.mxu0 %vm16571_vm14, %v21992_v12  ;;  %v14734_v28 = vpack.c.bf16 %v11204_v29, %v11203_v7 }
 0x43a   :  { %15140 = vmatpush1.bf16.msra.mxu1 %v18472_v60 }
 0x43b   :  { %v3250_v46 = vpop.f32.mrb[70].mxu0  ;;  %15141 = vmatprep.subr.bf16.mxu1 %v21964_v9 }
 0x43c   :  { %v3252_v25 = vpop.f32.mrb[71].mxu0  ;;  %12986 = vmatmul.mubr.msk.f32.gmra.mrb[56].mxu0 %vm2331_vm15, %v3250_v46  ;;  %v19255_v46 = vpop.f32.mrb[98].mxu1 }
 0x43d   :  { %12988 = vmatprep.mubr.msk.f32.mxu0 %vm16571_vm14, %v21992_v12  ;;  %v4841_v25 = vpop.f32.mrb[99].mxu1 }
 0x43e   :  { %15143 = vmatpush1.bf16.msra.mxu1 %v18562_v58 }
 0x43f   :  { %v3255_v45 = vpop.f32.mrb[72].mxu0  ;;  %15144 = vmatprep.subr.bf16.mxu1 %v21964_v9 }
 0x440   :  { %v3257_v33 = vpop.f32.mrb[73].mxu0  ;;  %12989 = vmatmul.mubr.msk.f32.gmra.mrb[58].mxu0 %vm2331_vm15, %v3255_v45 }
 0x441   :  { %12991 = vmatprep.mubr.msk.f32.mxu0 %vm16571_vm14, %v21992_v12 }
 0x442   :  { %15146 = vmatpush1.bf16.msra.mxu1 %v18619_v47 }
 0x443   :  { %v3260_v19 = vpop.f32.mrb[74].mxu0  ;;  %15147 = vmatprep.subr.bf16.mxu1 %v21964_v9 }
 0x444   :  { %v3262_v34 = vpop.f32.mrb[75].mxu0  ;;  %12992 = vmatmul.mubr.msk.f32.gmra.mrb[60].mxu0 %vm2331_vm15, %v3260_v19 }
 0x445   :  { %12994 = vmatprep.mubr.msk.f32.mxu0 %vm16571_vm14, %v21992_v12 }
 0x446   :  { %15149 = vmatpush1.bf16.msra.mxu1 %v18653_v13 }
 0x447   :  { %v3265_v31 = vpop.f32.mrb[76].mxu0  ;;  %6725 = vmatprep.subr.mxu1 %v21992_v12 }
 0x448   :  { %v3267_v52 = vpop.f32.mrb[77].mxu0  ;;  %12995 = vmatmul.mubr.msk.f32.gmra.mrb[62].mxu0 %vm2331_vm15, %v3265_v31 }
 0x449   :  { %13005 = vmatprep.mubr.msk.f32.mxu0 %vm16571_vm14, %v21992_v12 }
 0x44a   :  { %6726 = vmatpush1.msra.mxu1 %v18738_v8 }
 0x44b   :  { %15156 = vmatprep.subr.bf16.mxu1 %v21964_v9  ;;  %6742 = vmatmul.mubr.f32.vlgmr.msra.gmra.mrb[182].mxu1 %v6642_v44 }
 0x44c   :  { %13006 = vmatmul.mubr.msk.f32.vlgmr.msra.gmra.mrb[50].mxu0 %vm2331_vm15, %v18974_v4  ;;  %15158 = vmatpush1.bf16.msra.mxu1 %v22032_v32  ;;  %v19260_v4 = vpop.f32.mrb[100].mxu1 }
 0x44d   :  { %14732 = vmatpush3.bf16.msra.mxu0 %v14731_v11  ;;  %13008 = vmatprep.mubr.msk.f32.mxu0 %vm16571_vm14, %v21992_v12  ;;  %v4846_v45 = vpop.f32.mrb[101].mxu1 }
 0x44e   :  { %15159 = vmatprep.subr.bf16.mxu1 %v21964_v9  ;;  %14733 = vmatprep.subr.bf16.mxu0 %v21964_v9  ;;  %v19265_v33 = vpop.f32.mrb[102].mxu1 }
 0x44f   :  { %v4851_v19 = vpop.f32.mrb[103].mxu1 }
 0x450   :  { %13009 = vmatmul.mubr.msk.f32.gmra.mrb[52].mxu0 %vm2331_vm15, %v19007_v36  ;;  %15161 = vmatpush1.bf16.msra.mxu1 %v22033_v53  ;;  %v19271_v36 = vpop.f32.mrb[104].mxu1 }
 0x451   :  { %13011 = vmatprep.mubr.msk.f32.mxu0 %vm16571_vm14, %v21992_v12  ;;  %15162 = vmatprep.subr.bf16.mxu1 %v21964_v9  ;;  %v4856_v34 = vpop.f32.mrb[105].mxu1 }
 0x452   :  { %14735 = vmatpush3.bf16.msra.mxu0 %v14734_v28  ;;  %v19449_v17 = vpop.f32.mrb[106].mxu1 }
 0x453   :  { %14772 = vmatprep.subr.bf16.mxu0 %v21964_v9  ;;  %v4861_v31 = vpop.f32.mrb[107].mxu1 }
 0x454   :  { %13012 = vmatmul.mubr.msk.f32.gmra.mrb[54].mxu0 %vm2331_vm15, %v19015_v18  ;;  %15164 = vmatpush1.bf16.msra.mxu1 %v22034_v49  ;;  %v11226_v18 = vld [vmem:[%s21898_s5 + $0xe0] sm:$0xff]  ;;  %v19451_v44 = vpop.f32.mrb[108].mxu1 }
 0x455   :  { %13014 = vmatprep.mubr.msk.f32.mxu0 %vm16571_vm14, %v21992_v12  ;;  %15165 = vmatprep.subr.bf16.mxu1 %v21964_v9  ;;  %v4866_v52 = vpop.f32.mrb[109].mxu1 }
 0x456   :  { %v19453_v11 = vpop.f32.mrb[110].mxu1 }
 0x457   :  { %v4871_v7 = vpop.f32.mrb[111].mxu1 }
 0x458   :  { %13015 = vmatmul.mubr.msk.f32.gmra.mrb[56].mxu0 %vm2331_vm15, %v19023_v41  ;;  %15167 = vmatpush1.bf16.msra.mxu1 %v22035_v30  ;;  %v11227_v41 = vld [vmem:[%s21898_s5 + $0xe8] sm:$0xff]  ;;  %v19455_v29 = vpop.f32.mrb[112].mxu1 }
 0x459   :  { %13017 = vmatprep.mubr.msk.f32.mxu0 %vm16571_vm14, %v21992_v12  ;;  %15168 = vmatprep.subr.bf16.mxu1 %v21964_v9  ;;  %v4987_v28 = vpop.f32.mrb[113].mxu1 }
 0x45a   :  { %v19457_v25 = vpop.f32.mrb[114].mxu1 }
 0x45b   :  { %v4992_v45 = vpop.f32.mrb[115].mxu1 }
 0x45c   :  { %13018 = vmatmul.mubr.msk.f32.gmra.mrb[58].mxu0 %vm2331_vm15, %v19031_v6  ;;  %15170 = vmatpush1.bf16.msra.mxu1 %v22036_v55  ;;  %v14773_v6 = vpack.c.bf16 %v11227_v41, %v11226_v18  ;;  %v19459_v19 = vpop.f32.mrb[116].mxu1 }
 0x45d   :  { %13020 = vmatprep.mubr.msk.f32.mxu0 %vm16571_vm14, %v21992_v12  ;;  %15171 = vmatprep.subr.bf16.mxu1 %v21964_v9  ;;  %v4997_v34 = vpop.f32.mrb[117].mxu1 }
 0x45e   :  { %v19461_v18 = vpop.f32.mrb[118].mxu1 }
 0x45f   :  { %v5002_v41 = vpop.f32.mrb[119].mxu1 }
 0x460   :  { %13021 = vmatmul.mubr.msk.f32.gmra.mrb[60].mxu0 %vm2331_vm15, %v19039_v61  ;;  %15173 = vmatpush1.bf16.msra.mxu1 %v18311_v14  ;;  %v11228_v61 = vld [vmem:[%s21898_s5 + $0xf0] sm:$0xff] }
 0x461   :  { %13023 = vmatprep.mubr.msk.f32.mxu0 %vm16571_vm14, %v21992_v12  ;;  %15174 = vmatprep.subr.bf16.mxu1 %v21964_v9 }
 0x464   :  { %13024 = vmatmul.mubr.msk.f32.gmra.mrb[62].mxu0 %vm2331_vm15, %v19044_v42  ;;  %15176 = vmatpush1.bf16.msra.mxu1 %v22037_v50  ;;  %v14776_v42 = vpack.c.bf16 %v11229_v62, %v11228_v61 }
 0x465   :  { %13034 = vmatprep.mubr.msk.f32.mxu0 %vm16571_vm14, %v21992_v12  ;;  %15177 = vmatprep.subr.bf16.mxu1 %v21964_v9 }
 0x468   :  { %13035 = vmatmul.mubr.msk.f32.vlgmr.msra.gmra.mrb[50].mxu0 %vm2331_vm15, %v19049_v21  ;;  %15179 = vmatpush1.bf16.msra.mxu1 %v22038_v27 }
 0x469   :  { %14774 = vmatpush3.bf16.msra.mxu0 %v14773_v6  ;;  %13037 = vmatprep.mubr.msk.f32.mxu0 %vm16571_vm14, %v21992_v12  ;;  %v19463_v6 = vpop.f32.mrb[120].mxu1 }
 0x46a   :  { %15180 = vmatprep.subr.bf16.mxu1 %v21964_v9  ;;  %14775 = vmatprep.subr.bf16.mxu0 %v21964_v9  ;;  %v5007_v61 = vpop.f32.mrb[121].mxu1 }
 0x46b   :  { %v19465_v62 = vpop.f32.mrb[122].mxu1 }
 0x46c   :  { %13038 = vmatmul.mubr.msk.f32.gmra.mrb[52].mxu0 %vm2331_vm15, %v19075_v43  ;;  %15182 = vmatpush1.bf16.msra.mxu1 %v18472_v60 }
 0x46d   :  { %13040 = vmatprep.mubr.msk.f32.mxu0 %vm16571_vm14, %v21992_v12  ;;  %15183 = vmatprep.subr.bf16.mxu1 %v21964_v9 }
 0x46e   :  { %14777 = vmatpush3.bf16.msra.mxu0 %v14776_v42  ;;  %v5012_v42 = vpop.f32.mrb[123].mxu1 }
 0x46f   :  { %14778 = vmatprep.subr.bf16.mxu0 %v21964_v9 }
 0x470   :  { %13041 = vmatmul.mubr.msk.f32.gmra.mrb[54].mxu0 %vm2331_vm15, %v19079_v10  ;;  %15185 = vmatpush1.bf16.msra.mxu1 %v18562_v58  ;;  %v11240_v10 = vld [vmem:[%s21897_s4 + $0x1d8] sm:$0xff] }
 0x471   :  { %13043 = vmatprep.mubr.msk.f32.mxu0 %vm16571_vm14, %v21992_v12  ;;  %15186 = vmatprep.subr.bf16.mxu1 %v21964_v9 }
 0x474   :  { %13044 = vmatmul.mubr.msk.f32.gmra.mrb[56].mxu0 %vm2331_vm15, %v19087_v23  ;;  %15188 = vmatpush1.bf16.msra.mxu1 %v18619_v47 }
 0x475   :  { %13046 = vmatprep.mubr.msk.f32.mxu0 %vm16571_vm14, %v21992_v12  ;;  %15189 = vmatprep.subr.bf16.mxu1 %v21964_v9 }
 0x478   :  { %13047 = vmatmul.mubr.msk.f32.gmra.mrb[58].mxu0 %vm2331_vm15, %v19095_v16  ;;  %15191 = vmatpush1.bf16.msra.mxu1 %v18653_v13  ;;  %v11241_v16 = vld [vmem:[%s21897_s4 + $0x1e0] sm:$0xff] }
 0x479   :  { %13049 = vmatprep.mubr.msk.f32.mxu0 %vm16571_vm14, %v21992_v12  ;;  %6999 = vmatprep.subr.mxu1 %v21992_v12 }
 0x47c   :  { %13050 = vmatmul.mubr.msk.f32.gmra.mrb[60].mxu0 %vm2331_vm15, %v19103_v39  ;;  %7000 = vmatpush1.msra.mxu1 %v18738_v8  ;;  %v4244_v39 = vunpack.c.l.bf16 %v11240_v10 }
 0x47d   :  { %13052 = vmatprep.mubr.msk.f32.mxu0 %vm16571_vm14, %v21992_v12 }
 0x480   :  { %13053 = vmatmul.mubr.msk.f32.gmra.mrb[62].mxu0 %vm2331_vm15, %v19111_v0  ;;  %v4247_v0 = vunpack.c.h.bf16 %v11241_v16 }
 0x481   :  { %13063 = vmatprep.mubr.msk.f32.mxu0 %vm16571_vm14, %v21992_v12 }
 0x484   :  { %13064 = vmatmul.mubr.msk.f32.vlgmr.msra.gmra.mrb[50].mxu0 %vm2331_vm15, %v19116_v24  ;;  %v11242_v24 = vld [vmem:[%s21897_s4 + $0x1e8] sm:$0xff] }
 0x485   :  { %14780 = vmatpush1.bf16.msra.mxu0 %v22039_v3  ;;  %13066 = vmatprep.mubr.msk.f32.mxu0 %vm16571_vm14, %v21992_v12  ;;  %v11253_v3 = vld [vmem:[%s21898_s5 + $0x110] sm:$0xff] }
 0x486   :  { %14781 = vmatprep.subr.bf16.mxu0 %v21964_v9 }
 0x488   :  { %13067 = vmatmul.mubr.msk.f32.gmra.mrb[52].mxu0 %vm2331_vm15, %v19137_v48  ;;  %v4246_v48 = vunpack.c.l.bf16 %v11241_v16 }
 0x489   :  { %14783 = vmatpush1.bf16.msra.mxu0 %v22040_v26  ;;  %13069 = vmatprep.mubr.msk.f32.mxu0 %vm16571_vm14, %v21992_v12  ;;  %v11254_v26 = vld [vmem:[%s21898_s5 + $0x118] sm:$0xff] }
 0x48a   :  { %14784 = vmatprep.subr.bf16.mxu0 %v21964_v9  ;;  %v14818_v43 = vpack.c.bf16 %v11254_v26, %v11253_v3 }
 0x48c   :  { %13070 = vmatmul.mubr.msk.f32.gmra.mrb[54].mxu0 %vm2331_vm15, %v19145_v63  ;;  %v4249_v63 = vunpack.c.h.bf16 %v11242_v24 }
 0x48d   :  { %14786 = vmatpush1.bf16.msra.mxu0 %v22008_v15  ;;  %13072 = vmatprep.mubr.msk.f32.mxu0 %vm16571_vm14, %v21992_v12  ;;  %v11237_v15 = vld [vmem:[%s21897_s4 + $0x1c0] sm:$0xff] }
 0x48e   :  { %14787 = vmatprep.subr.bf16.mxu0 %v21964_v9 }
 0x490   :  { %13073 = vmatmul.mubr.msk.f32.gmra.mrb[56].mxu0 %vm2331_vm15, %v19153_v22  ;;  %v11243_v22 = vld [vmem:[%s21897_s4 + $0x1f0] sm:$0xff] }
 0x491   :  { %14789 = vmatpush1.bf16.msra.mxu0 %v17042_v51  ;;  %13075 = vmatprep.mubr.msk.f32.mxu0 %vm16571_vm14, %v21992_v12  ;;  %v4239_v51 = vunpack.c.h.bf16 %v11237_v15 }
 0x492   :  { %14790 = vmatprep.subr.bf16.mxu0 %v21964_v9 }
 0x494   :  { %13076 = vmatmul.mubr.msk.f32.gmra.mrb[58].mxu0 %vm2331_vm15, %v19161_v35  ;;  %v4248_v35 = vunpack.c.l.bf16 %v11242_v24 }
 0x495   :  { %14792 = vmatpush1.bf16.msra.mxu0 %v17140_v59  ;;  %13078 = vmatprep.mubr.msk.f32.mxu0 %vm16571_vm14, %v21992_v12  ;;  %v11238_v59 = vld [vmem:[%s21897_s4 + $0x1c8] sm:$0xff] }
 0x496   :  { %14793 = vmatprep.subr.bf16.mxu0 %v21964_v9 }
 0x498   :  { %13079 = vmatmul.mubr.msk.f32.gmra.mrb[60].mxu0 %vm2331_vm15, %v19169_v56  ;;  %v4251_v56 = vunpack.c.h.bf16 %v11243_v22 }
 0x499   :  { %14795 = vmatpush1.bf16.msra.mxu0 %v17173_v20  ;;  %13081 = vmatprep.mubr.msk.f32.mxu0 %vm16571_vm14, %v21992_v12  ;;  %v11251_v20 = vld [vmem:[%s21898_s5 + $0x100] sm:$0xff] }
 0x49a   :  { %14796 = vmatprep.subr.bf16.mxu0 %v21964_v9 }
 0x49c   :  { %13082 = vmatmul.mubr.msk.f32.gmra.mrb[62].mxu0 %vm2331_vm15, %v19185_v54  ;;  %v4250_v54 = vunpack.c.l.bf16 %v11243_v22 }
 0x49d   :  { %14798 = vmatpush1.bf16.msra.mxu0 %v17190_v5  ;;  %11244 = vmatprep.mubr.msk.f32.mxu0 %vm2057_vm0, %v4239_v51  ;;  %v11252_v5 = vld [vmem:[%s21898_s5 + $0x108] sm:$0xff] }
 0x49e   :  { %14799 = vmatprep.subr.bf16.mxu0 %v21964_v9 }
 0x4a1   :  { %14801 = vmatpush1.bf16.msra.mxu0 %v17237_v37  ;;  %v4238_v37 = vunpack.c.l.bf16 %v11237_v15  ;;  %v19467_v15 = vpop.f32.mrb[124].mxu1 }
 0x4a2   :  { %14802 = vmatprep.subr.bf16.mxu0 %v21964_v9  ;;  %v5017_v51 = vpop.f32.mrb[125].mxu1 }
 0x4a5   :  { %14804 = vmatpush1.bf16.msra.mxu0 %v17349_v38  ;;  %v4241_v38 = vunpack.c.h.bf16 %v11238_v59 }
 0x4a6   :  { %14805 = vmatprep.subr.bf16.mxu0 %v21964_v9 }
 0x4a9   :  { %14807 = vmatpush1.bf16.msra.mxu0 %v17421_v1  ;;  %v14815_v1 = vpack.c.bf16 %v11252_v5, %v11251_v20 }
 0x4aa   :  { %14808 = vmatprep.subr.bf16.mxu0 %v21964_v9 }
 0x4ad   :  { %14810 = vmatpush1.bf16.msra.mxu0 %v21989_v57  ;;  %v11239_v57 = vld [vmem:[%s21897_s4 + $0x1d0] sm:$0xff] }
 0x4ae   :  { %14811 = vmatprep.subr.bf16.mxu0 %v21964_v9  ;;  %v4243_v21 = vunpack.c.h.bf16 %v11239_v57  ;;  %v4242_v23 = vunpack.c.l.bf16 %v11239_v57 }
 0x4b1   :  { %14813 = vmatpush1.bf16.msra.mxu0 %v21991_v2  ;;  %v4240_v2 = vunpack.c.l.bf16 %v11238_v59  ;;  %v19469_v59 = vpop.f32.mrb[126].mxu1 }
 0x4b2   :  { %4321 = vmatprep.subr.mxu0 %v21992_v12  ;;  %v5375_v20 = vpop.f32.mrb[127].mxu1 }
 0x4b3   :  { %v19471_v5 = vpop.f32.mrb[128].mxu1 }
 0x4b5   :  { %4322 = vmatpush1.msra.mxu0 %v17515_v40  ;;  %v4245_v40 = vunpack.c.h.bf16 %v11240_v10 }
 0x4b6   :  { %4338 = vmatmul.mubr.f32.vlgmr.msra.gmra.mrb[78].mxu0 %v4238_v37  ;;  %14814 = vmatprep.subr.bf16.mxu0 %v21964_v9  ;;  %v5380_v37 = vpop.f32.mrb[129].mxu1 }
 0x4b7   :  { %11245 = vmatprep.mubr.msk.f32.mxu0 %vm2057_vm0, %v4241_v38  ;;  %14816 = vmatpush3.bf16.msra.mxu0 %v14815_v1  ;;  %v19473_v38 = vpop.f32.mrb[130].mxu1 }
 0x4b8   :  { %14817 = vmatprep.subr.bf16.mxu0 %v21964_v9  ;;  %v5385_v1 = vpop.f32.mrb[131].mxu1 }
 0x4b9   :  { %v19475_v57 = vpop.f32.mrb[132].mxu1 }
 0x4ba   :  { %4343 = vmatmul.mubr.f32.gmra.mrb[80].mxu0 %v4240_v2  ;;  %v5390_v3 = vpop.f32.mrb[133].mxu1 }
 0x4bb   :  { %11246 = vmatprep.mubr.msk.f32.mxu0 %vm2057_vm0, %v4243_v21  ;;  %14819 = vmatpush3.bf16.msra.mxu0 %v14818_v43  ;;  %v19477_v26 = vpop.f32.mrb[134].mxu1 }
 0x4bc   :  { %14892 = vmatprep.subr.bf16.mxu0 %v21964_v9  ;;  %v5395_v2 = vpop.f32.mrb[135].mxu1 }
 0x4bd   :  { %v19479_v21 = vpop.f32.mrb[136].mxu1 }
 0x4be   :  { %4348 = vmatmul.mubr.f32.gmra.mrb[82].mxu0 %v4242_v23  ;;  %v5400_v43 = vpop.f32.mrb[137].mxu1 }
 0x4bf   :  { %11247 = vmatprep.mubr.msk.f32.mxu0 %vm2057_vm0, %v4245_v40  ;;  %v19481_v10 = vpop.f32.mrb[138].mxu1 }
 0x4c0   :  { %v5405_v23 = vpop.f32.mrb[139].mxu1 }
 0x4c1   :  { %v19483_v40 = vpop.f32.mrb[140].mxu1 }
 0x4c2   :  { %4353 = vmatmul.mubr.f32.gmra.mrb[84].mxu0 %v4244_v39  ;;  %v5649_v16 = vpop.f32.mrb[141].mxu1  ;;  %v11285_v39 = vld [vmem:[%s21898_s5 + $0x20] sm:$0xff] }
 0x4c3   :  { %11248 = vmatprep.mubr.msk.f32.mxu0 %vm2057_vm0, %v4247_v0  ;;  %v11286_v0 = vld [vmem:[%s21898_s5 + $0x28] sm:$0xff]  ;;  %v19504_v52 = vpop.f32.mrb[142].mxu1 }
 0x4c4   :  { %v14893_v24 = vpack.c.bf16 %v11286_v0, %v11285_v39  ;;  %v5654_v7 = vpop.f32.mrb[143].mxu1  ;;  %v4873_v39 = vld [vmem:[%s21898_s5] sm:$0xff]  ;;  %v4874_v0 = vld [vmem:[%s21898_s5 + $0x8] sm:$0xff] }
 0x4c5   :  { %v19510_v34 = vpop.f32.mrb[144].mxu1 }
 0x4c6   :  { %4358 = vmatmul.mubr.f32.gmra.mrb[86].mxu0 %v4246_v48  ;;  %v11287_v48 = vld [vmem:[%s21898_s5 + $0x30] sm:$0xff]  ;;  %v5659_v41 = vpop.f32.mrb[145].mxu1 }
 0x4c7   :  { %11249 = vmatprep.mubr.msk.f32.mxu0 %vm2057_vm0, %v4249_v63  ;;  %v11288_v63 = vld [vmem:[%s21898_s5 + $0x38] sm:$0xff]  ;;  %v19515_v51 = vpop.f32.mrb[146].mxu1 }
 0x4c8   :  { %v5664_v20 = vpop.f32.mrb[147].mxu1 }
 0x4c9   :  { %v19520_v3 = vpop.f32.mrb[148].mxu1 }
 0x4ca   :  { %4363 = vmatmul.mubr.f32.gmra.mrb[88].mxu0 %v4248_v35  ;;  %v5669_v2 = vpop.f32.mrb[149].mxu1 }
 0x4cb   :  { %11250 = vmatprep.mubr.msk.f32.mxu0 %vm2057_vm0, %v4251_v56  ;;  %v14896_v56 = vpack.c.bf16 %v11288_v63, %v11287_v48  ;;  %v19525_v16 = vpop.f32.mrb[150].mxu1 }
 0x4ce   :  { %4368 = vmatmul.mubr.f32.gmra.mrb[90].mxu0 %v4250_v54 }
 0x4cf   :  { %13092 = vmatprep.mubr.msk.f32.mxu0 %vm16571_vm14, %v21992_v12 }
 0x589   :  { %v4339_v22 = vpop.f32.mrb[78].mxu0 }
 0x58a   :  { %v4341_v35 = vpop.f32.mrb[79].mxu0  ;;  %13093 = vmatmul.mubr.msk.f32.vlgmr.msra.gmra.mrb[50].mxu0 %vm2331_vm15, %v4339_v22  ;;  %v14899_v22 = vpack.c.bf16 %v4874_v0, %v4873_v39 }
 0x58b   :  { %14894 = vmatpush3.bf16.msra.mxu0 %v14893_v24  ;;  %13095 = vmatprep.mubr.msk.f32.mxu0 %vm16571_vm14, %v21992_v12  ;;  %v5674_v24 = vpop.f32.mrb[151].mxu1 }
 0x58c   :  { %14895 = vmatprep.subr.bf16.mxu0 %v21964_v9  ;;  %v19536_v35 = vpop.f32.mrb[152].mxu1 }
 0x58d   :  { %v4344_v54 = vpop.f32.mrb[80].mxu0 }
 0x58e   :  { %v4346_v31 = vpop.f32.mrb[81].mxu0  ;;  %13096 = vmatmul.mubr.msk.f32.gmra.mrb[52].mxu0 %vm2331_vm15, %v4344_v54  ;;  %v4876_v54 = vld [vmem:[%s21898_s5 + $0x18] sm:$0xff] }
 0x58f   :  { %13098 = vmatprep.mubr.msk.f32.mxu0 %vm16571_vm14, %v21992_v12  ;;  %14897 = vmatpush3.bf16.msra.mxu0 %v14896_v56  ;;  %v4875_v56 = vld [vmem:[%s21898_s5 + $0x10] sm:$0xff]  ;;  %v5679_v31 = vpop.f32.mrb[153].mxu1 }
 0x590   :  { %14898 = vmatprep.subr.bf16.mxu0 %v21964_v9  ;;  %v14902_v7 = vpack.c.bf16 %v4876_v54, %v4875_v56  ;;  %v11459_v54 = vld [vmem:[%s21897_s4 + $0x1f0] sm:$0xff]  ;;  %v11357_v31 = vld [vmem:[%s21897_s4 + $0x100] sm:$0xff] }
 0x591   :  { %v4349_v28 = vpop.f32.mrb[82].mxu0 }
 0x592   :  { %v4351_v45 = vpop.f32.mrb[83].mxu0  ;;  %13099 = vmatmul.mubr.msk.f32.gmra.mrb[54].mxu0 %vm2331_vm15, %v4349_v28  ;;  %v11434_v28 = vld [vmem:[%s21897_s4 + $0x1b8] sm:$0xff] }
 0x593   :  { %13101 = vmatprep.mubr.msk.f32.mxu0 %vm16571_vm14, %v21992_v12  ;;  %v6655_v45 = vunpack.c.h.bf16 %v11434_v28 }
 0x595   :  { %v4354_v61 = vpop.f32.mrb[84].mxu0 }
 0x596   :  { %v4356_v42 = vpop.f32.mrb[85].mxu0  ;;  %13102 = vmatmul.mubr.msk.f32.gmra.mrb[56].mxu0 %vm2331_vm15, %v4354_v61 }
 0x597   :  { %13104 = vmatprep.mubr.msk.f32.mxu0 %vm16571_vm14, %v21992_v12 }
 0x599   :  { %v4359_v37 = vpop.f32.mrb[86].mxu0 }
 0x59a   :  { %v4361_v1 = vpop.f32.mrb[87].mxu0  ;;  %13105 = vmatmul.mubr.msk.f32.gmra.mrb[58].mxu0 %vm2331_vm15, %v4359_v37 }
 0x59b   :  { %13107 = vmatprep.mubr.msk.f32.mxu0 %vm16571_vm14, %v21992_v12  ;;  %v11354_v1 = vld [vmem:[%s21897_s4 + $0xe8] sm:$0xff] }
 0x59c   :  { %v5822_v0 = vunpack.c.l.bf16 %v11354_v1 }
 0x59d   :  { %v4364_v43 = vpop.f32.mrb[88].mxu0 }
 0x59e   :  { %v4366_v23 = vpop.f32.mrb[89].mxu0  ;;  %13108 = vmatmul.mubr.msk.f32.gmra.mrb[60].mxu0 %vm2331_vm15, %v4364_v43  ;;  %v5823_v43 = vunpack.c.h.bf16 %v11354_v1 }
 0x59f   :  { %13110 = vmatprep.mubr.msk.f32.mxu0 %vm16571_vm14, %v21992_v12  ;;  %v11457_v23 = vld [vmem:[%s21897_s4 + $0x1e0] sm:$0xff] }
 0x5a0   :  { %v6925_v39 = vunpack.c.h.bf16 %v11457_v23 }
 0x5a1   :  { %v4369_v48 = vpop.f32.mrb[90].mxu0 }
 0x5a2   :  { %v4371_v63 = vpop.f32.mrb[91].mxu0  ;;  %13111 = vmatmul.mubr.msk.f32.gmra.mrb[62].mxu0 %vm2331_vm15, %v4369_v48  ;;  %v11458_v48 = vld [vmem:[%s21897_s4 + $0x1e8] sm:$0xff] }
 0x5a3   :  { %13121 = vmatprep.mubr.msk.f32.mxu0 %vm16571_vm14, %v21992_v12  ;;  %v11356_v63 = vld [vmem:[%s21897_s4 + $0xf8] sm:$0xff] }
 0x5a4   :  { %v5827_v56 = vunpack.c.h.bf16 %v11356_v63 }
 0x5a6   :  { %13122 = vmatmul.mubr.msk.f32.vlgmr.msra.gmra.mrb[92].mxu0 %vm2331_vm15, %v19455_v29  ;;  %v11317_v29 = vld [vmem:[%s21898_s5 + $0x40] sm:$0xff] }
 0x5a7   :  { %14900 = vmatpush3.bf16.msra.mxu0 %v14899_v22  ;;  %13124 = vmatprep.mubr.msk.f32.mxu0 %vm16571_vm14, %v21992_v12  ;;  %v6927_v22 = vunpack.c.h.bf16 %v11458_v48 }
 0x5a8   :  { %14901 = vmatprep.subr.bf16.mxu0 %v21964_v9 }
 0x5aa   :  { %13125 = vmatmul.mubr.msk.f32.gmra.mrb[94].mxu0 %vm2331_vm15, %v19457_v25  ;;  %v11318_v25 = vld [vmem:[%s21898_s5 + $0x48] sm:$0xff] }
 0x5ab   :  { %13127 = vmatprep.mubr.msk.f32.mxu0 %vm16571_vm14, %v21992_v12  ;;  %14903 = vmatpush3.bf16.msra.mxu0 %v14902_v7  ;;  %v6929_v7 = vunpack.c.h.bf16 %v11459_v54 }
 0x5ac   :  { %14940 = vmatprep.subr.bf16.mxu0 %v21964_v9 }
 0x5ae   :  { %13128 = vmatmul.mubr.msk.f32.gmra.mrb[96].mxu0 %vm2331_vm15, %v19459_v19  ;;  %v14941_v19 = vpack.c.bf16 %v11318_v25, %v11317_v29  ;;  %v6928_v29 = vunpack.c.l.bf16 %v11459_v54  ;;  %v5826_v25 = vunpack.c.l.bf16 %v11356_v63 }
 0x5af   :  { %13130 = vmatprep.mubr.msk.f32.mxu0 %vm16571_vm14, %v21992_v12 }
 0x5b2   :  { %13131 = vmatmul.mubr.msk.f32.gmra.mrb[98].mxu0 %vm2331_vm15, %v19461_v18  ;;  %v11319_v18 = vld [vmem:[%s21898_s5 + $0x50] sm:$0xff] }
 0x5b3   :  { %13133 = vmatprep.mubr.msk.f32.mxu0 %vm16571_vm14, %v21992_v12 }
 0x5b6   :  { %13134 = vmatmul.mubr.msk.f32.gmra.mrb[100].mxu0 %vm2331_vm15, %v19463_v6  ;;  %v11320_v6 = vld [vmem:[%s21898_s5 + $0x58] sm:$0xff] }
 0x5b7   :  { %13136 = vmatprep.mubr.msk.f32.mxu0 %vm16571_vm14, %v21992_v12 }
 0x5ba   :  { %13137 = vmatmul.mubr.msk.f32.gmra.mrb[102].mxu0 %vm2331_vm15, %v19465_v62  ;;  %v14944_v62 = vpack.c.bf16 %v11320_v6, %v11319_v18  ;;  %v11367_v18 = vld [vmem:[%s21898_s5 + $0x80] sm:$0xff]  ;;  %v11368_v6 = vld [vmem:[%s21898_s5 + $0x88] sm:$0xff] }
 0x5bb   :  { %13139 = vmatprep.mubr.msk.f32.mxu0 %vm16571_vm14, %v21992_v12 }
 0x5be   :  { %13140 = vmatmul.mubr.msk.f32.gmra.mrb[104].mxu0 %vm2331_vm15, %v19467_v15 }
 0x5bf   :  { %13150 = vmatprep.mubr.msk.f32.mxu0 %vm16571_vm14, %v21992_v12 }
 0x5c2   :  { %13151 = vmatmul.mubr.msk.f32.vlgmr.msra.gmra.mrb[92].mxu0 %vm2331_vm15, %v19255_v46  ;;  %v11342_v46 = vld [vmem:[%s21898_s5 + $0x60] sm:$0xff] }
 0x5c3   :  { %14942 = vmatpush3.bf16.msra.mxu0 %v14941_v19  ;;  %13153 = vmatprep.mubr.msk.f32.mxu0 %vm16571_vm14, %v21992_v12  ;;  %v19784_v19 = vpop.f32.mrb[154].mxu1 }
 0x5c4   :  { %14943 = vmatprep.subr.bf16.mxu0 %v21964_v9 }
 0x5c6   :  { %13154 = vmatmul.mubr.msk.f32.gmra.mrb[94].mxu0 %vm2331_vm15, %v19260_v4  ;;  %v11343_v4 = vld [vmem:[%s21898_s5 + $0x68] sm:$0xff] }
 0x5c7   :  { %13156 = vmatprep.mubr.msk.f32.mxu0 %vm16571_vm14, %v21992_v12  ;;  %14945 = vmatpush3.bf16.msra.mxu0 %v14944_v62  ;;  %v11369_v62 = vld [vmem:[%s21898_s5 + $0x90] sm:$0xff] }
 0x5c8   :  { %14982 = vmatprep.subr.bf16.mxu0 %v21964_v9 }
 0x5ca   :  { %13157 = vmatmul.mubr.msk.f32.gmra.mrb[96].mxu0 %vm2331_vm15, %v19265_v33  ;;  %v14983_v33 = vpack.c.bf16 %v11343_v4, %v11342_v46  ;;  %v5829_v46 = vunpack.c.h.bf16 %v11357_v31  ;;  %v6197_v4 = vpop.f32.mrb[155].mxu1 }
 0x5cb   :  { %13159 = vmatprep.mubr.msk.f32.mxu0 %vm16571_vm14, %v21992_v12 }
 0x5ce   :  { %13160 = vmatmul.mubr.msk.f32.gmra.mrb[98].mxu0 %vm2331_vm15, %v19271_v36  ;;  %v11344_v36 = vld [vmem:[%s21898_s5 + $0x70] sm:$0xff] }
 0x5cf   :  { %13162 = vmatprep.mubr.msk.f32.mxu0 %vm16571_vm14, %v21992_v12 }
 0x5d2   :  { %13163 = vmatmul.mubr.msk.f32.gmra.mrb[100].mxu0 %vm2331_vm15, %v19449_v17  ;;  %v11345_v17 = vld [vmem:[%s21898_s5 + $0x78] sm:$0xff] }
 0x5d3   :  { %13165 = vmatprep.mubr.msk.f32.mxu0 %vm16571_vm14, %v21992_v12 }
 0x5d6   :  { %13166 = vmatmul.mubr.msk.f32.gmra.mrb[102].mxu0 %vm2331_vm15, %v19451_v44  ;;  %v14986_v44 = vpack.c.bf16 %v11345_v17, %v11344_v36  ;;  %v11370_v36 = vld [vmem:[%s21898_s5 + $0x98] sm:$0xff]  ;;  %v11358_v17 = vld [vmem:[%s21897_s4 + $0x108] sm:$0xff] }
 0x5d7   :  { %13168 = vmatprep.mubr.msk.f32.mxu0 %vm16571_vm14, %v21992_v12 }
 0x5da   :  { %13169 = vmatmul.mubr.msk.f32.gmra.mrb[104].mxu0 %vm2331_vm15, %v19453_v11  ;;  %v11429_v11 = vld [vmem:[%s21897_s4 + $0x190] sm:$0xff] }
 0x5db   :  { %13179 = vmatprep.mubr.msk.f32.mxu0 %vm16571_vm14, %v21992_v12  ;;  %v6644_v15 = vunpack.c.l.bf16 %v11429_v11 }
 0x5de   :  { %13180 = vmatmul.mubr.msk.f32.vlgmr.msra.gmra.mrb[92].mxu0 %vm2331_vm15, %v19469_v59 }
 0x5df   :  { %14984 = vmatpush3.bf16.msra.mxu0 %v14983_v33  ;;  %13182 = vmatprep.mubr.msk.f32.mxu0 %vm16571_vm14, %v21992_v12  ;;  %v15025_v33 = vpack.c.bf16 %v11368_v6, %v11367_v18 }
 0x5e0   :  { %14985 = vmatprep.subr.bf16.mxu0 %v21964_v9 }
 0x5e2   :  { %13183 = vmatmul.mubr.msk.f32.gmra.mrb[94].mxu0 %vm2331_vm15, %v19471_v5  ;;  %v11431_v5 = vld [vmem:[%s21897_s4 + $0x1a0] sm:$0xff] }
 0x5e3   :  { %13185 = vmatprep.mubr.msk.f32.mxu0 %vm16571_vm14, %v21992_v12  ;;  %14987 = vmatpush3.bf16.msra.mxu0 %v14986_v44  ;;  %v19802_v44 = vpop.f32.mrb[156].mxu1 }
 0x5e4   :  { %14988 = vmatprep.subr.bf16.mxu0 %v21964_v9 }
 0x5e6   :  { %13186 = vmatmul.mubr.msk.f32.gmra.mrb[96].mxu0 %vm2331_vm15, %v19473_v38  ;;  %v6649_v38 = vunpack.c.h.bf16 %v11431_v5 }
 0x5e7   :  { %13188 = vmatprep.mubr.msk.f32.mxu0 %vm16571_vm14, %v21992_v12 }
 0x5ea   :  { %13189 = vmatmul.mubr.msk.f32.gmra.mrb[98].mxu0 %vm2331_vm15, %v19475_v57  ;;  %v19702_v57 = vld [vmem:[%s21897_s4 + $0xe0] sm:$0xff] }
 0x5eb   :  { %13191 = vmatprep.mubr.msk.f32.mxu0 %vm16571_vm14, %v21992_v12 }
 0x5ee   :  { %13192 = vmatmul.mubr.msk.f32.gmra.mrb[100].mxu0 %vm2331_vm15, %v19477_v26  ;;  %v11432_v26 = vld [vmem:[%s21897_s4 + $0x1a8] sm:$0xff] }
 0x5ef   :  { %13194 = vmatprep.mubr.msk.f32.mxu0 %vm16571_vm14, %v21992_v12 }
 0x5f2   :  { %13195 = vmatmul.mubr.msk.f32.gmra.mrb[102].mxu0 %vm2331_vm15, %v19479_v21  ;;  %v5821_v21 = vunpack.c.h.bf16 %v19702_v57 }
 0x5f3   :  { %13197 = vmatprep.mubr.msk.f32.mxu0 %vm16571_vm14, %v21992_v12 }
 0x5f6   :  { %13198 = vmatmul.mubr.msk.f32.gmra.mrb[104].mxu0 %vm2331_vm15, %v19481_v10  ;;  %v6650_v10 = vunpack.c.l.bf16 %v11432_v26 }
 0x5f7   :  { %13208 = vmatprep.mubr.msk.f32.mxu0 %vm16571_vm14, %v21992_v12 }
 0x5fa   :  { %13209 = vmatmul.mubr.msk.f32.vlgmr.msra.gmra.mrb[92].mxu0 %vm2331_vm15, %v19483_v40  ;;  %v11433_v40 = vld [vmem:[%s21897_s4 + $0x1b0] sm:$0xff] }
 0x5fb   :  { %14990 = vmatpush1.bf16.msra.mxu0 %v22032_v32  ;;  %13211 = vmatprep.mubr.msk.f32.mxu0 %vm16571_vm14, %v21992_v12  ;;  %v6645_v32 = vunpack.c.h.bf16 %v11429_v11  ;;  %v15028_v11 = vpack.c.bf16 %v11370_v36, %v11369_v62 }
 0x5fc   :  { %14991 = vmatprep.subr.bf16.mxu0 %v21964_v9 }
 0x5fd   :  { %11436 = vmatprep.mubr.msk.f32.mxu1 %vm2057_vm0, %v6645_v32  ;;  %v6202_v32 = vpop.f32.mrb[157].mxu1 }
 0x5fe   :  { %13212 = vmatmul.mubr.msk.f32.gmra.mrb[94].mxu0 %vm2331_vm15, %v19504_v52  ;;  %6747 = vmatmul.mubr.f32.gmra.mrb[184].mxu1 %v6644_v15  ;;  %v6653_v52 = vunpack.c.h.bf16 %v11433_v40  ;;  %v5828_v15 = vunpack.c.l.bf16 %v11357_v31 }
 0x5ff   :  { %14993 = vmatpush1.bf16.msra.mxu0 %v22033_v53  ;;  %13214 = vmatprep.mubr.msk.f32.mxu0 %vm16571_vm14, %v21992_v12  ;;  %v11430_v53 = vld [vmem:[%s21897_s4 + $0x198] sm:$0xff] }
 0x600   :  { %14994 = vmatprep.subr.bf16.mxu0 %v21964_v9  ;;  %v6647_v59 = vunpack.c.h.bf16 %v11430_v53 }
 0x602   :  { %13215 = vmatmul.mubr.msk.f32.gmra.mrb[96].mxu0 %vm2331_vm15, %v19510_v34  ;;  %11437 = vmatprep.mubr.msk.f32.mxu1 %vm2057_vm0, %v6647_v59  ;;  %v6654_v34 = vunpack.c.l.bf16 %v11434_v28  ;;  %v5831_v59 = vunpack.c.h.bf16 %v11358_v17 }
 0x603   :  { %14996 = vmatpush1.bf16.msra.mxu0 %v22034_v49  ;;  %13217 = vmatprep.mubr.msk.f32.mxu0 %vm16571_vm14, %v21992_v12  ;;  %v6646_v49 = vunpack.c.l.bf16 %v11430_v53  ;;  %v19805_v53 = vpop.f32.mrb[158].mxu1 }
 0x604   :  { %14997 = vmatprep.subr.bf16.mxu0 %v21964_v9 }
 0x605   :  { %6752 = vmatmul.mubr.f32.gmra.mrb[186].mxu1 %v6646_v49  ;;  %v6207_v49 = vpop.f32.mrb[159].mxu1 }
 0x606   :  { %13218 = vmatmul.mubr.msk.f32.gmra.mrb[98].mxu0 %vm2331_vm15, %v19515_v51  ;;  %11438 = vmatprep.mubr.msk.f32.mxu1 %vm2057_vm0, %v6649_v38  ;;  %v19811_v38 = vpop.f32.mrb[160].mxu1 }
 0x607   :  { %14999 = vmatpush1.bf16.msra.mxu0 %v22035_v30  ;;  %13220 = vmatprep.mubr.msk.f32.mxu0 %vm16571_vm14, %v21992_v12  ;;  %v6648_v30 = vunpack.c.l.bf16 %v11431_v5  ;;  %v11359_v5 = vld [vmem:[%s21897_s4 + $0x110] sm:$0xff] }
 0x608   :  { %15000 = vmatprep.subr.bf16.mxu0 %v21964_v9 }
 0x609   :  { %6757 = vmatmul.mubr.f32.gmra.mrb[188].mxu1 %v6648_v30  ;;  %v6212_v30 = vpop.f32.mrb[161].mxu1 }
 0x60a   :  { %13221 = vmatmul.mubr.msk.f32.gmra.mrb[100].mxu0 %vm2331_vm15, %v19520_v3 }
 0x60b   :  { %15002 = vmatpush1.bf16.msra.mxu0 %v22036_v55  ;;  %13223 = vmatprep.mubr.msk.f32.mxu0 %vm16571_vm14, %v21992_v12  ;;  %v6651_v55 = vunpack.c.h.bf16 %v11432_v26  ;;  %v5833_v26 = vunpack.c.h.bf16 %v11359_v5 }
 0x60c   :  { %15003 = vmatprep.subr.bf16.mxu0 %v21964_v9 }
 0x60d   :  { %11439 = vmatprep.mubr.msk.f32.mxu1 %vm2057_vm0, %v6651_v55  ;;  %v5832_v55 = vunpack.c.l.bf16 %v11359_v5 }
 0x60e   :  { %13224 = vmatmul.mubr.msk.f32.gmra.mrb[102].mxu0 %vm2331_vm15, %v19525_v16  ;;  %6762 = vmatmul.mubr.f32.gmra.mrb[190].mxu1 %v6650_v10  ;;  %v11355_v16 = vld [vmem:[%s21897_s4 + $0xf0] sm:$0xff] }
 0x60f   :  { %15005 = vmatpush1.bf16.msra.mxu0 %v18311_v14  ;;  %13226 = vmatprep.mubr.msk.f32.mxu0 %vm16571_vm14, %v21992_v12  ;;  %v6652_v14 = vunpack.c.l.bf16 %v11433_v40  ;;  %v5825_v24 = vunpack.c.h.bf16 %v11355_v16  ;;  %v19826_v40 = vld [vmem:[%s21900_s7] ss:$0 sm:$0xff] }
 0x610   :  { %15006 = vmatprep.subr.bf16.mxu0 %v21964_v9  ;;  %11440 = vmatprep.mubr.msk.f32.mxu1 %vm2057_vm0, %v6653_v52 }
 0x612   :  { %13227 = vmatmul.mubr.msk.f32.gmra.mrb[104].mxu0 %vm2331_vm15, %v19536_v35  ;;  %6767 = vmatmul.mubr.f32.gmra.mrb[192].mxu1 %v6652_v14  ;;  %v5824_v35 = vunpack.c.l.bf16 %v11355_v16 }
 0x613   :  { %15008 = vmatpush1.bf16.msra.mxu0 %v22037_v50  ;;  %11360 = vmatprep.mubr.msk.f32.mxu0 %vm2057_vm0, %v5821_v21  ;;  %v11453_v50 = vld [vmem:[%s21897_s4 + $0x1c0] sm:$0xff] }
 0x614   :  { %15009 = vmatprep.subr.bf16.mxu0 %v21964_v9  ;;  %11441 = vmatprep.mubr.msk.f32.mxu1 %vm2057_vm0, %v6655_v45  ;;  %v6917_v41 = vunpack.c.h.bf16 %v11453_v50  ;;  %v6916_v61 = vunpack.c.l.bf16 %v11453_v50  ;;  %v19821_v21 = vld [vmem:[%s21899_s6] ss:$0 sm:$0xff] }
 0x616   :  { %6772 = vmatmul.mubr.f32.gmra.mrb[194].mxu1 %v6654_v34 }
 0x617   :  { %15011 = vmatpush1.bf16.msra.mxu0 %v22038_v27  ;;  %11460 = vmatprep.mubr.msk.f32.mxu1 %vm2057_vm0, %v6917_v41  ;;  %v11454_v27 = vld [vmem:[%s21897_s4 + $0x1c8] sm:$0xff] }
 0x618   :  { %15012 = vmatprep.subr.bf16.mxu0 %v21964_v9  ;;  %v6919_v42 = vunpack.c.h.bf16 %v11454_v27  ;;  %v6918_v51 = vunpack.c.l.bf16 %v11454_v27 }
 0x61a   :  { %7016 = vmatmul.mubr.f32.vlgmr.msra.gmra.mrb[196].mxu1 %v6916_v61 }
 0x61b   :  { %15014 = vmatpush1.bf16.msra.mxu0 %v18472_v60  ;;  %11461 = vmatprep.mubr.msk.f32.mxu1 %vm2057_vm0, %v6919_v42  ;;  %v11455_v60 = vld [vmem:[%s21897_s4 + $0x1d0] sm:$0xff] }
 0x61c   :  { %15015 = vmatprep.subr.bf16.mxu0 %v21964_v9  ;;  %v6921_v20 = vunpack.c.h.bf16 %v11455_v60  ;;  %v6920_v37 = vunpack.c.l.bf16 %v11455_v60 }
 0x61e   :  { %7021 = vmatmul.mubr.f32.gmra.mrb[198].mxu1 %v6918_v51 }
 0x61f   :  { %15017 = vmatpush1.bf16.msra.mxu0 %v18562_v58  ;;  %11462 = vmatprep.mubr.msk.f32.mxu1 %vm2057_vm0, %v6921_v20  ;;  %v11456_v58 = vld [vmem:[%s21897_s4 + $0x1d8] sm:$0xff] }
 0x620   :  { %15018 = vmatprep.subr.bf16.mxu0 %v21964_v9  ;;  %v6923_v3 = vunpack.c.h.bf16 %v11456_v58  ;;  %v6922_v2 = vunpack.c.l.bf16 %v11456_v58 }
 0x622   :  { %7026 = vmatmul.mubr.f32.gmra.mrb[200].mxu1 %v6920_v37 }
 0x623   :  { %15020 = vmatpush1.bf16.msra.mxu0 %v18619_v47  ;;  %v5820_v47 = vunpack.c.l.bf16 %v19702_v57  ;;  %11463 = vmatprep.mubr.msk.f32.mxu1 %vm2057_vm0, %v6923_v3  ;;  %v5830_v57 = vunpack.c.l.bf16 %v11358_v17 }
 0x624   :  { %15021 = vmatprep.subr.bf16.mxu0 %v21964_v9 }
 0x626   :  { %7031 = vmatmul.mubr.f32.gmra.mrb[202].mxu1 %v6922_v2 }
 0x627   :  { %15023 = vmatpush1.bf16.msra.mxu0 %v18653_v13  ;;  %v6924_v13 = vunpack.c.l.bf16 %v11457_v23  ;;  %11464 = vmatprep.mubr.msk.f32.mxu1 %vm2057_vm0, %v6925_v39 }
 0x628   :  { %5903 = vmatprep.subr.mxu0 %v21992_v12 }
 0x62a   :  { %7036 = vmatmul.mubr.f32.gmra.mrb[204].mxu1 %v6924_v13 }
 0x62b   :  { %5904 = vmatpush1.msra.mxu0 %v18738_v8  ;;  %v6926_v8 = vunpack.c.l.bf16 %v11458_v48  ;;  %11465 = vmatprep.mubr.msk.f32.mxu1 %vm2057_vm0, %v6927_v22 }
 0x62c   :  { %5920 = vmatmul.mubr.f32.vlgmr.msra.gmra.mrb[106].mxu0 %v5820_v47  ;;  %15024 = vmatprep.subr.bf16.mxu0 %v21964_v9 }
 0x62d   :  { %11361 = vmatprep.mubr.msk.f32.mxu0 %vm2057_vm0, %v5823_v43  ;;  %15026 = vmatpush3.bf16.msra.mxu0 %v15025_v33 }
 0x62e   :  { %7041 = vmatmul.mubr.f32.gmra.mrb[206].mxu1 %v6926_v8  ;;  %15027 = vmatprep.subr.bf16.mxu0 %v21964_v9 }
 0x62f   :  { %11466 = vmatprep.mubr.msk.f32.mxu1 %vm2057_vm0, %v6929_v7 }
 0x630   :  { %5925 = vmatmul.mubr.f32.gmra.mrb[108].mxu0 %v5822_v0 }
 0x631   :  { %11362 = vmatprep.mubr.msk.f32.mxu0 %vm2057_vm0, %v5825_v24  ;;  %15029 = vmatpush3.bf16.msra.mxu0 %v15028_v11 }
 0x632   :  { %7046 = vmatmul.mubr.f32.gmra.mrb[208].mxu1 %v6928_v29  ;;  %15066 = vmatprep.subr.bf16.mxu0 %v21964_v9 }
 0x634   :  { %5930 = vmatmul.mubr.f32.gmra.mrb[110].mxu0 %v5824_v35 }
 0x635   :  { %11363 = vmatprep.mubr.msk.f32.mxu0 %vm2057_vm0, %v5827_v56 }
 0x638   :  { %5935 = vmatmul.mubr.f32.gmra.mrb[112].mxu0 %v5826_v25 }
 0x639   :  { %11364 = vmatprep.mubr.msk.f32.mxu0 %vm2057_vm0, %v5829_v46 }
 0x63c   :  { %5940 = vmatmul.mubr.f32.gmra.mrb[114].mxu0 %v5828_v15 }
 0x63d   :  { %11365 = vmatprep.mubr.msk.f32.mxu0 %vm2057_vm0, %v5831_v59 }
 0x640   :  { %5945 = vmatmul.mubr.f32.gmra.mrb[116].mxu0 %v5830_v57 }
 0x641   :  { %11366 = vmatprep.mubr.msk.f32.mxu0 %vm2057_vm0, %v5833_v26  ;;  %vm4723_vm0 = vcmask 523264  }
 0x644   :  { %5950 = vmatmul.mubr.f32.gmra.mrb[118].mxu0 %v5832_v55 }
 0x645   :  { %13237 = vmatprep.mubr.msk.f32.mxu0 %vm16571_vm14, %v21992_v12 }
 0x65d   :  { %v4465_v10 = vpop.f32.mrb[50].mxu0 }
 0x65e   :  { %v4513_v52 = vmul.f32 %v19821_v21, %v4465_v10  ;;  %v13094_v14 = vpop.f32.mrb[51].mxu0 }
 0x660   :  { %v19830_v28 = vadd.f32 %v19826_v40, %v4513_v52 }
 0x661   :  { %v4470_v45 = vpop.f32.mrb[52].mxu0 }
 0x662   :  { %v19833_v34 = vmul.f32 0.70710677, %v19830_v28  ;;  %v4514_v50 = vmul.f32 %v19821_v21, %v4470_v45  ;;  %v13097_v41 = vpop.f32.mrb[53].mxu0 }
 0x664   :  { %v4548_v61 = vand.u32 2147483647, %v19833_v34  ;;  %v19838_v27 = vadd.f32 %v19826_v40, %v4514_v50  ;;  %vm4688_vm9 = vcmp.lt.f32.partialorder %v19833_v34, 0.0 }
 0x665   :  { %v4475_v42 = vpop.f32.mrb[54].mxu0 }
 0x666   :  { %v4555_v51 = vmul.f32 0.3275911, %v4548_v61  ;;  %v19841_v60 = vmul.f32 0.70710677, %v19838_v27  ;;  %v13100_v20 = vpop.f32.mrb[55].mxu0  ;;  %v4515_v37 = vmul.f32 %v19821_v21, %v4475_v42  ;;  %v4646_v22 = vmul.f32 %v4548_v61, %v4548_v61 }
 0x668   :  { %v4562_v58 = vadd.f32 1.0, %v4555_v51  ;;  %v4549_v1 = vand.u32 2147483647, %v19841_v60  ;;  %v19846_v3 = vadd.f32 %v19826_v40, %v4515_v37  ;;  %v4653_v6 = vsub.f32 0.0, %v4646_v22  ;;  %v19896_v22 = vpop.f32.mrb[162].mxu1 }
 0x669   :  { %v4480_v2 = vpop.f32.mrb[56].mxu0  ;;  %vm4689_vm10 = vcmp.lt.f32.partialorder %v19841_v60, 0.0 }
 0x66a   :  { %16441 = vrcp.f32 %v4562_v58  ;;  %v4556_v47 = vmul.f32 0.3275911, %v4549_v1  ;;  %v13103_v43 = vpop.f32.mrb[57].mxu0  ;;  %v19849_v23 = vmul.f32 0.70710677, %v19846_v3  ;;  %v4516_v16 = vmul.f32 %v19821_v21, %v4480_v2 }
 0x66b   :  { %v4647_v4 = vmul.f32 %v4549_v1, %v4549_v1  ;;  %v4660_v30 = vmul.f32 1.442695, %v4653_v6 }
 0x66c   :  { %v4563_v39 = vadd.f32 1.0, %v4556_v47  ;;  %v4550_v13 = vand.u32 2147483647, %v19849_v23  ;;  %v19854_v0 = vadd.f32 %v19826_v40, %v4516_v16  ;;  %vm4690_vm11 = vcmp.lt.f32.partialorder %v19849_v23, 0.0 }
 0x66d   :  { %v4485_v24 = vpop.f32.mrb[58].mxu0  ;;  %v4654_v55 = vsub.f32 0.0, %v4647_v4 }
 0x66e   :  { %16443 = vrcp.f32 %v4563_v39  ;;  %v4517_v48 = vmul.f32 %v19821_v21, %v4485_v24  ;;  %v13106_v63 = vpop.f32.mrb[59].mxu0  ;;  %v4557_v8 = vmul.f32 0.3275911, %v4550_v13  ;;  %v19858_v35 = vmul.f32 0.70710677, %v19854_v0 }
 0x66f   :  { %v4648_v50 = vmul.f32 %v4550_v13, %v4550_v13  ;;  %v4662_v20 = vmul.f32 1.442695, %v4654_v55 }
 0x670   :  { %v19861_v56 = vadd.f32 %v19826_v40, %v4517_v48  ;;  %v4564_v54 = vadd.f32 1.0, %v4557_v8  ;;  %v4551_v31 = vand.u32 2147483647, %v19858_v35  ;;  %vm4691_vm12 = vcmp.lt.f32.partialorder %v19858_v35, 0.0 }
 0x671   :  { %v4490_v7 = vpop.f32.mrb[60].mxu0  ;;  %v4655_v16 = vsub.f32 0.0, %v4648_v50 }
 0x672   :  { %v19865_v29 = vmul.f32 0.70710677, %v19861_v56  ;;  %v4518_v25 = vmul.f32 %v19821_v21, %v4490_v7  ;;  %v13109_v18 = vpop.f32.mrb[61].mxu0  ;;  %16445 = vrcp.f32 %v4564_v54  ;;  %v4558_v62 = vmul.f32 0.3275911, %v4551_v31  ;;  %v6217_v7 = vpop.f32.mrb[163].mxu1 }
 0x673   :  { %v4649_v37 = vmul.f32 %v4551_v31, %v4551_v31 }
 0x674   :  { %v19868_v46 = vpop.eup %16441  ;;  %v4552_v33 = vand.u32 2147483647, %v19865_v29  ;;  %v19872_v36 = vadd.f32 %v19826_v40, %v4518_v25  ;;  %v4565_v11 = vadd.f32 1.0, %v4558_v62  ;;  %v4664_v62 = vmul.f32 1.442695, %v4655_v16 }
 0x675   :  { %v4583_v17 = vmul.f32 1.0614054, %v19868_v46  ;;  %v4495_v32 = vpop.f32.mrb[62].mxu0  ;;  %v4656_v54 = vsub.f32 0.0, %v4649_v37  ;;  %vm4692_vm13 = vcmp.lt.f32.partialorder %v19865_v29, 0.0 }
 0x676   :  { %v4559_v15 = vmul.f32 0.3275911, %v4552_v33  ;;  %v19876_v59 = vmul.f32 0.70710677, %v19872_v36  ;;  %v13112_v49 = vpop.f32.mrb[63].mxu0  ;;  %16447 = vrcp.f32 %v4565_v11  ;;  %v4519_v57 = vmul.f32 %v19821_v21, %v4495_v32 }
 0x677   :  { %v4590_v5 = vadd.f32 -1.4531521, %v4583_v17  ;;  %v4650_v39 = vmul.f32 %v4552_v33, %v4552_v33 }
 0x678   :  { %v19879_v26 = vpop.eup %16443  ;;  %v4566_v10 = vadd.f32 1.0, %v4559_v15  ;;  %v4553_v52 = vand.u32 2147483647, %v19876_v59  ;;  %v19885_v41 = vadd.f32 %v19826_v40, %v4519_v57  ;;  %vm4693_vm1 = vcmp.lt.f32.partialorder %v19876_v59, 0.0 }
 0x679   :  { %v4597_v14 = vmul.f32 %v19868_v46, %v4590_v5  ;;  %v4584_v45 = vmul.f32 1.0614054, %v19879_v26  ;;  %v4657_v4 = vsub.f32 0.0, %v4650_v39  ;;  %v19904_v5 = vpop.f32.mrb[164].mxu1 }
 0x67a   :  { %16449 = vrcp.f32 %v4566_v10  ;;  %v4560_v61 = vmul.f32 0.3275911, %v4553_v52  ;;  %v19888_v1 = vmul.f32 0.70710677, %v19885_v41  ;;  %v4651_v11 = vmul.f32 %v4553_v52, %v4553_v52  ;;  %v6222_v52 = vpop.f32.mrb[165].mxu1 }
 0x67b   :  { %v4604_v42 = vadd.f32 1.4214138, %v4597_v14  ;;  %16451 = vpow2.f32 %v4660_v30  ;;  %v4591_v51 = vadd.f32 -1.4531521, %v4584_v45  ;;  %v4666_v10 = vmul.f32 1.442695, %v4656_v54 }
 0x67c   :  { %v4567_v58 = vadd.f32 1.0, %v4560_v61  ;;  %v19890_v2 = vpop.eup %16445  ;;  %v4554_v24 = vand.u32 2147483647, %v19888_v1  ;;  %v4658_v37 = vsub.f32 0.0, %v4651_v11  ;;  %v19914_v39 = vpop.f32.mrb[166].mxu1  ;;  %vm4694_vm2 = vcmp.lt.f32.partialorder %v19888_v1, 0.0 }
 0x67d   :  { %v4611_v47 = vmul.f32 %v19868_v46, %v4604_v42  ;;  %v4598_v43 = vmul.f32 %v19879_v26, %v4591_v51  ;;  %v4585_v13 = vmul.f32 1.0614054, %v19890_v2 }
 0x67e   :  { %16453 = vrcp.f32 %v4567_v58  ;;  %v4561_v31 = vmul.f32 0.3275911, %v4554_v24  ;;  %v4534_v58 = vmul.f32 0.5, %v19830_v28 }
 0x67f   :  { %v4618_v48 = vadd.f32 -0.28449672, %v4611_v47  ;;  %v4605_v63 = vadd.f32 1.4214138, %v4598_v43  ;;  %16455 = vpow2.f32 %v4662_v20  ;;  %v4592_v8 = vadd.f32 -1.4531521, %v4585_v13 }
 0x680   :  { %v19898_v25 = vpop.eup %16447  ;;  %v4568_v32 = vadd.f32 1.0, %v4561_v31  ;;  %v4668_v20 = vmul.f32 1.442695, %v4657_v4  ;;  %v4652_v4 = vmul.f32 %v4554_v24, %v4554_v24 }
 0x681   :  { %v4625_v18 = vmul.f32 %v19868_v46, %v4618_v48  ;;  %v4612_v6 = vmul.f32 %v19879_v26, %v4605_v63  ;;  %v4599_v33 = vmul.f32 %v19890_v2, %v4592_v8  ;;  %v4586_v17 = vmul.f32 1.0614054, %v19898_v25  ;;  %v6227_v63 = vpop.f32.mrb[167].mxu1 }
 0x682   :  { %16457 = vrcp.f32 %v4568_v32 }
 0x683   :  { %v4632_v15 = vadd.f32 0.2548296, %v4625_v18  ;;  %v4619_v49 = vadd.f32 -0.28449672, %v4612_v6  ;;  %v4606_v57 = vadd.f32 1.4214138, %v4599_v33  ;;  %16459 = vpow2.f32 %v4664_v62 }
 0x684   :  { %v19906_v30 = vpop.eup %16449  ;;  %v4593_v55 = vadd.f32 -1.4531521, %v4586_v17  ;;  %16461 = vpow2.f32 %v4666_v10  ;;  %v4670_v62 = vmul.f32 1.442695, %v4658_v37 }
 0x685   :  { %v16452_v14 = vpop.eup %16451  ;;  %v4639_v45 = vmul.f32 %v19868_v46, %v4632_v15  ;;  %v4626_v50 = vmul.f32 %v19879_v26, %v4619_v49  ;;  %v4587_v61 = vmul.f32 1.0614054, %v19906_v30  ;;  %v4613_v42 = vmul.f32 %v19890_v2, %v4606_v57  ;;  %v19924_v15 = vpop.f32.mrb[168].mxu1 }
 0x686   :  { %v4600_v51 = vmul.f32 %v19898_v25, %v4593_v55  ;;  %16463 = vpow2.f32 %v4668_v20  ;;  %v6471_v57 = vpop.f32.mrb[169].mxu1 }
 0x687   :  { %v4674_v47 = vmul.f32 %v16452_v14, %v4639_v45  ;;  %v4633_v43 = vadd.f32 0.2548296, %v4626_v50  ;;  %v4594_v16 = vadd.f32 -1.4531521, %v4587_v61  ;;  %v4620_v13 = vadd.f32 -0.28449672, %v4613_v42 }
 0x688   :  { %v19916_v46 = vpop.eup %16453  ;;  %v4607_v48 = vadd.f32 1.4214138, %v4600_v51  ;;  %16465 = vpow2.f32 %v4670_v62 }
 0x689   :  { %v4681_v8 = vsub.f32 1.0, %v4674_v47  ;;  %v4640_v54 = vmul.f32 %v19879_v26, %v4633_v43  ;;  %v4601_v31 = vmul.f32 %v19906_v30, %v4594_v16  ;;  %v4588_v28 = vmul.f32 1.0614054, %v19916_v46  ;;  %v16456_v7 = vpop.eup %16455 }
 0x68a   :  { %v4627_v18 = vmul.f32 %v19890_v2, %v4620_v13  ;;  %v4614_v6 = vmul.f32 %v19898_v25, %v4607_v48  ;;  %v4659_v47 = vsub.f32 0.0, %v4652_v4  ;;  %v4535_v48 = vmul.f32 0.5, %v19838_v27 }
 0x68b   :  { %v4695_v33 = vsub.f32 0.0, %v4681_v8  ;;  %v4675_v17 = vmul.f32 %v16456_v7, %v4640_v54  ;;  %v4608_v11 = vadd.f32 1.4214138, %v4601_v31  ;;  %v4595_v32 = vadd.f32 -1.4531521, %v4588_v28 }
 0x68c   :  { %v4634_v26 = vadd.f32 0.2548296, %v4627_v18  ;;  %v4621_v49 = vadd.f32 -0.28449672, %v4614_v6  ;;  %v19931_v45 = vpop.eup %16457  ;;  %v4672_v62 = vmul.f32 1.442695, %v4659_v47 }
 0x68d   :  { %v4702_v55 = vsel %vm4688_vm9, %v4695_v33, %v4681_v8  ;;  %v4682_v10 = vsub.f32 1.0, %v4675_v17  ;;  %v4615_v14 = vmul.f32 %v19906_v30, %v4608_v11  ;;  %v4602_v24 = vmul.f32 %v19916_v46, %v4595_v32  ;;  %v16460_v42 = vpop.eup %16459 }
 0x68e   :  { %v4709_v50 = vadd.f32 1.0, %v4702_v55  ;;  %v4641_v61 = vmul.f32 %v19890_v2, %v4634_v26  ;;  %v4628_v52 = vmul.f32 %v19898_v25, %v4621_v49  ;;  %v4589_v13 = vmul.f32 1.0614054, %v19931_v45  ;;  %v16462_v54 = vpop.eup %16461 }
 0x68f   :  { %v4696_v51 = vsub.f32 0.0, %v4682_v10  ;;  %v4622_v20 = vadd.f32 -0.28449672, %v4615_v14  ;;  %v4609_v37 = vadd.f32 1.4214138, %v4602_v24  ;;  %16467 = vpow2.f32 %v4672_v62  ;;  %v19966_v62 = vpop.f32.mrb[170].mxu1 }
 0x690   :  { %v4716_v34 = vmul.f32 %v4709_v50, %v4534_v58  ;;  %v4676_v43 = vmul.f32 %v16460_v42, %v4641_v61  ;;  %v4635_v16 = vadd.f32 0.2548296, %v4628_v52  ;;  %v4596_v7 = vadd.f32 -1.4531521, %v4589_v13  ;;  %v16464_v32 = vpop.eup %16463 }
 0x691   :  { %v4703_v63 = vsel %vm4689_vm10, %v4696_v51, %v4682_v10  ;;  %v4629_v2 = vmul.f32 %v19906_v30, %v4622_v20  ;;  %v4616_v8 = vmul.f32 %v19916_v46, %v4609_v37 }
 0x692   :  { %4724 = vst.msk [vmem:[#allocation2] sm:$0xff] %vm4723_vm0, %v4716_v34  ;;  %v4710_v31 = vadd.f32 1.0, %v4703_v63  ;;  %v4683_v28 = vsub.f32 1.0, %v4676_v43  ;;  %v4642_v58 = vmul.f32 %v19898_v25, %v4635_v16  ;;  %v4603_v60 = vmul.f32 %v19931_v45, %v4596_v7  ;;  %v16466_v24 = vpop.eup %16465 }
 0x693   :  { %v4636_v18 = vadd.f32 0.2548296, %v4629_v2  ;;  %v4623_v6 = vadd.f32 -0.28449672, %v4616_v8  ;;  %v4536_v25 = vmul.f32 0.5, %v19846_v3  ;;  %v4537_v3 = vmul.f32 0.5, %v19854_v0 }
 0x694   :  { %v4717_v4 = vmul.f32 %v4710_v31, %v4535_v48  ;;  %v4697_v27 = vsub.f32 0.0, %v4683_v28  ;;  %v4677_v33 = vmul.f32 %v16462_v54, %v4642_v58  ;;  %v4610_v57 = vadd.f32 1.4214138, %v4603_v60 }
 0x695   :  { %v4643_v17 = vmul.f32 %v19906_v30, %v4636_v18  ;;  %v4630_v11 = vmul.f32 %v19916_v46, %v4623_v6 }
 0x696   :  { %4725 = vst.msk [vmem:[#allocation2 + $0x8] sm:$0xff] %vm4723_vm0, %v4717_v4  ;;  %v4704_v26 = vsel %vm4690_vm11, %v4697_v27, %v4683_v28  ;;  %v4684_v49 = vsub.f32 1.0, %v4677_v33  ;;  %v4617_v23 = vmul.f32 %v19931_v45, %v4610_v57  ;;  %v6476_v4 = vpop.f32.mrb[171].mxu1 }
 0x697   :  { %v4711_v55 = vadd.f32 1.0, %v4704_v26  ;;  %v4678_v10 = vmul.f32 %v16464_v32, %v4643_v17  ;;  %v4637_v14 = vadd.f32 0.2548296, %v4630_v11  ;;  %v19972_v17 = vpop.f32.mrb[172].mxu1 }
 0x698   :  { %v4698_v50 = vsub.f32 0.0, %v4684_v49  ;;  %v4624_v51 = vadd.f32 -0.28449672, %v4617_v23  ;;  %v6481_v32 = vpop.f32.mrb[173].mxu1 }
 0x699   :  { %v4718_v61 = vmul.f32 %v4711_v55, %v4536_v25  ;;  %v4685_v30 = vsub.f32 1.0, %v4678_v10  ;;  %v4644_v52 = vmul.f32 %v19916_v46, %v4637_v14  ;;  %v7407_v43 = vld [vmem:[#allocation2] sm:$0xff]  ;;  %v4538_v46 = vmul.f32 0.5, %v19861_v56  ;;  %v16468_v31 = vpop.eup %16467  ;;  %v19977_v26 = vpop.f32.mrb[174].mxu1 }
 0x69a   :  { %v4705_v42 = vsel %vm4691_vm12, %v4698_v50, %v4684_v49  ;;  %v4631_v34 = vmul.f32 %v19931_v45, %v4624_v51  ;;  %v4539_v56 = vmul.f32 0.5, %v19872_v36  ;;  %v4540_v36 = vmul.f32 0.5, %v19885_v41  ;;  %v6486_v55 = vpop.f32.mrb[175].mxu1 }
 0x69b   :  { %4726 = vst.msk [vmem:[#allocation2 + $0x10] sm:$0xff] %vm4723_vm0, %v4718_v61  ;;  %v4712_v20 = vadd.f32 1.0, %v4705_v42  ;;  %v4699_v37 = vsub.f32 0.0, %v4685_v30  ;;  %v4679_v47 = vmul.f32 %v16466_v24, %v4644_v52  ;;  %v19983_v10 = vpop.f32.mrb[176].mxu1 }
 0x69c   :  { %v4638_v8 = vadd.f32 0.2548296, %v4631_v34  ;;  %v6491_v41 = vpop.f32.mrb[177].mxu1 }
 0x69d   :  { %v7408_v16 = vld [vmem:[#allocation2 + $0x8] sm:$0xff]  ;;  %v4719_v13 = vmul.f32 %v4712_v20, %v4537_v3  ;;  %v4706_v35 = vsel %vm4692_vm13, %v4699_v37, %v4685_v30  ;;  %v4686_v48 = vsub.f32 1.0, %v4679_v47  ;;  %v19986_v14 = vpop.f32.mrb[178].mxu1 }
 0x69e   :  { %v19956_v63 = vpack.c.bf16 %v7408_v16, %v7407_v43  ;;  %v4713_v2 = vadd.f32 1.0, %v4706_v35  ;;  %v4645_v29 = vmul.f32 %v19931_v45, %v4638_v8  ;;  %v6496_v24 = vpop.f32.mrb[179].mxu1 }
 0x69f   :  { %4727 = vst.msk [vmem:[#allocation2 + $0x18] sm:$0xff] %vm4723_vm0, %v4719_v13  ;;  %v4700_v0 = vsub.f32 0.0, %v4686_v48  ;;  %v19988_v50 = vpop.f32.mrb[180].mxu1 }
 0x6a0   :  { %v4720_v54 = vmul.f32 %v4713_v2, %v4538_v46  ;;  %15227 = vmatprep.subr.bf16.mxu1 %v19956_v63  ;;  %v4680_v7 = vmul.f32 %v16468_v31, %v4645_v29  ;;  %v6501_v23 = vpop.f32.mrb[181].mxu1  ;;  %v11392_v29 = vld [vmem:[%s21898_s5 + $0xa0] sm:$0xff]  ;;  %v11393_v31 = vld [vmem:[%s21898_s5 + $0xa8] sm:$0xff] }
 0x6a1   :  { %v4707_v28 = vsel %vm4693_vm1, %v4700_v0, %v4686_v48  ;;  %15229 = vmatpush3.bf16.msra.mxu1 %v19956_v63  ;;  %v19990_v61 = vpop.f32.mrb[182].mxu1 }
 0x6a2   :  { %4728 = vst.msk [vmem:[#allocation2 + $0x20] sm:$0xff] %vm4723_vm0, %v4720_v54  ;;  %v4714_v58 = vadd.f32 1.0, %v4707_v28  ;;  %v4687_v6 = vsub.f32 1.0, %v4680_v7  ;;  %v7409_v59 = vld [vmem:[#allocation2 + $0x10] sm:$0xff]  ;;  %v6745_v30 = vpop.f32.mrb[183].mxu1 }
 0x6a3   :  { %v11394_v7 = vld [vmem:[%s21898_s5 + $0xb0] sm:$0xff] }
 0x6a4   :  { %v4721_v18 = vmul.f32 %v4714_v58, %v4539_v56  ;;  %v4701_v45 = vsub.f32 0.0, %v4687_v6  ;;  %v15067_v56 = vpack.c.bf16 %v11393_v31, %v11392_v29 }
 0x6a6   :  { %v7410_v27 = vld [vmem:[#allocation2 + $0x18] sm:$0xff]  ;;  %4729 = vst.msk [vmem:[#allocation2 + $0x28] sm:$0xff] %vm4723_vm0, %v4721_v18  ;;  %v4708_v60 = vsel %vm4694_vm2, %v4701_v45, %v4687_v6 }
 0x6a7   :  { %v19969_v33 = vpack.c.bf16 %v7410_v27, %v7409_v59  ;;  %v4715_v11 = vadd.f32 1.0, %v4708_v60  ;;  %v11395_v18 = vld [vmem:[%s21898_s5 + $0xb8] sm:$0xff] }
 0x6a8   :  { %v15070_v27 = vpack.c.bf16 %v11395_v18, %v11394_v7 }
 0x6a9   :  { %15231 = vmatprep.subr.bf16.mxu1 %v19969_v33  ;;  %v4722_v25 = vmul.f32 %v4715_v11, %v4540_v36  ;;  %v7411_v49 = vld [vmem:[#allocation2 + $0x20] sm:$0xff] }
 0x6aa   :  { %15233 = vmatpush3.bf16.msra.mxu1 %v19969_v33 }
 0x6ab   :  { %4730 = vst.msk [vmem:[#allocation2 + $0x30] sm:$0xff] %vm4723_vm0, %v4722_v25 }
 0x6ad   :  { %v7412_v57 = vld [vmem:[#allocation2 + $0x28] sm:$0xff] }
 0x6ae   :  { %v19980_v1 = vpack.c.bf16 %v7412_v57, %v7411_v49 }
 0x6b0   :  { %15235 = vmatprep.subr.bf16.mxu1 %v19980_v1 }
 0x6b1   :  { %15237 = vmatpush3.bf16.msra.mxu1 %v19980_v1 }
 0x6d1   :  { %v19992_v52 = vpop.f32.mrb[184].mxu1 }
 0x6d2   :  { %v6750_v42 = vpop.f32.mrb[185].mxu1 }
 0x6d8   :  { %v19994_v51 = vpop.f32.mrb[186].mxu1 }
 0x6d9   :  { %v6755_v3 = vpop.f32.mrb[187].mxu1 }
 0x6dc   :  { %v19996_v20 = vpop.f32.mrb[188].mxu1 }
 0x6dd   :  { %v6760_v37 = vpop.f32.mrb[189].mxu1 }
 0x6de   :  { %v11417_v37 = vld [vmem:[%s21898_s5 + $0xc0] sm:$0xff] }
 0x6e1   :  { %v19998_v47 = vpop.f32.mrb[190].mxu1 }
 0x6e2   :  { %v6765_v34 = vpop.f32.mrb[191].mxu1 }
 0x6e3   :  { %v11418_v34 = vld [vmem:[%s21898_s5 + $0xc8] sm:$0xff] }
 0x6e5   :  { %v20000_v43 = vpop.f32.mrb[192].mxu1 }
 0x6e6   :  { %v6770_v16 = vpop.f32.mrb[193].mxu1 }
 0x6e9   :  { %v20002_v13 = vpop.f32.mrb[194].mxu1 }
 0x6ea   :  { %v6775_v35 = vpop.f32.mrb[195].mxu1 }
 0x6ed   :  { %v20004_v48 = vpop.f32.mrb[196].mxu1 }
 0x6ee   :  { %v7019_v46 = vpop.f32.mrb[197].mxu1 }
 0x6ef   :  { %v15109_v46 = vpack.c.bf16 %v11418_v34, %v11417_v37 }
 0x6f1   :  { %v20006_v2 = vpop.f32.mrb[198].mxu1 }
 0x6f2   :  { %v7024_v8 = vpop.f32.mrb[199].mxu1 }
 0x6f3   :  { %v11419_v8 = vld [vmem:[%s21898_s5 + $0xd0] sm:$0xff] }
 0x6f5   :  { %v20008_v0 = vpop.f32.mrb[200].mxu1 }
 0x6f6   :  { %v7029_v54 = vpop.f32.mrb[201].mxu1 }
 0x6f7   :  { %v11420_v54 = vld [vmem:[%s21898_s5 + $0xd8] sm:$0xff] }
 0x6f8   :  { %v15112_v29 = vpack.c.bf16 %v11420_v54, %v11419_v8 }
 0x6f9   :  { %v20016_v28 = vpop.f32.mrb[202].mxu1 }
 0x6fa   :  { %v7034_v58 = vpop.f32.mrb[203].mxu1 }
 0x6fd   :  { %v20025_v59 = vpop.f32.mrb[204].mxu1 }
 0x6fe   :  { %v7039_v45 = vpop.f32.mrb[205].mxu1 }
 0x6ff   :  { %v5921_v6 = vpop.f32.mrb[106].mxu0 }
 0x700   :  { %v5923_v4 = vpop.f32.mrb[107].mxu0  ;;  %13238 = vmatmul.mubr.msk.f32.vlgmr.msra.gmra.mrb[92].mxu0 %vm2331_vm15, %v5921_v6 }
 0x701   :  { %15068 = vmatpush3.bf16.msra.mxu0 %v15067_v56  ;;  %13240 = vmatprep.mubr.msk.f32.mxu0 %vm16571_vm14, %v21992_v12  ;;  %v20031_v11 = vpop.f32.mrb[206].mxu1 }
 0x702   :  { %15069 = vmatprep.subr.bf16.mxu0 %v21964_v9  ;;  %v7044_v32 = vpop.f32.mrb[207].mxu1 }
 0x703   :  { %v5926_v60 = vpop.f32.mrb[108].mxu0 }
 0x704   :  { %v5928_v36 = vpop.f32.mrb[109].mxu0  ;;  %13241 = vmatmul.mubr.msk.f32.gmra.mrb[94].mxu0 %vm2331_vm15, %v5926_v60 }
 0x705   :  { %13243 = vmatprep.mubr.msk.f32.mxu0 %vm16571_vm14, %v21992_v12  ;;  %15071 = vmatpush3.bf16.msra.mxu0 %v15070_v27  ;;  %v20037_v57 = vpop.f32.mrb[208].mxu1 }
 0x706   :  { %15108 = vmatprep.subr.bf16.mxu0 %v21964_v9  ;;  %v7049_v55 = vpop.f32.mrb[209].mxu1 }
 0x707   :  { %v5931_v25 = vpop.f32.mrb[110].mxu0 }
 0x708   :  { %v5933_v49 = vpop.f32.mrb[111].mxu0  ;;  %13244 = vmatmul.mubr.msk.f32.gmra.mrb[96].mxu0 %vm2331_vm15, %v5931_v25 }
 0x709   :  { %13246 = vmatprep.mubr.msk.f32.mxu0 %vm16571_vm14, %v21992_v12 }
 0x70b   :  { %v5936_v41 = vpop.f32.mrb[112].mxu0 }
 0x70c   :  { %v5938_v24 = vpop.f32.mrb[113].mxu0  ;;  %13247 = vmatmul.mubr.msk.f32.gmra.mrb[98].mxu0 %vm2331_vm15, %v5936_v41 }
 0x70d   :  { %13249 = vmatprep.mubr.msk.f32.mxu0 %vm16571_vm14, %v21992_v12 }
 0x70f   :  { %v5941_v23 = vpop.f32.mrb[114].mxu0 }
 0x710   :  { %v5943_v30 = vpop.f32.mrb[115].mxu0  ;;  %13250 = vmatmul.mubr.msk.f32.gmra.mrb[100].mxu0 %vm2331_vm15, %v5941_v23 }
 0x711   :  { %13252 = vmatprep.mubr.msk.f32.mxu0 %vm16571_vm14, %v21992_v12 }
 0x713   :  { %v5946_v42 = vpop.f32.mrb[116].mxu0 }
 0x714   :  { %v5948_v3 = vpop.f32.mrb[117].mxu0  ;;  %13253 = vmatmul.mubr.msk.f32.gmra.mrb[102].mxu0 %vm2331_vm15, %v5946_v42 }
 0x715   :  { %13255 = vmatprep.mubr.msk.f32.mxu0 %vm16571_vm14, %v21992_v12 }
 0x717   :  { %v5951_v16 = vpop.f32.mrb[118].mxu0 }
 0x718   :  { %v5953_v35 = vpop.f32.mrb[119].mxu0  ;;  %13256 = vmatmul.mubr.msk.f32.gmra.mrb[104].mxu0 %vm2331_vm15, %v5951_v16 }
 0x719   :  { %13266 = vmatprep.mubr.msk.f32.mxu0 %vm16571_vm14, %v21992_v12 }
 0x71c   :  { %13267 = vmatmul.mubr.msk.f32.vlgmr.msra.gmra.mrb[92].mxu0 %vm2331_vm15, %v19784_v19  ;;  %v11442_v19 = vld [vmem:[%s21898_s5 + $0xe0] sm:$0xff] }
 0x71d   :  { %15110 = vmatpush3.bf16.msra.mxu0 %v15109_v46  ;;  %13269 = vmatprep.mubr.msk.f32.mxu0 %vm16571_vm14, %v21992_v12 }
 0x71e   :  { %15111 = vmatprep.subr.bf16.mxu0 %v21964_v9 }
 0x720   :  { %13270 = vmatmul.mubr.msk.f32.gmra.mrb[94].mxu0 %vm2331_vm15, %v19802_v44  ;;  %v11443_v44 = vld [vmem:[%s21898_s5 + $0xe8] sm:$0xff] }
 0x721   :  { %13272 = vmatprep.mubr.msk.f32.mxu0 %vm16571_vm14, %v21992_v12  ;;  %15113 = vmatpush3.bf16.msra.mxu0 %v15112_v29 }
 0x722   :  { %15150 = vmatprep.subr.bf16.mxu0 %v21964_v9 }
 0x724   :  { %13273 = vmatmul.mubr.msk.f32.gmra.mrb[96].mxu0 %vm2331_vm15, %v19805_v53  ;;  %v15151_v53 = vpack.c.bf16 %v11443_v44, %v11442_v19 }
 0x725   :  { %13275 = vmatprep.mubr.msk.f32.mxu0 %vm16571_vm14, %v21992_v12 }
 0x728   :  { %13276 = vmatmul.mubr.msk.f32.gmra.mrb[98].mxu0 %vm2331_vm15, %v19811_v38  ;;  %v11444_v38 = vld [vmem:[%s21898_s5 + $0xf0] sm:$0xff] }
 0x729   :  { %13278 = vmatprep.mubr.msk.f32.mxu0 %vm16571_vm14, %v21992_v12 }
 0x72c   :  { %13279 = vmatmul.mubr.msk.f32.gmra.mrb[100].mxu0 %vm2331_vm15, %v19896_v22  ;;  %v11445_v22 = vld [vmem:[%s21898_s5 + $0xf8] sm:$0xff] }
 0x72d   :  { %13281 = vmatprep.mubr.msk.f32.mxu0 %vm16571_vm14, %v21992_v12 }
 0x730   :  { %13282 = vmatmul.mubr.msk.f32.gmra.mrb[102].mxu0 %vm2331_vm15, %v19904_v5  ;;  %v15154_v5 = vpack.c.bf16 %v11445_v22, %v11444_v38 }
 0x731   :  { %13284 = vmatprep.mubr.msk.f32.mxu0 %vm16571_vm14, %v21992_v12 }
 0x734   :  { %13285 = vmatmul.mubr.msk.f32.gmra.mrb[104].mxu0 %vm2331_vm15, %v19914_v39  ;;  %v11467_v39 = vld [vmem:[%s21898_s5 + $0x100] sm:$0xff] }
 0x735   :  { %13295 = vmatprep.mubr.msk.f32.mxu0 %vm16571_vm14, %v21992_v12 }
 0x738   :  { %13296 = vmatmul.mubr.msk.f32.vlgmr.msra.gmra.mrb[92].mxu0 %vm2331_vm15, %v19924_v15  ;;  %v11468_v15 = vld [vmem:[%s21898_s5 + $0x108] sm:$0xff] }
 0x739   :  { %15152 = vmatpush3.bf16.msra.mxu0 %v15151_v53  ;;  %13298 = vmatprep.mubr.msk.f32.mxu0 %vm16571_vm14, %v21992_v12 }
 0x73a   :  { %15153 = vmatprep.subr.bf16.mxu0 %v21964_v9 }
 0x73c   :  { %13299 = vmatmul.mubr.msk.f32.gmra.mrb[94].mxu0 %vm2331_vm15, %v19966_v62  ;;  %v15193_v62 = vpack.c.bf16 %v11468_v15, %v11467_v39 }
 0x73d   :  { %13301 = vmatprep.mubr.msk.f32.mxu0 %vm16571_vm14, %v21992_v12  ;;  %15155 = vmatpush3.bf16.msra.mxu0 %v15154_v5 }
 0x73e   :  { %15192 = vmatprep.subr.bf16.mxu0 %v21964_v9 }
 0x740   :  { %13302 = vmatmul.mubr.msk.f32.gmra.mrb[96].mxu0 %vm2331_vm15, %v19972_v17  ;;  %v11469_v17 = vld [vmem:[%s21898_s5 + $0x110] sm:$0xff] }
 0x741   :  { %13304 = vmatprep.mubr.msk.f32.mxu0 %vm16571_vm14, %v21992_v12 }
 0x744   :  { %13305 = vmatmul.mubr.msk.f32.gmra.mrb[98].mxu0 %vm2331_vm15, %v19977_v26  ;;  %v11470_v26 = vld [vmem:[%s21898_s5 + $0x118] sm:$0xff] }
 0x745   :  { %13307 = vmatprep.mubr.msk.f32.mxu0 %vm16571_vm14, %v21992_v12 }
 0x748   :  { %13308 = vmatmul.mubr.msk.f32.gmra.mrb[100].mxu0 %vm2331_vm15, %v19983_v10  ;;  %v15196_v10 = vpack.c.bf16 %v11470_v26, %v11469_v17 }
 0x749   :  { %13310 = vmatprep.mubr.msk.f32.mxu0 %vm16571_vm14, %v21992_v12 }
 0x74c   :  { %13311 = vmatmul.mubr.msk.f32.gmra.mrb[102].mxu0 %vm2331_vm15, %v19986_v14  ;;  %v20213_v14 = vld [vmem:[%s21901_s8 + $0x10] sm:$0xff]  }
 0x74d   :  { %13313 = vmatprep.mubr.msk.f32.mxu0 %vm16571_vm14, %v21992_v12 }
 0x750   :  { %13314 = vmatmul.mubr.msk.f32.gmra.mrb[104].mxu0 %vm2331_vm15, %v19988_v50  ;;  %v11902_v50 = vunpack.c.l.bf16 %v20213_v14 }
 0x751   :  { %13324 = vmatprep.mubr.msk.f32.mxu0 %vm16571_vm14, %v21992_v12 }
 0x752   :  { %13436 = vmatprep.mubr.msk.f32.mxu1 %vm7429_vm3, %v11902_v50 }
 0x754   :  { %13325 = vmatmul.mubr.msk.f32.vlgmr.msra.gmra.mrb[92].mxu0 %vm2331_vm15, %v19990_v61  ;;  %v20220_v61 = vld [vmem:[%s21901_s8] sm:$0xff]  }
 0x755   :  { %15194 = vmatpush3.bf16.msra.mxu0 %v15193_v62  ;;  %13327 = vmatprep.mubr.msk.f32.mxu0 %vm16571_vm14, %v21992_v12 }
 0x756   :  { %15195 = vmatprep.subr.bf16.mxu0 %v21964_v9 }
 0x758   :  { %13328 = vmatmul.mubr.msk.f32.gmra.mrb[94].mxu0 %vm2331_vm15, %v19992_v52  ;;  %v11894_v52 = vunpack.c.l.bf16 %v20220_v61 }
 0x759   :  { %15197 = vmatpush3.bf16.msra.mxu0 %v15196_v10  ;;  %13330 = vmatprep.mubr.msk.f32.mxu0 %vm16571_vm14, %v21992_v12 }
 0x75a   :  { %15199 = vmatprep.subr.bf16.mxu0 %v19956_v63 }
 0x75c   :  { %13331 = vmatmul.mubr.msk.f32.gmra.mrb[96].mxu0 %vm2331_vm15, %v19994_v51 }
 0x75d   :  { %13333 = vmatprep.mubr.msk.f32.mxu0 %vm16571_vm14, %v21992_v12 }
 0x760   :  { %13334 = vmatmul.mubr.msk.f32.gmra.mrb[98].mxu0 %vm2331_vm15, %v19996_v20 }
 0x761   :  { %13336 = vmatprep.mubr.msk.f32.mxu0 %vm16571_vm14, %v21992_v12 }
 0x764   :  { %13337 = vmatmul.mubr.msk.f32.gmra.mrb[100].mxu0 %vm2331_vm15, %v19998_v47 }
 0x765   :  { %13339 = vmatprep.mubr.msk.f32.mxu0 %vm16571_vm14, %v21992_v12 }
 0x768   :  { %13340 = vmatmul.mubr.msk.f32.gmra.mrb[102].mxu0 %vm2331_vm15, %v20000_v43 }
 0x769   :  { %13342 = vmatprep.mubr.msk.f32.mxu0 %vm16571_vm14, %v21992_v12 }
 0x76c   :  { %13343 = vmatmul.mubr.msk.f32.gmra.mrb[104].mxu0 %vm2331_vm15, %v20002_v13 }
 0x76d   :  { %13353 = vmatprep.mubr.msk.f32.mxu0 %vm16571_vm14, %v21992_v12 }
 0x770   :  { %13354 = vmatmul.mubr.msk.f32.vlgmr.msra.gmra.mrb[92].mxu0 %vm2331_vm15, %v20004_v48 }
 0x771   :  { %15201 = vmatpush3.bf16.msra.mxu0 %v19956_v63  ;;  %13356 = vmatprep.mubr.msk.f32.mxu0 %vm16571_vm14, %v21992_v12 }
 0x772   :  { %15203 = vmatprep.subr.bf16.mxu0 %v19969_v33 }
 0x774   :  { %13357 = vmatmul.mubr.msk.f32.gmra.mrb[94].mxu0 %vm2331_vm15, %v20006_v2 }
 0x775   :  { %15205 = vmatpush3.bf16.msra.mxu0 %v19969_v33  ;;  %13359 = vmatprep.mubr.msk.f32.mxu0 %vm16571_vm14, %v21992_v12 }
 0x776   :  { %15207 = vmatprep.subr.bf16.mxu0 %v19980_v1 }
 0x778   :  { %13360 = vmatmul.mubr.msk.f32.gmra.mrb[96].mxu0 %vm2331_vm15, %v20008_v0 }
 0x779   :  { %15209 = vmatpush3.bf16.msra.mxu0 %v19980_v1  ;;  %13362 = vmatprep.mubr.msk.f32.mxu0 %vm16571_vm14, %v21992_v12 }
 0x77c   :  { %13363 = vmatmul.mubr.msk.f32.gmra.mrb[98].mxu0 %vm2331_vm15, %v20016_v28 }
 0x77d   :  { %13365 = vmatprep.mubr.msk.f32.mxu0 %vm16571_vm14, %v21992_v12 }
 0x780   :  { %13366 = vmatmul.mubr.msk.f32.gmra.mrb[100].mxu0 %vm2331_vm15, %v20025_v59 }
 0x781   :  { %13368 = vmatprep.mubr.msk.f32.mxu0 %vm16571_vm14, %v21992_v12 }
 0x784   :  { %13369 = vmatmul.mubr.msk.f32.gmra.mrb[102].mxu0 %vm2331_vm15, %v20031_v11 }
 0x785   :  { %13371 = vmatprep.mubr.msk.f32.mxu0 %vm16571_vm14, %v21992_v12 }
 0x788   :  { %13372 = vmatmul.mubr.msk.f32.gmra.mrb[104].mxu0 %vm2331_vm15, %v20037_v57 }
 0x789   :  { %13402 = vmatprep.mubr.msk.f32.mxu0 %vm7429_vm3, %v11894_v52 }
 0x843   :  { %v7142_v51 = vpop.f32.mrb[92].mxu0 }
 0x844   :  { %v7190_v20 = vmul.f32 %v19821_v21, %v7142_v51  ;;  %v13355_v47 = vpop.f32.mrb[93].mxu0 }
 0x846   :  { %v20226_v43 = vadd.f32 %v19826_v40, %v7190_v20 }
 0x847   :  { %v7147_v13 = vpop.f32.mrb[94].mxu0 }
 0x848   :  { %v20229_v48 = vmul.f32 0.70710677, %v20226_v43  ;;  %v7191_v2 = vmul.f32 %v19821_v21, %v7147_v13  ;;  %v13358_v0 = vpop.f32.mrb[95].mxu0 }
 0x84a   :  { %v7225_v31 = vand.u32 2147483647, %v20229_v48  ;;  %v20234_v28 = vadd.f32 %v19826_v40, %v7191_v2  ;;  %vm7365_vm15 = vcmp.lt.f32.partialorder %v20229_v48, 0.0 }
 0x84b   :  { %v7152_v56 = vpop.f32.mrb[96].mxu0 }
 0x84c   :  { %v7232_v58 = vmul.f32 0.3275911, %v7225_v31  ;;  %v20237_v7 = vmul.f32 0.70710677, %v20234_v28  ;;  %v13361_v18 = vpop.f32.mrb[97].mxu0  ;;  %v7192_v6 = vmul.f32 %v19821_v21, %v7152_v56  ;;  %v7323_v42 = vmul.f32 %v7225_v31, %v7225_v31 }
 0x84e   :  { %v7239_v4 = vadd.f32 1.0, %v7232_v58  ;;  %v7226_v59 = vand.u32 2147483647, %v20237_v7  ;;  %v20242_v27 = vadd.f32 %v19826_v40, %v7192_v6  ;;  %v7330_v19 = vsub.f32 0.0, %v7323_v42 }
 0x84f   :  { %v7157_v45 = vpop.f32.mrb[98].mxu0  ;;  %vm7366_vm4 = vcmp.lt.f32.partialorder %v20237_v7, 0.0 }
 0x850   :  { %16469 = vrcp.f32 %v7239_v4  ;;  %v7233_v60 = vmul.f32 0.3275911, %v7226_v59  ;;  %v13364_v36 = vpop.f32.mrb[99].mxu0  ;;  %v20245_v11 = vmul.f32 0.70710677, %v20242_v27  ;;  %v7193_v32 = vmul.f32 %v19821_v21, %v7157_v45 }
 0x851   :  { %v7324_v44 = vmul.f32 %v7226_v59, %v7226_v59  ;;  %v7337_v52 = vmul.f32 1.442695, %v7330_v19 }
 0x852   :  { %v7240_v25 = vadd.f32 1.0, %v7233_v60  ;;  %v7227_v49 = vand.u32 2147483647, %v20245_v11  ;;  %v20250_v57 = vadd.f32 %v19826_v40, %v7193_v32  ;;  %vm7367_vm5 = vcmp.lt.f32.partialorder %v20245_v11, 0.0 }
 0x853   :  { %v7162_v55 = vpop.f32.mrb[100].mxu0  ;;  %v7331_v51 = vsub.f32 0.0, %v7324_v44 }
 0x854   :  { %16471 = vrcp.f32 %v7240_v25  ;;  %v7194_v41 = vmul.f32 %v19821_v21, %v7162_v55  ;;  %v13367_v24 = vpop.f32.mrb[101].mxu0  ;;  %v7234_v23 = vmul.f32 0.3275911, %v7227_v49  ;;  %v20254_v30 = vmul.f32 0.70710677, %v20250_v57 }
 0x855   :  { %v7325_v0 = vmul.f32 %v7227_v49, %v7227_v49 }
 0x856   :  { %v20257_v3 = vadd.f32 %v19826_v40, %v7194_v41  ;;  %v7241_v37 = vadd.f32 1.0, %v7234_v23  ;;  %v7228_v34 = vand.u32 2147483647, %v20254_v30  ;;  %vm7368_vm6 = vcmp.lt.f32.partialorder %v20254_v30, 0.0 }
 0x857   :  { %v7167_v16 = vpop.f32.mrb[102].mxu0  ;;  %v7332_v32 = vsub.f32 0.0, %v7325_v0 }
 0x858   :  { %v20261_v35 = vmul.f32 0.70710677, %v20257_v3  ;;  %v7195_v46 = vmul.f32 %v19821_v21, %v7167_v16  ;;  %v13370_v8 = vpop.f32.mrb[103].mxu0  ;;  %16473 = vrcp.f32 %v7241_v37  ;;  %v7235_v54 = vmul.f32 0.3275911, %v7228_v34 }
 0x859   :  { %v7326_v6 = vmul.f32 %v7228_v34, %v7228_v34 }
 0x85a   :  { %v16470_v29 = vpop.eup %16469  ;;  %v7229_v53 = vand.u32 2147483647, %v20261_v35  ;;  %v20266_v38 = vadd.f32 %v19826_v40, %v7195_v46  ;;  %v7242_v5 = vadd.f32 1.0, %v7235_v54  ;;  %v7341_v46 = vmul.f32 1.442695, %v7332_v32 }
 0x85b   :  { %v7260_v22 = vmul.f32 1.0614054, %v16470_v29  ;;  %v7172_v39 = vpop.f32.mrb[104].mxu0  ;;  %v7333_v41 = vsub.f32 0.0, %v7326_v6  ;;  %vm7369_vm7 = vcmp.lt.f32.partialorder %v20261_v35, 0.0 }
 0x85c   :  { %v7236_v15 = vmul.f32 0.3275911, %v7229_v53  ;;  %v20269_v62 = vmul.f32 0.70710677, %v20266_v38  ;;  %v13373_v17 = vpop.f32.mrb[105].mxu0  ;;  %16475 = vrcp.f32 %v7242_v5  ;;  %v7196_v10 = vmul.f32 %v19821_v21, %v7172_v39 }
 0x85d   :  { %v7267_v26 = vadd.f32 -1.4531521, %v7260_v22  ;;  %v7339_v21 = vmul.f32 1.442695, %v7331_v51  ;;  %v7327_v23 = vmul.f32 %v7229_v53, %v7229_v53  ;;  %v7343_v39 = vmul.f32 1.442695, %v7333_v41 }
 0x85e   :  { %v20272_v50 = vpop.eup %16471  ;;  %v7243_v20 = vadd.f32 1.0, %v7236_v15  ;;  %v7230_v47 = vand.u32 2147483647, %v20269_v62  ;;  %v20277_v31 = vadd.f32 %v19826_v40, %v7196_v10  ;;  %vm7370_vm8 = vcmp.lt.f32.partialorder %v20269_v62, 0.0 }
 0x85f   :  { %v7274_v13 = vmul.f32 %v16470_v29, %v7267_v26  ;;  %v7261_v2 = vmul.f32 1.0614054, %v20272_v50  ;;  %v7334_v26 = vsub.f32 0.0, %v7327_v23 }
 0x860   :  { %16477 = vrcp.f32 %v7243_v20  ;;  %v7237_v56 = vmul.f32 0.3275911, %v7230_v47  ;;  %v20280_v59 = vmul.f32 0.70710677, %v20277_v31  ;;  %v7328_v19 = vmul.f32 %v7230_v47, %v7230_v47 }
 0x861   :  { %v7281_v58 = vadd.f32 1.4214138, %v7274_v13  ;;  %v7268_v18 = vadd.f32 -1.4531521, %v7261_v2  ;;  %16479 = vpow2.f32 %v7337_v52  ;;  %v7211_v13 = vmul.f32 0.5, %v20226_v43 }
 0x862   :  { %v7244_v4 = vadd.f32 1.0, %v7237_v56  ;;  %v20282_v45 = vpop.eup %16473  ;;  %v7231_v25 = vand.u32 2147483647, %v20280_v59  ;;  %v7335_v0 = vsub.f32 0.0, %v7328_v19  ;;  %vm7371_vm9 = vcmp.lt.f32.partialorder %v20280_v59, 0.0 }
 0x863   :  { %v7288_v60 = vmul.f32 %v16470_v29, %v7281_v58  ;;  %v7275_v36 = vmul.f32 %v20272_v50, %v7268_v18  ;;  %v7262_v40 = vmul.f32 1.0614054, %v20282_v45 }
 0x864   :  { %16481 = vrcp.f32 %v7244_v4  ;;  %v7238_v42 = vmul.f32 0.3275911, %v7231_v25  ;;  %v7345_v4 = vmul.f32 1.442695, %v7334_v26  ;;  %v7347_v41 = vmul.f32 1.442695, %v7335_v0 }
 0x865   :  { %v7295_v49 = vadd.f32 -0.28449672, %v7288_v60  ;;  %v7282_v55 = vadd.f32 1.4214138, %v7275_v36  ;;  %16483 = vpow2.f32 %v7339_v21  ;;  %v7269_v24 = vadd.f32 -1.4531521, %v7262_v40 }
 0x866   :  { %v20287_v37 = vpop.eup %16475  ;;  %v7245_v44 = vadd.f32 1.0, %v7238_v42 }
 0x867   :  { %v7302_v34 = vmul.f32 %v16470_v29, %v7295_v49  ;;  %v7289_v16 = vmul.f32 %v20272_v50, %v7282_v55  ;;  %v7276_v8 = vmul.f32 %v20282_v45, %v7269_v24  ;;  %v7263_v54 = vmul.f32 1.0614054, %v20287_v37 }
 0x868   :  { %16485 = vrcp.f32 %v7245_v44  ;;  %v7329_v24 = vmul.f32 %v7231_v25, %v7231_v25 }
 0x869   :  { %v7309_v22 = vadd.f32 0.2548296, %v7302_v34  ;;  %v7296_v5 = vadd.f32 -0.28449672, %v7289_v16  ;;  %v7283_v17 = vadd.f32 1.4214138, %v7276_v8  ;;  %16487 = vpow2.f32 %v7341_v46 }
 0x86a   :  { %v20292_v15 = vpop.eup %16477  ;;  %v7270_v53 = vadd.f32 -1.4531521, %v7263_v54  ;;  %16489 = vpow2.f32 %v7343_v39 }
 0x86b   :  { %v7316_v10 = vmul.f32 %v16470_v29, %v7309_v22  ;;  %v7303_v52 = vmul.f32 %v20272_v50, %v7296_v5  ;;  %v7264_v51 = vmul.f32 1.0614054, %v20292_v15  ;;  %v16480_v20 = vpop.eup %16479  ;;  %v7290_v47 = vmul.f32 %v20282_v45, %v7283_v17 }
 0x86c   :  { %v7277_v2 = vmul.f32 %v20287_v37, %v7270_v53  ;;  %16491 = vpow2.f32 %v7345_v4 }
 0x86d   :  { %v7351_v56 = vmul.f32 %v16480_v20, %v7316_v10  ;;  %v7310_v58 = vadd.f32 0.2548296, %v7303_v52  ;;  %v7271_v18 = vadd.f32 -1.4531521, %v7264_v51  ;;  %v7297_v29 = vadd.f32 -0.28449672, %v7290_v47 }
 0x86e   :  { %v20300_v6 = vpop.eup %16481  ;;  %v7284_v21 = vadd.f32 1.4214138, %v7277_v2  ;;  %16493 = vpow2.f32 %v7347_v41  ;;  %v7336_v52 = vsub.f32 0.0, %v7329_v24  ;;  %v7212_v2 = vmul.f32 0.5, %v20234_v28 }
 0x86f   :  { %v7358_v60 = vsub.f32 1.0, %v7351_v56  ;;  %v7317_v36 = vmul.f32 %v20272_v50, %v7310_v58  ;;  %v7278_v43 = vmul.f32 %v20292_v15, %v7271_v18  ;;  %v7265_v32 = vmul.f32 1.0614054, %v20300_v6  ;;  %v16484_v40 = vpop.eup %16483 }
 0x870   :  { %v7304_v49 = vmul.f32 %v20282_v45, %v7297_v29  ;;  %v7291_v55 = vmul.f32 %v20287_v37, %v7284_v21 }
 0x871   :  { %v7372_v23 = vsub.f32 0.0, %v7358_v60  ;;  %v7352_v42 = vmul.f32 %v16484_v40, %v7317_v36  ;;  %v7285_v34 = vadd.f32 1.4214138, %v7278_v43  ;;  %v7272_v16 = vadd.f32 -1.4531521, %v7265_v32 }
 0x872   :  { %v7311_v46 = vadd.f32 0.2548296, %v7304_v49  ;;  %v7298_v8 = vadd.f32 -0.28449672, %v7291_v55  ;;  %v20312_v22 = vpop.eup %16485  ;;  %v7349_v36 = vmul.f32 1.442695, %v7336_v52 }
 0x873   :  { %v7379_v50 = vsel %vm7365_vm15, %v7372_v23, %v7358_v60  ;;  %v7359_v54 = vsub.f32 1.0, %v7352_v42  ;;  %v7292_v19 = vmul.f32 %v20292_v15, %v7285_v34  ;;  %v7279_v44 = vmul.f32 %v20300_v6, %v7272_v16  ;;  %v16488_v17 = vpop.eup %16487 }
 0x874   :  { %v7386_v25 = vadd.f32 1.0, %v7379_v50  ;;  %v7318_v5 = vmul.f32 %v20282_v45, %v7311_v46  ;;  %v7305_v39 = vmul.f32 %v20287_v37, %v7298_v8  ;;  %v7266_v47 = vmul.f32 1.0614054, %v20312_v22  ;;  %v16490_v58 = vpop.eup %16489  ;;  %v7413_v50 = vld [vmem:[#allocation2 + $0x30] sm:$0xff] }
 0x875   :  { %v7373_v53 = vsub.f32 0.0, %v7359_v54  ;;  %v7299_v26 = vadd.f32 -0.28449672, %v7292_v19  ;;  %v7286_v10 = vadd.f32 1.4214138, %v7279_v44  ;;  %16495 = vpow2.f32 %v7349_v36 }
 0x876   :  { %v7393_v48 = vmul.f32 %v7386_v25, %v7211_v13  ;;  %v7353_v51 = vmul.f32 %v16488_v17, %v7318_v5  ;;  %v7312_v20 = vadd.f32 0.2548296, %v7305_v39  ;;  %v7273_v21 = vadd.f32 -1.4531521, %v7266_v47  ;;  %v16492_v55 = vpop.eup %16491 }
 0x877   :  { %v7380_v0 = vsel %vm7366_vm4, %v7373_v53, %v7359_v54  ;;  %v7306_v45 = vmul.f32 %v20292_v15, %v7299_v26  ;;  %v7293_v56 = vmul.f32 %v20300_v6, %v7286_v10  ;;  %v7214_v39 = vmul.f32 0.5, %v20250_v57 }
 0x878   :  { %7400 = vst.msk [vmem:[#allocation2 + $0x38] sm:$0xff] %vm4723_vm0, %v7393_v48  ;;  %v7387_v18 = vadd.f32 1.0, %v7380_v0  ;;  %v7360_v29 = vsub.f32 1.0, %v7353_v51  ;;  %v7319_v13 = vmul.f32 %v20287_v37, %v7312_v20  ;;  %v7280_v7 = vmul.f32 %v20312_v22, %v7273_v21  ;;  %v16494_v46 = vpop.eup %16493 }
 0x879   :  { %v7313_v4 = vadd.f32 0.2548296, %v7306_v45  ;;  %v7300_v60 = vadd.f32 -0.28449672, %v7293_v56  ;;  %v7213_v37 = vmul.f32 0.5, %v20242_v27  ;;  %v7215_v57 = vmul.f32 0.5, %v20257_v3 }
 0x87a   :  { %v7394_v43 = vmul.f32 %v7387_v18, %v7212_v2  ;;  %v7374_v28 = vsub.f32 0.0, %v7360_v29  ;;  %v7354_v32 = vmul.f32 %v16490_v58, %v7319_v13  ;;  %v7287_v23 = vadd.f32 1.4214138, %v7280_v7 }
 0x87b   :  { %v7320_v40 = vmul.f32 %v20292_v15, %v7313_v4  ;;  %v7307_v49 = vmul.f32 %v20300_v6, %v7300_v60  ;;  %v7216_v58 = vmul.f32 0.5, %v20266_v38  ;;  %v7217_v60 = vmul.f32 0.5, %v20277_v31  ;;  %v11966_v31 = vld [vmem:[%s21901_s8 + $0x18] sm:$0xff]  }
 0x87c   :  { %7401 = vst.msk [vmem:[#allocation2 + $0x40] sm:$0xff] %vm4723_vm0, %v7394_v43  ;;  %v7381_v41 = vsel %vm7367_vm5, %v7374_v28, %v7360_v29  ;;  %v7361_v24 = vsub.f32 1.0, %v7354_v32  ;;  %v7294_v11 = vmul.f32 %v20312_v22, %v7287_v23  ;;  %v11907_v23 = vunpack.c.h.bf16 %v11966_v31 }
 0x87d   :  { %v7388_v42 = vadd.f32 1.0, %v7381_v41  ;;  %v7355_v34 = vmul.f32 %v16492_v55, %v7320_v40  ;;  %v7314_v16 = vadd.f32 0.2548296, %v7307_v49  ;;  %v11964_v40 = vld [vmem:[%s21901_s8 + $0x8] sm:$0xff]   ;;  %v11903_v49 = vunpack.c.h.bf16 %v20213_v14 }
 0x87e   :  { %v7375_v8 = vsub.f32 0.0, %v7361_v24  ;;  %v7301_v5 = vadd.f32 -0.28449672, %v7294_v11  ;;  %v11895_v55 = vunpack.c.h.bf16 %v20220_v61  ;;  %v11898_v41 = vunpack.c.l.bf16 %v11964_v40 }
 0x87f   :  { %v7414_v15 = vld [vmem:[#allocation2 + $0x38] sm:$0xff]  ;;  %v7395_v54 = vmul.f32 %v7388_v42, %v7213_v37  ;;  %v7362_v19 = vsub.f32 1.0, %v7355_v34  ;;  %v7321_v44 = vmul.f32 %v20300_v6, %v7314_v16  ;;  %v16496_v2 = vpop.eup %16495  ;;  %v11906_v37 = vunpack.c.l.bf16 %v11966_v31  ;;  %v11492_v42 = vld [vmem:[%s21902_s9 + $0x40] sm:$0xff]  ;;  %v11493_v34 = vld [vmem:[%s21902_s9 + $0x48] sm:$0xff] }
 0x880   :  { %v20333_v27 = vpack.c.bf16 %v7414_v15, %v7413_v50  ;;  %v7382_v25 = vsel %vm7368_vm6, %v7375_v8, %v7361_v24  ;;  %v7308_v10 = vmul.f32 %v20312_v22, %v7301_v5  ;;  %v11967_v24 = vld [vmem:[%s21901_s8 + $0x20] sm:$0xff]   ;;  %v11899_v14 = vunpack.c.h.bf16 %v11964_v40  ;;  %v11494_v16 = vld [vmem:[%s21902_s9 + $0x50] sm:$0xff]  ;;  %v11495_v8 = vld [vmem:[%s21902_s9 + $0x58] sm:$0xff] }
 0x881   :  { %7402 = vst.msk [vmem:[#allocation2 + $0x48] sm:$0xff] %vm4723_vm0, %v7395_v54  ;;  %v7389_v17 = vadd.f32 1.0, %v7382_v25  ;;  %v7376_v53 = vsub.f32 0.0, %v7362_v19  ;;  %v7356_v26 = vmul.f32 %v16494_v46, %v7321_v44  ;;  %v11910_v61 = vunpack.c.l.bf16 %v11967_v24  ;;  %v11496_v50 = vld [vmem:[%s21902_s9 + $0x60] sm:$0xff]  ;;  %v11497_v15 = vld [vmem:[%s21902_s9 + $0x68] sm:$0xff]  ;;  %v11499_v44 = vld [vmem:[%s21902_s9 + $0x78] sm:$0xff] }
 0x882   :  { %15211 = vmatprep.subr.bf16.mxu0 %v20333_v27  ;;  %15239 = vmatprep.subr.bf16.mxu1 %v20333_v27  ;;  %v7315_v51 = vadd.f32 0.2548296, %v7308_v10  ;;  %v15254_v46 = vpack.c.bf16 %v11493_v34, %v11492_v42  ;;  %v15258_v11 = vpack.c.bf16 %v11495_v8, %v11494_v16  ;;  %v15262_v54 = vpack.c.bf16 %v11497_v15, %v11496_v50  ;;  %v11968_v5 = vld [vmem:[%s21901_s8 + $0x28] sm:$0xff]   ;;  %v7533_v16 = vld [vmem:[%s21902_s9 + $0x30] sm:$0xff] }
 0x883   :  { %v7396_v30 = vmul.f32 %v7389_v17, %v7214_v39  ;;  %v7383_v6 = vsel %vm7369_vm7, %v7376_v53, %v7362_v19  ;;  %v7363_v52 = vsub.f32 1.0, %v7356_v26  ;;  %15213 = vmatpush3.bf16.msra.mxu0 %v20333_v27  ;;  %15241 = vmatpush3.bf16.msra.mxu1 %v20333_v27  ;;  %v7415_v45 = vld [vmem:[#allocation2 + $0x40] sm:$0xff]  ;;  %v11498_v19 = vld [vmem:[%s21902_s9 + $0x70] sm:$0xff]  ;;  %v11911_v39 = vunpack.c.h.bf16 %v11967_v24  ;;  %v7532_v24 = vld [vmem:[%s21902_s9 + $0x28] sm:$0xff] }
 0x884   :  { %v7390_v48 = vadd.f32 1.0, %v7383_v6  ;;  %v7322_v47 = vmul.f32 %v20312_v22, %v7315_v51  ;;  %v15266_v25 = vpack.c.bf16 %v11499_v44, %v11498_v19  ;;  %v11914_v17 = vunpack.c.l.bf16 %v11968_v5  ;;  %v11971_v53 = vld [vmem:[%s21901_s8 + $0x40] sm:$0xff]   ;;  %v11517_v50 = vld [vmem:[%s21902_s9 + $0x88] sm:$0xff]  ;;  %v11519_v19 = vld [vmem:[%s21902_s9 + $0x98] sm:$0xff] }
 0x885   :  { %7403 = vst.msk [vmem:[#allocation2 + $0x50] sm:$0xff] %vm4723_vm0, %v7396_v30  ;;  %v7377_v35 = vsub.f32 0.0, %v7363_v52  ;;  %v11915_v26 = vunpack.c.h.bf16 %v11968_v5  ;;  %v11926_v10 = vunpack.c.l.bf16 %v11971_v53  ;;  %v11972_v30 = vld [vmem:[%s21901_s8 + $0x48] sm:$0xff]   ;;  %v11927_v6 = vunpack.c.h.bf16 %v11971_v53  ;;  %v11523_v53 = vld [vmem:[%s21902_s9 + $0xb8] sm:$0xff] }
 0x886   :  { %v7397_v20 = vmul.f32 %v7390_v48, %v7215_v57  ;;  %v7357_v3 = vmul.f32 %v16496_v2, %v7322_v47  ;;  %v11973_v57 = vld [vmem:[%s21901_s8 + $0x50] sm:$0xff]   ;;  %v11931_v48 = vunpack.c.h.bf16 %v11972_v30  ;;  %v11975_v2 = vld [vmem:[%s21901_s8 + $0x60] sm:$0xff]   ;;  %v11521_v5 = vld [vmem:[%s21902_s9 + $0xa8] sm:$0xff] }
 0x887   :  { %v7384_v0 = vsel %vm7370_vm8, %v7377_v35, %v7363_v52  ;;  %v11930_v52 = vunpack.c.l.bf16 %v11972_v30  ;;  %v11934_v51 = vunpack.c.l.bf16 %v11973_v57  ;;  %v11974_v35 = vld [vmem:[%s21901_s8 + $0x58] sm:$0xff]  }
 0x888   :  { %v7416_v56 = vld [vmem:[#allocation2 + $0x48] sm:$0xff]  ;;  %7404 = vst.msk [vmem:[#allocation2 + $0x58] sm:$0xff] %vm4723_vm0, %v7397_v20  ;;  %v7391_v18 = vadd.f32 1.0, %v7384_v0  ;;  %v7364_v21 = vsub.f32 1.0, %v7357_v3  ;;  %v11935_v20 = vunpack.c.h.bf16 %v11973_v57  ;;  %v11938_v47 = vunpack.c.l.bf16 %v11974_v35  ;;  %v7527_v0 = vld [vmem:[%s21902_s9] sm:$0xff]  ;;  %v11969_v57 = vld [vmem:[%s21901_s8 + $0x30] sm:$0xff]  }
 0x889   :  { %v20349_v29 = vpack.c.bf16 %v7416_v56, %v7415_v45  ;;  %v7528_v45 = vld [vmem:[%s21902_s9 + $0x8] sm:$0xff]  ;;  %v11943_v3 = vunpack.c.h.bf16 %v11975_v2 }
 0x88a   :  { %v7398_v13 = vmul.f32 %v7391_v18, %v7216_v58  ;;  %v7378_v62 = vsub.f32 0.0, %v7364_v21  ;;  %v20488_v56 = vpack.c.bf16 %v7528_v45, %v7527_v0  ;;  %v11939_v58 = vunpack.c.h.bf16 %v11974_v35  ;;  %v11537_v35 = vld [vmem:[%s21902_s9 + $0xc8] sm:$0xff]  ;;  %v11538_v45 = vld [vmem:[%s21902_s9 + $0xd0] sm:$0xff] }
 0x88b   :  { %15215 = vmatprep.subr.bf16.mxu0 %v20349_v29  ;;  %15243 = vmatprep.subr.bf16.mxu1 %v20349_v29  ;;  %v11942_v18 = vunpack.c.l.bf16 %v11975_v2 }
 0x88c   :  { %7405 = vst.msk [vmem:[#allocation2 + $0x60] sm:$0xff] %vm4723_vm0, %v7398_v13  ;;  %15217 = vmatpush3.bf16.msra.mxu0 %v20349_v29  ;;  %15245 = vmatpush3.bf16.msra.mxu1 %v20349_v29  ;;  %v7385_v38 = vsel %vm7371_vm9, %v7378_v62, %v7364_v21  ;;  %v7417_v22 = vld [vmem:[#allocation2 + $0x50] sm:$0xff]  ;;  %v11976_v13 = vld [vmem:[%s21901_s8 + $0x68] sm:$0xff]  }
 0x88d   :  { %v7392_v36 = vadd.f32 1.0, %v7385_v38  ;;  %v11977_v21 = vld [vmem:[%s21901_s8 + $0x70] sm:$0xff]   ;;  %v11946_v62 = vunpack.c.l.bf16 %v11976_v13  ;;  %v11947_v38 = vunpack.c.h.bf16 %v11976_v13  ;;  %v11540_v13 = vld [vmem:[%s21902_s9 + $0xe0] sm:$0xff] }
 0x88f   :  { %v7418_v4 = vld [vmem:[#allocation2 + $0x58] sm:$0xff]  ;;  %v7399_v28 = vmul.f32 %v7392_v36, %v7217_v60  ;;  %v11951_v60 = vunpack.c.h.bf16 %v11977_v21 }
 0x890   :  { %v20358_v43 = vpack.c.bf16 %v7418_v4, %v7417_v22  ;;  %v11950_v22 = vunpack.c.l.bf16 %v11977_v21  ;;  %v11978_v4 = vld [vmem:[%s21901_s8 + $0x78] sm:$0xff]   ;;  %v11541_v21 = vld [vmem:[%s21902_s9 + $0xe8] sm:$0xff] }
 0x891   :  { %7406 = vst.msk [vmem:[#allocation2 + $0x68] sm:$0xff] %vm4723_vm0, %v7399_v28  ;;  %v11954_v36 = vunpack.c.l.bf16 %v11978_v4  ;;  %v11955_v28 = vunpack.c.h.bf16 %v11978_v4  ;;  %v11543_v4 = vld [vmem:[%s21902_s9 + $0xf8] sm:$0xff] }
 0x892   :  { %15219 = vmatprep.subr.bf16.mxu0 %v20358_v43  ;;  %15247 = vmatprep.subr.bf16.mxu1 %v20358_v43 }
 0x893   :  { %15221 = vmatpush3.bf16.msra.mxu0 %v20358_v43  ;;  %15249 = vmatpush3.bf16.msra.mxu1 %v20358_v43  ;;  %v7419_v59 = vld [vmem:[#allocation2 + $0x60] sm:$0xff] }
 0x898   :  { %v7420_v32 = vld [vmem:[#allocation2 + $0x68] sm:$0xff] }
 0x899   :  { %v20365_v7 = vpack.c.bf16 %v7420_v32, %v7419_v59  ;;  %v7529_v59 = vld [vmem:[%s21902_s9 + $0x10] sm:$0xff]  ;;  %v7530_v32 = vld [vmem:[%s21902_s9 + $0x18] sm:$0xff] }
 0x89b   :  { %15223 = vmatprep.subr.bf16.mxu0 %v20365_v7  ;;  %15251 = vmatprep.subr.bf16.mxu1 %v20365_v7 }
 0x89c   :  { %15225 = vmatpush3.bf16.msra.mxu0 %v20365_v7  ;;  %15253 = vmatpush3.bf16.msra.mxu1 %v20365_v7 }
 0x89d   :  { %15287 = vmatprep.subr.bf16.mxu1 %v19956_v63  ;;  %15255 = vmatprep.subr.bf16.mxu0 %v15254_v46 }
 0x89f   :  { %13437 = vmatmul.mubr.msk.f32.vlgmr.msra.gmra.mrb[210].mxu1 %vm7429_vm3, %v11903_v49  ;;  %13403 = vmatmul.mubr.msk.f32.vlgmr.msra.gmra.mrb[120].mxu0 %vm7429_vm3, %v11895_v55  ;;  %v15274_v55 = vpack.c.bf16 %v7530_v32, %v7529_v59 }
 0x8a0   :  { %15289 = vmatpush3.bf16.msra.mxu1 %v19956_v63  ;;  %13439 = vmatprep.mubr.msk.f32.mxu1 %vm7429_vm3, %v11906_v37 }
 0x8a1   :  { %15291 = vmatprep.subr.bf16.mxu1 %v19969_v33  ;;  %13405 = vmatprep.mubr.msk.f32.mxu0 %vm7429_vm3, %v11898_v41  ;;  %v7531_v41 = vld [vmem:[%s21902_s9 + $0x20] sm:$0xff] }
 0x8a2   :  { %15257 = vmatpush3.bf16.msra.mxu0 %v15254_v46  ;;  %v7534_v46 = vld [vmem:[%s21902_s9 + $0x38] sm:$0xff] }
 0x8a3   :  { %13440 = vmatmul.mubr.msk.f32.gmra.mrb[212].mxu1 %vm7429_vm3, %v11907_v23  ;;  %13406 = vmatmul.mubr.msk.f32.gmra.mrb[122].mxu0 %vm7429_vm3, %v11899_v14  ;;  %v15282_v8 = vpack.c.bf16 %v7534_v46, %v7533_v16  ;;  %v11558_v46 = vld [vmem:[%s21902_s9 + $0x110] sm:$0xff] }
 0x8a4   :  { %15293 = vmatpush3.bf16.msra.mxu1 %v19969_v33  ;;  %13514 = vmatprep.mubr.msk.f32.mxu1 %vm7429_vm3, %v11910_v61  ;;  %v15278_v61 = vpack.c.bf16 %v7532_v24, %v7531_v41 }
 0x8a5   :  { %15295 = vmatprep.subr.bf16.mxu1 %v19980_v1  ;;  %15259 = vmatprep.subr.bf16.mxu0 %v15258_v11 }
 0x8a6   :  { %15261 = vmatpush3.bf16.msra.mxu0 %v15258_v11  ;;  %v11516_v11 = vld [vmem:[%s21902_s9 + $0x80] sm:$0xff] }
 0x8a7   :  { %15263 = vmatprep.subr.bf16.mxu0 %v15262_v54  ;;  %v15314_v15 = vpack.c.bf16 %v11517_v50, %v11516_v11 }
 0x8a8   :  { %15297 = vmatpush3.bf16.msra.mxu1 %v19980_v1 }
 0x8a9   :  { %15299 = vmatprep.subr.bf16.mxu1 %v20333_v27 }
 0x8aa   :  { %15265 = vmatpush3.bf16.msra.mxu0 %v15262_v54  ;;  %v11518_v54 = vld [vmem:[%s21902_s9 + $0x90] sm:$0xff] }
 0x8ab   :  { %15267 = vmatprep.subr.bf16.mxu0 %v15266_v25  ;;  %v15318_v44 = vpack.c.bf16 %v11519_v19, %v11518_v54  ;;  %v11560_v54 = vld [vmem:[%s21902_s9 + $0x120] sm:$0xff]  ;;  %v11561_v19 = vld [vmem:[%s21902_s9 + $0x128] sm:$0xff] }
 0x8ac   :  { %15301 = vmatpush3.bf16.msra.mxu1 %v20333_v27 }
 0x8ad   :  { %15303 = vmatprep.subr.bf16.mxu1 %v20349_v29 }
 0x8ae   :  { %15269 = vmatpush3.bf16.msra.mxu0 %v15266_v25  ;;  %v11520_v25 = vld [vmem:[%s21902_s9 + $0xa0] sm:$0xff] }
 0x8af   :  { %15271 = vmatprep.subr.bf16.mxu0 %v20488_v56 }
 0x8b0   :  { %15305 = vmatpush3.bf16.msra.mxu1 %v20349_v29 }
 0x8b1   :  { %15307 = vmatprep.subr.bf16.mxu1 %v20358_v43 }
 0x8b4   :  { %15309 = vmatpush3.bf16.msra.mxu1 %v20358_v43 }
 0x8b5   :  { %15311 = vmatprep.subr.bf16.mxu1 %v20365_v7 }
 0x8b8   :  { %15313 = vmatpush3.bf16.msra.mxu1 %v20365_v7 }
 0x8b9   :  { %15375 = vmatprep.subr.bf16.mxu1 %v19956_v63 }
 0x8bb   :  { %13515 = vmatmul.mubr.msk.f32.vlgmr.msra.gmra.mrb[214].mxu1 %vm7429_vm3, %v11911_v39  ;;  %v15322_v39 = vpack.c.bf16 %v11521_v5, %v11520_v25  ;;  %v15410_v5 = vpack.c.bf16 %v11561_v19, %v11560_v54 }
 0x8bc   :  { %15377 = vmatpush3.bf16.msra.mxu1 %v19956_v63  ;;  %13517 = vmatprep.mubr.msk.f32.mxu1 %vm7429_vm3, %v11914_v17  ;;  %v11522_v17 = vld [vmem:[%s21902_s9 + $0xb0] sm:$0xff] }
 0x8bd   :  { %15379 = vmatprep.subr.bf16.mxu1 %v19969_v33 }
 0x8bf   :  { %13518 = vmatmul.mubr.msk.f32.gmra.mrb[216].mxu1 %vm7429_vm3, %v11915_v26  ;;  %v15326_v26 = vpack.c.bf16 %v11523_v53, %v11522_v17  ;;  %v11563_v17 = vld [vmem:[%s21902_s9 + $0x138] sm:$0xff] }
 0x8c0   :  { %15381 = vmatpush3.bf16.msra.mxu1 %v19969_v33  ;;  %13626 = vmatprep.mubr.msk.f32.mxu1 %vm7429_vm3, %v11926_v10 }
 0x8c1   :  { %15383 = vmatprep.subr.bf16.mxu1 %v19980_v1 }
 0x8c4   :  { %15385 = vmatpush3.bf16.msra.mxu1 %v19980_v1 }
 0x8c5   :  { %15387 = vmatprep.subr.bf16.mxu1 %v20333_v27 }
 0x8c8   :  { %15389 = vmatpush3.bf16.msra.mxu1 %v20333_v27 }
 0x8c9   :  { %15391 = vmatprep.subr.bf16.mxu1 %v20349_v29 }
 0x8cc   :  { %15393 = vmatpush3.bf16.msra.mxu1 %v20349_v29 }
 0x8cd   :  { %15395 = vmatprep.subr.bf16.mxu1 %v20358_v43 }
 0x8d0   :  { %15397 = vmatpush3.bf16.msra.mxu1 %v20358_v43 }
 0x8d1   :  { %15399 = vmatprep.subr.bf16.mxu1 %v20365_v7 }
 0x8d4   :  { %15401 = vmatpush3.bf16.msra.mxu1 %v20365_v7 }
 0x8d5   :  { %15419 = vmatprep.subr.bf16.mxu1 %v19956_v63 }
 0x8d7   :  { %13627 = vmatmul.mubr.msk.f32.vlgmr.msra.gmra.mrb[218].mxu1 %vm7429_vm3, %v11927_v6 }
 0x8d8   :  { %15421 = vmatpush3.bf16.msra.mxu1 %v19956_v63  ;;  %13629 = vmatprep.mubr.msk.f32.mxu1 %vm7429_vm3, %v11930_v52 }
 0x8d9   :  { %15423 = vmatprep.subr.bf16.mxu1 %v19969_v33 }
 0x8db   :  { %13630 = vmatmul.mubr.msk.f32.gmra.mrb[220].mxu1 %vm7429_vm3, %v11931_v48  ;;  %v11918_v48 = vunpack.c.l.bf16 %v11969_v57 }
 0x8dc   :  { %15425 = vmatpush3.bf16.msra.mxu1 %v19969_v33  ;;  %13682 = vmatprep.mubr.msk.f32.mxu1 %vm7429_vm3, %v11934_v51  ;;  %v11536_v51 = vld [vmem:[%s21902_s9 + $0xc0] sm:$0xff] }
 0x8dd   :  { %15427 = vmatprep.subr.bf16.mxu1 %v19980_v1  ;;  %v15358_v0 = vpack.c.bf16 %v11537_v35, %v11536_v51  ;;  %v11581_v51 = vld [vmem:[%s21902_s9 + $0x168] sm:$0xff] }
 0x8e0   :  { %15429 = vmatpush3.bf16.msra.mxu1 %v19980_v1 }
 0x8e1   :  { %15431 = vmatprep.subr.bf16.mxu1 %v20333_v27 }
 0x8e4   :  { %15433 = vmatpush3.bf16.msra.mxu1 %v20333_v27 }
 0x8e5   :  { %15435 = vmatprep.subr.bf16.mxu1 %v20349_v29 }
 0x8e8   :  { %15437 = vmatpush3.bf16.msra.mxu1 %v20349_v29 }
 0x8e9   :  { %15439 = vmatprep.subr.bf16.mxu1 %v20358_v43 }
 0x8ec   :  { %15441 = vmatpush3.bf16.msra.mxu1 %v20358_v43 }
 0x8ed   :  { %15443 = vmatprep.subr.bf16.mxu1 %v20365_v7 }
 0x8f0   :  { %15445 = vmatpush3.bf16.msra.mxu1 %v20365_v7 }
 0x8f1   :  { %15463 = vmatprep.subr.bf16.mxu1 %v19956_v63 }
 0x8f3   :  { %13683 = vmatmul.mubr.msk.f32.vlgmr.msra.gmra.mrb[222].mxu1 %vm7429_vm3, %v11935_v20 }
 0x8f4   :  { %15465 = vmatpush3.bf16.msra.mxu1 %v19956_v63  ;;  %13685 = vmatprep.mubr.msk.f32.mxu1 %vm7429_vm3, %v11938_v47  ;;  %v11970_v47 = vld [vmem:[%s21901_s8 + $0x38] sm:$0xff]  }
 0x8f5   :  { %15467 = vmatprep.subr.bf16.mxu1 %v19969_v33 }
 0x8f7   :  { %13686 = vmatmul.mubr.msk.f32.gmra.mrb[224].mxu1 %vm7429_vm3, %v11939_v58  ;;  %v11919_v58 = vunpack.c.h.bf16 %v11969_v57 }
 0x8f8   :  { %15469 = vmatpush3.bf16.msra.mxu1 %v19969_v33  ;;  %13738 = vmatprep.mubr.msk.f32.mxu1 %vm7429_vm3, %v11942_v18  ;;  %v11922_v18 = vunpack.c.l.bf16 %v11970_v47 }
 0x8f9   :  { %15471 = vmatprep.subr.bf16.mxu1 %v19980_v1 }
 0x8fc   :  { %15473 = vmatpush3.bf16.msra.mxu1 %v19980_v1 }
 0x8fd   :  { %15475 = vmatprep.subr.bf16.mxu1 %v20333_v27 }
 0x900   :  { %15477 = vmatpush3.bf16.msra.mxu1 %v20333_v27 }
 0x901   :  { %15479 = vmatprep.subr.bf16.mxu1 %v20349_v29 }
 0x904   :  { %15481 = vmatpush3.bf16.msra.mxu1 %v20349_v29 }
 0x905   :  { %15483 = vmatprep.subr.bf16.mxu1 %v20358_v43 }
 0x908   :  { %15485 = vmatpush3.bf16.msra.mxu1 %v20358_v43 }
 0x909   :  { %15487 = vmatprep.subr.bf16.mxu1 %v20365_v7 }
 0x90c   :  { %15489 = vmatpush3.bf16.msra.mxu1 %v20365_v7 }
 0x90d   :  { %15507 = vmatprep.subr.bf16.mxu1 %v19956_v63 }
 0x90f   :  { %13739 = vmatmul.mubr.msk.f32.vlgmr.msra.gmra.mrb[226].mxu1 %vm7429_vm3, %v11943_v3 }
 0x910   :  { %15509 = vmatpush3.bf16.msra.mxu1 %v19956_v63  ;;  %13741 = vmatprep.mubr.msk.f32.mxu1 %vm7429_vm3, %v11946_v62  ;;  %v11923_v62 = vunpack.c.h.bf16 %v11970_v47  ;;  %v11582_v47 = vld [vmem:[%s21902_s9 + $0x170] sm:$0xff] }
 0x911   :  { %15511 = vmatprep.subr.bf16.mxu1 %v19969_v33 }
 0x913   :  { %13742 = vmatmul.mubr.msk.f32.gmra.mrb[228].mxu1 %vm7429_vm3, %v11947_v38  ;;  %v15366_v38 = vpack.c.bf16 %v11541_v21, %v11540_v13  ;;  %v11600_v13 = vld [vmem:[%s21902_s9 + $0x1a0] sm:$0xff]  ;;  %v11601_v21 = vld [vmem:[%s21902_s9 + $0x1a8] sm:$0xff] }
 0x914   :  { %15513 = vmatpush3.bf16.msra.mxu1 %v19969_v33  ;;  %13794 = vmatprep.mubr.msk.f32.mxu1 %vm7429_vm3, %v11950_v22  ;;  %v11542_v22 = vld [vmem:[%s21902_s9 + $0xf0] sm:$0xff] }
 0x915   :  { %15515 = vmatprep.subr.bf16.mxu1 %v19980_v1 }
 0x918   :  { %15517 = vmatpush3.bf16.msra.mxu1 %v19980_v1 }
 0x919   :  { %15519 = vmatprep.subr.bf16.mxu1 %v20333_v27 }
 0x91c   :  { %15521 = vmatpush3.bf16.msra.mxu1 %v20333_v27 }
 0x91d   :  { %15523 = vmatprep.subr.bf16.mxu1 %v20349_v29 }
 0x920   :  { %15525 = vmatpush3.bf16.msra.mxu1 %v20349_v29 }
 0x921   :  { %15527 = vmatprep.subr.bf16.mxu1 %v20358_v43 }
 0x924   :  { %15529 = vmatpush3.bf16.msra.mxu1 %v20358_v43 }
 0x925   :  { %15531 = vmatprep.subr.bf16.mxu1 %v20365_v7 }
 0x928   :  { %15533 = vmatpush3.bf16.msra.mxu1 %v20365_v7 }
 0x929   :  { %15594 = vmatprep.subr.bf16.mxu1 %v21964_v9 }
 0x92b   :  { %13795 = vmatmul.mubr.msk.f32.vlgmr.msra.gmra.mrb[230].mxu1 %vm7429_vm3, %v11951_v60  ;;  %v15370_v60 = vpack.c.bf16 %v11543_v4, %v11542_v22  ;;  %v11603_v22 = vld [vmem:[%s21902_s9 + $0x1b8] sm:$0xff] }
 0x92c   :  { %13797 = vmatprep.mubr.msk.f32.mxu1 %vm7429_vm3, %v11954_v36  ;;  %v11556_v36 = vld [vmem:[%s21902_s9 + $0x100] sm:$0xff] }
 0x92f   :  { %13798 = vmatmul.mubr.msk.f32.gmra.mrb[232].mxu1 %vm7429_vm3, %v11955_v28  ;;  %v11557_v28 = vld [vmem:[%s21902_s9 + $0x108] sm:$0xff] }
 0x930   :  { %13910 = vmatprep.mubr.msk.f32.mxu1 %vm16571_vm14, %v21992_v12  ;;  %v15402_v59 = vpack.c.bf16 %v11557_v28, %v11556_v36  ;;  %v11617_v36 = vld [vmem:[%s21902_s9 + $0x1c8] sm:$0xff] }
 0x972   :  { %v13438_v31 = vpop.f32.mrb[210].mxu1  ;;  %v13404_v40 = vpop.f32.mrb[120].mxu0 }
 0x973   :  { %v7622_v49 = vpop.f32.mrb[211].mxu1  ;;  %v7508_v37 = vpop.f32.mrb[121].mxu0 }
 0x974   :  { %13458 = vmatprep.mubr.msk.f32.mxu0 %vm4723_vm0, %v7622_v49 }
 0x975   :  { %13459 = vmatmul.mubr.msk.f32.vlgmr.msra.gmra.mrb[124].mxu0 %vm4723_vm0, %v13438_v31 }
 0x976   :  { %15273 = vmatpush3.bf16.msra.mxu0 %v20488_v56  ;;  %v13441_v23 = vpop.f32.mrb[212].mxu1  ;;  %v13407_v14 = vpop.f32.mrb[122].mxu0  ;;  %v11539_v56 = vld [vmem:[%s21902_s9 + $0xd8] sm:$0xff] }
 0x977   :  { %15275 = vmatprep.subr.bf16.mxu0 %v15274_v55  ;;  %v7632_v42 = vpop.f32.mrb[213].mxu1  ;;  %v7518_v34 = vpop.f32.mrb[123].mxu0  ;;  %v15362_v3 = vpack.c.bf16 %v11539_v56, %v11538_v45  ;;  %v11597_v45 = vld [vmem:[%s21902_s9 + $0x188] sm:$0xff] }
 0x978   :  { %13461 = vmatprep.mubr.msk.f32.mxu0 %vm4723_vm0, %v7632_v42 }
 0x979   :  { %13462 = vmatmul.mubr.msk.f32.gmra.mrb[126].mxu0 %vm4723_vm0, %v13441_v23 }
 0x97a   :  { %15277 = vmatpush3.bf16.msra.mxu0 %v15274_v55  ;;  %13480 = vmatprep.mubr.msk.f32.mxu0 %vm4723_vm0, %v7508_v37 }
 0x97b   :  { %15279 = vmatprep.subr.bf16.mxu0 %v15278_v61 }
 0x97e   :  { %15281 = vmatpush3.bf16.msra.mxu0 %v15278_v61 }
 0x97f   :  { %15283 = vmatprep.subr.bf16.mxu0 %v15282_v8 }
 0x982   :  { %15285 = vmatpush3.bf16.msra.mxu0 %v15282_v8  ;;  %v11559_v8 = vld [vmem:[%s21902_s9 + $0x118] sm:$0xff] }
 0x983   :  { %15315 = vmatprep.subr.bf16.mxu0 %v15314_v15 }
 0x985   :  { %13481 = vmatmul.mubr.msk.f32.vlgmr.msra.gmra.mrb[124].mxu0 %vm4723_vm0, %v13404_v40 }
 0x986   :  { %15317 = vmatpush3.bf16.msra.mxu0 %v15314_v15  ;;  %13483 = vmatprep.mubr.msk.f32.mxu0 %vm4723_vm0, %v7518_v34  ;;  %v15406_v15 = vpack.c.bf16 %v11559_v8, %v11558_v46  ;;  %v11641_v46 = vld [vmem:[%s21902_s9 + $0x228] sm:$0xff] }
 0x987   :  { %15319 = vmatprep.subr.bf16.mxu0 %v15318_v44 }
 0x989   :  { %13484 = vmatmul.mubr.msk.f32.gmra.mrb[126].mxu0 %vm4723_vm0, %v13407_v14 }
 0x98a   :  { %15321 = vmatpush3.bf16.msra.mxu0 %v15318_v44 }
 0x98b   :  { %15323 = vmatprep.subr.bf16.mxu0 %v15322_v39 }
 0x98e   :  { %15325 = vmatpush3.bf16.msra.mxu0 %v15322_v39  ;;  %v13516_v10 = vpop.f32.mrb[214].mxu1  ;;  %v11562_v39 = vld [vmem:[%s21902_s9 + $0x130] sm:$0xff] }
 0x98f   :  { %15327 = vmatprep.subr.bf16.mxu0 %v15326_v26  ;;  %v7931_v30 = vpop.f32.mrb[215].mxu1  ;;  %v15414_v53 = vpack.c.bf16 %v11563_v17, %v11562_v39  ;;  %v11651_v39 = vld [vmem:[%s21905_s12 + $0x88] sm:$0xff]  ;;  %v11666_v17 = vld [vmem:[%s21905_s12 + $0x100] sm:$0xff] }
 0x990   :  { %13536 = vmatprep.mubr.msk.f32.mxu0 %vm4723_vm0, %v7931_v30 }
 0x992   :  { %15329 = vmatpush3.bf16.msra.mxu0 %v15326_v26  ;;  %v13519_v6 = vpop.f32.mrb[216].mxu1  ;;  %v11576_v26 = vld [vmem:[%s21902_s9 + $0x140] sm:$0xff] }
 0x993   :  { %15331 = vmatprep.subr.bf16.mxu0 %v19956_v63  ;;  %v7941_v52 = vpop.f32.mrb[217].mxu1 }
 0x995   :  { %13537 = vmatmul.mubr.msk.f32.vlgmr.msra.gmra.mrb[124].mxu0 %vm4723_vm0, %v13516_v10  ;;  %v11577_v10 = vld [vmem:[%s21902_s9 + $0x148] sm:$0xff] }
 0x996   :  { %15333 = vmatpush3.bf16.msra.mxu0 %v19956_v63  ;;  %13539 = vmatprep.mubr.msk.f32.mxu0 %vm4723_vm0, %v7941_v52  ;;  %v15446_v30 = vpack.c.bf16 %v11577_v10, %v11576_v26  ;;  %v11579_v52 = vld [vmem:[%s21902_s9 + $0x158] sm:$0xff]  ;;  %v11667_v26 = vld [vmem:[%s21905_s12 + $0x108] sm:$0xff] }
 0x997   :  { %15335 = vmatprep.subr.bf16.mxu0 %v19969_v33  ;;  %v15643_v10 = vpack.c.bf16 %v11667_v26, %v11666_v17 }
 0x999   :  { %13540 = vmatmul.mubr.msk.f32.gmra.mrb[126].mxu0 %vm4723_vm0, %v13519_v6  ;;  %v11578_v6 = vld [vmem:[%s21902_s9 + $0x150] sm:$0xff] }
 0x99a   :  { %15337 = vmatpush3.bf16.msra.mxu0 %v19969_v33  ;;  %13570 = vmatprep.mubr.msk.f32.mxu0 %vm7429_vm3, %v11918_v48  ;;  %v15450_v57 = vpack.c.bf16 %v11579_v52, %v11578_v6  ;;  %v11580_v48 = vld [vmem:[%s21902_s9 + $0x160] sm:$0xff]  ;;  %v11653_v6 = vld [vmem:[%s21905_s12 + $0x98] sm:$0xff]  ;;  %v11668_v52 = vld [vmem:[%s21905_s12 + $0x110] sm:$0xff] }
 0x99b   :  { %15339 = vmatprep.subr.bf16.mxu0 %v19980_v1  ;;  %v15454_v35 = vpack.c.bf16 %v11581_v51, %v11580_v48  ;;  %v11669_v48 = vld [vmem:[%s21905_s12 + $0x118] sm:$0xff] }
 0x99c   :  { %v15646_v51 = vpack.c.bf16 %v11669_v48, %v11668_v52 }
 0x99e   :  { %15341 = vmatpush3.bf16.msra.mxu0 %v19980_v1 }
 0x99f   :  { %15343 = vmatprep.subr.bf16.mxu0 %v20333_v27 }
 0x9a2   :  { %15345 = vmatpush3.bf16.msra.mxu0 %v20333_v27 }
 0x9a3   :  { %15347 = vmatprep.subr.bf16.mxu0 %v20349_v29 }
 0x9a6   :  { %15349 = vmatpush3.bf16.msra.mxu0 %v20349_v29 }
 0x9a7   :  { %15351 = vmatprep.subr.bf16.mxu0 %v20358_v43 }
 0x9aa   :  { %15353 = vmatpush3.bf16.msra.mxu0 %v20358_v43  ;;  %v20618_v20 = vpop.f32.mrb[218].mxu1 }
 0x9ab   :  { %15355 = vmatprep.subr.bf16.mxu0 %v20365_v7  ;;  %v20624_v2 = vpop.f32.mrb[219].mxu1 }
 0x9ae   :  { %15357 = vmatpush3.bf16.msra.mxu0 %v20365_v7  ;;  %v13631_v32 = vpop.f32.mrb[220].mxu1 }
 0x9af   :  { %15359 = vmatprep.subr.bf16.mxu0 %v15358_v0  ;;  %v8373_v31 = vpop.f32.mrb[221].mxu1 }
 0x9b1   :  { %13571 = vmatmul.mubr.msk.f32.vlgmr.msra.gmra.mrb[128].mxu0 %vm7429_vm3, %v11919_v58  ;;  %v11598_v58 = vld [vmem:[%s21902_s9 + $0x190] sm:$0xff] }
 0x9b2   :  { %13573 = vmatprep.mubr.msk.f32.mxu0 %vm7429_vm3, %v11922_v18  ;;  %15361 = vmatpush3.bf16.msra.mxu0 %v15358_v0  ;;  %v11596_v0 = vld [vmem:[%s21902_s9 + $0x180] sm:$0xff]  ;;  %v11599_v18 = vld [vmem:[%s21902_s9 + $0x198] sm:$0xff] }
 0x9b3   :  { %15363 = vmatprep.subr.bf16.mxu0 %v15362_v3  ;;  %v15490_v56 = vpack.c.bf16 %v11597_v45, %v11596_v0  ;;  %v11671_v0 = vld [vmem:[%s21905_s12 + $0x128] sm:$0xff] }
 0x9b5   :  { %13574 = vmatmul.mubr.msk.f32.gmra.mrb[130].mxu0 %vm7429_vm3, %v11923_v62  ;;  %v15498_v62 = vpack.c.bf16 %v11601_v21, %v11600_v13  ;;  %v11673_v13 = vld [vmem:[%s21905_s12 + $0x138] sm:$0xff] }
 0x9b6   :  { %15365 = vmatpush3.bf16.msra.mxu0 %v15362_v3  ;;  %v15494_v3 = vpack.c.bf16 %v11599_v18, %v11598_v58  ;;  %v11657_v58 = vld [vmem:[%s21905_s12 + $0xb8] sm:$0xff]  ;;  %v11672_v18 = vld [vmem:[%s21905_s12 + $0x130] sm:$0xff] }
 0x9b7   :  { %15367 = vmatprep.subr.bf16.mxu0 %v15366_v38  ;;  %v15652_v21 = vpack.c.bf16 %v11673_v13, %v11672_v18 }
 0x9ba   :  { %15369 = vmatpush3.bf16.msra.mxu0 %v15366_v38  ;;  %v11602_v38 = vld [vmem:[%s21902_s9 + $0x1b0] sm:$0xff] }
 0x9bb   :  { %15371 = vmatprep.subr.bf16.mxu0 %v15370_v60  ;;  %v15502_v4 = vpack.c.bf16 %v11603_v22, %v11602_v38  ;;  %v11659_v38 = vld [vmem:[%s21905_s12 + $0xc8] sm:$0xff]  ;;  %v11674_v22 = vld [vmem:[%s21905_s12 + $0x140] sm:$0xff] }
 0x9be   :  { %15373 = vmatpush3.bf16.msra.mxu0 %v15370_v60  ;;  %v11616_v60 = vld [vmem:[%s21902_s9 + $0x1c0] sm:$0xff] }
 0x9bf   :  { %15403 = vmatprep.subr.bf16.mxu0 %v15402_v59  ;;  %v15534_v28 = vpack.c.bf16 %v11617_v36, %v11616_v60  ;;  %v11675_v60 = vld [vmem:[%s21905_s12 + $0x148] sm:$0xff] }
 0x9c0   :  { %v15655_v36 = vpack.c.bf16 %v11675_v60, %v11674_v22 }
 0x9c6   :  { %v20654_v40 = vpop.f32.mrb[222].mxu1 }
 0x9c7   :  { %v8579_v49 = vpop.f32.mrb[223].mxu1 }
 0x9ca   :  { %v20656_v55 = vpop.f32.mrb[224].mxu1 }
 0x9cb   :  { %v20658_v37 = vpop.f32.mrb[225].mxu1 }
 0x9e2   :  { %v20660_v41 = vpop.f32.mrb[226].mxu1 }
 0x9e3   :  { %v20662_v24 = vpop.f32.mrb[227].mxu1 }
 0x9e6   :  { %v20664_v23 = vpop.f32.mrb[228].mxu1 }
 0x9e7   :  { %v20666_v14 = vpop.f32.mrb[229].mxu1 }
 0x9fe   :  { %v20668_v61 = vpop.f32.mrb[230].mxu1 }
 0x9ff   :  { %v20670_v42 = vpop.f32.mrb[231].mxu1 }
 0xa02   :  { %v20672_v34 = vpop.f32.mrb[232].mxu1 }
 0xa03   :  { %v20674_v16 = vpop.f32.mrb[233].mxu1 }
 0xa84   :  { %v13572_v11 = vpop.f32.mrb[128].mxu0 }
 0xa85   :  { %v8147_v50 = vpop.f32.mrb[129].mxu0 }
 0xa86   :  { %13592 = vmatprep.mubr.msk.f32.mxu0 %vm4723_vm0, %v8147_v50  ;;  %v11643_v50 = vld [vmem:[%s21902_s9 + $0x238] sm:$0xff] }
 0xa87   :  { %13593 = vmatmul.mubr.msk.f32.vlgmr.msra.gmra.mrb[124].mxu0 %vm4723_vm0, %v13572_v11 }
 0xa88   :  { %15405 = vmatpush3.bf16.msra.mxu0 %v15402_v59  ;;  %v13575_v44 = vpop.f32.mrb[130].mxu0  ;;  %v11618_v59 = vld [vmem:[%s21902_s9 + $0x1d0] sm:$0xff] }
 0xa89   :  { %v8157_v25 = vpop.f32.mrb[131].mxu0  ;;  %15407 = vmatprep.subr.bf16.mxu0 %v15406_v15 }
 0xa8a   :  { %13595 = vmatprep.mubr.msk.f32.mxu0 %vm4723_vm0, %v8157_v25 }
 0xa8b   :  { %13596 = vmatmul.mubr.msk.f32.gmra.mrb[126].mxu0 %vm4723_vm0, %v13575_v44 }
 0xa8c   :  { %15409 = vmatpush3.bf16.msra.mxu0 %v15406_v15  ;;  %13648 = vmatprep.mubr.msk.f32.mxu0 %vm4723_vm0, %v20624_v2  ;;  %v11583_v2 = vld [vmem:[%s21902_s9 + $0x178] sm:$0xff] }
 0xa8d   :  { %15411 = vmatprep.subr.bf16.mxu0 %v15410_v5 }
 0xa90   :  { %15413 = vmatpush3.bf16.msra.mxu0 %v15410_v5  ;;  %v11650_v5 = vld [vmem:[%s21905_s12 + $0x80] sm:$0xff] }
 0xa91   :  { %15415 = vmatprep.subr.bf16.mxu0 %v15414_v53 }
 0xa94   :  { %15417 = vmatpush3.bf16.msra.mxu0 %v15414_v53  ;;  %v15595_v53 = vpack.c.bf16 %v11651_v39, %v11650_v5 }
 0xa95   :  { %15447 = vmatprep.subr.bf16.mxu0 %v15446_v30 }
 0xa96   :  { %15596 = vmatpush3.bf16.msra.mxu1 %v15595_v53 }
 0xa97   :  { %13649 = vmatmul.mubr.msk.f32.vlgmr.msra.gmra.mrb[124].mxu0 %vm4723_vm0, %v20618_v20  ;;  %v15458_v20 = vpack.c.bf16 %v11583_v2, %v11582_v47  ;;  %15597 = vmatprep.subr.bf16.mxu1 %v21964_v9  ;;  %v11655_v47 = vld [vmem:[%s21905_s12 + $0xa8] sm:$0xff]  ;;  %v11670_v2 = vld [vmem:[%s21905_s12 + $0x120] sm:$0xff] }
 0xa98   :  { %13651 = vmatprep.mubr.msk.f32.mxu0 %vm4723_vm0, %v8373_v31  ;;  %15449 = vmatpush3.bf16.msra.mxu0 %v15446_v30  ;;  %v11652_v30 = vld [vmem:[%s21905_s12 + $0x90] sm:$0xff]  ;;  %v15649_v45 = vpack.c.bf16 %v11671_v0, %v11670_v2 }
 0xa99   :  { %15451 = vmatprep.subr.bf16.mxu0 %v15450_v57 }
 0xa9b   :  { %13652 = vmatmul.mubr.msk.f32.gmra.mrb[126].mxu0 %vm4723_vm0, %v13631_v32  ;;  %v11619_v32 = vld [vmem:[%s21902_s9 + $0x1d8] sm:$0xff] }
 0xa9c   :  { %15453 = vmatpush3.bf16.msra.mxu0 %v15450_v57  ;;  %13704 = vmatprep.mubr.msk.f32.mxu0 %vm4723_vm0, %v8579_v49  ;;  %v15538_v31 = vpack.c.bf16 %v11619_v32, %v11618_v59  ;;  %v11621_v49 = vld [vmem:[%s21902_s9 + $0x1e8] sm:$0xff]  ;;  %v15598_v57 = vpack.c.bf16 %v11653_v6, %v11652_v30  ;;  %v11661_v59 = vld [vmem:[%s21905_s12 + $0xd8] sm:$0xff]  ;;  %v11676_v32 = vld [vmem:[%s21905_s12 + $0x150] sm:$0xff] }
 0xa9d   :  { %15455 = vmatprep.subr.bf16.mxu0 %v15454_v35 }
 0xa9e   :  { %15599 = vmatpush3.bf16.msra.mxu1 %v15598_v57 }
 0xa9f   :  { %15600 = vmatprep.subr.bf16.mxu1 %v21964_v9 }
 0xaa0   :  { %15457 = vmatpush3.bf16.msra.mxu0 %v15454_v35  ;;  %v11654_v35 = vld [vmem:[%s21905_s12 + $0xa0] sm:$0xff] }
 0xaa1   :  { %15459 = vmatprep.subr.bf16.mxu0 %v15458_v20 }
 0xaa4   :  { %15461 = vmatpush3.bf16.msra.mxu0 %v15458_v20  ;;  %v15601_v20 = vpack.c.bf16 %v11655_v47, %v11654_v35 }
 0xaa5   :  { %15491 = vmatprep.subr.bf16.mxu0 %v15490_v56 }
 0xaa6   :  { %15602 = vmatpush3.bf16.msra.mxu1 %v15601_v20 }
 0xaa7   :  { %13705 = vmatmul.mubr.msk.f32.vlgmr.msra.gmra.mrb[124].mxu0 %vm4723_vm0, %v20654_v40  ;;  %v11620_v40 = vld [vmem:[%s21902_s9 + $0x1e0] sm:$0xff]  ;;  %15603 = vmatprep.subr.bf16.mxu1 %v21964_v9 }
 0xaa8   :  { %13707 = vmatprep.mubr.msk.f32.mxu0 %vm4723_vm0, %v20658_v37  ;;  %15493 = vmatpush3.bf16.msra.mxu0 %v15490_v56  ;;  %v11622_v37 = vld [vmem:[%s21902_s9 + $0x1f0] sm:$0xff] }
 0xaa9   :  { %15495 = vmatprep.subr.bf16.mxu0 %v15494_v3  ;;  %v11656_v56 = vld [vmem:[%s21905_s12 + $0xb0] sm:$0xff] }
 0xaab   :  { %13708 = vmatmul.mubr.msk.f32.gmra.mrb[126].mxu0 %vm4723_vm0, %v20656_v55  ;;  %v15542_v55 = vpack.c.bf16 %v11621_v49, %v11620_v40  ;;  %v11677_v40 = vld [vmem:[%s21905_s12 + $0x158] sm:$0xff] }
 0xaac   :  { %15497 = vmatpush3.bf16.msra.mxu0 %v15494_v3  ;;  %13760 = vmatprep.mubr.msk.f32.mxu0 %vm4723_vm0, %v20662_v24  ;;  %v11623_v24 = vld [vmem:[%s21902_s9 + $0x1f8] sm:$0xff]  ;;  %v15604_v3 = vpack.c.bf16 %v11657_v58, %v11656_v56  ;;  %v15658_v49 = vpack.c.bf16 %v11677_v40, %v11676_v32  ;;  %v9486_v40 = vld [vmem:[%s21905_s12] sm:$0xff] }
 0xaad   :  { %15499 = vmatprep.subr.bf16.mxu0 %v15498_v62 }
 0xaae   :  { %15605 = vmatpush3.bf16.msra.mxu1 %v15604_v3 }
 0xaaf   :  { %15606 = vmatprep.subr.bf16.mxu1 %v21964_v9 }
 0xab0   :  { %15501 = vmatpush3.bf16.msra.mxu0 %v15498_v62  ;;  %v11658_v62 = vld [vmem:[%s21905_s12 + $0xc0] sm:$0xff] }
 0xab1   :  { %15503 = vmatprep.subr.bf16.mxu0 %v15502_v4 }
 0xab4   :  { %15505 = vmatpush3.bf16.msra.mxu0 %v15502_v4  ;;  %v15607_v4 = vpack.c.bf16 %v11659_v38, %v11658_v62 }
 0xab5   :  { %15535 = vmatprep.subr.bf16.mxu0 %v15534_v28 }
 0xab6   :  { %15608 = vmatpush3.bf16.msra.mxu1 %v15607_v4 }
 0xab7   :  { %13761 = vmatmul.mubr.msk.f32.vlgmr.msra.gmra.mrb[124].mxu0 %vm4723_vm0, %v20660_v41  ;;  %v15546_v41 = vpack.c.bf16 %v11623_v24, %v11622_v37  ;;  %15609 = vmatprep.subr.bf16.mxu1 %v21964_v9  ;;  %v11663_v37 = vld [vmem:[%s21905_s12 + $0xe8] sm:$0xff]  ;;  %v11678_v24 = vld [vmem:[%s21905_s12 + $0x160] sm:$0xff] }
 0xab8   :  { %15537 = vmatpush3.bf16.msra.mxu0 %v15534_v28  ;;  %13763 = vmatprep.mubr.msk.f32.mxu0 %vm4723_vm0, %v20666_v14  ;;  %v11979_v14 = vld [vmem:[%s21901_s8 + $0x80] sm:$0xff]   ;;  %v11660_v28 = vld [vmem:[%s21905_s12 + $0xd0] sm:$0xff] }
 0xab9   :  { %15539 = vmatprep.subr.bf16.mxu0 %v15538_v31 }
 0xabb   :  { %13764 = vmatmul.mubr.msk.f32.gmra.mrb[126].mxu0 %vm4723_vm0, %v20664_v23  ;;  %v11958_v23 = vunpack.c.l.bf16 %v11979_v14 }
 0xabc   :  { %15541 = vmatpush3.bf16.msra.mxu0 %v15538_v31  ;;  %13816 = vmatprep.mubr.msk.f32.mxu0 %vm4723_vm0, %v20670_v42  ;;  %v11959_v42 = vunpack.c.h.bf16 %v11979_v14  ;;  %v15610_v31 = vpack.c.bf16 %v11661_v59, %v11660_v28  ;;  %v11679_v14 = vld [vmem:[%s21905_s12 + $0x168] sm:$0xff] }
 0xabd   :  { %15543 = vmatprep.subr.bf16.mxu0 %v15542_v55 }
 0xabe   :  { %15611 = vmatpush3.bf16.msra.mxu1 %v15610_v31 }
 0xabf   :  { %15612 = vmatprep.subr.bf16.mxu1 %v21964_v9 }
 0xac0   :  { %15545 = vmatpush3.bf16.msra.mxu0 %v15542_v55  ;;  %v11662_v55 = vld [vmem:[%s21905_s12 + $0xe0] sm:$0xff] }
 0xac1   :  { %15547 = vmatprep.subr.bf16.mxu0 %v15546_v41 }
 0xac4   :  { %15549 = vmatpush3.bf16.msra.mxu0 %v15546_v41  ;;  %v15613_v41 = vpack.c.bf16 %v11663_v37, %v11662_v55  ;;  %v9487_v37 = vld [vmem:[%s21905_s12 + $0x8] sm:$0xff] }
 0xac5   :  { %15551 = vmatprep.subr.bf16.mxu0 %v19956_v63 }
 0xac6   :  { %15614 = vmatpush3.bf16.msra.mxu1 %v15613_v41  ;;  %v11699_v41 = vld [vmem:[%s21905_s12 + $0x208] sm:$0xff] }
 0xac7   :  { %13817 = vmatmul.mubr.msk.f32.vlgmr.msra.gmra.mrb[124].mxu0 %vm4723_vm0, %v20668_v61  ;;  %v11639_v61 = vld [vmem:[%s21902_s9 + $0x218] sm:$0xff]  ;;  %15615 = vmatprep.subr.bf16.mxu1 %v21964_v9 }
 0xac8   :  { %15553 = vmatpush3.bf16.msra.mxu0 %v19956_v63  ;;  %13819 = vmatprep.mubr.msk.f32.mxu0 %vm4723_vm0, %v20674_v16  ;;  %v11636_v63 = vld [vmem:[%s21902_s9 + $0x200] sm:$0xff] }
 0xac9   :  { %15555 = vmatprep.subr.bf16.mxu0 %v19969_v33  ;;  %v11640_v16 = vld [vmem:[%s21902_s9 + $0x220] sm:$0xff] }
 0xaca   :  { %v15586_v11 = vpack.c.bf16 %v11641_v46, %v11640_v16 }
 0xacb   :  { %13820 = vmatmul.mubr.msk.f32.gmra.mrb[126].mxu0 %vm4723_vm0, %v20672_v34 }
 0xacc   :  { %15557 = vmatpush3.bf16.msra.mxu0 %v19969_v33  ;;  %13850 = vmatprep.mubr.msk.f32.mxu0 %vm7429_vm3, %v11958_v23  ;;  %v11637_v33 = vld [vmem:[%s21902_s9 + $0x208] sm:$0xff]  ;;  %v15661_v23 = vpack.c.bf16 %v11679_v14, %v11678_v24  ;;  %v11698_v24 = vld [vmem:[%s21905_s12 + $0x200] sm:$0xff] }
 0xacd   :  { %15559 = vmatprep.subr.bf16.mxu0 %v19980_v1 }
 0xad0   :  { %15561 = vmatpush3.bf16.msra.mxu0 %v19980_v1  ;;  %v11980_v1 = vld [vmem:[%s21901_s8 + $0x88] sm:$0xff]   ;;  %s16572_s8 = smov 2  }
 0xad1   :  { %15563 = vmatprep.subr.bf16.mxu0 %v20333_v27  ;;  %v11962_v34 = vunpack.c.l.bf16 %v11980_v1  ;;  %v11963_v8 = vunpack.c.h.bf16 %v11980_v1  ;;  %v11680_v1 = vld [vmem:[%s21905_s12 + $0x170] sm:$0xff] }
 0xad4   :  { %15565 = vmatpush3.bf16.msra.mxu0 %v20333_v27  ;;  %v15578_v27 = vpack.c.bf16 %v11637_v33, %v11636_v63  ;;  %v11664_v63 = vld [vmem:[%s21905_s12 + $0xf0] sm:$0xff]  ;;  %v11665_v33 = vld [vmem:[%s21905_s12 + $0xf8] sm:$0xff] }
 0xad5   :  { %15567 = vmatprep.subr.bf16.mxu0 %v20349_v29 }
 0xad8   :  { %15569 = vmatpush3.bf16.msra.mxu0 %v20349_v29  ;;  %v11638_v29 = vld [vmem:[%s21902_s9 + $0x210] sm:$0xff] }
 0xad9   :  { %15571 = vmatprep.subr.bf16.mxu0 %v20358_v43 }
 0xadc   :  { %15573 = vmatpush3.bf16.msra.mxu0 %v20358_v43  ;;  %v15582_v43 = vpack.c.bf16 %v11639_v61, %v11638_v29  ;;  %v11681_v29 = vld [vmem:[%s21905_s12 + $0x178] sm:$0xff] }
 0xadd   :  { %15575 = vmatprep.subr.bf16.mxu0 %v20365_v7  ;;  %v15664_v61 = vpack.c.bf16 %v11681_v29, %v11680_v1  ;;  %v15691_v1 = vpack.c.bf16 %v11699_v41, %v11698_v24  ;;  %v11712_v24 = vld [vmem:[%s21905_s12 + $0x270] sm:$0xff]  ;;  %v11713_v41 = vld [vmem:[%s21905_s12 + $0x278] sm:$0xff] }
 0xae0   :  { %15577 = vmatpush3.bf16.msra.mxu0 %v20365_v7  ;;  %v11642_v7 = vld [vmem:[%s21902_s9 + $0x230] sm:$0xff] }
 0xae1   :  { %15579 = vmatprep.subr.bf16.mxu0 %v15578_v27  ;;  %v15590_v15 = vpack.c.bf16 %v11643_v50, %v11642_v7 }
 0xae3   :  { %13851 = vmatmul.mubr.msk.f32.vlgmr.msra.gmra.mrb[132].mxu0 %vm7429_vm3, %v11959_v42  ;;  %v11648_v42 = vld [vmem:[%s21903_s10] ss:$0 sm:$0xff] }
 0xae4   :  { %13853 = vmatprep.mubr.msk.f32.mxu0 %vm7429_vm3, %v11962_v34  ;;  %15581 = vmatpush3.bf16.msra.mxu0 %v15578_v27  ;;  %v15616_v27 = vpack.c.bf16 %v11665_v33, %v11664_v63  ;;  %v15619_v33 = vpack.c.bf16 %v9487_v37, %v9486_v40  ;;  %v9501_v37 = vld [vmem:[%s21905_s12 + $0x78] sm:$0xff] }
 0xae5   :  { %15583 = vmatprep.subr.bf16.mxu0 %v15582_v43 }
 0xae6   :  { %15617 = vmatpush3.bf16.msra.mxu1 %v15616_v27  ;;  %v9488_v27 = vld [vmem:[%s21905_s12 + $0x10] sm:$0xff] }
 0xae7   :  { %13854 = vmatmul.mubr.msk.f32.gmra.mrb[134].mxu0 %vm7429_vm3, %v11963_v8  ;;  %15618 = vmatprep.subr.bf16.mxu1 %v21964_v9 }
 0xae8   :  { %15585 = vmatpush3.bf16.msra.mxu0 %v15582_v43  ;;  %v11649_v43 = vld [vmem:[%s21904_s11] ss:$0 sm:$0xff] }
 0xae9   :  { %15587 = vmatprep.subr.bf16.mxu0 %v15586_v11 }
 0xaec   :  { %15589 = vmatpush3.bf16.msra.mxu0 %v15586_v11 }
 0xaed   :  { %15591 = vmatprep.subr.bf16.mxu0 %v15590_v15 }
 0xaf0   :  { %15593 = vmatpush3.bf16.msra.mxu0 %v15590_v15 }
 0xaf1   :  { %15642 = vmatprep.subr.bf16.mxu0 %v21964_v9 }
 0xbb6   :  { %v13852_v54 = vpop.f32.mrb[132].mxu0 }
 0xbb7   :  { %v9227_v19 = vpop.f32.mrb[133].mxu0 }
 0xbb8   :  { %13872 = vmatprep.mubr.msk.f32.mxu0 %vm4723_vm0, %v9227_v19 }
 0xbb9   :  { %13873 = vmatmul.mubr.msk.f32.vlgmr.msra.gmra.mrb[124].mxu0 %vm4723_vm0, %v13852_v54 }
 0xbba   :  { %v13855_v44 = vpop.f32.mrb[134].mxu0  ;;  %15644 = vmatpush3.bf16.msra.mxu0 %v15643_v10 }
 0xbbb   :  { %v9237_v25 = vpop.f32.mrb[135].mxu0  ;;  %15645 = vmatprep.subr.bf16.mxu0 %v21964_v9 }
 0xbbc   :  { %13875 = vmatprep.mubr.msk.f32.mxu0 %vm4723_vm0, %v9237_v25 }
 0xbbd   :  { %13876 = vmatmul.mubr.msk.f32.gmra.mrb[126].mxu0 %vm4723_vm0, %v13855_v44 }
 0xbbe   :  { %13980 = vmatprep.mubr.msk.f32.mxu0 %vm16571_vm14, %v21992_v12  ;;  %15647 = vmatpush3.bf16.msra.mxu0 %v15646_v51 }
 0xbbf   :  { %15648 = vmatprep.subr.bf16.mxu0 %v21964_v9 }
 0xbc2   :  { %15650 = vmatpush3.bf16.msra.mxu0 %v15649_v45 }
 0xbc3   :  { %15651 = vmatprep.subr.bf16.mxu0 %v21964_v9 }
 0xbc6   :  { %15653 = vmatpush3.bf16.msra.mxu0 %v15652_v21 }
 0xbc7   :  { %15654 = vmatprep.subr.bf16.mxu0 %v21964_v9 }
 0xbca   :  { %15656 = vmatpush3.bf16.msra.mxu0 %v15655_v36 }
 0xbcb   :  { %15657 = vmatprep.subr.bf16.mxu0 %v21964_v9 }
 0xbce   :  { %15659 = vmatpush3.bf16.msra.mxu0 %v15658_v49 }
 0xbcf   :  { %15660 = vmatprep.subr.bf16.mxu0 %v21964_v9 }
 0xbd2   :  { %15662 = vmatpush3.bf16.msra.mxu0 %v15661_v23 }
 0xbd3   :  { %15663 = vmatprep.subr.bf16.mxu0 %v21964_v9 }
 0xbd6   :  { %15665 = vmatpush3.bf16.msra.mxu0 %v15664_v61 }
 0xbd7   :  { %15690 = vmatprep.subr.bf16.mxu0 %v21964_v9 }
 0xc8c   :  { %v13874_v34 = vpop.f32.mrb[124].mxu0 }
 0xc8d   :  { %v9364_v16 = vmul.f32 %v13874_v34, %v11648_v42  ;;  %v9333_v46 = vpop.f32.mrb[125].mxu0  ;;  %v11700_v34 = vld [vmem:[%s21905_s12 + $0x210] sm:$0xff] }
 0xc8e   :  { %v9363_v8 = vmul.f32 %v11648_v42, %v9333_v46 }
 0xc8f   :  { %v20972_v11 = vadd.f32 %v11649_v43, %v9364_v16 }
 0xc90   :  { %v9374_v7 = vadd.f32 %v11649_v43, %v9363_v8  ;;  %v13877_v50 = vpop.f32.mrb[126].mxu0 }
 0xc91   :  { %v20975_v15 = vmul.f32 0.70710677, %v20972_v11  ;;  %v9366_v54 = vmul.f32 %v13877_v50, %v11648_v42  ;;  %v9343_v19 = vpop.f32.mrb[127].mxu0  ;;  %v9491_v50 = vld [vmem:[%s21905_s12 + $0x28] sm:$0xff] }
 0xc92   :  { %v9382_v44 = vmul.f32 0.70710677, %v9374_v7  ;;  %v9365_v25 = vmul.f32 %v11648_v42, %v9343_v19  ;;  %v9378_v49 = vmul.f32 0.5, %v9374_v7  ;;  %v9489_v42 = vld [vmem:[%s21905_s12 + $0x18] sm:$0xff]  ;;  %v9490_v7 = vld [vmem:[%s21905_s12 + $0x20] sm:$0xff]  ;;  %v11703_v19 = vld [vmem:[%s21905_s12 + $0x228] sm:$0xff] }
 0xc93   :  { %v9387_v5 = vand.u32 2147483647, %v20975_v15  ;;  %v20978_v39 = vadd.f32 %v11649_v43, %v9366_v54  ;;  %v15622_v46 = vpack.c.bf16 %v9489_v42, %v9488_v27  ;;  %v11702_v54 = vld [vmem:[%s21905_s12 + $0x220] sm:$0xff]  ;;  %vm9467_vm10 = vcmp.lt.f32.partialorder %v20975_v15, 0.0  ;;  %v11683_v27 = vld [vmem:[%s21905_s12 + $0x188] sm:$0xff] }
 0xc94   :  { %v9386_v17 = vand.u32 2147483647, %v9382_v44  ;;  %v20980_v53 = vadd.f32 %v11649_v43, %v9365_v25  ;;  %vm9466_vm0 = vcmp.lt.f32.partialorder %v9382_v44, 0.0  ;;  %v11701_v43 = vld [vmem:[%s21905_s12 + $0x218] sm:$0xff]  ;;  %v15625_v25 = vpack.c.bf16 %v9491_v50, %v9490_v7 }
 0xc95   :  { %v9391_v26 = vmul.f32 0.3275911, %v9387_v5  ;;  %v9443_v60 = vmul.f32 %v9387_v5, %v9387_v5  ;;  %v15694_v8 = vpack.c.bf16 %v11701_v43, %v11700_v34  ;;  %v15697_v5 = vpack.c.bf16 %v11703_v19, %v11702_v54  ;;  %v11733_v7 = vld [vmem:[%s21905_s12 + $0x318] sm:$0xff]  ;;  %v11686_v19 = vld [vmem:[%s21905_s12 + $0x1a0] sm:$0xff] }
 0xc96   :  { %v9390_v10 = vmul.f32 0.3275911, %v9386_v17  ;;  %v9442_v52 = vmul.f32 %v9386_v17, %v9386_v17  ;;  %v9492_v17 = vld [vmem:[%s21905_s12 + $0x30] sm:$0xff]  ;;  %v9379_v42 = vmul.f32 0.5, %v20972_v11 }
 0xc97   :  { %v9395_v6 = vadd.f32 1.0, %v9391_v26  ;;  %v9447_v32 = vsub.f32 0.0, %v9443_v60  ;;  %v9493_v26 = vld [vmem:[%s21905_s12 + $0x38] sm:$0xff]  ;;  %v11732_v11 = vld [vmem:[%s21905_s12 + $0x310] sm:$0xff] }
 0xc98   :  { %v9394_v30 = vadd.f32 1.0, %v9390_v10  ;;  %v9446_v48 = vsub.f32 0.0, %v9442_v52  ;;  %v11704_v10 = vld [vmem:[%s21905_s12 + $0x230] sm:$0xff]  ;;  %v15628_v52 = vpack.c.bf16 %v9493_v26, %v9492_v17  ;;  %v15742_v54 = vpack.c.bf16 %v11733_v7, %v11732_v11 }
 0xc99   :  { %v9452_v23 = vmul.f32 1.442695, %v9447_v32 }
 0xc9a   :  { %16497 = vrcp.f32 %v9394_v30  ;;  %v9450_v2 = vmul.f32 1.442695, %v9446_v48  ;;  %v11705_v30 = vld [vmem:[%s21905_s12 + $0x238] sm:$0xff]  ;;  %v9494_v48 = vld [vmem:[%s21905_s12 + $0x40] sm:$0xff] }
 0xc9b   :  { %16499 = vrcp.f32 %v9395_v6 }
 0xc9c   :  { %16501 = vpow2.f32 %v9450_v2  ;;  %v11706_v2 = vld [vmem:[%s21905_s12 + $0x240] sm:$0xff] }
 0xc9d   :  { %16503 = vpow2.f32 %v9452_v23  ;;  %v15712_v23 = vpack.c.bf16 %v11713_v41, %v11712_v24  ;;  %v11697_v24 = vld [vmem:[%s21905_s12 + $0x1f8] sm:$0xff] }
 0xc9e   :  { %v11745_v41 = vld [vmem:[%s21905_s12 + $0x378] sm:$0xff] }
 0xca4   :  { %v16498_v57 = vpop.eup %16497 }
 0xca5   :  { %v9406_v51 = vmul.f32 1.0614054, %v16498_v57  ;;  %v20982_v47 = vpop.eup %16499 }
 0xca6   :  { %v9407_v0 = vmul.f32 1.0614054, %v20982_v47  ;;  %v16502_v38 = vpop.eup %16501 }
 0xca7   :  { %v9410_v35 = vadd.f32 -1.4531521, %v9406_v51  ;;  %v16504_v51 = vpop.eup %16503 }
 0xca8   :  { %v9411_v58 = vadd.f32 -1.4531521, %v9407_v0 }
 0xca9   :  { %v9414_v20 = vmul.f32 %v16498_v57, %v9410_v35  ;;  %v21053_v35 = vmul.f32 0.70710677, %v20980_v53 }
 0xcaa   :  { %v9415_v13 = vmul.f32 %v20982_v47, %v9411_v58  ;;  %v9496_v58 = vld [vmem:[%s21905_s12 + $0x50] sm:$0xff] }
 0xcab   :  { %v9418_v45 = vadd.f32 1.4214138, %v9414_v20  ;;  %v11707_v20 = vld [vmem:[%s21905_s12 + $0x248] sm:$0xff]  ;;  %vm9468_vm11 = vcmp.lt.f32.partialorder %v21053_v35, 0.0 }
 0xcac   :  { %v9419_v22 = vadd.f32 1.4214138, %v9415_v13  ;;  %v11708_v13 = vld [vmem:[%s21905_s12 + $0x250] sm:$0xff] }
 0xcad   :  { %v9422_v56 = vmul.f32 %v16498_v57, %v9418_v45 }
 0xcae   :  { %v9423_v28 = vmul.f32 %v20982_v47, %v9419_v22 }
 0xcaf   :  { %v9426_v18 = vadd.f32 -0.28449672, %v9422_v56  ;;  %v15703_v56 = vpack.c.bf16 %v11707_v20, %v11706_v2  ;;  %v11690_v2 = vld [vmem:[%s21905_s12 + $0x1c0] sm:$0xff]  ;;  %v11691_v20 = vld [vmem:[%s21905_s12 + $0x1c8] sm:$0xff] }
 0xcb0   :  { %v9427_v14 = vadd.f32 -0.28449672, %v9423_v28  ;;  %v11710_v28 = vld [vmem:[%s21905_s12 + $0x260] sm:$0xff] }
 0xcb1   :  { %v9430_v3 = vmul.f32 %v16498_v57, %v9426_v18  ;;  %v21070_v18 = vand.u32 2147483647, %v21053_v35 }
 0xcb2   :  { %v9431_v16 = vmul.f32 %v20982_v47, %v9427_v14 }
 0xcb3   :  { %v9434_v21 = vadd.f32 0.2548296, %v9430_v3  ;;  %v9497_v3 = vld [vmem:[%s21905_s12 + $0x58] sm:$0xff]  ;;  %v9392_v60 = vmul.f32 0.3275911, %v21070_v18 }
 0xcb4   :  { %v9435_v44 = vadd.f32 0.2548296, %v9431_v16  ;;  %v11684_v16 = vld [vmem:[%s21905_s12 + $0x190] sm:$0xff] }
 0xcb5   :  { %v9438_v62 = vmul.f32 %v16498_v57, %v9434_v21  ;;  %v15700_v57 = vpack.c.bf16 %v11705_v30, %v11704_v10  ;;  %v11709_v21 = vld [vmem:[%s21905_s12 + $0x258] sm:$0xff]  ;;  %v11688_v30 = vld [vmem:[%s21905_s12 + $0x1b0] sm:$0xff] }
 0xcb6   :  { %v9439_v6 = vmul.f32 %v20982_v47, %v9435_v44  ;;  %v9495_v47 = vld [vmem:[%s21905_s12 + $0x48] sm:$0xff]  ;;  %v15706_v22 = vpack.c.bf16 %v11709_v21, %v11708_v13  ;;  %v11692_v13 = vld [vmem:[%s21905_s12 + $0x1d0] sm:$0xff]  ;;  %v11693_v21 = vld [vmem:[%s21905_s12 + $0x1d8] sm:$0xff] }
 0xcb7   :  { %v9458_v4 = vmul.f32 %v16502_v38, %v9438_v62  ;;  %v15631_v45 = vpack.c.bf16 %v9495_v47, %v9494_v48  ;;  %v15634_v38 = vpack.c.bf16 %v9497_v3, %v9496_v58  ;;  %v11687_v44 = vld [vmem:[%s21905_s12 + $0x1a8] sm:$0xff]  ;;  %v15679_v58 = vpack.c.bf16 %v11691_v20, %v11690_v2  ;;  %v11769_v2 = vld [vmem:[%s21905_s12 + $0x438] sm:$0xff] }
 0xcb8   :  { %v9459_v0 = vmul.f32 %v16504_v51, %v9439_v6  ;;  %v15673_v26 = vpack.c.bf16 %v11687_v44, %v11686_v19  ;;  %v11689_v6 = vld [vmem:[%s21905_s12 + $0x1b8] sm:$0xff] }
 0xcb9   :  { %v9462_v36 = vsub.f32 1.0, %v9458_v4  ;;  %v9498_v4 = vld [vmem:[%s21905_s12 + $0x60] sm:$0xff]  ;;  %v15676_v51 = vpack.c.bf16 %v11689_v6, %v11688_v30  ;;  %v11765_v19 = vld [vmem:[%s21905_s12 + $0x418] sm:$0xff]  ;;  %v11767_v30 = vld [vmem:[%s21905_s12 + $0x428] sm:$0xff] }
 0xcba   :  { %v9463_v62 = vsub.f32 1.0, %v9459_v0  ;;  %v11738_v0 = vld [vmem:[%s21905_s12 + $0x340] sm:$0xff] }
 0xcbb   :  { %v9470_v59 = vsub.f32 0.0, %v9462_v36 }
 0xcbc   :  { %v9471_v32 = vsub.f32 0.0, %v9463_v62 }
 0xcbd   :  { %v9474_v31 = vsel %vm9466_vm0, %v9470_v59, %v9462_v36  ;;  %v9499_v36 = vld [vmem:[%s21905_s12 + $0x68] sm:$0xff] }
 0xcbe   :  { %v9478_v55 = vadd.f32 1.0, %v9474_v31  ;;  %v11711_v59 = vld [vmem:[%s21905_s12 + $0x268] sm:$0xff]  ;;  %v15637_v31 = vpack.c.bf16 %v9499_v36, %v9498_v4  ;;  %v9475_v14 = vsel %vm9467_vm10, %v9471_v32, %v9463_v62  ;;  %v11740_v62 = vld [vmem:[%s21905_s12 + $0x350] sm:$0xff]  ;;  %v15682_v4 = vpack.c.bf16 %v11693_v21, %v11692_v13  ;;  %v11694_v36 = vld [vmem:[%s21905_s12 + $0x1e0] sm:$0xff] }
 0xcbf   :  { %v15709_v40 = vpack.c.bf16 %v11711_v59, %v11710_v28  ;;  %v11695_v28 = vld [vmem:[%s21905_s12 + $0x1e8] sm:$0xff]  ;;  %v11742_v59 = vld [vmem:[%s21905_s12 + $0x360] sm:$0xff] }
 0xcc0   :  { %v20999_v63 = vmul.f32 %v9478_v55, %v9378_v49  ;;  %v9500_v49 = vld [vmem:[%s21905_s12 + $0x70] sm:$0xff]  ;;  %v9396_v55 = vadd.f32 1.0, %v9392_v60  ;;  %v11743_v32 = vld [vmem:[%s21905_s12 + $0x368] sm:$0xff]  ;;  %v11770_v13 = vld [vmem:[%s21905_s12 + $0x440] sm:$0xff] }
 0xcc1   :  { %v15640_v15 = vpack.c.bf16 %v9501_v37, %v9500_v49  ;;  %v15685_v49 = vpack.c.bf16 %v11695_v28, %v11694_v36  ;;  %v11696_v37 = vld [vmem:[%s21905_s12 + $0x1f0] sm:$0xff]  ;;  %v11771_v21 = vld [vmem:[%s21905_s12 + $0x448] sm:$0xff]  ;;  %v11725_v36 = vld [vmem:[%s21905_s12 + $0x2d8] sm:$0xff] }
 0xcc2   :  { %v9520_v29 = vrot.slane %v20999_v63, 2  ;;  %v9679_v61 = vrot.slane %v20999_v63, 4  ;;  %16505 = vrcp.f32 %v9396_v55  ;;  %v15757_v55 = vpack.c.bf16 %v11743_v32, %v11742_v59  ;;  %v11772_v28 = vld [vmem:[%s21905_s12 + $0x450] sm:$0xff]  ;;  %v11773_v59 = vld [vmem:[%s21905_s12 + $0x458] sm:$0xff] }
 0xcc3   :  { %v9769_v11 = vrot.slane %v20999_v63, 6 }
 0xcc4   :  { %13911 = vmatmul.mubr.f32.vlgmr.msra.gmra.mrb[234].mxu1 %v9520_v29  ;;  %13981 = vmatmul.mubr.f32.vlgmr.msra.gmra.mrb[136].mxu0 %v9679_v61  ;;  %v11730_v29 = vld [vmem:[%s21905_s12 + $0x300] sm:$0xff]  ;;  %v11731_v61 = vld [vmem:[%s21905_s12 + $0x308] sm:$0xff] }
 0xcc5   :  { %15620 = vmatpush3.bf16.msra.mxu1 %v15619_v33  ;;  %15692 = vmatpush3.bf16.msra.mxu0 %v15691_v1  ;;  %v11682_v33 = vld [vmem:[%s21905_s12 + $0x180] sm:$0xff]  ;;  %v9479_v1 = vadd.f32 1.0, %v9475_v14  ;;  %v15739_v43 = vpack.c.bf16 %v11731_v61, %v11730_v29  ;;  %v11763_v61 = vld [vmem:[%s21905_s12 + $0x408] sm:$0xff] }
 0xcc6   :  { %15621 = vmatprep.subr.bf16.mxu1 %v21964_v9  ;;  %15693 = vmatprep.subr.bf16.mxu0 %v21964_v9  ;;  %v15667_v34 = vpack.c.bf16 %v11683_v27, %v11682_v33  ;;  %v11715_v27 = vld [vmem:[%s21905_s12 + $0x288] sm:$0xff]  ;;  %v11762_v29 = vld [vmem:[%s21905_s12 + $0x400] sm:$0xff] }
 0xcc7   :  { %13945 = vmatprep.mubr.msk.f32.mxu1 %vm16571_vm14, %v21992_v12  ;;  %14050 = vmatprep.mubr.msk.f32.mxu0 %vm16571_vm14, %v21992_v12 }
 0xcc9   :  { %15623 = vmatpush3.bf16.msra.mxu1 %v15622_v46  ;;  %15695 = vmatpush3.bf16.msra.mxu0 %v15694_v8  ;;  %v21131_v46 = vmul.f32 %v9479_v1, %v9379_v42  ;;  %v11685_v8 = vld [vmem:[%s21905_s12 + $0x198] sm:$0xff]  ;;  %v11714_v1 = vld [vmem:[%s21905_s12 + $0x280] sm:$0xff] }
 0xcca   :  { %15624 = vmatprep.subr.bf16.mxu1 %v21964_v9  ;;  %15696 = vmatprep.subr.bf16.mxu0 %v21964_v9  ;;  %v15670_v50 = vpack.c.bf16 %v11685_v8, %v11684_v16  ;;  %v15787_v16 = vpack.c.bf16 %v11763_v61, %v11762_v29  ;;  %v11716_v8 = vld [vmem:[%s21905_s12 + $0x290] sm:$0xff]  ;;  %v11777_v29 = vld [vmem:[%s21905_s12 + $0x478] sm:$0xff] }
 0xccb   :  { %v10038_v7 = vrot.slane %v21131_v46, 4 }
 0xccc   :  { %v21164_v17 = vpop.eup %16505 }
 0xccd   :  { %15626 = vmatpush3.bf16.msra.mxu1 %v15625_v25  ;;  %15698 = vmatpush3.bf16.msra.mxu0 %v15697_v5  ;;  %v11734_v25 = vld [vmem:[%s21905_s12 + $0x320] sm:$0xff]  ;;  %v11735_v5 = vld [vmem:[%s21905_s12 + $0x328] sm:$0xff]  ;;  %v9408_v48 = vmul.f32 1.0614054, %v21164_v17 }
 0xcce   :  { %15627 = vmatprep.subr.bf16.mxu1 %v21964_v9  ;;  %15699 = vmatprep.subr.bf16.mxu0 %v21964_v9  ;;  %v15745_v10 = vpack.c.bf16 %v11735_v5, %v11734_v25  ;;  %v11718_v5 = vld [vmem:[%s21905_s12 + $0x2a0] sm:$0xff] }
 0xcd1   :  { %15629 = vmatpush3.bf16.msra.mxu1 %v15628_v52  ;;  %15701 = vmatpush3.bf16.msra.mxu0 %v15700_v57  ;;  %v11736_v52 = vld [vmem:[%s21905_s12 + $0x330] sm:$0xff]  ;;  %v11737_v57 = vld [vmem:[%s21905_s12 + $0x338] sm:$0xff] }
 0xcd2   :  { %15630 = vmatprep.subr.bf16.mxu1 %v21964_v9  ;;  %15702 = vmatprep.subr.bf16.mxu0 %v21964_v9  ;;  %v15748_v47 = vpack.c.bf16 %v11737_v57, %v11736_v52 }
 0xcd5   :  { %15632 = vmatpush3.bf16.msra.mxu1 %v15631_v45  ;;  %15704 = vmatpush3.bf16.msra.mxu0 %v15703_v56  ;;  %v11739_v45 = vld [vmem:[%s21905_s12 + $0x348] sm:$0xff]  ;;  %v9412_v56 = vadd.f32 -1.4531521, %v9408_v48  ;;  %v11720_v48 = vld [vmem:[%s21905_s12 + $0x2b0] sm:$0xff] }
 0xcd6   :  { %15633 = vmatprep.subr.bf16.mxu1 %v21964_v9  ;;  %15705 = vmatprep.subr.bf16.mxu0 %v21964_v9  ;;  %v15751_v3 = vpack.c.bf16 %v11739_v45, %v11738_v0 }
 0xcd9   :  { %15635 = vmatpush3.bf16.msra.mxu1 %v15634_v38  ;;  %15707 = vmatpush3.bf16.msra.mxu0 %v15706_v22  ;;  %v11741_v38 = vld [vmem:[%s21905_s12 + $0x358] sm:$0xff]  ;;  %v9416_v22 = vmul.f32 %v21164_v17, %v9412_v56  ;;  %v11722_v56 = vld [vmem:[%s21905_s12 + $0x2c0] sm:$0xff] }
 0xcda   :  { %15636 = vmatprep.subr.bf16.mxu1 %v21964_v9  ;;  %15708 = vmatprep.subr.bf16.mxu0 %v21964_v9  ;;  %v15754_v60 = vpack.c.bf16 %v11741_v38, %v11740_v62 }
 0xcdd   :  { %15638 = vmatpush3.bf16.msra.mxu1 %v15637_v31  ;;  %15710 = vmatpush3.bf16.msra.mxu0 %v15709_v40  ;;  %v9420_v31 = vadd.f32 1.4214138, %v9416_v22  ;;  %v9444_v40 = vmul.f32 %v21070_v18, %v21070_v18  ;;  %v11744_v18 = vld [vmem:[%s21905_s12 + $0x370] sm:$0xff]  ;;  %v15799_v22 = vpack.c.bf16 %v11771_v21, %v11770_v13  ;;  %v11754_v13 = vld [vmem:[%s21905_s12 + $0x3c0] sm:$0xff]  ;;  %v11755_v21 = vld [vmem:[%s21905_s12 + $0x3c8] sm:$0xff] }
 0xcde   :  { %15639 = vmatprep.subr.bf16.mxu1 %v21964_v9  ;;  %15711 = vmatprep.subr.bf16.mxu0 %v21964_v9  ;;  %v15760_v33 = vpack.c.bf16 %v11745_v41, %v11744_v18  ;;  %v11775_v18 = vld [vmem:[%s21905_s12 + $0x468] sm:$0xff] }
 0xcdf   :  { %v9424_v14 = vmul.f32 %v21164_v17, %v9420_v31 }
 0xce1   :  { %15641 = vmatpush3.bf16.msra.mxu1 %v15640_v15  ;;  %15713 = vmatpush3.bf16.msra.mxu0 %v15712_v23  ;;  %v9448_v15 = vsub.f32 0.0, %v9444_v40  ;;  %v15688_v23 = vpack.c.bf16 %v11697_v24, %v11696_v37  ;;  %v9428_v42 = vadd.f32 -0.28449672, %v9424_v14  ;;  %v15802_v40 = vpack.c.bf16 %v11773_v59, %v11772_v28  ;;  %v11727_v37 = vld [vmem:[%s21905_s12 + $0x2e8] sm:$0xff]  ;;  %v11774_v24 = vld [vmem:[%s21905_s12 + $0x460] sm:$0xff]  ;;  %v11756_v28 = vld [vmem:[%s21905_s12 + $0x3d0] sm:$0xff] }
 0xce2   :  { %15666 = vmatprep.subr.bf16.mxu1 %v21964_v9  ;;  %15738 = vmatprep.subr.bf16.mxu0 %v21964_v9  ;;  %v11757_v59 = vld [vmem:[%s21905_s12 + $0x3d8] sm:$0xff] }
 0xce4   :  { %13946 = vmatmul.mubr.f32.vlgmr.msra.gmra.mrb[236].mxu1 %v20999_v63  ;;  %14051 = vmatmul.mubr.f32.vlgmr.msra.gmra.mrb[138].mxu0 %v21131_v46  ;;  %v9432_v63 = vmul.f32 %v21164_v17, %v9428_v42 }
 0xce5   :  { %15668 = vmatpush3.bf16.msra.mxu1 %v15667_v34  ;;  %15740 = vmatpush3.bf16.msra.mxu0 %v15739_v43  ;;  %v9454_v34 = vmul.f32 1.442695, %v9448_v15  ;;  %v15715_v43 = vpack.c.bf16 %v11715_v27, %v11714_v1  ;;  %v15805_v15 = vpack.c.bf16 %v11775_v18, %v11774_v24  ;;  %v11729_v1 = vld [vmem:[%s21905_s12 + $0x2f8] sm:$0xff]  ;;  %v11776_v27 = vld [vmem:[%s21905_s12 + $0x470] sm:$0xff]  ;;  %v11759_v24 = vld [vmem:[%s21905_s12 + $0x3e8] sm:$0xff] }
 0xce6   :  { %15669 = vmatprep.subr.bf16.mxu1 %v21964_v9  ;;  %15741 = vmatprep.subr.bf16.mxu0 %v21964_v9  ;;  %v9436_v6 = vadd.f32 0.2548296, %v9432_v63  ;;  %v15808_v42 = vpack.c.bf16 %v11777_v29, %v11776_v27  ;;  %v11806_v18 = vld [vmem:[%s21905_s12 + $0x560] sm:$0xff]  ;;  %v11761_v27 = vld [vmem:[%s21905_s12 + $0x3f8] sm:$0xff] }
 0xce7   :  { %14015 = vmatprep.mubr.msk.f32.mxu1 %vm16571_vm14, %v21992_v12  ;;  %14120 = vmatprep.mubr.msk.f32.mxu0 %vm16571_vm14, %v21992_v12  ;;  %16507 = vpow2.f32 %v9454_v34  ;;  %v11746_v34 = vld [vmem:[%s21905_s12 + $0x380] sm:$0xff]  ;;  %v11809_v29 = vld [vmem:[%s21905_s12 + $0x578] sm:$0xff] }
 0xce8   :  { %v9440_v20 = vmul.f32 %v21164_v17, %v9436_v6  ;;  %v11723_v17 = vld [vmem:[%s21905_s12 + $0x2c8] sm:$0xff] }
 0xce9   :  { %15671 = vmatpush3.bf16.msra.mxu1 %v15670_v50  ;;  %15743 = vmatpush3.bf16.msra.mxu0 %v15742_v54  ;;  %v11717_v50 = vld [vmem:[%s21905_s12 + $0x298] sm:$0xff]  ;;  %v11764_v54 = vld [vmem:[%s21905_s12 + $0x410] sm:$0xff]  ;;  %v15727_v38 = vpack.c.bf16 %v11723_v17, %v11722_v56  ;;  %v11751_v6 = vld [vmem:[%s21905_s12 + $0x3a8] sm:$0xff] }
 0xcea   :  { %15672 = vmatprep.subr.bf16.mxu1 %v21964_v9  ;;  %15744 = vmatprep.subr.bf16.mxu0 %v21964_v9  ;;  %v15718_v44 = vpack.c.bf16 %v11717_v50, %v11716_v8  ;;  %v15790_v25 = vpack.c.bf16 %v11765_v19, %v11764_v54  ;;  %v11794_v8 = vld [vmem:[%s21905_s12 + $0x500] sm:$0xff]  ;;  %v11748_v19 = vld [vmem:[%s21905_s12 + $0x390] sm:$0xff] }
 0xced   :  { %15674 = vmatpush3.bf16.msra.mxu1 %v15673_v26  ;;  %15746 = vmatpush3.bf16.msra.mxu0 %v15745_v10  ;;  %v11719_v26 = vld [vmem:[%s21905_s12 + $0x2a8] sm:$0xff]  ;;  %v11766_v10 = vld [vmem:[%s21905_s12 + $0x420] sm:$0xff] }
 0xcee   :  { %15675 = vmatprep.subr.bf16.mxu1 %v21964_v9  ;;  %15747 = vmatprep.subr.bf16.mxu0 %v21964_v9  ;;  %v15721_v52 = vpack.c.bf16 %v11719_v26, %v11718_v5  ;;  %v15793_v57 = vpack.c.bf16 %v11767_v30, %v11766_v10  ;;  %v11797_v5 = vld [vmem:[%s21905_s12 + $0x518] sm:$0xff]  ;;  %v11750_v30 = vld [vmem:[%s21905_s12 + $0x3a0] sm:$0xff] }
 0xcf1   :  { %15677 = vmatpush3.bf16.msra.mxu1 %v15676_v51  ;;  %15749 = vmatpush3.bf16.msra.mxu0 %v15748_v47  ;;  %v11721_v51 = vld [vmem:[%s21905_s12 + $0x2b8] sm:$0xff]  ;;  %v11768_v47 = vld [vmem:[%s21905_s12 + $0x430] sm:$0xff] }
 0xcf2   :  { %15678 = vmatprep.subr.bf16.mxu1 %v21964_v9  ;;  %15750 = vmatprep.subr.bf16.mxu0 %v21964_v9  ;;  %v15724_v0 = vpack.c.bf16 %v11721_v51, %v11720_v48  ;;  %v15796_v45 = vpack.c.bf16 %v11769_v2, %v11768_v47  ;;  %v15769_v51 = vpack.c.bf16 %v11751_v6, %v11750_v30  ;;  %v11752_v2 = vld [vmem:[%s21905_s12 + $0x3b0] sm:$0xff] }
 0xcf5   :  { %15680 = vmatpush3.bf16.msra.mxu1 %v15679_v58  ;;  %15752 = vmatpush3.bf16.msra.mxu0 %v15751_v3  ;;  %v16508_v58 = vpop.eup %16507  ;;  %v21309_v3 = vmul.f32 0.70710677, %v20978_v39 }
 0xcf6   :  { %15681 = vmatprep.subr.bf16.mxu1 %v21964_v9  ;;  %15753 = vmatprep.subr.bf16.mxu0 %v21964_v9  ;;  %v9460_v62 = vmul.f32 %v16508_v58, %v9440_v20  ;;  %v11753_v20 = vld [vmem:[%s21905_s12 + $0x3b8] sm:$0xff] }
 0xcf7   :  { %v15772_v58 = vpack.c.bf16 %v11753_v20, %v11752_v2  ;;  %vm9469_vm12 = vcmp.lt.f32.partialorder %v21309_v3, 0.0 }
 0xcf8   :  { %v9464_v32 = vsub.f32 1.0, %v9460_v62  ;;  %v11802_v62 = vld [vmem:[%s21905_s12 + $0x540] sm:$0xff] }
 0xcf9   :  { %15683 = vmatpush3.bf16.msra.mxu1 %v15682_v4  ;;  %15755 = vmatpush3.bf16.msra.mxu0 %v15754_v60  ;;  %v11724_v4 = vld [vmem:[%s21905_s12 + $0x2d0] sm:$0xff]  ;;  %v21326_v60 = vand.u32 2147483647, %v21309_v3 }
 0xcfa   :  { %15684 = vmatprep.subr.bf16.mxu1 %v21964_v9  ;;  %15756 = vmatprep.subr.bf16.mxu0 %v21964_v9  ;;  %v15730_v31 = vpack.c.bf16 %v11725_v36, %v11724_v4  ;;  %v9472_v41 = vsub.f32 0.0, %v9464_v32  ;;  %v15775_v4 = vpack.c.bf16 %v11755_v21, %v11754_v13 }
 0xcfc   :  { %v9476_v61 = vsel %vm9468_vm11, %v9472_v41, %v9464_v32  ;;  %v11804_v32 = vld [vmem:[%s21905_s12 + $0x550] sm:$0xff]  ;;  %v11807_v41 = vld [vmem:[%s21905_s12 + $0x568] sm:$0xff] }
 0xcfd   :  { %15686 = vmatpush3.bf16.msra.mxu1 %v15685_v49  ;;  %15758 = vmatpush3.bf16.msra.mxu0 %v15757_v55  ;;  %v11726_v49 = vld [vmem:[%s21905_s12 + $0x2e0] sm:$0xff]  ;;  %v9393_v55 = vmul.f32 0.3275911, %v21326_v60 }
 0xcfe   :  { %15687 = vmatprep.subr.bf16.mxu1 %v21964_v9  ;;  %15759 = vmatprep.subr.bf16.mxu0 %v21964_v9  ;;  %v15733_v14 = vpack.c.bf16 %v11727_v37, %v11726_v49  ;;  %v15778_v49 = vpack.c.bf16 %v11757_v59, %v11756_v28  ;;  %v11758_v37 = vld [vmem:[%s21905_s12 + $0x3e0] sm:$0xff] }
 0xd01   :  { %15689 = vmatpush3.bf16.msra.mxu1 %v15688_v23  ;;  %15761 = vmatpush3.bf16.msra.mxu0 %v15760_v33  ;;  %v11728_v23 = vld [vmem:[%s21905_s12 + $0x2f0] sm:$0xff]  ;;  %v9397_v33 = vadd.f32 1.0, %v9393_v55 }
 0xd02   :  { %15714 = vmatprep.subr.bf16.mxu1 %v21964_v9  ;;  %15786 = vmatprep.subr.bf16.mxu0 %v21964_v9  ;;  %v15736_v35 = vpack.c.bf16 %v11729_v1, %v11728_v23  ;;  %v15781_v23 = vpack.c.bf16 %v11759_v24, %v11758_v37  ;;  %v11760_v1 = vld [vmem:[%s21905_s12 + $0x3f0] sm:$0xff] }
 0xd03   :  { %16509 = vrcp.f32 %v9397_v33  ;;  %v15853_v33 = vpack.c.bf16 %v11807_v41, %v11806_v18  ;;  %v11790_v41 = vld [vmem:[%s21905_s12 + $0x4e0] sm:$0xff] }
 0xd04   :  { %14016 = vmatmul.mubr.f32.vlgmr.msra.gmra.mrb[238].mxu1 %v9769_v11  ;;  %14121 = vmatmul.mubr.f32.vlgmr.msra.gmra.mrb[140].mxu0 %v10038_v7  ;;  %v11795_v11 = vld [vmem:[%s21905_s12 + $0x508] sm:$0xff]  ;;  %v9380_v7 = vmul.f32 0.5, %v20980_v53  ;;  %v11749_v53 = vld [vmem:[%s21905_s12 + $0x398] sm:$0xff] }
 0xd05   :  { %15716 = vmatpush3.bf16.msra.mxu1 %v15715_v43  ;;  %15788 = vmatpush3.bf16.msra.mxu0 %v15787_v16  ;;  %v9480_v43 = vadd.f32 1.0, %v9476_v61  ;;  %v11747_v16 = vld [vmem:[%s21905_s12 + $0x388] sm:$0xff]  ;;  %v15835_v54 = vpack.c.bf16 %v11795_v11, %v11794_v8  ;;  %v15766_v26 = vpack.c.bf16 %v11749_v53, %v11748_v19  ;;  %v11826_v8 = vld [vmem:[%s21905_s12 + $0x600] sm:$0xff]  ;;  %v10128_v53 = vrot.slane %v21131_v46, 6 }
 0xd06   :  { %15717 = vmatprep.subr.bf16.mxu1 %v21964_v9  ;;  %15789 = vmatprep.subr.bf16.mxu0 %v21964_v9  ;;  %v15763_v50 = vpack.c.bf16 %v11747_v16, %v11746_v34  ;;  %v11779_v16 = vld [vmem:[%s21905_s12 + $0x488] sm:$0xff] }
 0xd07   :  { %14085 = vmatprep.mubr.msk.f32.mxu1 %vm16571_vm14, %v21992_v12  ;;  %14190 = vmatprep.mubr.msk.f32.mxu0 %vm16571_vm14, %v21992_v12  ;;  %v21387_v63 = vmul.f32 %v9480_v43, %v9380_v7  ;;  %v11778_v43 = vld [vmem:[%s21905_s12 + $0x480] sm:$0xff]  ;;  %v11827_v11 = vld [vmem:[%s21905_s12 + $0x608] sm:$0xff] }
 0xd08   :  { %v15883_v19 = vpack.c.bf16 %v11827_v11, %v11826_v8  ;;  %v11811_v8 = vld [vmem:[%s21905_s12 + $0x588] sm:$0xff]  ;;  %v11858_v11 = vld [vmem:[%s21905_s12 + $0x700] sm:$0xff] }
 0xd09   :  { %15719 = vmatpush3.bf16.msra.mxu1 %v15718_v44  ;;  %15791 = vmatpush3.bf16.msra.mxu0 %v15790_v25  ;;  %v9948_v44 = vrot.slane %v21131_v46, 2  ;;  %v11796_v25 = vld [vmem:[%s21905_s12 + $0x510] sm:$0xff] }
 0xd0a   :  { %15720 = vmatprep.subr.bf16.mxu1 %v21964_v9  ;;  %15792 = vmatprep.subr.bf16.mxu0 %v21964_v9  ;;  %v15838_v10 = vpack.c.bf16 %v11797_v5, %v11796_v25  ;;  %v10397_v25 = vrot.slane %v21387_v63, 4  ;;  %v11781_v5 = vld [vmem:[%s21905_s12 + $0x498] sm:$0xff] }
 0xd0d   :  { %15722 = vmatpush3.bf16.msra.mxu1 %v15721_v52  ;;  %15794 = vmatpush3.bf16.msra.mxu0 %v15793_v57  ;;  %v11798_v52 = vld [vmem:[%s21905_s12 + $0x520] sm:$0xff]  ;;  %v11799_v57 = vld [vmem:[%s21905_s12 + $0x528] sm:$0xff]  ;;  %v21420_v48 = vpop.eup %16509 }
 0xd0e   :  { %15723 = vmatprep.subr.bf16.mxu1 %v21964_v9  ;;  %15795 = vmatprep.subr.bf16.mxu0 %v21964_v9  ;;  %v15841_v47 = vpack.c.bf16 %v11799_v57, %v11798_v52  ;;  %v9409_v56 = vmul.f32 1.0614054, %v21420_v48  ;;  %v11782_v52 = vld [vmem:[%s21905_s12 + $0x4a0] sm:$0xff]  ;;  %v11783_v57 = vld [vmem:[%s21905_s12 + $0x4a8] sm:$0xff] }
 0xd0f   :  { %v15817_v20 = vpack.c.bf16 %v11783_v57, %v11782_v52  ;;  %v11862_v52 = vld [vmem:[%s21905_s12 + $0x720] sm:$0xff]  ;;  %v11863_v57 = vld [vmem:[%s21905_s12 + $0x728] sm:$0xff] }
 0xd11   :  { %15725 = vmatpush3.bf16.msra.mxu1 %v15724_v0  ;;  %15797 = vmatpush3.bf16.msra.mxu0 %v15796_v45  ;;  %v11800_v0 = vld [vmem:[%s21905_s12 + $0x530] sm:$0xff]  ;;  %v11801_v45 = vld [vmem:[%s21905_s12 + $0x538] sm:$0xff] }
 0xd12   :  { %15726 = vmatprep.subr.bf16.mxu1 %v21964_v9  ;;  %15798 = vmatprep.subr.bf16.mxu0 %v21964_v9  ;;  %v15844_v17 = vpack.c.bf16 %v11801_v45, %v11800_v0  ;;  %v11784_v45 = vld [vmem:[%s21905_s12 + $0x4b0] sm:$0xff] }
 0xd15   :  { %15728 = vmatpush3.bf16.msra.mxu1 %v15727_v38  ;;  %15800 = vmatpush3.bf16.msra.mxu0 %v15799_v22  ;;  %v11803_v38 = vld [vmem:[%s21905_s12 + $0x548] sm:$0xff]  ;;  %v9413_v22 = vadd.f32 -1.4531521, %v9409_v56  ;;  %v11785_v56 = vld [vmem:[%s21905_s12 + $0x4b8] sm:$0xff] }
 0xd16   :  { %15729 = vmatprep.subr.bf16.mxu1 %v21964_v9  ;;  %15801 = vmatprep.subr.bf16.mxu0 %v21964_v9  ;;  %v15847_v36 = vpack.c.bf16 %v11803_v38, %v11802_v62  ;;  %v15820_v21 = vpack.c.bf16 %v11785_v56, %v11784_v45  ;;  %v11786_v38 = vld [vmem:[%s21905_s12 + $0x4c0] sm:$0xff]  ;;  %v11865_v45 = vld [vmem:[%s21905_s12 + $0x738] sm:$0xff] }
 0xd19   :  { %15731 = vmatpush3.bf16.msra.mxu1 %v15730_v31  ;;  %15803 = vmatpush3.bf16.msra.mxu0 %v15802_v40  ;;  %v11805_v31 = vld [vmem:[%s21905_s12 + $0x558] sm:$0xff]  ;;  %v9417_v40 = vmul.f32 %v21420_v48, %v9413_v22 }
 0xd1a   :  { %15732 = vmatprep.subr.bf16.mxu1 %v21964_v9  ;;  %15804 = vmatprep.subr.bf16.mxu0 %v21964_v9  ;;  %v15850_v55 = vpack.c.bf16 %v11805_v31, %v11804_v32  ;;  %v11788_v31 = vld [vmem:[%s21905_s12 + $0x4d0] sm:$0xff] }
 0xd1d   :  { %15734 = vmatpush3.bf16.msra.mxu1 %v15733_v14  ;;  %15806 = vmatpush3.bf16.msra.mxu0 %v15805_v15  ;;  %v9421_v14 = vadd.f32 1.4214138, %v9417_v40  ;;  %v9445_v15 = vmul.f32 %v21326_v60, %v21326_v60  ;;  %v11808_v60 = vld [vmem:[%s21905_s12 + $0x570] sm:$0xff]  ;;  %v11789_v40 = vld [vmem:[%s21905_s12 + $0x4d8] sm:$0xff] }
 0xd1e   :  { %15735 = vmatprep.subr.bf16.mxu1 %v21964_v9  ;;  %15807 = vmatprep.subr.bf16.mxu0 %v21964_v9  ;;  %v15856_v34 = vpack.c.bf16 %v11809_v29, %v11808_v60  ;;  %v15826_v24 = vpack.c.bf16 %v11789_v40, %v11788_v31  ;;  %v11792_v60 = vld [vmem:[%s21905_s12 + $0x4f0] sm:$0xff]  ;;  %v11793_v29 = vld [vmem:[%s21905_s12 + $0x4f8] sm:$0xff]  ;;  %v11822_v31 = vld [vmem:[%s21905_s12 + $0x5e0] sm:$0xff] }
 0xd1f   :  { %v9425_v61 = vmul.f32 %v21420_v48, %v9421_v14  ;;  %v11791_v14 = vld [vmem:[%s21905_s12 + $0x4e8] sm:$0xff]  ;;  %v15832_v3 = vpack.c.bf16 %v11793_v29, %v11792_v60  ;;  %v10487_v29 = vrot.slane %v21387_v63, 6 }
 0xd20   :  { %v11823_v40 = vld [vmem:[%s21905_s12 + $0x5e8] sm:$0xff] }
 0xd21   :  { %15737 = vmatpush3.bf16.msra.mxu1 %v15736_v35  ;;  %15809 = vmatpush3.bf16.msra.mxu0 %v15808_v42  ;;  %v9449_v35 = vsub.f32 0.0, %v9445_v15  ;;  %v15784_v42 = vpack.c.bf16 %v11761_v27, %v11760_v1  ;;  %v9429_v7 = vadd.f32 -0.28449672, %v9425_v61  ;;  %v11838_v15 = vld [vmem:[%s21905_s12 + $0x660] sm:$0xff]  ;;  %v15829_v1 = vpack.c.bf16 %v11791_v14, %v11790_v41  ;;  %v11840_v61 = vld [vmem:[%s21905_s12 + $0x670] sm:$0xff]  ;;  %v11825_v41 = vld [vmem:[%s21905_s12 + $0x5f8] sm:$0xff] }
 0xd22   :  { %15762 = vmatprep.subr.bf16.mxu1 %v21964_v9  ;;  %15834 = vmatprep.subr.bf16.mxu0 %v21964_v9  ;;  %v11872_v14 = vld [vmem:[%s21905_s12 + $0x770] sm:$0xff] }
 0xd23   :  { %v9433_v46 = vmul.f32 %v21420_v48, %v9429_v7  ;;  %v11859_v7 = vld [vmem:[%s21905_s12 + $0x708] sm:$0xff] }
 0xd24   :  { %14086 = vmatmul.mubr.f32.vlgmr.msra.gmra.mrb[240].mxu1 %v9948_v44  ;;  %14191 = vmatmul.mubr.f32.vlgmr.msra.gmra.mrb[142].mxu0 %v21387_v63  ;;  %v11780_v44 = vld [vmem:[%s21905_s12 + $0x490] sm:$0xff] }
 0xd25   :  { %15764 = vmatpush3.bf16.msra.mxu1 %v15763_v50  ;;  %15836 = vmatpush3.bf16.msra.mxu0 %v15835_v54  ;;  %v9456_v50 = vmul.f32 1.442695, %v9449_v35  ;;  %v15811_v54 = vpack.c.bf16 %v11779_v16, %v11778_v43  ;;  %v15814_v30 = vpack.c.bf16 %v11781_v5, %v11780_v44  ;;  %v9437_v2 = vadd.f32 0.2548296, %v9433_v46  ;;  %v11841_v35 = vld [vmem:[%s21905_s12 + $0x678] sm:$0xff]  ;;  %v11810_v43 = vld [vmem:[%s21905_s12 + $0x580] sm:$0xff] }
 0xd26   :  { %15765 = vmatprep.subr.bf16.mxu1 %v21964_v9  ;;  %15837 = vmatprep.subr.bf16.mxu0 %v21964_v9  ;;  %v11812_v44 = vld [vmem:[%s21905_s12 + $0x590] sm:$0xff] }
 0xd27   :  { %14155 = vmatprep.mubr.msk.f32.mxu1 %vm16571_vm14, %v21992_v12  ;;  %14260 = vmatprep.mubr.msk.f32.mxu0 %vm16571_vm14, %v21992_v12  ;;  %16511 = vpow2.f32 %v9456_v50  ;;  %v9441_v13 = vmul.f32 %v21420_v48, %v9437_v2  ;;  %v11834_v48 = vld [vmem:[%s21905_s12 + $0x640] sm:$0xff]  ;;  %v9381_v50 = vmul.f32 0.5, %v20978_v39  ;;  %v11813_v39 = vld [vmem:[%s21905_s12 + $0x598] sm:$0xff]  ;;  %v11860_v5 = vld [vmem:[%s21905_s12 + $0x710] sm:$0xff] }
 0xd28   :  { %v11816_v2 = vld [vmem:[%s21905_s12 + $0x5b0] sm:$0xff] }
 0xd29   :  { %15767 = vmatpush3.bf16.msra.mxu1 %v15766_v26  ;;  %15839 = vmatpush3.bf16.msra.mxu0 %v15838_v10  ;;  %v11828_v26 = vld [vmem:[%s21905_s12 + $0x610] sm:$0xff]  ;;  %v11829_v10 = vld [vmem:[%s21905_s12 + $0x618] sm:$0xff] }
 0xd2a   :  { %15768 = vmatprep.subr.bf16.mxu1 %v21964_v9  ;;  %15840 = vmatprep.subr.bf16.mxu0 %v21964_v9  ;;  %v15886_v6 = vpack.c.bf16 %v11829_v10, %v11828_v26  ;;  %v11861_v26 = vld [vmem:[%s21905_s12 + $0x718] sm:$0xff]  ;;  %v15862_v10 = vpack.c.bf16 %v11813_v39, %v11812_v44  ;;  %v11854_v39 = vld [vmem:[%s21905_s12 + $0x6e0] sm:$0xff] }
 0xd2b   :  { %v15934_v46 = vpack.c.bf16 %v11861_v26, %v11860_v5  ;;  %v11853_v44 = vld [vmem:[%s21905_s12 + $0x6d8] sm:$0xff]  ;;  %v11855_v5 = vld [vmem:[%s21905_s12 + $0x6e8] sm:$0xff] }
 0xd2d   :  { %15770 = vmatpush3.bf16.msra.mxu1 %v15769_v51  ;;  %15842 = vmatpush3.bf16.msra.mxu0 %v15841_v47  ;;  %v11830_v51 = vld [vmem:[%s21905_s12 + $0x620] sm:$0xff]  ;;  %v11831_v47 = vld [vmem:[%s21905_s12 + $0x628] sm:$0xff] }
 0xd2e   :  { %15771 = vmatprep.subr.bf16.mxu1 %v21964_v9  ;;  %15843 = vmatprep.subr.bf16.mxu0 %v21964_v9  ;;  %v15889_v0 = vpack.c.bf16 %v11831_v47, %v11830_v51  ;;  %v15937_v47 = vpack.c.bf16 %v11863_v57, %v11862_v52  ;;  %v15925_v52 = vpack.c.bf16 %v11855_v5, %v11854_v39  ;;  %v11856_v57 = vld [vmem:[%s21905_s12 + $0x6f0] sm:$0xff] }
 0xd31   :  { %15773 = vmatpush3.bf16.msra.mxu1 %v15772_v58  ;;  %15845 = vmatpush3.bf16.msra.mxu0 %v15844_v17  ;;  %v11832_v58 = vld [vmem:[%s21905_s12 + $0x630] sm:$0xff]  ;;  %v11833_v17 = vld [vmem:[%s21905_s12 + $0x638] sm:$0xff]  ;;  %v16512_v22 = vpop.eup %16511 }
 0xd32   :  { %15774 = vmatprep.subr.bf16.mxu1 %v21964_v9  ;;  %15846 = vmatprep.subr.bf16.mxu0 %v21964_v9  ;;  %v15892_v62 = vpack.c.bf16 %v11833_v17, %v11832_v58  ;;  %v9461_v28 = vmul.f32 %v16512_v22, %v9441_v13  ;;  %v11818_v17 = vld [vmem:[%s21905_s12 + $0x5c0] sm:$0xff]  ;;  %v11819_v13 = vld [vmem:[%s21905_s12 + $0x5c8] sm:$0xff] }
 0xd34   :  { %v9465_v37 = vsub.f32 1.0, %v9461_v28  ;;  %v11869_v28 = vld [vmem:[%s21905_s12 + $0x758] sm:$0xff] }
 0xd35   :  { %15776 = vmatpush3.bf16.msra.mxu1 %v15775_v4  ;;  %15848 = vmatpush3.bf16.msra.mxu0 %v15847_v36  ;;  %v11787_v4 = vld [vmem:[%s21905_s12 + $0x4c8] sm:$0xff] }
 0xd36   :  { %15777 = vmatprep.subr.bf16.mxu1 %v21964_v9  ;;  %15849 = vmatprep.subr.bf16.mxu0 %v21964_v9  ;;  %v11835_v36 = vld [vmem:[%s21905_s12 + $0x648] sm:$0xff]  ;;  %v15823_v59 = vpack.c.bf16 %v11787_v4, %v11786_v38  ;;  %v15871_v38 = vpack.c.bf16 %v11819_v13, %v11818_v17  ;;  %v11820_v4 = vld [vmem:[%s21905_s12 + $0x5d0] sm:$0xff]  ;;  %v11878_v13 = vld [vmem:[%s21905_s12 + $0x7a0] sm:$0xff] }
 0xd37   :  { %v15895_v32 = vpack.c.bf16 %v11835_v36, %v11834_v48  ;;  %v11821_v48 = vld [vmem:[%s21905_s12 + $0x5d8] sm:$0xff]  ;;  %v11868_v36 = vld [vmem:[%s21905_s12 + $0x750] sm:$0xff] }
 0xd39   :  { %15779 = vmatpush3.bf16.msra.mxu1 %v15778_v49  ;;  %15851 = vmatpush3.bf16.msra.mxu0 %v15850_v55  ;;  %v11836_v49 = vld [vmem:[%s21905_s12 + $0x650] sm:$0xff]  ;;  %v11837_v55 = vld [vmem:[%s21905_s12 + $0x658] sm:$0xff] }
 0xd3a   :  { %15780 = vmatprep.subr.bf16.mxu1 %v21964_v9  ;;  %15852 = vmatprep.subr.bf16.mxu0 %v21964_v9  ;;  %v15898_v18 = vpack.c.bf16 %v11837_v55, %v11836_v49  ;;  %v11870_v49 = vld [vmem:[%s21905_s12 + $0x760] sm:$0xff]  ;;  %v11871_v55 = vld [vmem:[%s21905_s12 + $0x768] sm:$0xff] }
 0xd3d   :  { %15782 = vmatpush3.bf16.msra.mxu1 %v15781_v23  ;;  %15854 = vmatpush3.bf16.msra.mxu0 %v15853_v33  ;;  %v11839_v23 = vld [vmem:[%s21905_s12 + $0x668] sm:$0xff]  ;;  %v9473_v33 = vsub.f32 0.0, %v9465_v37 }
 0xd3e   :  { %15783 = vmatprep.subr.bf16.mxu1 %v21964_v9  ;;  %15855 = vmatprep.subr.bf16.mxu0 %v21964_v9  ;;  %v15901_v27 = vpack.c.bf16 %v11839_v23, %v11838_v15  ;;  %v11873_v15 = vld [vmem:[%s21905_s12 + $0x778] sm:$0xff] }
 0xd41   :  { %15785 = vmatpush3.bf16.msra.mxu1 %v15784_v42  ;;  %15857 = vmatpush3.bf16.msra.mxu0 %v15856_v34  ;;  %v9477_v42 = vsel %vm9469_vm12, %v9473_v33, %v9465_v37  ;;  %v15904_v34 = vpack.c.bf16 %v11841_v35, %v11840_v61  ;;  %v15877_v37 = vpack.c.bf16 %v11823_v40, %v11822_v31  ;;  %v11844_v35 = vld [vmem:[%s21905_s12 + $0x690] sm:$0xff]  ;;  %v11886_v31 = vld [vmem:[%s21905_s12 + $0x7e0] sm:$0xff]  ;;  %v11887_v40 = vld [vmem:[%s21905_s12 + $0x7e8] sm:$0xff] }
 0xd42   :  { %15810 = vmatprep.subr.bf16.mxu1 %v21964_v9  ;;  %15882 = vmatprep.subr.bf16.mxu0 %v21964_v9  ;;  %v9481_v16 = vadd.f32 1.0, %v9477_v42  ;;  %v15952_v33 = vpack.c.bf16 %v11873_v15, %v11872_v14  ;;  %v11845_v42 = vld [vmem:[%s21905_s12 + $0x698] sm:$0xff]  ;;  %v11888_v14 = vld [vmem:[%s21905_s12 + $0x7f0] sm:$0xff] }
 0xd43   :  { %v11889_v15 = vld [vmem:[%s21905_s12 + $0x7f8] sm:$0xff] }
 0xd44   :  { %14156 = vmatmul.mubr.f32.vlgmr.msra.gmra.mrb[242].mxu1 %v10128_v53  ;;  %14261 = vmatmul.mubr.f32.vlgmr.msra.gmra.mrb[144].mxu0 %v10397_v25  ;;  %v21636_v53 = vmul.f32 %v9481_v16, %v9381_v50  ;;  %v10307_v25 = vrot.slane %v21387_v63, 2  ;;  %v11846_v63 = vld [vmem:[%s21905_s12 + $0x6a0] sm:$0xff]  ;;  %v11848_v16 = vld [vmem:[%s21905_s12 + $0x6b0] sm:$0xff]  ;;  %v11851_v50 = vld [vmem:[%s21905_s12 + $0x6c8] sm:$0xff] }
 0xd45   :  { %15812 = vmatpush3.bf16.msra.mxu1 %v15811_v54  ;;  %15884 = vmatpush3.bf16.msra.mxu0 %v15883_v19  ;;  %v15859_v54 = vpack.c.bf16 %v11811_v8, %v11810_v43  ;;  %v15931_v19 = vpack.c.bf16 %v11859_v7, %v11858_v11  ;;  %v11849_v8 = vld [vmem:[%s21905_s12 + $0x6b8] sm:$0xff]  ;;  %v11850_v7 = vld [vmem:[%s21905_s12 + $0x6c0] sm:$0xff] }
 0xd46   :  { %15813 = vmatprep.subr.bf16.mxu1 %v21964_v9  ;;  %15885 = vmatprep.subr.bf16.mxu0 %v21964_v9  ;;  %v10756_v61 = vrot.slane %v21636_v53, 4  ;;  %v15916_v11 = vpack.c.bf16 %v11849_v8, %v11848_v16 }
 0xd47   :  { %14225 = vmatprep.mubr.msk.f32.mxu1 %vm16571_vm14, %v21992_v12  ;;  %14330 = vmatprep.mubr.msk.f32.mxu0 %vm16571_vm14, %v21992_v12 }
 0xd49   :  { %15815 = vmatpush3.bf16.msra.mxu1 %v15814_v30  ;;  %15887 = vmatpush3.bf16.msra.mxu0 %v15886_v6  ;;  %v11814_v30 = vld [vmem:[%s21905_s12 + $0x5a0] sm:$0xff]  ;;  %v11815_v6 = vld [vmem:[%s21905_s12 + $0x5a8] sm:$0xff] }
 0xd4a   :  { %15816 = vmatprep.subr.bf16.mxu1 %v21964_v9  ;;  %15888 = vmatprep.subr.bf16.mxu0 %v21964_v9  ;;  %v15865_v51 = vpack.c.bf16 %v11815_v6, %v11814_v30  ;;  %v10929_v6 = vld [vmem:[%s21907_s14] sm:$0x3] }
 0xd4b   :  { %10931 = vrot.lane.b32.xlu1 %v10929_v6, %s16572_s8 }
 0xd4d   :  { %15818 = vmatpush3.bf16.msra.mxu1 %v15817_v20  ;;  %15890 = vmatpush3.bf16.msra.mxu0 %v15889_v0  ;;  %v11817_v20 = vld [vmem:[%s21905_s12 + $0x5b8] sm:$0xff]  ;;  %v11864_v0 = vld [vmem:[%s21905_s12 + $0x730] sm:$0xff] }
 0xd4e   :  { %15819 = vmatprep.subr.bf16.mxu1 %v21964_v9  ;;  %15891 = vmatprep.subr.bf16.mxu0 %v21964_v9  ;;  %v15868_v56 = vpack.c.bf16 %v11817_v20, %v11816_v2  ;;  %v15940_v58 = vpack.c.bf16 %v11865_v45, %v11864_v0  ;;  %v11874_v2 = vld [vmem:[%s21905_s12 + $0x780] sm:$0xff]  ;;  %v11875_v20 = vld [vmem:[%s21905_s12 + $0x788] sm:$0xff]  ;;  %v10666_v45 = vrot.slane %v21636_v53, 2 }
 0xd4f   :  { %v15955_v0 = vpack.c.bf16 %v11875_v20, %v11874_v2 }
 0xd51   :  { %15821 = vmatpush3.bf16.msra.mxu1 %v15820_v21  ;;  %15893 = vmatpush3.bf16.msra.mxu0 %v15892_v62  ;;  %v11866_v21 = vld [vmem:[%s21905_s12 + $0x740] sm:$0xff]  ;;  %v11867_v62 = vld [vmem:[%s21905_s12 + $0x748] sm:$0xff] }
 0xd52   :  { %15822 = vmatprep.subr.bf16.mxu1 %v21964_v9  ;;  %15894 = vmatprep.subr.bf16.mxu0 %v21964_v9  ;;  %v15943_v22 = vpack.c.bf16 %v11867_v62, %v11866_v21  ;;  %v11879_v21 = vld [vmem:[%s21905_s12 + $0x7a8] sm:$0xff] }
 0xd53   :  { %v15961_v62 = vpack.c.bf16 %v11879_v21, %v11878_v13 }
 0xd55   :  { %15824 = vmatpush3.bf16.msra.mxu1 %v15823_v59  ;;  %15896 = vmatpush3.bf16.msra.mxu0 %v15895_v32  ;;  %v15874_v59 = vpack.c.bf16 %v11821_v48, %v11820_v4  ;;  %v15946_v32 = vpack.c.bf16 %v11869_v28, %v11868_v36  ;;  %v11882_v4 = vld [vmem:[%s21905_s12 + $0x7c0] sm:$0xff]  ;;  %v11883_v48 = vld [vmem:[%s21905_s12 + $0x7c8] sm:$0xff]  ;;  %v11884_v28 = vld [vmem:[%s21905_s12 + $0x7d0] sm:$0xff] }
 0xd56   :  { %15825 = vmatprep.subr.bf16.mxu1 %v21964_v9  ;;  %15897 = vmatprep.subr.bf16.mxu0 %v21964_v9  ;;  %v15967_v36 = vpack.c.bf16 %v11883_v48, %v11882_v4 }
 0xd59   :  { %15827 = vmatpush3.bf16.msra.mxu1 %v15826_v24  ;;  %15899 = vmatpush3.bf16.msra.mxu0 %v15898_v18  ;;  %v15949_v24 = vpack.c.bf16 %v11871_v55, %v11870_v49  ;;  %v11824_v18 = vld [vmem:[%s21905_s12 + $0x5f0] sm:$0xff] }
 0xd5a   :  { %15828 = vmatprep.subr.bf16.mxu1 %v21964_v9  ;;  %15900 = vmatprep.subr.bf16.mxu0 %v21964_v9  ;;  %v15880_v23 = vpack.c.bf16 %v11825_v41, %v11824_v18  ;;  %v15973_v41 = vpack.c.bf16 %v11887_v40, %v11886_v31 }
 0xd5d   :  { %15830 = vmatpush3.bf16.msra.mxu1 %v15829_v1  ;;  %15902 = vmatpush3.bf16.msra.mxu0 %v15901_v27  ;;  %v11842_v1 = vld [vmem:[%s21905_s12 + $0x680] sm:$0xff]  ;;  %v11843_v27 = vld [vmem:[%s21905_s12 + $0x688] sm:$0xff] }
 0xd5e   :  { %15831 = vmatprep.subr.bf16.mxu1 %v21964_v9  ;;  %15903 = vmatprep.subr.bf16.mxu0 %v21964_v9  ;;  %v15907_v60 = vpack.c.bf16 %v11843_v27, %v11842_v1  ;;  %v10846_v1 = vrot.slane %v21636_v53, 6 }
 0xd61   :  { %15833 = vmatpush3.bf16.msra.mxu1 %v15832_v3  ;;  %15905 = vmatpush3.bf16.msra.mxu0 %v15904_v34  ;;  %v15910_v3 = vpack.c.bf16 %v11845_v42, %v11844_v35  ;;  %v11847_v34 = vld [vmem:[%s21905_s12 + $0x6a8] sm:$0xff] }
 0xd62   :  { %15858 = vmatprep.subr.bf16.mxu1 %v21964_v9  ;;  %15930 = vmatprep.subr.bf16.mxu0 %v21964_v9  ;;  %v15913_v43 = vpack.c.bf16 %v11847_v34, %v11846_v63 }
 0xd64   :  { %14226 = vmatmul.mubr.f32.vlgmr.msra.gmra.mrb[244].mxu1 %v10307_v25  ;;  %14331 = vmatmul.mubr.f32.vlgmr.msra.gmra.mrb[146].mxu0 %v21636_v53 }
 0xd65   :  { %15860 = vmatpush3.bf16.msra.mxu1 %v15859_v54  ;;  %15932 = vmatpush3.bf16.msra.mxu0 %v15931_v19  ;;  %v15919_v54 = vpack.c.bf16 %v11851_v50, %v11850_v7  ;;  %v11852_v19 = vld [vmem:[%s21905_s12 + $0x6d0] sm:$0xff] }
 0xd66   :  { %15861 = vmatprep.subr.bf16.mxu1 %v21964_v9  ;;  %15933 = vmatprep.subr.bf16.mxu0 %v21964_v9  ;;  %v15922_v25 = vpack.c.bf16 %v11853_v44, %v11852_v19 }
 0xd67   :  { %14295 = vmatprep.mubr.msk.f32.mxu1 %vm16571_vm14, %v21992_v12  ;;  %14400 = vmatprep.mubr.msk.f32.mxu0 %vm16571_vm14, %v21992_v12 }
 0xd69   :  { %15863 = vmatpush3.bf16.msra.mxu1 %v15862_v10  ;;  %15935 = vmatpush3.bf16.msra.mxu0 %v15934_v46 }
 0xd6a   :  { %15864 = vmatprep.subr.bf16.mxu1 %v21964_v9  ;;  %15936 = vmatprep.subr.bf16.mxu0 %v21964_v9 }
 0xd6d   :  { %15866 = vmatpush3.bf16.msra.mxu1 %v15865_v51  ;;  %15938 = vmatpush3.bf16.msra.mxu0 %v15937_v47  ;;  %v11857_v51 = vld [vmem:[%s21905_s12 + $0x6f8] sm:$0xff] }
 0xd6e   :  { %15867 = vmatprep.subr.bf16.mxu1 %v21964_v9  ;;  %15939 = vmatprep.subr.bf16.mxu0 %v21964_v9  ;;  %v15928_v47 = vpack.c.bf16 %v11857_v51, %v11856_v57 }
 0xd71   :  { %15869 = vmatpush3.bf16.msra.mxu1 %v15868_v56  ;;  %15941 = vmatpush3.bf16.msra.mxu0 %v15940_v58  ;;  %v11876_v56 = vld [vmem:[%s21905_s12 + $0x790] sm:$0xff]  ;;  %v11877_v58 = vld [vmem:[%s21905_s12 + $0x798] sm:$0xff] }
 0xd72   :  { %15870 = vmatprep.subr.bf16.mxu1 %v21964_v9  ;;  %15942 = vmatprep.subr.bf16.mxu0 %v21964_v9  ;;  %v15958_v17 = vpack.c.bf16 %v11877_v58, %v11876_v56 }
 0xd75   :  { %15872 = vmatpush3.bf16.msra.mxu1 %v15871_v38  ;;  %15944 = vmatpush3.bf16.msra.mxu0 %v15943_v22  ;;  %v11880_v38 = vld [vmem:[%s21905_s12 + $0x7b0] sm:$0xff] }
 0xd76   :  { %15873 = vmatprep.subr.bf16.mxu1 %v21964_v9  ;;  %15945 = vmatprep.subr.bf16.mxu0 %v21964_v9 }
 0xd79   :  { %15875 = vmatpush3.bf16.msra.mxu1 %v15874_v59  ;;  %15947 = vmatpush3.bf16.msra.mxu0 %v15946_v32  ;;  %v11885_v59 = vld [vmem:[%s21905_s12 + $0x7d8] sm:$0xff] }
 0xd7a   :  { %15876 = vmatprep.subr.bf16.mxu1 %v21964_v9  ;;  %15948 = vmatprep.subr.bf16.mxu0 %v21964_v9  ;;  %v15970_v32 = vpack.c.bf16 %v11885_v59, %v11884_v28 }
 0xd7d   :  { %15878 = vmatpush3.bf16.msra.mxu1 %v15877_v37  ;;  %15950 = vmatpush3.bf16.msra.mxu0 %v15949_v24 }
 0xd7e   :  { %15879 = vmatprep.subr.bf16.mxu1 %v21964_v9  ;;  %15951 = vmatprep.subr.bf16.mxu0 %v21964_v9 }
 0xd81   :  { %15881 = vmatpush3.bf16.msra.mxu1 %v15880_v23  ;;  %15953 = vmatpush3.bf16.msra.mxu0 %v15952_v33  ;;  %v15976_v33 = vpack.c.bf16 %v11889_v15, %v11888_v14 }
 0xd82   :  { %15906 = vmatprep.subr.bf16.mxu1 %v21964_v9 }
 0xd84   :  { %14296 = vmatmul.mubr.f32.vlgmr.msra.gmra.mrb[246].mxu1 %v10487_v29  ;;  %14401 = vmatmul.mubr.f32.vlgmr.msra.gmra.mrb[148].mxu0 %v10756_v61 }
 0xd85   :  { %15908 = vmatpush3.bf16.msra.mxu1 %v15907_v60  ;;  %14365 = vmatprep.mubr.msk.f32.mxu1 %vm16571_vm14, %v21992_v12 }
 0xd86   :  { %15909 = vmatprep.subr.bf16.mxu1 %v21964_v9 }
 0xd89   :  { %15911 = vmatpush3.bf16.msra.mxu1 %v15910_v3 }
 0xd8a   :  { %15912 = vmatprep.subr.bf16.mxu1 %v21964_v9 }
 0xd8d   :  { %15914 = vmatpush3.bf16.msra.mxu1 %v15913_v43 }
 0xd8e   :  { %15915 = vmatprep.subr.bf16.mxu1 %v21964_v9 }
 0xd91   :  { %15917 = vmatpush3.bf16.msra.mxu1 %v15916_v11 }
 0xd92   :  { %15918 = vmatprep.subr.bf16.mxu1 %v21964_v9 }
 0xd95   :  { %15920 = vmatpush3.bf16.msra.mxu1 %v15919_v54 }
 0xd96   :  { %15921 = vmatprep.subr.bf16.mxu1 %v21964_v9 }
 0xd97   :  { %v9588_v26 = vpop.f32.mrb[234].mxu1  ;;  %v9747_v10 = vpop.f32.mrb[136].mxu0 }
 0xd98   :  { %v13912_v46 = vpop.f32.mrb[235].mxu1  ;;  %v13982_v30 = vpop.f32.mrb[137].mxu0 }
 0xd99   :  { %15923 = vmatpush3.bf16.msra.mxu1 %v15922_v25 }
 0xd9a   :  { %15924 = vmatprep.subr.bf16.mxu1 %v21964_v9 }
 0xd9d   :  { %15926 = vmatpush3.bf16.msra.mxu1 %v15925_v52 }
 0xd9e   :  { %15927 = vmatprep.subr.bf16.mxu1 %v21964_v9 }
 0xda1   :  { %15929 = vmatpush3.bf16.msra.mxu1 %v15928_v47 }
 0xda2   :  { %15954 = vmatprep.subr.bf16.mxu1 %v21964_v9 }
 0xda4   :  { %14366 = vmatmul.mubr.f32.vlgmr.msra.gmra.mrb[248].mxu1 %v10666_v45  ;;  %v11890_v45 = vld [vmem:[%s21906_s13] ss:$0 sm:$0xff]  ;;  %s16574_s13 = smov [#allocation3]  }
 0xda5   :  { %15956 = vmatpush3.bf16.msra.mxu1 %v15955_v0  ;;  %14435 = vmatprep.mubr.msk.f32.mxu1 %vm16571_vm14, %v21992_v12  ;;  %v11881_v12 = vld [vmem:[%s21905_s12 + $0x7b8] sm:$0xff]  ;;  %vm10940_vm14 = vcmask 9216  }
 0xda6   :  { %15957 = vmatprep.subr.bf16.mxu1 %v21964_v9  ;;  %v15964_v22 = vpack.c.bf16 %v11881_v12, %v11880_v38 }
 0xda9   :  { %15959 = vmatpush3.bf16.msra.mxu1 %v15958_v17 }
 0xdaa   :  { %15960 = vmatprep.subr.bf16.mxu1 %v21964_v9 }
 0xdad   :  { %15962 = vmatpush3.bf16.msra.mxu1 %v15961_v62 }
 0xdae   :  { %15963 = vmatprep.subr.bf16.mxu1 %v21964_v9 }
 0xdb1   :  { %15965 = vmatpush3.bf16.msra.mxu1 %v15964_v22 }
 0xdb2   :  { %15966 = vmatprep.subr.bf16.mxu1 %v21964_v9 }
 0xdb5   :  { %15968 = vmatpush3.bf16.msra.mxu1 %v15967_v36 }
 0xdb6   :  { %15969 = vmatprep.subr.bf16.mxu1 %v21964_v9 }
 0xdb7   :  { %v9658_v49 = vpop.f32.mrb[236].mxu1  ;;  %v9925_v55 = vpop.f32.mrb[138].mxu0 }
 0xdb8   :  { %v9659_v37 = vadd.f32 %v9658_v49, %v9588_v26  ;;  %v13947_v24 = vpop.f32.mrb[237].mxu1  ;;  %v14052_v18 = vpop.f32.mrb[139].mxu0 }
 0xdb9   :  { %15971 = vmatpush3.bf16.msra.mxu1 %v15970_v32 }
 0xdba   :  { %15972 = vmatprep.subr.bf16.mxu1 %v21964_v9  ;;  %v9751_v23 = vadd.f32 %v9747_v10, %v9659_v37 }
 0xdbd   :  { %15974 = vmatpush3.bf16.msra.mxu1 %v15973_v41  ;;  %v10932_v36 = vpop.permute.xlu1 %10931 }
 0xdbe   :  { %15975 = vmatprep.subr.bf16.mxu1 %v21964_v9 }
 0xdc1   :  { %15977 = vmatpush3.bf16.msra.mxu1 %v15976_v33 }
 0xdc4   :  { %14436 = vmatmul.mubr.f32.vlgmr.msra.gmra.mrb[250].mxu1 %v10846_v1 }
 0xdd7   :  { %v9837_v27 = vpop.f32.mrb[238].mxu1  ;;  %v10106_v60 = vpop.f32.mrb[140].mxu0 }
 0xdd8   :  { %v9841_v29 = vadd.f32 %v9837_v27, %v9751_v23  ;;  %v14017_v61 = vpop.f32.mrb[239].mxu1  ;;  %v14122_v35 = vpop.f32.mrb[141].mxu0 }
 0xdda   :  { %v9929_v42 = vadd.f32 %v9925_v55, %v9841_v29 }
 0xdf7   :  { %v10016_v3 = vpop.f32.mrb[240].mxu1  ;;  %v10284_v63 = vpop.f32.mrb[142].mxu0 }
 0xdf8   :  { %v10020_v34 = vadd.f32 %v10016_v3, %v9929_v42  ;;  %v14087_v43 = vpop.f32.mrb[241].mxu1  ;;  %v14192_v16 = vpop.f32.mrb[143].mxu0 }
 0xdfa   :  { %v10110_v8 = vadd.f32 %v10106_v60, %v10020_v34 }
 0xe17   :  { %v10196_v11 = vpop.f32.mrb[242].mxu1  ;;  %v10465_v7 = vpop.f32.mrb[144].mxu0 }
 0xe18   :  { %v10200_v50 = vadd.f32 %v10196_v11, %v10110_v8  ;;  %v14157_v9 = vpop.f32.mrb[243].mxu1  ;;  %v14262_v54 = vpop.f32.mrb[145].mxu0 }
 0xe1a   :  { %v10288_v19 = vadd.f32 %v10284_v63, %v10200_v50 }
 0xe37   :  { %v10375_v53 = vpop.f32.mrb[244].mxu1  ;;  %v10643_v44 = vpop.f32.mrb[146].mxu0 }
 0xe38   :  { %v10379_v25 = vadd.f32 %v10375_v53, %v10288_v19  ;;  %v14227_v39 = vpop.f32.mrb[245].mxu1  ;;  %v14332_v5 = vpop.f32.mrb[147].mxu0 }
 0xe3a   :  { %v10469_v26 = vadd.f32 %v10465_v7, %v10379_v25 }
 0xe57   :  { %v10555_v10 = vpop.f32.mrb[246].mxu1  ;;  %v10824_v46 = vpop.f32.mrb[148].mxu0 }
 0xe58   :  { %v10559_v30 = vadd.f32 %v10555_v10, %v10469_v26  ;;  %v14297_v6 = vpop.f32.mrb[247].mxu1  ;;  %v14402_v52 = vpop.f32.mrb[149].mxu0 }
 0xe5a   :  { %v10647_v57 = vadd.f32 %v10643_v44, %v10559_v30 }
 0xe77   :  { %v10734_v51 = vpop.f32.mrb[248].mxu1 }
 0xe78   :  { %v10738_v47 = vadd.f32 %v10734_v51, %v10647_v57  ;;  %v14367_v2 = vpop.f32.mrb[249].mxu1 }
 0xe7a   :  { %v10828_v20 = vadd.f32 %v10824_v46, %v10738_v47 }
 0xe97   :  { %v10914_v0 = vpop.f32.mrb[250].mxu1 }
 0xe98   :  { %v10918_v56 = vadd.f32 %v10914_v0, %v10828_v20  ;;  %v14437_v58 = vpop.f32.mrb[251].mxu1 }
 0xe9a   :  { %v10926_v17 = vadd.f32 %v11890_v45, %v10918_v56 }
 0xe9c   :  { %v10943_v13 = vmul.f32 %v10926_v17, %v10926_v17  ;;  %v10927_v21 = vmul.f32 1.442695, %v10926_v17 }
 0xe9e   :  { %10945 = vrot.lane.b32.xlu0 %v10943_v13, %s16572_s8  ;;  %16513 = vpow2.f32 %v10927_v21  ;;  %s10974_s8 = sshll.u32 %s16574_s13, 4  ;;  %s10975_s8 = int_to_ptr.vmem [resolvable:$true] %s10974_s8 }
 0xe9f   :  { %s16521_s0 = scalar_lea.vmem %s10975_s8, 32  ;;  %p16526_p1 = scmp.lt.s32.totalorder %s10975_s8, %s10975_s8 }
 0xea0   :  { %p16522_p0 = scmp.ne.s32.totalorder %s10975_s8, %s16521_s0  ;;  %p16527_p2 = scmp.lt.s32.totalorder %s16521_s0, %s16521_s0 }
 0xea2   :  { %p16528_p3 = por %p16527_p2, %p16526_p1 }
 0xea4   :  { %p16529_p4 = pnand %p16528_p3, %p16522_p0 }
 0xea8   :  { %v16514_v62 = vpop.eup %16513 }
 0xea9   :  { %v10942_v38 = vmul.f32 %v16514_v62, %v16514_v62  ;;  %v10934_v28 = vmul.f32 %v16514_v62, %v10932_v36 }
 0xf10   :  { %v10946_v12 = vpop.permute.xlu0 %10945 }
 0xf11   :  { %v10948_v22 = vadd.f32 %v10946_v12, %v10942_v38 }
 0xf13   :  { %v10949_v4 = vsub.f32 %v10948_v22, %v10926_v17 }
 0xf15   :  { %v11891_v48 = vadd.f32 -0.5, %v10949_v4 }
 0xf17   :  { %10952 = vrot.lane.b32.xlu0 %v11891_v48, %s16573_s30 }
 0xf1b   :  { %10936 = vrot.lane.b32.xlu0 %v10934_v28, %s16573_s30 }
 0xf89   :  { %v10953_v59 = vpop.permute.xlu0 %10952 }
 0xf8a   :  { %v10955_v32 = vsel %vm10940_vm14, %v10953_v59, 0.0 }
 0xf8b   :  { %10956 = vadd.xlane.f32.xlu1 %v10955_v32 }
 0xf8d   :  { %v10937_v31 = vpop.permute.xlu0 %10936 }
 0xf8e   :  { %v10939_v40 = vadd.f32 %v10937_v31, %v10926_v17 }
 0xf90   :  { %10941 = vst.msk [vmem:[#allocation3] sm:$0x3] %vm10940_vm14, %v10939_v40 }
 0xf91   :  { %16532 = shalt.err (!%p16529_p4)
}
 0xf92   :  { %s16533_s17 = scalar_lea.hbm %s21908_s15, 32 }
 0xf93   :  { %p16534_p5 = scmp.ne.s32.totalorder %s21908_s15, %s16533_s17  ;;  %p16537_p6 = scmp.lt.u32.totalorder %s16533_s17, %s21908_s15 }
 0xf95   :  { %p16539_p7 = pnand %p16537_p6, %p16534_p5 }
 0xf97   :  { %16542 = shalt.err (!%p16539_p7)
}
 0xf98   :  { %10977 = dma.vmem_to_hbm [thread:$0]  %s10975_s8, 32, %s21908_s15, [#allocation4]   ;;  %vm10958_vm13 = vcmask 1041408   ;;  %vm10966_vm1 = vcmask 0  }
 0xf99   :  { %s16575_s20 = smov [#allocation5]  }
 0xf9a   :  { %s10984_s21 = sshll.u32 %s16575_s20, 4  ;;  %s10985_s21 = int_to_ptr.vmem [resolvable:$true] %s10984_s21 }
 0xf9b   :  { %s16543_s22 = scalar_lea.vmem %s10985_s21, 16  ;;  %s16547_s23 = scalar_lea.vmem %s10985_s21, 32 }
 0xf9c   :  { %p16544_p8 = scmp.ne.s32.totalorder %s10985_s21, %s16543_s22  ;;  %p16548_p9 = scmp.lt.s32.totalorder %s10985_s21, %s10985_s21 }
 0xf9d   :  { %p16549_p10 = scmp.lt.s32.totalorder %s16547_s23, %s16543_s22 }
 0xf9f   :  { %p16550_p11 = por %p16549_p10, %p16548_p9 }
 0xfa1   :  { %p16551_p12 = pnand %p16550_p11, %p16544_p8 }
0x1018   :  { %v10957_v49 = vpop.xlane.xlu1 %10956 }
0x1019   :  { %v10959_v55 = vsel %vm10958_vm13, %v10957_v49, 0.0 }
0x101a   :  { %v10960_v37 = vrot.slane %v10959_v55, 4 }
0x101c   :  { %v10961_v24 = vadd.f32 %v10960_v37, %v10959_v55 }
0x101e   :  { %v10962_v18 = vrot.slane %v10961_v24, 2 }
0x1020   :  { %v10963_v41 = vadd.f32 %v10962_v18, %v10961_v24 }
0x1022   :  { %v10964_v14 = vrot.slane %v10963_v41, 1 }
0x1024   :  { %v10965_v15 = vadd.f32 %v10964_v14, %v10963_v41 }
0x1026   :  { %10967 = vst.msk [vmem:[#allocation5] sm:$0x1] %vm10966_vm1, %v10965_v15 }
0x1027   :  { %16554 = shalt.err (!%p16551_p12)
}
0x1028   :  { %s16555_s10 = scalar_lea.hbm %s21909_s16, 16 }
0x1029   :  { %p16556_p13 = scmp.ne.s32.totalorder %s21909_s16, %s16555_s10  ;;  %p16559_p0 = scmp.lt.u32.totalorder %s16555_s10, %s21909_s16 }
0x102b   :  { %p16561_p1 = pnand %p16559_p0, %p16556_p13 }
0x102d   :  { %16564 = shalt.err (!%p16561_p1)
}
0x102e   :  { %10987 = dma.vmem_to_hbm [thread:$0]  %s10985_s21, 16, %s21909_s16, [#allocation6]  }
0x102f   :  { %16565 = dma.done.wait [#allocation4], 32  }
0x1030   :  { %16566 = vsyncadd [#allocation4], 4294967264 }
0x1031   :  { %16567 = dma.done.wait [#allocation6], 16  }
0x1032   :  { %16568 = vsyncadd [#allocation6], 4294967280 }
0x1033   :  { %10994 = vsyncpa [#allocation4], 1 }
0x1034   :  { %10995 = vsyncpa [#allocation6], 1 }

</bundles_post_ra>
